<compile_context>
chip_gen: v6e
topology: v6e:2x2x1
jax: 0.10.0
libtpu: 0.0.40
codegen_flags: <defaults>
</compile_context>

<pallas_src>
import functools

import jax
import jax.numpy as jnp
from jax.experimental import pallas as pl
from jax.experimental.pallas import tpu as pltpu

LANE = 128
SUB = 8
NUM_CLASSES = 2019
BN_EPS = 1e-5
VMEM_LIMIT = 32 * 1024 * 1024


def _ceil_to(x, m):
    return ((x + m - 1) // m) * m


def _choose_tm(M, HW, cap=1024):
    """Largest row-tile that is a multiple of 8, divides H*W (a tile never
    straddles a batch image and no padded rows exist), is <= cap, and leaves
    >= 2 M-tiles when possible (v7x megacore sharding)."""
    cands = [d for d in range(SUB, min(HW, cap) + 1, SUB) if HW % d == 0]
    if not cands:
        return SUB
    two_tile = [d for d in cands if M // d >= 2]
    return max(two_tile) if two_tile else max(cands)


# ---------------- Pallas kernels ----------------

def _conv_bn_kernel(x_ref, w_ref, b_ref, *rest, relu, has_residual, fuse_gap):
    """Fused 3x3 conv (single big-K matmul over 9 concatenated taps) +
    folded-BN bias + optional residual + ReLU.

    x_ref: (tm, 9*Cp_in) bf16, w_ref: (9*Cp_in, Cp_out) bf16 (BN scale folded),
    b_ref: (1, Cp_out) f32, optional r_ref: (tm, Cp_out) bf16.
    Output: (tm, Cp_out) bf16 activation, or — when fuse_gap — a (1,1,Cp_out)
    f32 per-tile channel sum (GAP partial) and no activation writeback.
    """
    if has_residual:
        r_ref, o_ref = rest
    else:
        r_ref = None
        (o_ref,) = rest

    y = jnp.dot(x_ref[...], w_ref[...], preferred_element_type=jnp.float32)
    y = y + b_ref[...]
    if has_residual:
        y = y + r_ref[...].astype(jnp.float32)
    if relu:
        y = jnp.maximum(y, 0.0)

    if fuse_gap:
        o_ref[...] = jnp.sum(y, axis=0, keepdims=True).reshape(o_ref.shape)
    else:
        o_ref[...] = y.astype(o_ref.dtype)


def _head_kernel(s_ref, w_ref, b_ref, o_ref):
    """Finish the GAP (sum of per-tile partial sums) + concatenated
    (class | binary) FC heads.  1/(H*W) is folded into w_ref."""
    feat = jnp.sum(s_ref[...], axis=1)                      # (B, Cp) f32 sums
    o_ref[...] = (
        jnp.dot(feat.astype(jnp.bfloat16), w_ref[...],
                preferred_element_type=jnp.float32)
        + b_ref[...]
    )


# ---------------- layer wrappers ----------------

def _conv_taps_kconcat(x_nhwc):
    """(B,H,W,Cp) bf16 -> (B*H*W, 9*Cp): the 9 stride-1/pad-1 taps laid out
    along the lane/K axis so the conv is one big-K matmul per tile."""
    B, H, W, Cp = x_nhwc.shape
    xp = jnp.pad(x_nhwc, ((0, 0), (1, 1), (1, 1), (0, 0)))
    taps = [xp[:, dh:dh + H, dw:dw + W, :] for dh in range(3) for dw in range(3)]
    return jnp.concatenate(taps, axis=-1).reshape(B * H * W, 9 * Cp)


def conv3x3_bn_fused(x_nhwc, layer, residual=None, relu=True, fuse_gap=False,
                     tm_cap=1024):
    """x_nhwc: (B,H,W,Cp_in) bf16, channels already lane-padded.
    Returns bf16 NHWC activation, or — when fuse_gap — (B, T, Cp_out) f32
    per-tile GAP partial sums (T = tiles per image)."""
    B, H, W, _ = x_nhwc.shape
    w, bias = layer["w"], layer["bias"]
    kc, cp_out = w.shape
    M = B * H * W
    HW = H * W

    x2 = _conv_taps_kconcat(x_nhwc)                         # (M, 9*Cp_in) bf16
    tm = _choose_tm(M, HW, cap=tm_cap)
    n_tiles = M // tm        # tm | HW and M = B*HW  ->  no row padding needed

    in_specs = [
        pl.BlockSpec((tm, kc), lambda i: (i, 0)),
        pl.BlockSpec((kc, cp_out), lambda i: (0, 0)),       # VMEM-resident weight
        pl.BlockSpec((1, cp_out), lambda i: (0, 0)),
    ]
    args = [x2, w, bias]

    has_residual = residual is not None
    if has_residual:
        in_specs.append(pl.BlockSpec((tm, cp_out), lambda i: (i, 0)))
        args.append(residual.reshape(M, cp_out))

    if fuse_gap:
        out_shape = jax.ShapeDtypeStruct((n_tiles, 1, cp_out), jnp.float32)
        out_spec = pl.BlockSpec((1, 1, cp_out), lambda i: (i, 0, 0))
    else:
        out_shape = jax.ShapeDtypeStruct((M, cp_out), jnp.bfloat16)
        out_spec = pl.BlockSpec((tm, cp_out), lambda i: (i, 0))

    out = pl.pallas_call(
        functools.partial(_conv_bn_kernel, relu=relu,
                          has_residual=has_residual, fuse_gap=fuse_gap),
        out_shape=out_shape,
        grid_spec=pltpu.PrefetchScalarGridSpec(
            num_scalar_prefetch=0,
            grid=(n_tiles,),
            in_specs=in_specs,
            out_specs=out_spec,
        ),
        compiler_params=pltpu.CompilerParams(
            dimension_semantics=("parallel",),
            vmem_limit_bytes=VMEM_LIMIT),
    )(*args)

    if fuse_gap:
        return out.reshape(B, HW // tm, cp_out)             # per-image partial sums
    return out.reshape(B, H, W, cp_out)


def gap_heads(gap_partial, head_w, head_b):
    """gap_partial: (B, T, Cp) f32 per-tile channel sums -> (B, Np_head) f32."""
    B, _, _ = gap_partial.shape
    np_head = head_w.shape[1]
    return pl.pallas_call(
        _head_kernel,
        out_shape=jax.ShapeDtypeStruct((B, np_head), jnp.float32),
        in_specs=[pl.BlockSpec(memory_space=pltpu.MemorySpace.VMEM)] * 3,
        out_specs=pl.BlockSpec(memory_space=pltpu.MemorySpace.VMEM),
    )(gap_partial, head_w, head_b)


# ---------------- params (raw + packed/padded) ----------------

def init_params(key, cin=3, width=16, num_classes=NUM_CLASSES):
    ks = jax.random.split(key, 16)

    def conv(k, ci, co):
        return 0.1 * jax.random.normal(k, (3, 3, ci, co), jnp.float32)  # HWIO

    def bn(k, c):
        k1, k2, k3, k4 = jax.random.split(k, 4)
        return dict(
            gamma=1.0 + 0.1 * jax.random.normal(k1, (c,), jnp.float32),
            beta=0.1 * jax.random.normal(k2, (c,), jnp.float32),
            mean=0.05 * jax.random.normal(k3, (c,), jnp.float32),
            var=1.0 + 0.1 * jnp.abs(jax.random.normal(k4, (c,), jnp.float32)),
        )

    p = {"conv1": conv(ks[0], cin, width), "bn1": bn(ks[1], width)}
    for i, name in enumerate(("block1", "block2")):
        p[name] = dict(
            conv_a=conv(ks[2 + 4 * i], width, width), bn_a=bn(ks[3 + 4 * i], width),
            conv_b=conv(ks[4 + 4 * i], width, width), bn_b=bn(ks[5 + 4 * i], width),
        )
    p["fc_w"] = 0.1 * jax.random.normal(ks[10], (width, num_classes), jnp.float32)
    p["fc_b"] = jnp.zeros((num_classes,), jnp.float32)
    p["fc_bin_w"] = 0.1 * jax.random.normal(ks[11], (width, 2), jnp.float32)
    p["fc_bin_b"] = jnp.zeros((2,), jnp.float32)
    return p


def _fold_bn(bn):
    scale = bn["gamma"] / jnp.sqrt(bn["var"] + BN_EPS)
    bias = bn["beta"] - bn["mean"] * scale
    return scale, bias


def _pack_conv(w_hwio, bn, cp_in, cp_out):
    """Fold BN scale into the weights, pad channels, lay K out as 9*Cp_in."""
    kh, kw, cin, cout = w_hwio.shape
    scale, bias = _fold_bn(bn)
    w = w_hwio * scale                                       # fold scale over Cout
    w9 = w.reshape(kh * kw, cin, cout)
    w9 = jnp.pad(w9, ((0, 0), (0, cp_in - cin), (0, cp_out - cout)))
    wk = w9.reshape(kh * kw * cp_in, cp_out).astype(jnp.bfloat16)
    b = jnp.pad(bias, (0, cp_out - cout)).reshape(1, cp_out).astype(jnp.float32)
    return dict(w=wk, bias=b)


def prepare_params(raw, hw, cin=3, width=16, num_classes=NUM_CLASSES):
    """hw = H*W of the feature maps; 1/hw is folded into the head weight, so the
    same spatial size must be used at forward time."""
    cp_img = _ceil_to(cin, LANE)
    cp = _ceil_to(width, LANE)
    p = {
        "conv1": _pack_conv(raw["conv1"], raw["bn1"], cp_img, cp),
        "block1": {
            "a": _pack_conv(raw["block1"]["conv_a"], raw["block1"]["bn_a"], cp, cp),
            "b": _pack_conv(raw["block1"]["conv_b"], raw["block1"]["bn_b"], cp, cp),
        },
        "block2": {
            "a": _pack_conv(raw["block2"]["conv_a"], raw["block2"]["bn_a"], cp, cp),
            "b": _pack_conv(raw["block2"]["conv_b"], raw["block2"]["bn_b"], cp, cp),
        },
    }
    # Fuse class head + binary head into one padded weight; fold GAP's 1/(H*W).
    n_head = num_classes + 2
    np_head = _ceil_to(n_head, LANE)
    w_head = jnp.concatenate([raw["fc_w"], raw["fc_bin_w"]], axis=1) * (1.0 / hw)
    p["head_w"] = jnp.pad(
        w_head, ((0, cp - width), (0, np_head - n_head))).astype(jnp.bfloat16)
    b_head = jnp.concatenate([raw["fc_b"], raw["fc_bin_b"]])
    p["head_b"] = jnp.pad(
        b_head, (0, np_head - n_head)).reshape(1, np_head).astype(jnp.float32)
    return p


# ---------------- forward ----------------

def network_forward(params, img_nchw):
    """Mirrors Network.forward: returns (logits, logits_bin)."""
    x = jnp.transpose(img_nchw, (0, 2, 3, 1)).astype(jnp.bfloat16)   # NCHW -> NHWC
    cp_in = params["conv1"]["w"].shape[0] // 9
    cin = x.shape[-1]
    x = jnp.pad(x, ((0, 0), (0, 0), (0, 0), (0, cp_in - cin)))       # pad channels once

    # stem
    x = conv3x3_bn_fused(x, params["conv1"], relu=True)

    # residual basic block 1
    blk = params["block1"]
    identity = x
    y = conv3x3_bn_fused(x, blk["a"], relu=True)
    x = conv3x3_bn_fused(y, blk["b"], residual=identity, relu=True)

    # residual basic block 2 — last conv fuses GAP into its epilogue, so the
    # final activation never round-trips to HBM.
    blk = params["block2"]
    identity = x
    y = conv3x3_bn_fused(x, blk["a"], relu=True)
    gap = conv3x3_bn_fused(y, blk["b"], residual=identity, relu=True, fuse_gap=True)

    out = gap_heads(gap, params["head_w"], params["head_b"])         # (B, 2048) f32
    logits = out[:, :NUM_CLASSES]
    logits_bin = out[:, NUM_CLASSES:NUM_CLASSES + 2]
    return logits, logits_bin


if __name__ == "__main__":
    key = jax.random.PRNGKey(0)
    k_param, k_img = jax.random.split(key)
    H = W = 16
    raw_params = init_params(k_param, cin=3, width=16, num_classes=NUM_CLASSES)
    params = prepare_params(raw_params, hw=H * W, cin=3, width=16,
                            num_classes=NUM_CLASSES)
    img = jax.random.normal(k_img, (2, 3, H, W), jnp.float32)   # NCHW like PyTorch

    fwd = jax.jit(network_forward)
    logits, logits_bin = fwd(params, img)
    jax.block_until_ready((logits, logits_bin))

    assert logits.shape == (2, NUM_CLASSES) and logits.dtype == jnp.float32
    assert logits_bin.shape == (2, 2) and logits_bin.dtype == jnp.float32
    assert bool(jnp.all(jnp.isfinite(logits))) and bool(jnp.all(jnp.isfinite(logits_bin)))
    print("KERNEL_OK")
</pallas_src>

<mosaic_0001>
module attributes {stable_mosaic.version = 11 : i64} {
  func.func @_conv_bn_kernel(%arg0: i32, %arg1: memref<256x1152xbf16, #tpu.memory_space<vmem>>, %arg2: memref<1152x128xbf16, #tpu.memory_space<vmem>>, %arg3: memref<1x128xf32, #tpu.memory_space<vmem>>, %arg4: memref<256x128xbf16, #tpu.memory_space<vmem>>) attributes {dimension_semantics = [#tpu.dimension_semantics<parallel>], iteration_bounds = array<i64: 2>, scalar_prefetch = 0 : i64, scratch_operands = 0 : i64, tpu.core_type = #tpu.core_type<tc>, window_params = [{transform_indices = @transform_0, window_bounds = array<i64: 256, 1152>}, {pipeline_mode = #tpu.pipeline_mode<synchronous>, transform_indices = @transform_1, window_bounds = array<i64: 1152, 128>}, {pipeline_mode = #tpu.pipeline_mode<synchronous>, transform_indices = @transform_2, window_bounds = array<i64: 1, 128>}, {transform_indices = @transform_3, window_bounds = array<i64: 256, 128>}]} {
    %c0 = arith.constant 0 : index
    %c0_0 = arith.constant 0 : index
    %0 = vector.load %arg1[%c0, %c0_0] : memref<256x1152xbf16, #tpu.memory_space<vmem>>, vector<256x1152xbf16>
    %c0_1 = arith.constant 0 : index
    %c0_2 = arith.constant 0 : index
    %1 = vector.load %arg2[%c0_1, %c0_2] : memref<1152x128xbf16, #tpu.memory_space<vmem>>, vector<1152x128xbf16>
    %cst = arith.constant dense<0.000000e+00> : vector<256x128xf32>
    %2 = tpu.matmul %0, %1, %cst {dimension_numbers = #tpu.dot_dimension_numbers<[1], [0], [0], [1], [0, 0, 1, 1], [], []>} : vector<256x1152xbf16>, vector<1152x128xbf16>, vector<256x128xf32> -> vector<256x128xf32>
    %c0_3 = arith.constant 0 : index
    %c0_4 = arith.constant 0 : index
    %3 = vector.load %arg3[%c0_3, %c0_4] : memref<1x128xf32, #tpu.memory_space<vmem>>, vector<1x128xf32>
    %4 = vector.broadcast %3 : vector<1x128xf32> to vector<256x128xf32>
    %5 = arith.addf %2, %4 : vector<256x128xf32>
    %cst_5 = arith.constant 0.000000e+00 : f32
    %6 = vector.broadcast %cst_5 : f32 to vector<256x128xf32>
    %7 = arith.maximumf %5, %6 : vector<256x128xf32>
    %8 = arith.truncf %7 : vector<256x128xf32> to vector<256x128xbf16>
    %c0_6 = arith.constant 0 : index
    %c0_7 = arith.constant 0 : index
    %9 = vector.load %arg4[%c0_6, %c0_7] : memref<256x128xbf16, #tpu.memory_space<vmem>>, vector<256x128xbf16>
    tpu.vector_store %arg4[%c0_6, %c0_7], %8 {strides = array<i32>} : memref<256x128xbf16, #tpu.memory_space<vmem>>, vector<256x128xbf16>,
    return
  }
  func.func @transform_0(%arg0: i32) -> (i32, i32) {
    %c0_i32 = arith.constant 0 : i32
    %c0_i32_0 = arith.constant 0 : i32
    return %arg0, %c0_i32 : i32, i32
  }
  func.func @transform_1(%arg0: i32) -> (i32, i32) {
    %c0_i32 = arith.constant 0 : i32
    %c0_i32_0 = arith.constant 0 : i32
    %c0_i32_1 = arith.constant 0 : i32
    return %c0_i32, %c0_i32_0 : i32, i32
  }
  func.func @transform_2(%arg0: i32) -> (i32, i32) {
    %c0_i32 = arith.constant 0 : i32
    %c0_i32_0 = arith.constant 0 : i32
    %c0_i32_1 = arith.constant 0 : i32
    return %c0_i32, %c0_i32_0 : i32, i32
  }
  func.func @transform_3(%arg0: i32) -> (i32, i32) {
    %c0_i32 = arith.constant 0 : i32
    %c0_i32_0 = arith.constant 0 : i32
    return %arg0, %c0_i32 : i32, i32
  }
}

module attributes {stable_mosaic.version = 11 : i64} {
  func.func @_conv_bn_kernel(%arg0: i32, %arg1: memref<256x1152xbf16, #tpu.memory_space<vmem>>, %arg2: memref<1152x128xbf16, #tpu.memory_space<vmem>>, %arg3: memref<1x128xf32, #tpu.memory_space<vmem>>, %arg4: memref<256x128xbf16, #tpu.memory_space<vmem>>, %arg5: memref<256x128xbf16, #tpu.memory_space<vmem>>) attributes {dimension_semantics = [#tpu.dimension_semantics<parallel>], iteration_bounds = array<i64: 2>, scalar_prefetch = 0 : i64, scratch_operands = 0 : i64, tpu.core_type = #tpu.core_type<tc>, window_params = [{transform_indices = @transform_0, window_bounds = array<i64: 256, 1152>}, {pipeline_mode = #tpu.pipeline_mode<synchronous>, transform_indices = @transform_1, window_bounds = array<i64: 1152, 128>}, {pipeline_mode = #tpu.pipeline_mode<synchronous>, transform_indices = @transform_2, window_bounds = array<i64: 1, 128>}, {transform_indices = @transform_3, window_bounds = array<i64: 256, 128>}, {transform_indices = @transform_4, window_bounds = array<i64: 256, 128>}]} {
    %c0 = arith.constant 0 : index
    %c0_0 = arith.constant 0 : index
    %0 = vector.load %arg1[%c0, %c0_0] : memref<256x1152xbf16, #tpu.memory_space<vmem>>, vector<256x1152xbf16>
    %c0_1 = arith.constant 0 : index
    %c0_2 = arith.constant 0 : index
    %1 = vector.load %arg2[%c0_1, %c0_2] : memref<1152x128xbf16, #tpu.memory_space<vmem>>, vector<1152x128xbf16>
    %cst = arith.constant dense<0.000000e+00> : vector<256x128xf32>
    %2 = tpu.matmul %0, %1, %cst {dimension_numbers = #tpu.dot_dimension_numbers<[1], [0], [0], [1], [0, 0, 1, 1], [], []>} : vector<256x1152xbf16>, vector<1152x128xbf16>, vector<256x128xf32> -> vector<256x128xf32>
    %c0_3 = arith.constant 0 : index
    %c0_4 = arith.constant 0 : index
    %3 = vector.load %arg3[%c0_3, %c0_4] : memref<1x128xf32, #tpu.memory_space<vmem>>, vector<1x128xf32>
    %4 = vector.broadcast %3 : vector<1x128xf32> to vector<256x128xf32>
    %5 = arith.addf %2, %4 : vector<256x128xf32>
    %c0_5 = arith.constant 0 : index
    %c0_6 = arith.constant 0 : index
    %6 = vector.load %arg4[%c0_5, %c0_6] : memref<256x128xbf16, #tpu.memory_space<vmem>>, vector<256x128xbf16>
    %7 = arith.extf %6 : vector<256x128xbf16> to vector<256x128xf32>
    %8 = arith.addf %5, %7 : vector<256x128xf32>
    %cst_7 = arith.constant 0.000000e+00 : f32
    %9 = vector.broadcast %cst_7 : f32 to vector<256x128xf32>
    %10 = arith.maximumf %8, %9 : vector<256x128xf32>
    %11 = arith.truncf %10 : vector<256x128xf32> to vector<256x128xbf16>
    %c0_8 = arith.constant 0 : index
    %c0_9 = arith.constant 0 : index
    %12 = vector.load %arg5[%c0_8, %c0_9] : memref<256x128xbf16, #tpu.memory_space<vmem>>, vector<256x128xbf16>
    tpu.vector_store %arg5[%c0_8, %c0_9], %11 {strides = array<i32>} : memref<256x128xbf16, #tpu.memory_space<vmem>>, vector<256x128xbf16>,
    return
  }
  func.func @transform_0(%arg0: i32) -> (i32, i32) {
    %c0_i32 = arith.constant 0 : i32
    %c0_i32_0 = arith.constant 0 : i32
    return %arg0, %c0_i32 : i32, i32
  }
  func.func @transform_1(%arg0: i32) -> (i32, i32) {
    %c0_i32 = arith.constant 0 : i32
    %c0_i32_0 = arith.constant 0 : i32
    %c0_i32_1 = arith.constant 0 : i32
    return %c0_i32, %c0_i32_0 : i32, i32
  }
  func.func @transform_2(%arg0: i32) -> (i32, i32) {
    %c0_i32 = arith.constant 0 : i32
    %c0_i32_0 = arith.constant 0 : i32
    %c0_i32_1 = arith.constant 0 : i32
    return %c0_i32, %c0_i32_0 : i32, i32
  }
  func.func @transform_3(%arg0: i32) -> (i32, i32) {
    %c0_i32 = arith.constant 0 : i32
    %c0_i32_0 = arith.constant 0 : i32
    return %arg0, %c0_i32 : i32, i32
  }
  func.func @transform_4(%arg0: i32) -> (i32, i32) {
    %c0_i32 = arith.constant 0 : i32
    %c0_i32_0 = arith.constant 0 : i32
    return %arg0, %c0_i32 : i32, i32
  }
}

module attributes {stable_mosaic.version = 11 : i64} {
  func.func @_conv_bn_kernel(%arg0: i32, %arg1: memref<256x1152xbf16, #tpu.memory_space<vmem>>, %arg2: memref<1152x128xbf16, #tpu.memory_space<vmem>>, %arg3: memref<1x128xf32, #tpu.memory_space<vmem>>, %arg4: memref<256x128xbf16, #tpu.memory_space<vmem>>, %arg5: memref<1x1x128xf32, #tpu.memory_space<vmem>>) attributes {dimension_semantics = [#tpu.dimension_semantics<parallel>], iteration_bounds = array<i64: 2>, scalar_prefetch = 0 : i64, scratch_operands = 0 : i64, tpu.core_type = #tpu.core_type<tc>, window_params = [{transform_indices = @transform_0, window_bounds = array<i64: 256, 1152>}, {pipeline_mode = #tpu.pipeline_mode<synchronous>, transform_indices = @transform_1, window_bounds = array<i64: 1152, 128>}, {pipeline_mode = #tpu.pipeline_mode<synchronous>, transform_indices = @transform_2, window_bounds = array<i64: 1, 128>}, {transform_indices = @transform_3, window_bounds = array<i64: 256, 128>}, {transform_indices = @transform_4, window_bounds = array<i64: 1, 1, 128>}]} {
    %c0 = arith.constant 0 : index
    %c0_0 = arith.constant 0 : index
    %0 = vector.load %arg1[%c0, %c0_0] : memref<256x1152xbf16, #tpu.memory_space<vmem>>, vector<256x1152xbf16>
    %c0_1 = arith.constant 0 : index
    %c0_2 = arith.constant 0 : index
    %1 = vector.load %arg2[%c0_1, %c0_2] : memref<1152x128xbf16, #tpu.memory_space<vmem>>, vector<1152x128xbf16>
    %cst = arith.constant dense<0.000000e+00> : vector<256x128xf32>
    %2 = tpu.matmul %0, %1, %cst {dimension_numbers = #tpu.dot_dimension_numbers<[1], [0], [0], [1], [0, 0, 1, 1], [], []>} : vector<256x1152xbf16>, vector<1152x128xbf16>, vector<256x128xf32> -> vector<256x128xf32>
    %c0_3 = arith.constant 0 : index
    %c0_4 = arith.constant 0 : index
    %3 = vector.load %arg3[%c0_3, %c0_4] : memref<1x128xf32, #tpu.memory_space<vmem>>, vector<1x128xf32>
    %4 = vector.broadcast %3 : vector<1x128xf32> to vector<256x128xf32>
    %5 = arith.addf %2, %4 : vector<256x128xf32>
    %c0_5 = arith.constant 0 : index
    %c0_6 = arith.constant 0 : index
    %6 = vector.load %arg4[%c0_5, %c0_6] : memref<256x128xbf16, #tpu.memory_space<vmem>>, vector<256x128xbf16>
    %7 = arith.extf %6 : vector<256x128xbf16> to vector<256x128xf32>
    %8 = arith.addf %5, %7 : vector<256x128xf32>
    %cst_7 = arith.constant 0.000000e+00 : f32
    %9 = vector.broadcast %cst_7 : f32 to vector<256x128xf32>
    %10 = arith.maximumf %8, %9 : vector<256x128xf32>
    %cst_8 = arith.constant dense<0.000000e+00> : vector<128xf32>
    %11 = vector.multi_reduction <add>, %10, %cst_8 [0] : vector<256x128xf32> to vector<128xf32>
    %12 = vector.shape_cast %11 : vector<128xf32> to vector<1x128xf32>
    %13 = vector.shape_cast %12 : vector<1x128xf32> to vector<1x1x128xf32>
    %c0_9 = arith.constant 0 : index
    %c0_10 = arith.constant 0 : index
    %c0_11 = arith.constant 0 : index
    %14 = vector.load %arg5[%c0_9, %c0_10, %c0_11] : memref<1x1x128xf32, #tpu.memory_space<vmem>>, vector<1x1x128xf32>
    tpu.vector_store %arg5[%c0_9, %c0_10, %c0_11], %13 {strides = array<i32>} : memref<1x1x128xf32, #tpu.memory_space<vmem>>, vector<1x1x128xf32>,
    return
  }
  func.func @transform_0(%arg0: i32) -> (i32, i32) {
    %c0_i32 = arith.constant 0 : i32
    %c0_i32_0 = arith.constant 0 : i32
    return %arg0, %c0_i32 : i32, i32
  }
  func.func @transform_1(%arg0: i32) -> (i32, i32) {
    %c0_i32 = arith.constant 0 : i32
    %c0_i32_0 = arith.constant 0 : i32
    %c0_i32_1 = arith.constant 0 : i32
    return %c0_i32, %c0_i32_0 : i32, i32
  }
  func.func @transform_2(%arg0: i32) -> (i32, i32) {
    %c0_i32 = arith.constant 0 : i32
    %c0_i32_0 = arith.constant 0 : i32
    %c0_i32_1 = arith.constant 0 : i32
    return %c0_i32, %c0_i32_0 : i32, i32
  }
  func.func @transform_3(%arg0: i32) -> (i32, i32) {
    %c0_i32 = arith.constant 0 : i32
    %c0_i32_0 = arith.constant 0 : i32
    return %arg0, %c0_i32 : i32, i32
  }
  func.func @transform_4(%arg0: i32) -> (i32, i32, i32) {
    %c0_i32 = arith.constant 0 : i32
    %c0_i32_0 = arith.constant 0 : i32
    %c0_i32_1 = arith.constant 0 : i32
    return %arg0, %c0_i32, %c0_i32_0 : i32, i32, i32
  }
}

module attributes {stable_mosaic.version = 11 : i64} {
  func.func @_head_kernel(%arg0: memref<2x1x128xf32, #tpu.memory_space<vmem>>, %arg1: memref<128x2048xbf16, #tpu.memory_space<vmem>>, %arg2: memref<1x2048xf32, #tpu.memory_space<vmem>>, %arg3: memref<2x2048xf32, #tpu.memory_space<vmem>>) attributes {dimension_semantics = [], scalar_prefetch = 0 : i64, scratch_operands = 0 : i64, tpu.core_type = #tpu.core_type<tc>} {
    %c0 = arith.constant 0 : index
    %c0_0 = arith.constant 0 : index
    %c0_1 = arith.constant 0 : index
    %0 = vector.load %arg0[%c0, %c0_0, %c0_1] : memref<2x1x128xf32, #tpu.memory_space<vmem>>, vector<2x1x128xf32>
    %cst = arith.constant dense<0.000000e+00> : vector<2x128xf32>
    %1 = vector.multi_reduction <add>, %0, %cst [1] : vector<2x1x128xf32> to vector<2x128xf32>
    %2 = arith.truncf %1 : vector<2x128xf32> to vector<2x128xbf16>
    %c0_2 = arith.constant 0 : index
    %c0_3 = arith.constant 0 : index
    %3 = vector.load %arg1[%c0_2, %c0_3] : memref<128x2048xbf16, #tpu.memory_space<vmem>>, vector<128x2048xbf16>
    %cst_4 = arith.constant dense<0.000000e+00> : vector<2x2048xf32>
    %4 = tpu.matmul %2, %3, %cst_4 {dimension_numbers = #tpu.dot_dimension_numbers<[1], [0], [0], [1], [0, 0, 1, 1], [], []>} : vector<2x128xbf16>, vector<128x2048xbf16>, vector<2x2048xf32> -> vector<2x2048xf32>
    %c0_5 = arith.constant 0 : index
    %c0_6 = arith.constant 0 : index
    %5 = vector.load %arg2[%c0_5, %c0_6] : memref<1x2048xf32, #tpu.memory_space<vmem>>, vector<1x2048xf32>
    %6 = vector.broadcast %5 : vector<1x2048xf32> to vector<2x2048xf32>
    %7 = arith.addf %4, %6 : vector<2x2048xf32>
    %c0_7 = arith.constant 0 : index
    %c0_8 = arith.constant 0 : index
    %8 = vector.load %arg3[%c0_7, %c0_8] : memref<2x2048xf32, #tpu.memory_space<vmem>>, vector<2x2048xf32>
    tpu.vector_store %arg3[%c0_7, %c0_8], %7 {strides = array<i32>} : memref<2x2048xf32, #tpu.memory_space<vmem>>, vector<2x2048xf32>,
    return
  }
}

</mosaic_0001>

<bundles_post_ra>
// kernel: network_forward.6
= control target key start
LH: loop header
LB: loop body
LE: loop exit
PB: predicated region body
PF: predicated region fallthrough
CT: control target
= control target key end

     0   :  { %s3950_s12 = smov 0   ;;  %s4799_s0 = inlined_call_operand.vmem [shape: bf16[512,1152], index: 0, kind: input, shape index: {}]   ;;  %s4800_s1 = inlined_call_operand.vmem [shape: bf16[1152,128], index: 1, kind: input, shape index: {}]   ;;  %s4801_s2 = inlined_call_operand.vmem [shape: f32[1,128], index: 2, kind: input, shape index: {}]   ;;  %s4802_s3 = inlined_call_operand.vmem [shape: bf16[512,128], index: 3, kind: output, shape index: {}]  }
   0x1 LB: > { %s2710_s13 = sadd.s32 4294967295, %s3928_s12   ;;  %p2714_p0 = scmp.ge.s32.totalorder %s3928_s12, 1  ;;  %s3928_s12 = sphi %s3950_s12, %s13_s12  }
   0x2   : > { %p139_p1 = scmp.lt.s32.totalorder %s3928_s12, 3 }
   0x4   : > { %p140_p2 = pnand %p2714_p0, %p139_p1 }
   0x6   : > { %143 = sbr.rel (%p140_p2) target bundleno = 534 (0x216), region = 32 }
   0xb   : > { %v3642_v0 = vld [vmem:[%s4800_s1 + $0x78] sm:$0xff]   ;;  %s2715_s16 = sshll.u32 %s2710_s13, 5  ;;  %v3644_v2 = vld [vmem:[%s4800_s1 + $0x70] sm:$0xff]   ;;  %v3646_v4 = vld [vmem:[%s4800_s1 + $0x68] sm:$0xff]  }
   0xc   : > { %v3643_v1 = vld [vmem:[%s4800_s1 + $0x38] sm:$0xff]   ;;  %3097 = vmatprep.subr.bf16.mxu0 %v3642_v0  ;;  %3617 = vmatprep.subr.bf16.mxu1 %v3642_v0  ;;  %p165_p3 = scmp.lt.s32.totalorder %s2715_s16, 63  ;;  %v3645_v3 = vld [vmem:[%s4800_s1 + $0x30] sm:$0xff]   ;;  %v3647_v5 = vld [vmem:[%s4800_s1 + $0x28] sm:$0xff]  }
   0xd   : > { %3098 = vmatpush3.bf16.msra.mxu0 %v3643_v1  ;;  %3625 = vmatpush3.bf16.msra.mxu1 %v3643_v1  ;;  %v3648_v6 = vld [vmem:[%s4800_s1 + $0x60] sm:$0xff]   ;;  %v3650_v8 = vld [vmem:[%s4800_s1 + $0x58] sm:$0xff]   ;;  %v3652_v10 = vld [vmem:[%s4800_s1 + $0x50] sm:$0xff]  }
   0xe   : > { %3099 = vmatprep.subr.bf16.mxu0 %v3644_v2  ;;  %3618 = vmatprep.subr.bf16.mxu1 %v3644_v2  ;;  %s4826_s16 = smov (!%p165_p3, %s2715_s16), 63  ;;  %v3649_v7 = vld [vmem:[%s4800_s1 + $0x20] sm:$0xff]   ;;  %v3651_v9 = vld [vmem:[%s4800_s1 + $0x18] sm:$0xff]   ;;  %v3653_v13 = vld [vmem:[%s4800_s1 + $0x10] sm:$0xff]  }
   0xf   : > { %s3633_s29 = smul.u32 36, %s4826_s16  ;;  %v3654_v14 = vld [vmem:[%s4800_s1 + $0x48] sm:$0xff]   ;;  %v3656_v16 = vld [vmem:[%s4800_s1 + $0x40] sm:$0xff]   ;;  %v3664_v18 = vld [vmem:[%s4800_s1 + $0xf8] sm:$0xff]  }
  0x10   : > { %v3655_v15 = vld [vmem:[%s4800_s1 + $0x8] sm:$0xff]   ;;  %v3657_v17 = vld [vmem:[%s4800_s1] sm:$0xff]   ;;  %v3667_v21 = vld [vmem:[%s4800_s1 + $0x178] sm:$0xff]  }
  0x11   : > { %3100 = vmatpush3.bf16.msra.mxu0 %v3645_v3  ;;  %3626 = vmatpush3.bf16.msra.mxu1 %v3645_v3  ;;  %s3991_s9 = scalar_lea.vmem %s4799_s0, %s3633_s29  ;;  %v3665_v22 = vld [vmem:[%s4800_s1 + $0xb8] sm:$0xff]   ;;  %v3666_v23 = vld [vmem:[%s4800_s1 + $0xf0] sm:$0xff]   ;;  %v3676_v31 = vld [vmem:[%s4800_s1 + $0xe8] sm:$0xff]  }
  0x12   : > { %3101 = vmatprep.subr.bf16.mxu0 %v3646_v4  ;;  %3619 = vmatprep.subr.bf16.mxu1 %v3646_v4  ;;  %v3660_v11 = vld [vmem:[%s3991_s9 + $0x4] ss:$36 sps:$4 sm:$0xff]   ;;  %v3669_v24 = vld [vmem:[%s4800_s1 + $0x138] sm:$0xff]   ;;  %v3670_v25 = vld [vmem:[%s3991_s9 + $0x4c] ss:$36 sps:$4 sm:$0xff]  }
  0x13   : > { %v3663_v12 = vld [vmem:[%s3991_s9 + $0x364] ss:$36 sps:$4 sm:$0xff]   ;;  %1689 = vmatprep.mubr.bf16.mxu0 %v3660_v11  ;;  %v3672_v26 = vld [vmem:[%s3991_s9 + $0x3ac] ss:$36 sps:$4 sm:$0xff]   ;;  %v3680_v35 = vld [vmem:[%s3991_s9 + $0x94] ss:$36 sps:$4 sm:$0xff]  }
  0x14   : > { %1785 = vmatprep.mubr.bf16.mxu1 %v3663_v12  ;;  %v3658_v19 = vld [vmem:[%s3991_s9] ss:$36 sps:$4 sm:$0xff]   ;;  %v3668_v27 = vld [vmem:[%s4800_s1 + $0xb0] sm:$0xff]   ;;  %v3674_v29 = vld [vmem:[%s3991_s9 + $0x48] ss:$36 sps:$4 sm:$0xff]  }
  0x15   : > { %3102 = vmatpush3.bf16.msra.mxu0 %v3647_v5  ;;  %3627 = vmatpush3.bf16.msra.mxu1 %v3647_v5  ;;  %v3661_v20 = vld [vmem:[%s3991_s9 + $0x360] ss:$36 sps:$4 sm:$0xff]   ;;  %v3687_v28 = vld [vmem:[%s4800_s1 + $0x170] sm:$0xff]   ;;  %v3675_v30 = vld [vmem:[%s3991_s9 + $0x3a8] ss:$36 sps:$4 sm:$0xff]  }
  0x16   : > { %3103 = vmatprep.subr.bf16.mxu0 %v3648_v6  ;;  %3620 = vmatprep.subr.bf16.mxu1 %v3648_v6  ;;  %v3677_v32 = vld [vmem:[%s4800_s1 + $0xa8] sm:$0xff]   ;;  %v3689_v33 = vld [vmem:[%s4800_s1 + $0x130] sm:$0xff]   ;;  %v3678_v34 = vld [vmem:[%s4800_s1 + $0xe0] sm:$0xff]  }
  0x17   : > { %v3682_v36 = vld [vmem:[%s3991_s9 + $0x3f4] ss:$36 sps:$4 sm:$0xff]   ;;  %v3679_v37 = vld [vmem:[%s4800_s1 + $0xa0] sm:$0xff]   ;;  %v3701_v43 = vld [vmem:[%s4800_s1 + $0x168] sm:$0xff]  }
  0x18   : > { %v3684_v38 = vld [vmem:[%s3991_s9 + $0x90] ss:$36 sps:$4 sm:$0xff]   ;;  %v3686_v40 = vld [vmem:[%s4800_s1 + $0xd8] sm:$0xff]   ;;  %v3703_v46 = vld [vmem:[%s4800_s1 + $0x128] sm:$0xff]  }
  0x19   : > { %3104 = vmatpush3.bf16.msra.mxu0 %v3649_v7  ;;  %3628 = vmatpush3.bf16.msra.mxu1 %v3649_v7  ;;  %v3685_v39 = vld [vmem:[%s3991_s9 + $0x3f0] ss:$36 sps:$4 sm:$0xff]   ;;  %v3688_v41 = vld [vmem:[%s4800_s1 + $0x98] sm:$0xff]   ;;  %v3698_v48 = vld [vmem:[%s4800_s1 + $0xc8] sm:$0xff]  }
  0x1a   : > { %3105 = vmatprep.subr.bf16.mxu0 %v3650_v8  ;;  %3621 = vmatprep.subr.bf16.mxu1 %v3650_v8  ;;  %v3690_v42 = vld [vmem:[%s4800_s1 + $0xd0] sm:$0xff]   ;;  %v3692_v44 = vld [vmem:[%s3991_s9 + $0xdc] ss:$36 sps:$4 sm:$0xff]   ;;  %v3699_v51 = vld [vmem:[%s4800_s1 + $0x88] sm:$0xff]  }
  0x1b   : > { %v3694_v45 = vld [vmem:[%s3991_s9 + $0x43c] ss:$36 sps:$4 sm:$0xff]   ;;  %v3691_v47 = vld [vmem:[%s4800_s1 + $0x90] sm:$0xff]   ;;  %v3704_v53 = vld [vmem:[%s3991_s9 + $0x124] ss:$36 sps:$4 sm:$0xff]  }
  0x1c   : > { %v3696_v49 = vld [vmem:[%s3991_s9 + $0xd8] ss:$36 sps:$4 sm:$0xff]   ;;  %v3700_v52 = vld [vmem:[%s4800_s1 + $0xc0] sm:$0xff]   ;;  %v3708_v54 = vld [vmem:[%s3991_s9 + $0xc] ss:$36 sps:$4 sm:$0xff]  }
  0x1d   : > { %3106 = vmatpush3.bf16.msra.mxu0 %v3651_v9  ;;  %3629 = vmatpush3.bf16.msra.mxu1 %v3651_v9  ;;  %v3697_v50 = vld [vmem:[%s3991_s9 + $0x438] ss:$36 sps:$4 sm:$0xff]   ;;  %v3718_v55 = vld [vmem:[%s4800_s1 + $0x160] sm:$0xff]   ;;  %v3706_v58 = vld [vmem:[%s3991_s9 + $0x8] ss:$36 sps:$4 sm:$0xff]  }
  0x1e   : > { %3107 = vmatprep.subr.bf16.mxu0 %v3652_v10  ;;  %3622 = vmatprep.subr.bf16.mxu1 %v3652_v10  ;;  %v3719_v56 = vld [vmem:[%s4800_s1 + $0x120] sm:$0xff]   ;;  %v3710_v60 = vld [vmem:[%s4800_s1 + $0x1f8] sm:$0xff]   ;;  %v3712_v62 = vld [vmem:[%s3991_s9 + $0x16c] ss:$36 sps:$4 sm:$0xff]  }
  0x1f   : > { %v3702_v57 = vld [vmem:[%s4800_s1 + $0x80] sm:$0xff]   ;;  %v3711_v61 = vld [vmem:[%s4800_s1 + $0x1b8] sm:$0xff]   ;;  %v3726_v1 = vld [vmem:[%s4800_s1 + $0x1f0] sm:$0xff]  }
  0x20   : > { %v3709_v59 = vld [vmem:[%s3991_s9 + $0x120] ss:$36 sps:$4 sm:$0xff]   ;;  %v3714_v63 = vld [vmem:[%s3991_s9 + $0x54] ss:$36 sps:$4 sm:$0xff]   ;;  %v3716_v4 = vld [vmem:[%s3991_s9 + $0x168] ss:$36 sps:$4 sm:$0xff]  }
  0x21   : > { %3108 = vmatpush3.bf16.msra.mxu0 %v3653_v13  ;;  %3630 = vmatpush3.bf16.msra.mxu1 %v3653_v13  ;;  %v3728_v0 = vld [vmem:[%s4800_s1 + $0x158] sm:$0xff]   ;;  %v3727_v3 = vld [vmem:[%s4800_s1 + $0x1b0] sm:$0xff]   ;;  %v3743_v9 = vld [vmem:[%s4800_s1 + $0x1e8] sm:$0xff]  }
  0x22   : > { %3109 = vmatprep.subr.bf16.mxu0 %v3654_v14  ;;  %3623 = vmatprep.subr.bf16.mxu1 %v3654_v14  ;;  %v3729_v2 = vld [vmem:[%s4800_s1 + $0x118] sm:$0xff]   ;;  %v3717_v5 = vld [vmem:[%s3991_s9 + $0x50] ss:$36 sps:$4 sm:$0xff]   ;;  %v3745_v11 = vld [vmem:[%s4800_s1 + $0x1a8] sm:$0xff]  }
  0x23   : > { %v3720_v6 = vld [vmem:[%s3991_s9 + $0x1b4] ss:$36 sps:$4 sm:$0xff]   ;;  %v3722_v7 = vld [vmem:[%s3991_s9 + $0x9c] ss:$36 sps:$4 sm:$0xff]  }
  0x24   : > { %v3742_v8 = vld [vmem:[%s4800_s1 + $0x150] sm:$0xff]   ;;  %v3725_v13 = vld [vmem:[%s3991_s9 + $0x98] ss:$36 sps:$4 sm:$0xff]  }
  0x25   : > { %3110 = vmatpush3.bf16.msra.mxu0 %v3655_v15  ;;  %3631 = vmatpush3.bf16.msra.mxu1 %v3655_v15  ;;  %v3744_v10 = vld [vmem:[%s4800_s1 + $0x110] sm:$0xff]   ;;  %v3730_v14 = vld [vmem:[%s3991_s9 + $0x1fc] ss:$36 sps:$4 sm:$0xff]   ;;  %v3752_v15 = vld [vmem:[%s4800_s1 + $0x148] sm:$0xff]  }
  0x26   : > { %3111 = vmatprep.subr.bf16.mxu0 %v3656_v16  ;;  %3624 = vmatprep.subr.bf16.mxu1 %v3656_v16  ;;  %v3724_v12 = vld [vmem:[%s3991_s9 + $0x1b0] ss:$36 sps:$4 sm:$0xff]   ;;  %v3753_v16 = vld [vmem:[%s4800_s1 + $0x108] sm:$0xff]  }
  0x29   : > { %3112 = vmatpush3.bf16.msra.mxu0 %v3657_v17  ;;  %3632 = vmatpush3.bf16.msra.mxu1 %v3657_v17  ;;  %v3732_v17 = vld [vmem:[%s3991_s9 + $0xe4] ss:$36 sps:$4 sm:$0xff]  }
  0x2a   : > { %3209 = vmatprep.subr.bf16.mxu1 %v3664_v18  ;;  %3321 = vmatprep.subr.bf16.mxu0 %v3667_v21  ;;  %v3760_v18 = vld [vmem:[%s4800_s1 + $0x1e0] sm:$0xff]  }
  0x2b   : > { %v3735_v21 = vld [vmem:[%s3991_s9 + $0xe0] ss:$36 sps:$4 sm:$0xff]  }
  0x2c   : > { %1690 = vmatmul.mubr.bf16.vlgmr.msra.gmra.mxu0 %v3658_v19  ;;  %1786 = vmatmul.mubr.bf16.vlgmr.msra.gmra.mxu1 %v3661_v20  ;;  %v3761_v19 = vld [vmem:[%s4800_s1 + $0x1a0] sm:$0xff]   ;;  %v3734_v20 = vld [vmem:[%s3991_s9 + $0x1f8] ss:$36 sps:$4 sm:$0xff]  }
  0x2d   : > { %3210 = vmatpush3.bf16.msra.mxu1 %v3665_v22  ;;  %3322 = vmatpush3.bf16.msra.mxu0 %v3669_v24  ;;  %v3736_v22 = vld [vmem:[%s3991_s9 + $0x244] ss:$36 sps:$4 sm:$0xff]  }
  0x2e   : > { %3211 = vmatprep.subr.bf16.mxu1 %v3666_v23  ;;  %1697 = vmatprep.mubr.bf16.mxu0 %v3670_v25  ;;  %v3738_v23 = vld [vmem:[%s3991_s9 + $0x12c] ss:$36 sps:$4 sm:$0xff]   ;;  %v3768_v24 = vld [vmem:[%s4800_s1 + $0x140] sm:$0xff]  }
  0x2f   : > { %1793 = vmatprep.mubr.bf16.mxu1 %v3672_v26  ;;  %3323 = vmatprep.subr.bf16.mxu0 %v3687_v28  ;;  %v3769_v25 = vld [vmem:[%s4800_s1 + $0x100] sm:$0xff]   ;;  %v3776_v26 = vld [vmem:[%s4800_s1 + $0x1d8] sm:$0xff]  }
  0x30   : > { %v3777_v28 = vld [vmem:[%s4800_s1 + $0x198] sm:$0xff]  }
  0x31   : > { %3212 = vmatpush3.bf16.msra.mxu1 %v3668_v27  ;;  %3324 = vmatpush3.bf16.msra.mxu0 %v3689_v33  ;;  %v3740_v27 = vld [vmem:[%s3991_s9 + $0x240] ss:$36 sps:$4 sm:$0xff]   ;;  %v3791_v33 = vld [vmem:[%s4800_s1 + $0x1d0] sm:$0xff]  }
  0x32   : > { %3213 = vmatprep.subr.bf16.mxu1 %v3676_v31  ;;  %3325 = vmatprep.subr.bf16.mxu0 %v3701_v43  ;;  %v3746_v31 = vld [vmem:[%s3991_s9 + $0x28c] ss:$36 sps:$4 sm:$0xff]   ;;  %v3762_v43 = vld [vmem:[%s3991_s9 + $0x31c] ss:$36 sps:$4 sm:$0xff]  }
  0x34   : > { %1698 = vmatmul.mubr.bf16.gmra.mxu0 %v3674_v29  ;;  %1794 = vmatmul.mubr.bf16.gmra.mxu1 %v3675_v30  ;;  %v3778_v29 = vld [vmem:[%s4800_s1 + $0x238] sm:$0xff]   ;;  %v3741_v30 = vld [vmem:[%s3991_s9 + $0x128] ss:$36 sps:$4 sm:$0xff]  }
  0x35   : > { %3214 = vmatpush3.bf16.msra.mxu1 %v3677_v32  ;;  %1705 = vmatprep.mubr.bf16.mxu0 %v3680_v35  ;;  %v3748_v32 = vld [vmem:[%s3991_s9 + $0x174] ss:$36 sps:$4 sm:$0xff]  }
  0x36   : > { %3215 = vmatprep.subr.bf16.mxu1 %v3678_v34  ;;  %1801 = vmatprep.mubr.bf16.mxu1 %v3682_v36  ;;  %v3750_v34 = vld [vmem:[%s3991_s9 + $0x288] ss:$36 sps:$4 sm:$0xff]   ;;  %v3792_v35 = vld [vmem:[%s4800_s1 + $0x190] sm:$0xff]  }
  0x37   : > { %3326 = vmatpush3.bf16.msra.mxu0 %v3703_v46  ;;  %v3751_v36 = vld [vmem:[%s3991_s9 + $0x170] ss:$36 sps:$4 sm:$0xff]   ;;  %v3767_v46 = vld [vmem:[%s3991_s9 + $0x200] ss:$36 sps:$4 sm:$0xff]  }
  0x38   : > { %3327 = vmatprep.subr.bf16.mxu0 %v3718_v55  ;;  %v3793_v55 = vld [vmem:[%s4800_s1 + $0x230] sm:$0xff]  }
  0x39   : > { %3216 = vmatpush3.bf16.msra.mxu1 %v3679_v37  ;;  %v3754_v37 = vld [vmem:[%s3991_s9 + $0x2d4] ss:$36 sps:$4 sm:$0xff]  }
  0x3a   : > { %3217 = vmatprep.subr.bf16.mxu1 %v3686_v40  ;;  %v3759_v40 = vld [vmem:[%s3991_s9 + $0x1b8] ss:$36 sps:$4 sm:$0xff]  }
  0x3b   : > { %3328 = vmatpush3.bf16.msra.mxu0 %v3719_v56  ;;  %v3808_v56 = vld [vmem:[%s4800_s1 + $0x228] sm:$0xff]  }
  0x3c   : > { %1706 = vmatmul.mubr.bf16.gmra.mxu0 %v3684_v38  ;;  %1802 = vmatmul.mubr.bf16.gmra.mxu1 %v3685_v39  ;;  %v3756_v38 = vld [vmem:[%s3991_s9 + $0x1bc] ss:$36 sps:$4 sm:$0xff]   ;;  %v3758_v39 = vld [vmem:[%s3991_s9 + $0x2d0] ss:$36 sps:$4 sm:$0xff]  }
  0x3d   : > { %3218 = vmatpush3.bf16.msra.mxu1 %v3688_v41  ;;  %1713 = vmatprep.mubr.bf16.mxu0 %v3692_v44  ;;  %v3806_v41 = vld [vmem:[%s4800_s1 + $0x1c8] sm:$0xff]  }
  0x3e   : > { %3219 = vmatprep.subr.bf16.mxu1 %v3690_v42  ;;  %1809 = vmatprep.mubr.bf16.mxu1 %v3694_v45  ;;  %v3807_v42 = vld [vmem:[%s4800_s1 + $0x188] sm:$0xff]   ;;  %v3766_v45 = vld [vmem:[%s3991_s9 + $0x318] ss:$36 sps:$4 sm:$0xff]  }
  0x3f   : > { %3329 = vmatprep.subr.bf16.mxu0 %v3728_v0  ;;  %v3764_v44 = vld [vmem:[%s3991_s9 + $0x204] ss:$36 sps:$4 sm:$0xff]  }
  0x40   : > { %3330 = vmatpush3.bf16.msra.mxu0 %v3729_v2  ;;  %v3790_v0 = vld [vmem:[%s3991_s9 + $0xa0] ss:$36 sps:$4 sm:$0xff]   ;;  %v3796_v2 = vld [vmem:[%s3991_s9 + $0xec] ss:$36 sps:$4 sm:$0xff]  }
  0x41   : > { %3220 = vmatpush3.bf16.msra.mxu1 %v3691_v47  ;;  %3331 = vmatprep.subr.bf16.mxu0 %v3742_v8  ;;  %v3821_v47 = vld [vmem:[%s4800_s1 + $0x1c0] sm:$0xff]   ;;  %v3802_v8 = vld [vmem:[%s3991_s9 + $0x134] ss:$36 sps:$4 sm:$0xff]  }
  0x42   : > { %3221 = vmatprep.subr.bf16.mxu1 %v3698_v48  ;;  %v3822_v48 = vld [vmem:[%s4800_s1 + $0x180] sm:$0xff]  }
  0x44   : > { %1714 = vmatmul.mubr.bf16.gmra.mxu0 %v3696_v49  ;;  %1810 = vmatmul.mubr.bf16.gmra.mxu1 %v3697_v50  ;;  %v3770_v49 = vld [vmem:[%s3991_s9 + $0x24c] ss:$36 sps:$4 sm:$0xff]   ;;  %v3774_v50 = vld [vmem:[%s3991_s9 + $0x14] ss:$36 sps:$4 sm:$0xff]  }
  0x45   : > { %3222 = vmatpush3.bf16.msra.mxu1 %v3699_v51  ;;  %1721 = vmatprep.mubr.bf16.mxu0 %v3704_v53  ;;  %v3772_v51 = vld [vmem:[%s3991_s9 + $0x10] ss:$36 sps:$4 sm:$0xff]  }
  0x46   : > { %3223 = vmatprep.subr.bf16.mxu1 %v3700_v52  ;;  %1850 = vmatprep.mubr.bf16.mxu1 %v3708_v54  ;;  %v3775_v52 = vld [vmem:[%s3991_s9 + $0x248] ss:$36 sps:$4 sm:$0xff]   ;;  %v3779_v53 = vld [vmem:[%s3991_s9 + $0x294] ss:$36 sps:$4 sm:$0xff]   ;;  %v3781_v54 = vld [vmem:[%s3991_s9 + $0x5c] ss:$36 sps:$4 sm:$0xff]  }
  0x47   : > { %3332 = vmatpush3.bf16.msra.mxu0 %v3744_v10  ;;  %v3804_v10 = vld [vmem:[%s3991_s9 + $0x368] ss:$36 sps:$4 sm:$0xff]  }
  0x48   : > { %3333 = vmatprep.subr.bf16.mxu0 %v3752_v15  ;;  %v3814_v15 = vld [vmem:[%s3991_s9 + $0x178] ss:$36 sps:$4 sm:$0xff]  }
  0x49   : > { %3224 = vmatpush3.bf16.msra.mxu1 %v3702_v57  ;;  %v3783_v57 = vld [vmem:[%s3991_s9 + $0x290] ss:$36 sps:$4 sm:$0xff]  }
  0x4a   : > { %3433 = vmatprep.subr.bf16.mxu1 %v3710_v60  ;;  %v3787_v60 = vld [vmem:[%s3991_s9 + $0xa4] ss:$36 sps:$4 sm:$0xff]  }
  0x4b   : > { %3334 = vmatpush3.bf16.msra.mxu0 %v3753_v16  ;;  %v3815_v16 = vld [vmem:[%s3991_s9 + $0x3fc] ss:$36 sps:$4 sm:$0xff]  }
  0x4c   : > { %1722 = vmatmul.mubr.bf16.gmra.mxu0 %v3709_v59  ;;  %1851 = vmatmul.mubr.bf16.vlgmr.msra.gmra.mxu1 %v3706_v58  ;;  %v3784_v58 = vld [vmem:[%s3991_s9 + $0x58] ss:$36 sps:$4 sm:$0xff]  }
  0x4d   : > { %3434 = vmatpush3.bf16.msra.mxu1 %v3711_v61  ;;  %1729 = vmatprep.mubr.bf16.mxu0 %v3712_v62  ;;  %v3785_v59 = vld [vmem:[%s3991_s9 + $0x2dc] ss:$36 sps:$4 sm:$0xff]  }
  0x4e   : > { %1858 = vmatprep.mubr.bf16.mxu1 %v3714_v63  ;;  %3435 = vmatprep.subr.bf16.mxu1 %v3726_v1  ;;  %v3823_v61 = vld [vmem:[%s4800_s1 + $0x220] sm:$0xff]   ;;  %v3789_v62 = vld [vmem:[%s3991_s9 + $0x2d8] ss:$36 sps:$4 sm:$0xff]  }
  0x4f   : > { %3335 = vmatprep.subr.bf16.mxu0 %v3768_v24  ;;  %v3836_v63 = vld [vmem:[%s4800_s1 + $0x218] sm:$0xff]   ;;  %v3794_v1 = vld [vmem:[%s3991_s9 + $0x324] ss:$36 sps:$4 sm:$0xff]  }
  0x50   : > { %3336 = vmatpush3.bf16.msra.mxu0 %v3769_v25  ;;  %v3830_v24 = vld [vmem:[%s3991_s9 + $0x254] ss:$36 sps:$4 sm:$0xff]   ;;  %v3834_v25 = vld [vmem:[%s3991_s9 + $0x1c] ss:$36 sps:$4 sm:$0xff]  }
  0x51   : > { %3436 = vmatpush3.bf16.msra.mxu1 %v3727_v3  ;;  %3569 = vmatprep.subr.bf16.mxu0 %v3778_v29  ;;  %v3849_v3 = vld [vmem:[%s4800_s1 + $0x210] sm:$0xff]  }
  0x52   : > { %3437 = vmatprep.subr.bf16.mxu1 %v3743_v9  ;;  %v3875_v9 = vld [vmem:[%s4800_s1 + $0x200] sm:$0xff]  }
  0x54   : > { %1730 = vmatmul.mubr.bf16.gmra.mxu0 %v3716_v4  ;;  %1859 = vmatmul.mubr.bf16.gmra.mxu1 %v3717_v5  ;;  %v3798_v4 = vld [vmem:[%s3991_s9 + $0x320] ss:$36 sps:$4 sm:$0xff]   ;;  %v3862_v5 = vld [vmem:[%s4800_s1 + $0x208] sm:$0xff]  }
  0x55   : > { %1737 = vmatprep.mubr.bf16.mxu0 %v3720_v6  ;;  %1866 = vmatprep.mubr.bf16.mxu1 %v3722_v7  ;;  %v3799_v6 = vld [vmem:[%s3991_s9 + $0xe8] ss:$36 sps:$4 sm:$0xff]  }
  0x56   : > { %3438 = vmatpush3.bf16.msra.mxu1 %v3745_v11  ;;  %v3800_v7 = vld [vmem:[%s3991_s9 + $0x36c] ss:$36 sps:$4 sm:$0xff]  }
  0x57   : > { %3439 = vmatprep.subr.bf16.mxu1 %v3760_v18  ;;  %v3805_v11 = vld [vmem:[%s3991_s9 + $0x130] ss:$36 sps:$4 sm:$0xff]   ;;  %v3819_v18 = vld [vmem:[%s3991_s9 + $0x3f8] ss:$36 sps:$4 sm:$0xff]  }
  0x5a   : > { %3440 = vmatpush3.bf16.msra.mxu1 %v3761_v19  ;;  %v3820_v19 = vld [vmem:[%s3991_s9 + $0x1c0] ss:$36 sps:$4 sm:$0xff]  }
  0x5b   : > { %3441 = vmatprep.subr.bf16.mxu1 %v3776_v26  ;;  %v3832_v26 = vld [vmem:[%s3991_s9 + $0x18] ss:$36 sps:$4 sm:$0xff]  }
  0x5c   : > { %1738 = vmatmul.mubr.bf16.gmra.mxu0 %v3724_v12  ;;  %1867 = vmatmul.mubr.bf16.gmra.mxu1 %v3725_v13  ;;  %v3809_v12 = vld [vmem:[%s3991_s9 + $0x3b4] ss:$36 sps:$4 sm:$0xff]   ;;  %v3811_v13 = vld [vmem:[%s3991_s9 + $0x17c] ss:$36 sps:$4 sm:$0xff]  }
  0x5d   : > { %1745 = vmatprep.mubr.bf16.mxu0 %v3730_v14  ;;  %1874 = vmatprep.mubr.bf16.mxu1 %v3732_v17  ;;  %v3813_v14 = vld [vmem:[%s3991_s9 + $0x3b0] ss:$36 sps:$4 sm:$0xff]   ;;  %v3817_v17 = vld [vmem:[%s3991_s9 + $0x1c4] ss:$36 sps:$4 sm:$0xff]  }
  0x5e   : > { %3442 = vmatpush3.bf16.msra.mxu1 %v3777_v28  ;;  %v3837_v28 = vld [vmem:[%s3991_s9 + $0x29c] ss:$36 sps:$4 sm:$0xff]  }
  0x5f   : > { %3443 = vmatprep.subr.bf16.mxu1 %v3791_v33  ;;  %v3845_v33 = vld [vmem:[%s3991_s9 + $0xac] ss:$36 sps:$4 sm:$0xff]  }
  0x62   : > { %3444 = vmatpush3.bf16.msra.mxu1 %v3792_v35  ;;  %v3848_v35 = vld [vmem:[%s3991_s9 + $0xa8] ss:$36 sps:$4 sm:$0xff]  }
  0x63   : > { %3445 = vmatprep.subr.bf16.mxu1 %v3806_v41  ;;  %v3858_v41 = vld [vmem:[%s3991_s9 + $0x13c] ss:$36 sps:$4 sm:$0xff]  }
  0x64   : > { %1746 = vmatmul.mubr.bf16.gmra.mxu0 %v3734_v20  ;;  %1875 = vmatmul.mubr.bf16.gmra.mxu1 %v3735_v21  ;;  %v3824_v20 = vld [vmem:[%s3991_s9 + $0x444] ss:$36 sps:$4 sm:$0xff]   ;;  %v3826_v21 = vld [vmem:[%s3991_s9 + $0x20c] ss:$36 sps:$4 sm:$0xff]  }
  0x65   : > { %1753 = vmatprep.mubr.bf16.mxu0 %v3736_v22  ;;  %1882 = vmatprep.mubr.bf16.mxu1 %v3738_v23  ;;  %v3828_v22 = vld [vmem:[%s3991_s9 + $0x440] ss:$36 sps:$4 sm:$0xff]   ;;  %v3829_v23 = vld [vmem:[%s3991_s9 + $0x208] ss:$36 sps:$4 sm:$0xff]  }
  0x66   : > { %3446 = vmatpush3.bf16.msra.mxu1 %v3807_v42  ;;  %v3860_v42 = vld [vmem:[%s3991_s9 + $0x370] ss:$36 sps:$4 sm:$0xff]  }
  0x67   : > { %3447 = vmatprep.subr.bf16.mxu1 %v3821_v47 }
  0x6a   : > { %3448 = vmatpush3.bf16.msra.mxu1 %v3822_v48 }
  0x6c   : > { %1754 = vmatmul.mubr.bf16.gmra.mxu0 %v3740_v27  ;;  %1883 = vmatmul.mubr.bf16.gmra.mxu1 %v3741_v30  ;;  %v3835_v27 = vld [vmem:[%s3991_s9 + $0x250] ss:$36 sps:$4 sm:$0xff]   ;;  %v3841_v30 = vld [vmem:[%s3991_s9 + $0x298] ss:$36 sps:$4 sm:$0xff]  }
  0x6d   : > { %1761 = vmatprep.mubr.bf16.mxu0 %v3746_v31  ;;  %1890 = vmatprep.mubr.bf16.mxu1 %v3748_v32  ;;  %v3842_v31 = vld [vmem:[%s3991_s9 + $0x60] ss:$36 sps:$4 sm:$0xff]  }
  0x6e   : > { %v3843_v32 = vld [vmem:[%s3991_s9 + $0x2e4] ss:$36 sps:$4 sm:$0xff]  }
  0x74   : > { %1762 = vmatmul.mubr.bf16.gmra.mxu0 %v3750_v34  ;;  %1891 = vmatmul.mubr.bf16.gmra.mxu1 %v3751_v36  ;;  %v3847_v34 = vld [vmem:[%s3991_s9 + $0x2e0] ss:$36 sps:$4 sm:$0xff]   ;;  %v3850_v36 = vld [vmem:[%s3991_s9 + $0x32c] ss:$36 sps:$4 sm:$0xff]  }
  0x75   : > { %1769 = vmatprep.mubr.bf16.mxu0 %v3754_v37  ;;  %1898 = vmatprep.mubr.bf16.mxu1 %v3756_v38  ;;  %v3852_v37 = vld [vmem:[%s3991_s9 + $0xf4] ss:$36 sps:$4 sm:$0xff]   ;;  %v3854_v38 = vld [vmem:[%s3991_s9 + $0x328] ss:$36 sps:$4 sm:$0xff]  }
  0x7c   : > { %1770 = vmatmul.mubr.bf16.gmra.mxu0 %v3758_v39  ;;  %1899 = vmatmul.mubr.bf16.gmra.mxu1 %v3759_v40  ;;  %v3855_v39 = vld [vmem:[%s3991_s9 + $0xf0] ss:$36 sps:$4 sm:$0xff]  }
  0x7d   : > { %1777 = vmatprep.mubr.bf16.mxu0 %v3762_v43  ;;  %1906 = vmatprep.mubr.bf16.mxu1 %v3764_v44  ;;  %v3856_v40 = vld [vmem:[%s3991_s9 + $0x374] ss:$36 sps:$4 sm:$0xff]   ;;  %v3863_v44 = vld [vmem:[%s3991_s9 + $0x3bc] ss:$36 sps:$4 sm:$0xff]  }
  0x7e   : > { %v3861_v43 = vld [vmem:[%s3991_s9 + $0x138] ss:$36 sps:$4 sm:$0xff]  }
  0x84   : > { %1778 = vmatmul.mubr.bf16.gmra.mxu0 %v3766_v45  ;;  %1907 = vmatmul.mubr.bf16.gmra.mxu1 %v3767_v46  ;;  %v3865_v45 = vld [vmem:[%s3991_s9 + $0x184] ss:$36 sps:$4 sm:$0xff]  }
  0x85   : > { %1914 = vmatprep.mubr.bf16.mxu1 %v3770_v49  ;;  %2011 = vmatprep.mubr.bf16.mxu0 %v3774_v50 }
  0x8c   : > { %1915 = vmatmul.mubr.bf16.gmra.mxu1 %v3775_v52  ;;  %2012 = vmatmul.mubr.bf16.vlgmr.msra.gmra.mxu0 %v3772_v51 }
  0x8d   : > { %3570 = vmatpush3.bf16.msra.mxu0 %v3778_v29  ;;  %1922 = vmatprep.mubr.bf16.mxu1 %v3779_v53  ;;  %v3839_v29 = vld [vmem:[%s3991_s9 + $0x64] ss:$36 sps:$4 sm:$0xff]  }
  0x8e   : > { %2019 = vmatprep.mubr.bf16.mxu0 %v3781_v54  ;;  %3571 = vmatprep.subr.bf16.mxu0 %v3793_v55  ;;  %v3867_v54 = vld [vmem:[%s3991_s9 + $0x3b8] ss:$36 sps:$4 sm:$0xff]  }
  0x91   : > { %3572 = vmatpush3.bf16.msra.mxu0 %v3793_v55  ;;  %v3868_v55 = vld [vmem:[%s3991_s9 + $0x180] ss:$36 sps:$4 sm:$0xff]  }
  0x92   : > { %3573 = vmatprep.subr.bf16.mxu0 %v3808_v56 }
  0x94   : > { %1923 = vmatmul.mubr.bf16.gmra.mxu1 %v3783_v57  ;;  %2020 = vmatmul.mubr.bf16.gmra.mxu0 %v3784_v58  ;;  %v3871_v57 = vld [vmem:[%s3991_s9 + $0x1cc] ss:$36 sps:$4 sm:$0xff]  }
  0x95   : > { %1930 = vmatprep.mubr.bf16.mxu1 %v3785_v59  ;;  %2027 = vmatprep.mubr.bf16.mxu0 %v3787_v60 }
  0x96   : > { %3574 = vmatpush3.bf16.msra.mxu0 %v3808_v56  ;;  %v3869_v56 = vld [vmem:[%s3991_s9 + $0x404] ss:$36 sps:$4 sm:$0xff]  }
  0x97   : > { %3575 = vmatprep.subr.bf16.mxu0 %v3823_v61 }
  0x9a   : > { %3576 = vmatpush3.bf16.msra.mxu0 %v3823_v61 }
  0x9b   : > { %3577 = vmatprep.subr.bf16.mxu0 %v3836_v63 }
  0x9c   : > { %1931 = vmatmul.mubr.bf16.gmra.mxu1 %v3789_v62  ;;  %2028 = vmatmul.mubr.bf16.gmra.mxu0 %v3790_v0 }
  0x9d   : > { %1938 = vmatprep.mubr.bf16.mxu1 %v3794_v1  ;;  %2035 = vmatprep.mubr.bf16.mxu0 %v3796_v2 }
  0x9e   : > { %3578 = vmatpush3.bf16.msra.mxu0 %v3836_v63 }
  0x9f   : > { %3579 = vmatprep.subr.bf16.mxu0 %v3849_v3 }
  0xa2   : > { %3580 = vmatpush3.bf16.msra.mxu0 %v3849_v3 }
  0xa3   : > { %3581 = vmatprep.subr.bf16.mxu0 %v3862_v5 }
  0xa4   : > { %1939 = vmatmul.mubr.bf16.gmra.mxu1 %v3798_v4  ;;  %2036 = vmatmul.mubr.bf16.gmra.mxu0 %v3799_v6  ;;  %v3873_v6 = vld [vmem:[%s3991_s9 + $0x400] ss:$36 sps:$4 sm:$0xff]  }
  0xa5   : > { %1946 = vmatprep.mubr.bf16.mxu1 %v3800_v7  ;;  %2043 = vmatprep.mubr.bf16.mxu0 %v3802_v8  ;;  %v3874_v7 = vld [vmem:[%s3991_s9 + $0x1c8] ss:$36 sps:$4 sm:$0xff]  }
  0xa6   : > { %3582 = vmatpush3.bf16.msra.mxu0 %v3862_v5  ;;  %v3876_v8 = vld [vmem:[%s3991_s9 + $0x44c] ss:$36 sps:$4 sm:$0xff]  }
  0xa7   : > { %3583 = vmatprep.subr.bf16.mxu0 %v3875_v9 }
  0xaa   : > { %3584 = vmatpush3.bf16.msra.mxu0 %v3875_v9  ;;  %v3878_v9 = vld [vmem:[%s3991_s9 + $0x214] ss:$36 sps:$4 sm:$0xff]  }
  0xac   : > { %1947 = vmatmul.mubr.bf16.gmra.mxu1 %v3804_v10  ;;  %2044 = vmatmul.mubr.bf16.gmra.mxu0 %v3805_v11 }
  0xad   : > { %1954 = vmatprep.mubr.bf16.mxu1 %v3809_v12  ;;  %2051 = vmatprep.mubr.bf16.mxu0 %v3811_v13 }
  0xb4   : > { %1955 = vmatmul.mubr.bf16.gmra.mxu1 %v3813_v14  ;;  %2052 = vmatmul.mubr.bf16.gmra.mxu0 %v3814_v15 }
  0xb5   : > { %1962 = vmatprep.mubr.bf16.mxu1 %v3815_v16  ;;  %2059 = vmatprep.mubr.bf16.mxu0 %v3817_v17 }
  0xbc   : > { %1963 = vmatmul.mubr.bf16.gmra.mxu1 %v3819_v18  ;;  %2060 = vmatmul.mubr.bf16.gmra.mxu0 %v3820_v19 }
  0xbd   : > { %1970 = vmatprep.mubr.bf16.mxu1 %v3824_v20  ;;  %2067 = vmatprep.mubr.bf16.mxu0 %v3826_v21 }
  0xc4   : > { %1971 = vmatmul.mubr.bf16.gmra.mxu1 %v3828_v22  ;;  %2068 = vmatmul.mubr.bf16.gmra.mxu0 %v3829_v23  ;;  %v3880_v22 = vld [vmem:[%s3991_s9 + $0x448] ss:$36 sps:$4 sm:$0xff]   ;;  %v3881_v23 = vld [vmem:[%s3991_s9 + $0x210] ss:$36 sps:$4 sm:$0xff]  }
  0xc5   : > { %2075 = vmatprep.mubr.bf16.mxu0 %v3830_v24  ;;  %2172 = vmatprep.mubr.bf16.mxu1 %v3834_v25  ;;  %v3884_v24 = vld [vmem:[%s3991_s9 + $0x25c] ss:$36 sps:$4 sm:$0xff]  }
  0xc6   : > { %v3885_v25 = vld [vmem:[%s3991_s9 + $0x20] ss:$36 sps:$4 sm:$0xff]  }
  0xcc   : > { %2076 = vmatmul.mubr.bf16.gmra.mxu0 %v3835_v27  ;;  %2173 = vmatmul.mubr.bf16.vlgmr.msra.gmra.mxu1 %v3832_v26 }
  0xcd   : > { %2083 = vmatprep.mubr.bf16.mxu0 %v3837_v28  ;;  %2180 = vmatprep.mubr.bf16.mxu1 %v3839_v29 }
  0xd4   : > { %2084 = vmatmul.mubr.bf16.gmra.mxu0 %v3841_v30  ;;  %2181 = vmatmul.mubr.bf16.gmra.mxu1 %v3842_v31 }
  0xd5   : > { %2091 = vmatprep.mubr.bf16.mxu0 %v3843_v32  ;;  %2188 = vmatprep.mubr.bf16.mxu1 %v3845_v33 }
  0xdc   : > { %2092 = vmatmul.mubr.bf16.gmra.mxu0 %v3847_v34  ;;  %2189 = vmatmul.mubr.bf16.gmra.mxu1 %v3848_v35 }
  0xdd   : > { %2099 = vmatprep.mubr.bf16.mxu0 %v3850_v36  ;;  %2196 = vmatprep.mubr.bf16.mxu1 %v3852_v37 }
  0xe4   : > { %2100 = vmatmul.mubr.bf16.gmra.mxu0 %v3854_v38  ;;  %2197 = vmatmul.mubr.bf16.gmra.mxu1 %v3855_v39  ;;  %v3882_v38 = vld [vmem:[%s3991_s9 + $0x258] ss:$36 sps:$4 sm:$0xff]   ;;  %v3886_v39 = vld [vmem:[%s3991_s9 + $0x68] ss:$36 sps:$4 sm:$0xff]  }
  0xe5   : > { %2107 = vmatprep.mubr.bf16.mxu0 %v3856_v40  ;;  %2204 = vmatprep.mubr.bf16.mxu1 %v3858_v41  ;;  %v3889_v40 = vld [vmem:[%s3991_s9 + $0x2a4] ss:$36 sps:$4 sm:$0xff]   ;;  %v3890_v41 = vld [vmem:[%s3991_s9 + $0xb0] ss:$36 sps:$4 sm:$0xff]  }
  0xec   : > { %v3113_v46 = vpop.f32.mrf.mxu0  ;;  %v3185_v47 = vpop.f32.mrf.mxu1  ;;  %2108 = vmatmul.mubr.bf16.gmra.mxu0 %v3860_v42  ;;  %2205 = vmatmul.mubr.bf16.gmra.mxu1 %v3861_v43 }
  0xed   : > { %2115 = vmatprep.mubr.bf16.mxu0 %v3863_v44  ;;  %2212 = vmatprep.mubr.bf16.mxu1 %v3865_v45 }
  0xee   : > { %v3114_v48 = vpop.f32.mrf.mxu0  ;;  %v3186_v49 = vpop.f32.mrf.mxu1 }
  0xef   : > { %v4284_v50 = vadd.f32 %v3114_v48, %v3113_v46  ;;  %v4286_v51 = vadd.f32 %v3186_v49, %v3185_v47  ;;  %v4335_v48 = vld [vmem:[%s4801_s2] ss:$0 sm:$0xff] }
  0xf0   : > { %v3116_v52 = vpop.f32.mrf.mxu0  ;;  %v3188_v53 = vpop.f32.mrf.mxu1 }
  0xf2   : > { %v3117_v58 = vpop.f32.mrf.mxu0  ;;  %v3189_v59 = vpop.f32.mrf.mxu1 }
  0xf3   : > { %v4292_v60 = vadd.f32 %v3117_v58, %v3116_v52  ;;  %v4294_v61 = vadd.f32 %v3189_v59, %v3188_v53  ;;  %v1692_v53 = vadd.f32 %v4284_v50, %v4335_v48  ;;  %v3887_v58 = vld [vmem:[%s3991_s9 + $0x2a0] ss:$36 sps:$4 sm:$0xff]   ;;  %v3891_v59 = vld [vmem:[%s3991_s9 + $0xf8] ss:$36 sps:$4 sm:$0xff]  }
  0xf4   : > { %v3119_v62 = vpop.f32.mrf.mxu0  ;;  %v3191_v63 = vpop.f32.mrf.mxu1  ;;  %2116 = vmatmul.mubr.bf16.gmra.mxu0 %v3867_v54  ;;  %2213 = vmatmul.mubr.bf16.gmra.mxu1 %v3868_v55 }
  0xf5   : > { %2123 = vmatprep.mubr.bf16.mxu0 %v3869_v56  ;;  %2220 = vmatprep.mubr.bf16.mxu1 %v3871_v57 }
  0xf6   : > { %v3120_v0 = vpop.f32.mrf.mxu0  ;;  %v3192_v1 = vpop.f32.mrf.mxu1 }
  0xf7   : > { %v4296_v2 = vadd.f32 %v3120_v0, %v3119_v62  ;;  %v4298_v3 = vadd.f32 %v3192_v1, %v3191_v63  ;;  %v3894_v63 = vld [vmem:[%s3991_s9 + $0x2ec] ss:$36 sps:$4 sm:$0xff]   ;;  %v3895_v0 = vld [vmem:[%s3991_s9 + $0x140] ss:$36 sps:$4 sm:$0xff]  }
  0xf8   : > { %v3122_v4 = vpop.f32.mrf.mxu0  ;;  %v3194_v5 = vpop.f32.mrf.mxu1 }
  0xfa   : > { %v3123_v10 = vpop.f32.mrf.mxu0  ;;  %v3195_v11 = vpop.f32.mrf.mxu1 }
  0xfb   : > { %v4304_v12 = vadd.f32 %v3123_v10, %v3122_v4  ;;  %v4306_v13 = vadd.f32 %v3195_v11, %v3194_v5  ;;  %v1695_v5 = vadd.f32 %v4292_v60, %v4335_v48  ;;  %v1700_v60 = vadd.f32 %v4296_v2, %v4335_v48 }
  0xfc   : > { %v3125_v14 = vpop.f32.mrf.mxu0  ;;  %v3197_v15 = vpop.f32.mrf.mxu1  ;;  %2124 = vmatmul.mubr.bf16.gmra.mxu0 %v3873_v6  ;;  %2221 = vmatmul.mubr.bf16.gmra.mxu1 %v3874_v7 }
  0xfd   : > { %2131 = vmatprep.mubr.bf16.mxu0 %v3876_v8  ;;  %2228 = vmatprep.mubr.bf16.mxu1 %v3878_v9 }
  0xfe   : > { %v3126_v16 = vpop.f32.mrf.mxu0  ;;  %v3198_v17 = vpop.f32.mrf.mxu1 }
  0xff   : > { %v4308_v18 = vadd.f32 %v3126_v16, %v3125_v14  ;;  %v4310_v19 = vadd.f32 %v3198_v17, %v3197_v15 }
 0x100   : > { %v3128_v20 = vpop.f32.mrf.mxu0  ;;  %v3200_v21 = vpop.f32.mrf.mxu1 }
 0x102   : > { %v3129_v26 = vpop.f32.mrf.mxu0  ;;  %v3201_v27 = vpop.f32.mrf.mxu1 }
 0x103   : > { %v4316_v28 = vadd.f32 %v3129_v26, %v3128_v20  ;;  %v4318_v29 = vadd.f32 %v3201_v27, %v3200_v21  ;;  %v3892_v20 = vld [vmem:[%s3991_s9 + $0x2e8] ss:$36 sps:$4 sm:$0xff]   ;;  %v1703_v27 = vadd.f32 %v4304_v12, %v4335_v48  ;;  %v1708_v12 = vadd.f32 %v4308_v18, %v4335_v48 }
 0x104   : > { %v3131_v30 = vpop.f32.mrf.mxu0  ;;  %v3203_v31 = vpop.f32.mrf.mxu1  ;;  %2132 = vmatmul.mubr.bf16.gmra.mxu0 %v3880_v22  ;;  %2229 = vmatmul.mubr.bf16.gmra.mxu1 %v3881_v23  ;;  %v3896_v21 = vld [vmem:[%s3991_s9 + $0x188] ss:$36 sps:$4 sm:$0xff]   ;;  %v3899_v23 = vld [vmem:[%s3991_s9 + $0x334] ss:$36 sps:$4 sm:$0xff]  }
 0x105   : > { %2236 = vmatprep.mubr.bf16.mxu1 %v3884_v24  ;;  %3585 = vmatprep.mubr.bf16.mxu0 %v3885_v25  ;;  %v3900_v24 = vld [vmem:[%s3991_s9 + $0x1d0] ss:$36 sps:$4 sm:$0xff]  }
 0x106   : > { %v3132_v32 = vpop.f32.mrf.mxu0  ;;  %v3204_v33 = vpop.f32.mrf.mxu1 }
 0x107   : > { %v4320_v34 = vadd.f32 %v3132_v32, %v3131_v30  ;;  %v4322_v35 = vadd.f32 %v3204_v33, %v3203_v31 }
 0x108   : > { %v3134_v36 = vpop.f32.mrf.mxu0  ;;  %v3206_v37 = vpop.f32.mrf.mxu1 }
 0x10a   : > { %v3135_v42 = vpop.f32.mrf.mxu0  ;;  %v3207_v43 = vpop.f32.mrf.mxu1 }
 0x10b   : > { %v4328_v44 = vadd.f32 %v3135_v42, %v3134_v36  ;;  %v4330_v45 = vadd.f32 %v3207_v43, %v3206_v37  ;;  %v3897_v42 = vld [vmem:[%s3991_s9 + $0x330] ss:$36 sps:$4 sm:$0xff]   ;;  %v3901_v43 = vld [vmem:[%s3991_s9 + $0x218] ss:$36 sps:$4 sm:$0xff]  }
 0x10c   : > { %v3137_v46 = vpop.f32.mrf.mxu0  ;;  %v3225_v47 = vpop.f32.mrf.mxu1  ;;  %2237 = vmatmul.mubr.bf16.gmra.mxu1 %v3882_v38  ;;  %3586 = vmatmul.mubr.bf16.vlgmr.msra.gmra.mxu0 %v3886_v39 }
 0x10d   : > { %2244 = vmatprep.mubr.bf16.mxu1 %v3889_v40  ;;  %3589 = vmatprep.mubr.bf16.mxu0 %v3890_v41 }
 0x10e   : > { %v3138_v49 = vpop.f32.mrf.mxu0  ;;  %v3226_v52 = vpop.f32.mrf.mxu1 }
 0x10f   : > { %v4339_v54 = vadd.f32 %v3138_v49, %v3137_v46  ;;  %v3227_v55 = vadd.f32 %v3226_v52, %v3225_v47  ;;  %v3904_v47 = vld [vmem:[%s3991_s9 + $0x37c] ss:$36 sps:$4 sm:$0xff]  }
 0x110   : > { %v3140_v56 = vpop.f32.mrf.mxu0  ;;  %v3228_v57 = vpop.f32.mrf.mxu1  ;;  %v3905_v49 = vld [vmem:[%s3991_s9 + $0x260] ss:$36 sps:$4 sm:$0xff]  }
 0x111   : > { %v4343_v62 = vadd.f32 %v3227_v55, %v1692_v53  ;;  %v1711_v55 = vadd.f32 %v4316_v28, %v4335_v48  ;;  %v1716_v28 = vadd.f32 %v4320_v34, %v4335_v48 }
 0x112   : > { %v3141_v1 = vpop.f32.mrf.mxu0  ;;  %v3229_v4 = vpop.f32.mrf.mxu1 }
 0x113   : > { %v4349_v6 = vadd.f32 %v3141_v1, %v3140_v56  ;;  %v3230_v50 = vadd.f32 %v3229_v4, %v3228_v57 }
 0x114   : > { %v3143_v7 = vpop.f32.mrf.mxu0  ;;  %v3231_v8 = vpop.f32.mrf.mxu1  ;;  %2245 = vmatmul.mubr.bf16.gmra.mxu1 %v3887_v58  ;;  %3590 = vmatmul.mubr.bf16.gmra.mxu0 %v3891_v59 }
 0x115   : > { %v4351_v9 = vadd.f32 %v3230_v50, %v1695_v5  ;;  %2252 = vmatprep.mubr.bf16.mxu1 %v3894_v63  ;;  %3593 = vmatprep.mubr.bf16.mxu0 %v3895_v0 }
 0x116   : > { %v3144_v10 = vpop.f32.mrf.mxu0  ;;  %v3232_v11 = vpop.f32.mrf.mxu1 }
 0x117   : > { %v4355_v14 = vadd.f32 %v3144_v10, %v3143_v7  ;;  %v3233_v15 = vadd.f32 %v3232_v11, %v3231_v8  ;;  %v3902_v7 = vld [vmem:[%s3991_s9 + $0x378] ss:$36 sps:$4 sm:$0xff]   ;;  %v3906_v8 = vld [vmem:[%s3991_s9 + $0x2a8] ss:$36 sps:$4 sm:$0xff]  }
 0x118   : > { %v3146_v16 = vpop.f32.mrf.mxu0  ;;  %v3234_v17 = vpop.f32.mrf.mxu1  ;;  %v3909_v11 = vld [vmem:[%s3991_s9 + $0x3c4] ss:$36 sps:$4 sm:$0xff]  }
 0x119   : > { %v4359_v22 = vadd.f32 %v3233_v15, %v1700_v60  ;;  %v3910_v60 = vld [vmem:[%s3991_s9 + $0x2f0] ss:$36 sps:$4 sm:$0xff]  }
 0x11a   : > { %v3147_v25 = vpop.f32.mrf.mxu0  ;;  %v3235_v26 = vpop.f32.mrf.mxu1 }
 0x11b   : > { %v4365_v30 = vadd.f32 %v3147_v25, %v3146_v16  ;;  %v3236_v2 = vadd.f32 %v3235_v26, %v3234_v17  ;;  %v1719_v17 = vadd.f32 %v4328_v44, %v4335_v48  ;;  %v1724_v44 = vadd.f32 %v4339_v54, %v4335_v48 }
 0x11c   : > { %v3149_v31 = vpop.f32.mrf.mxu0  ;;  %v3237_v32 = vpop.f32.mrf.mxu1  ;;  %2253 = vmatmul.mubr.bf16.gmra.mxu1 %v3892_v20  ;;  %3594 = vmatmul.mubr.bf16.gmra.mxu0 %v3896_v21 }
 0x11d   : > { %v4367_v33 = vadd.f32 %v3236_v2, %v1703_v27  ;;  %2260 = vmatprep.mubr.bf16.mxu1 %v3899_v23  ;;  %3597 = vmatprep.mubr.bf16.mxu0 %v3900_v24 }
 0x11e   : > { %v3150_v36 = vpop.f32.mrf.mxu0  ;;  %v3238_v37 = vpop.f32.mrf.mxu1 }
 0x11f   : > { %v4371_v38 = vadd.f32 %v3150_v36, %v3149_v31  ;;  %v3239_v39 = vadd.f32 %v3238_v37, %v3237_v32  ;;  %v3907_v36 = vld [vmem:[%s3991_s9 + $0x3c0] ss:$36 sps:$4 sm:$0xff]   ;;  %v3911_v37 = vld [vmem:[%s3991_s9 + $0x338] ss:$36 sps:$4 sm:$0xff]  }
 0x120   : > { %v3152_v40 = vpop.f32.mrf.mxu0  ;;  %v3240_v41 = vpop.f32.mrf.mxu1 }
 0x121   : > { %v4375_v46 = vadd.f32 %v3239_v39, %v1708_v12  ;;  %v3914_v39 = vld [vmem:[%s3991_s9 + $0x40c] ss:$36 sps:$4 sm:$0xff]  }
 0x122   : > { %v3153_v52 = vpop.f32.mrf.mxu0  ;;  %v3241_v53 = vpop.f32.mrf.mxu1 }
 0x123   : > { %v4381_v56 = vadd.f32 %v3153_v52, %v3152_v40  ;;  %v3242_v18 = vadd.f32 %v3241_v53, %v3240_v41  ;;  %v3915_v40 = vld [vmem:[%s3991_s9 + $0x380] ss:$36 sps:$4 sm:$0xff]  }
 0x124   : > { %v3155_v57 = vpop.f32.mrf.mxu0  ;;  %v3243_v58 = vpop.f32.mrf.mxu1  ;;  %2261 = vmatmul.mubr.bf16.gmra.mxu1 %v3897_v42  ;;  %3598 = vmatmul.mubr.bf16.gmra.mxu0 %v3901_v43  ;;  %v1727_v43 = vadd.f32 %v4349_v6, %v4335_v48  ;;  %v1732_v6 = vadd.f32 %v4355_v14, %v4335_v48 }
 0x125   : > { %v4383_v59 = vadd.f32 %v3242_v18, %v1711_v55  ;;  %2268 = vmatprep.mubr.bf16.mxu1 %v3904_v47  ;;  %3601 = vmatprep.mubr.bf16.mxu0 %v3905_v49 }
 0x126   : > { %v3156_v63 = vpop.f32.mrf.mxu0  ;;  %v3244_v0 = vpop.f32.mrf.mxu1 }
 0x127   : > { %v4387_v1 = vadd.f32 %v3156_v63, %v3155_v57  ;;  %v3245_v4 = vadd.f32 %v3244_v0, %v3243_v58 }
 0x128   : > { %v3158_v5 = vpop.f32.mrf.mxu0  ;;  %v3246_v50 = vpop.f32.mrf.mxu1 }
 0x129   : > { %v4391_v10 = vadd.f32 %v3245_v4, %v1716_v28  ;;  %v3912_v28 = vld [vmem:[%s3991_s9 + $0x408] ss:$36 sps:$4 sm:$0xff]  }
 0x12a   : > { %v3159_v15 = vpop.f32.mrf.mxu0  ;;  %v3247_v16 = vpop.f32.mrf.mxu1  ;;  %v3916_v4 = vld [vmem:[%s3991_s9 + $0x3c8] ss:$36 sps:$4 sm:$0xff]  }
 0x12b   : > { %v4397_v20 = vadd.f32 %v3159_v15, %v3158_v5  ;;  %v3248_v34 = vadd.f32 %v3247_v16, %v3246_v50  ;;  %v3919_v50 = vld [vmem:[%s3991_s9 + $0x454] ss:$36 sps:$4 sm:$0xff]  }
 0x12c   : > { %v3161_v21 = vpop.f32.mrf.mxu0  ;;  %v3249_v23 = vpop.f32.mrf.mxu1  ;;  %2269 = vmatmul.mubr.bf16.gmra.mxu1 %v3902_v7  ;;  %3602 = vmatmul.mubr.bf16.gmra.mxu0 %v3906_v8  ;;  %v3920_v7 = vld [vmem:[%s3991_s9 + $0x410] ss:$36 sps:$4 sm:$0xff]  }
 0x12d   : > { %v4399_v24 = vadd.f32 %v3248_v34, %v1719_v17  ;;  %2276 = vmatprep.mubr.bf16.mxu1 %v3909_v11  ;;  %3605 = vmatprep.mubr.bf16.mxu0 %v3910_v60  ;;  %v1735_v60 = vadd.f32 %v4365_v30, %v4335_v48 }
 0x12e   : > { %v3162_v25 = vpop.f32.mrf.mxu0  ;;  %v3250_v26 = vpop.f32.mrf.mxu1 }
 0x12f   : > { %v4403_v27 = vadd.f32 %v3162_v25, %v3161_v21  ;;  %v3251_v2 = vadd.f32 %v3250_v26, %v3249_v23  ;;  %v1740_v25 = vadd.f32 %v4371_v38, %v4335_v48 }
 0x130   : > { %v3164_v31 = vpop.f32.mrf.mxu0  ;;  %v3252_v32 = vpop.f32.mrf.mxu1 }
 0x131   : > { %v4407_v12 = vadd.f32 %v3251_v2, %v1724_v44 }
 0x132   : > { %v3165_v41 = vpop.f32.mrf.mxu0  ;;  %v3253_v42 = vpop.f32.mrf.mxu1 }
 0x133   : > { %v4413_v47 = vadd.f32 %v3165_v41, %v3164_v31  ;;  %v3254_v54 = vadd.f32 %v3253_v42, %v3252_v32  ;;  %v3917_v31 = vld [vmem:[%s3991_s9 + $0x450] ss:$36 sps:$4 sm:$0xff]   ;;  %v3921_v32 = vld [vmem:[%s3991_s9 + $0x458] ss:$36 sps:$4 sm:$0xff]   ;;  %s2718_s9 = sshll.u32 %s4826_s16, 2 }
 0x134   : > { %v3167_v49 = vpop.f32.mrf.mxu0  ;;  %v3255_v52 = vpop.f32.mrf.mxu1  ;;  %2277 = vmatmul.mubr.bf16.gmra.mxu1 %v3907_v36  ;;  %3606 = vmatmul.mubr.bf16.gmra.mxu0 %v3911_v37  ;;  %s4712_s21 = scalar_lea.vmem %s4802_s3, %s2718_s9 }
 0x135   : > { %v4415_v53 = vadd.f32 %v3254_v54, %v1727_v43  ;;  %2284 = vmatprep.mubr.bf16.mxu1 %v3914_v39  ;;  %3609 = vmatprep.mubr.bf16.mxu0 %v3915_v40  ;;  %v1743_v40 = vadd.f32 %v4381_v56, %v4335_v48 }
 0x136   : > { %v3168_v55 = vpop.f32.mrf.mxu0  ;;  %v3256_v18 = vpop.f32.mrf.mxu1 }
 0x137   : > { %v4419_v57 = vadd.f32 %v3168_v55, %v3167_v49  ;;  %v3257_v58 = vadd.f32 %v3256_v18, %v3255_v52  ;;  %v1748_v55 = vadd.f32 %v4387_v1, %v4335_v48 }
 0x138   : > { %v3170_v63 = vpop.f32.mrf.mxu0  ;;  %v3258_v0 = vpop.f32.mrf.mxu1 }
 0x139   : > { %v4423_v5 = vadd.f32 %v3257_v58, %v1732_v6 }
 0x13a   : > { %v3171_v8 = vpop.f32.mrf.mxu0  ;;  %v3259_v11 = vpop.f32.mrf.mxu1 }
 0x13b   : > { %v4429_v15 = vadd.f32 %v3171_v8, %v3170_v63  ;;  %v3260_v14 = vadd.f32 %v3259_v11, %v3258_v0 }
 0x13c   : > { %v3173_v16 = vpop.f32.mrf.mxu0  ;;  %v3261_v17 = vpop.f32.mrf.mxu1  ;;  %2285 = vmatmul.mubr.bf16.gmra.mxu1 %v3912_v28  ;;  %3610 = vmatmul.mubr.bf16.gmra.mxu0 %v3916_v4  ;;  %v1751_v4 = vadd.f32 %v4397_v20, %v4335_v48 }
 0x13d   : > { %v4431_v34 = vadd.f32 %v3260_v14, %v1735_v60  ;;  %2292 = vmatprep.mubr.bf16.mxu1 %v3919_v50  ;;  %3613 = vmatprep.mubr.bf16.mxu0 %v3920_v7 }
 0x13e   : > { %v3174_v21 = vpop.f32.mrf.mxu0  ;;  %v3262_v23 = vpop.f32.mrf.mxu1 }
 0x13f   : > { %v4435_v26 = vadd.f32 %v3174_v21, %v3173_v16  ;;  %v3263_v30 = vadd.f32 %v3262_v23, %v3261_v17  ;;  %v1756_v16 = vadd.f32 %v4403_v27, %v4335_v48 }
 0x140   : > { %v3176_v44 = vpop.f32.mrf.mxu0  ;;  %v3264_v2 = vpop.f32.mrf.mxu1 }
 0x141   : > { %v4439_v36 = vadd.f32 %v3263_v30, %v1740_v25 }
 0x142   : > { %v3177_v37 = vpop.f32.mrf.mxu0  ;;  %v3265_v39 = vpop.f32.mrf.mxu1 }
 0x143   : > { %v4443_v41 = vadd.f32 %v3177_v37, %v3176_v44  ;;  %v3266_v42 = vadd.f32 %v3265_v39, %v3264_v2 }
 0x144   : > { %v3179_v43 = vpop.f32.mrf.mxu0  ;;  %v3267_v54 = vpop.f32.mrf.mxu1  ;;  %2293 = vmatmul.mubr.bf16.gmra.mxu1 %v3917_v31  ;;  %3614 = vmatmul.mubr.bf16.gmra.mxu0 %v3921_v32  ;;  %v1759_v31 = vadd.f32 %v4413_v47, %v4335_v48 }
 0x145   : > { %v4445_v38 = vadd.f32 %v3266_v42, %v1743_v40 }
 0x146   : > { %v3180_v49 = vpop.f32.mrf.mxu0  ;;  %v3268_v52 = vpop.f32.mrf.mxu1 }
 0x147   : > { %v4449_v18 = vadd.f32 %v3180_v49, %v3179_v43  ;;  %v3269_v6 = vadd.f32 %v3268_v52, %v3267_v54 }
 0x148   : > { %v3182_v58 = vpop.f32.mrf.mxu0  ;;  %v3270_v63 = vpop.f32.mrf.mxu1 }
 0x149   : > { %v4451_v56 = vadd.f32 %v3269_v6, %v1748_v55 }
 0x14a   : > { %v3183_v0 = vpop.f32.mrf.mxu0  ;;  %v3271_v28 = vpop.f32.mrf.mxu1 }
 0x14b   : > { %v4455_v50 = vadd.f32 %v3183_v0, %v3182_v58  ;;  %v3272_v7 = vadd.f32 %v3271_v28, %v3270_v63 }
 0x14c   : > { %v3273_v8 = vpop.f32.mrf.mxu1  ;;  %v3337_v11 = vpop.f32.mrf.mxu0 }
 0x14d   : > { %v4457_v60 = vadd.f32 %v3272_v7, %v1751_v4 }
 0x14e   : > { %v3274_v1 = vpop.f32.mrf.mxu1  ;;  %v3338_v14 = vpop.f32.mrf.mxu0 }
 0x14f   : > { %v3275_v17 = vadd.f32 %v3274_v1, %v3273_v8  ;;  %v3339_v21 = vadd.f32 %v3338_v14, %v3337_v11 }
 0x150   : > { %v3276_v23 = vpop.f32.mrf.mxu1  ;;  %v3340_v25 = vpop.f32.mrf.mxu0 }
 0x151   : > { %v4461_v30 = vadd.f32 %v3275_v17, %v1756_v16  ;;  %v4464_v20 = vadd.f32 %v3339_v21, %v4343_v62  ;;  %v1764_v62 = vadd.f32 %v4419_v57, %v4335_v48 }
 0x152   : > { %v3277_v44 = vpop.f32.mrf.mxu1  ;;  %v3341_v2 = vpop.f32.mrf.mxu0 }
 0x153   : > { %v3278_v32 = vadd.f32 %v3277_v44, %v3276_v23  ;;  %v3342_v37 = vadd.f32 %v3341_v2, %v3340_v25 }
 0x154   : > { %v3279_v39 = vpop.f32.mrf.mxu1  ;;  %v3343_v40 = vpop.f32.mrf.mxu0 }
 0x155   : > { %v4468_v42 = vadd.f32 %v3278_v32, %v1759_v31  ;;  %v4471_v27 = vadd.f32 %v3342_v37, %v4351_v9  ;;  %v1767_v9 = vadd.f32 %v4429_v15, %v4335_v48 }
 0x156   : > { %v3280_v43 = vpop.f32.mrf.mxu1  ;;  %v3344_v54 = vpop.f32.mrf.mxu0 }
 0x157   : > { %v3281_v49 = vadd.f32 %v3280_v43, %v3279_v39  ;;  %v3345_v52 = vadd.f32 %v3344_v54, %v3343_v40 }
 0x158   : > { %v3282_v55 = vpop.f32.mrf.mxu1  ;;  %v3346_v6 = vpop.f32.mrf.mxu0 }
 0x159   : > { %v4475_v58 = vadd.f32 %v3281_v49, %v1764_v62  ;;  %v4478_v47 = vadd.f32 %v3345_v52, %v4359_v22  ;;  %v1772_v22 = vadd.f32 %v4435_v26, %v4335_v48 }
 0x15a   : > { %v3283_v63 = vpop.f32.mrf.mxu1  ;;  %v3347_v0 = vpop.f32.mrf.mxu0 }
 0x15b   : > { %v3284_v28 = vadd.f32 %v3283_v63, %v3282_v55  ;;  %v3348_v4 = vadd.f32 %v3347_v0, %v3346_v6 }
 0x15c   : > { %v3285_v7 = vpop.f32.mrf.mxu1  ;;  %v3349_v8 = vpop.f32.mrf.mxu0 }
 0x15d   : > { %v4482_v11 = vadd.f32 %v3284_v28, %v1767_v9  ;;  %v4485_v57 = vadd.f32 %v3348_v4, %v4367_v33  ;;  %v1775_v33 = vadd.f32 %v4443_v41, %v4335_v48 }
 0x15e   : > { %v3286_v1 = vpop.f32.mrf.mxu1  ;;  %v3350_v14 = vpop.f32.mrf.mxu0 }
 0x15f   : > { %v3287_v16 = vadd.f32 %v3286_v1, %v3285_v7  ;;  %v3351_v17 = vadd.f32 %v3350_v14, %v3349_v8 }
 0x160   : > { %v3288_v21 = vpop.f32.mrf.mxu1  ;;  %v3352_v23 = vpop.f32.mrf.mxu0 }
 0x161   : > { %v4489_v25 = vadd.f32 %v3287_v16, %v1772_v22  ;;  %v4492_v15 = vadd.f32 %v3351_v17, %v4375_v46  ;;  %v1780_v46 = vadd.f32 %v4449_v18, %v4335_v48 }
 0x162   : > { %v3289_v44 = vpop.f32.mrf.mxu1  ;;  %v3353_v2 = vpop.f32.mrf.mxu0 }
 0x163   : > { %v3290_v31 = vadd.f32 %v3289_v44, %v3288_v21  ;;  %v3354_v32 = vadd.f32 %v3353_v2, %v3352_v23 }
 0x164   : > { %v3291_v37 = vpop.f32.mrf.mxu1  ;;  %v3355_v39 = vpop.f32.mrf.mxu0 }
 0x165   : > { %v4496_v40 = vadd.f32 %v3290_v31, %v1775_v33  ;;  %v4499_v26 = vadd.f32 %v3354_v32, %v4383_v59  ;;  %v1783_v59 = vadd.f32 %v4455_v50, %v4335_v48 }
 0x166   : > { %v3292_v43 = vpop.f32.mrf.mxu1  ;;  %v3356_v54 = vpop.f32.mrf.mxu0 }
 0x167   : > { %v3293_v62 = vadd.f32 %v3292_v43, %v3291_v37  ;;  %v3357_v49 = vadd.f32 %v3356_v54, %v3355_v39 }
 0x168   : > { %v3294_v52 = vpop.f32.mrf.mxu1  ;;  %v3358_v55 = vpop.f32.mrf.mxu0 }
 0x169   : > { %v4503_v6 = vadd.f32 %v3293_v62, %v1780_v46  ;;  %v4506_v41 = vadd.f32 %v3357_v49, %v4391_v10  ;;  %v1788_v10 = vadd.f32 %v4286_v51, %v4335_v48 }
 0x16a   : > { %v3295_v63 = vpop.f32.mrf.mxu1  ;;  %v3359_v0 = vpop.f32.mrf.mxu0 }
 0x16b   : > { %v3296_v9 = vadd.f32 %v3295_v63, %v3294_v52  ;;  %v3360_v28 = vadd.f32 %v3359_v0, %v3358_v55 }
 0x16c   : > { %v3297_v4 = vpop.f32.mrf.mxu1  ;;  %v3361_v7 = vpop.f32.mrf.mxu0 }
 0x16d   : > { %v4510_v8 = vadd.f32 %v3296_v9, %v1783_v59  ;;  %v4513_v18 = vadd.f32 %v3360_v28, %v4399_v24  ;;  %v1791_v24 = vadd.f32 %v4294_v61, %v4335_v48 }
 0x16e   : > { %v3298_v1 = vpop.f32.mrf.mxu1  ;;  %v3362_v14 = vpop.f32.mrf.mxu0 }
 0x16f   : > { %v3299_v22 = vadd.f32 %v3298_v1, %v3297_v4  ;;  %v3363_v16 = vadd.f32 %v3362_v14, %v3361_v7 }
 0x170   : > { %v3300_v17 = vpop.f32.mrf.mxu1  ;;  %v3364_v21 = vpop.f32.mrf.mxu0 }
 0x171   : > { %v4517_v23 = vadd.f32 %v3299_v22, %v1788_v10  ;;  %v4520_v50 = vadd.f32 %v3363_v16, %v4407_v12  ;;  %v1796_v12 = vadd.f32 %v4298_v3, %v4335_v48 }
 0x172   : > { %v3301_v44 = vpop.f32.mrf.mxu1  ;;  %v3365_v2 = vpop.f32.mrf.mxu0 }
 0x173   : > { %v3302_v33 = vadd.f32 %v3301_v44, %v3300_v17  ;;  %v3366_v31 = vadd.f32 %v3365_v2, %v3364_v21 }
 0x174   : > { %v3303_v32 = vpop.f32.mrf.mxu1  ;;  %v3367_v37 = vpop.f32.mrf.mxu0 }
 0x175   : > { %v4524_v39 = vadd.f32 %v3302_v33, %v1791_v24  ;;  %v4527_v51 = vadd.f32 %v3366_v31, %v4415_v53  ;;  %v1799_v53 = vadd.f32 %v4306_v13, %v4335_v48 }
 0x176   : > { %v3304_v43 = vpop.f32.mrf.mxu1  ;;  %v3368_v54 = vpop.f32.mrf.mxu0 }
 0x177   : > { %v3305_v46 = vadd.f32 %v3304_v43, %v3303_v32  ;;  %v3369_v62 = vadd.f32 %v3368_v54, %v3367_v37 }
 0x178   : > { %v3306_v49 = vpop.f32.mrf.mxu1  ;;  %v3370_v52 = vpop.f32.mrf.mxu0 }
 0x179   : > { %v4531_v55 = vadd.f32 %v3305_v46, %v1796_v12  ;;  %v4534_v61 = vadd.f32 %v3369_v62, %v4423_v5  ;;  %v1804_v5 = vadd.f32 %v4310_v19, %v4335_v48 }
 0x17a   : > { %v3307_v63 = vpop.f32.mrf.mxu1  ;;  %v3371_v0 = vpop.f32.mrf.mxu0 }
 0x17b   : > { %v3308_v59 = vadd.f32 %v3307_v63, %v3306_v49  ;;  %v3372_v9 = vadd.f32 %v3371_v0, %v3370_v52 }
 0x17c   : > { %v3309_v28 = vpop.f32.mrf.mxu1  ;;  %v3373_v4 = vpop.f32.mrf.mxu0 }
 0x17d   : > { %v4538_v7 = vadd.f32 %v3308_v59, %v1799_v53  ;;  %v4541_v3 = vadd.f32 %v3372_v9, %v4431_v34  ;;  %v1807_v34 = vadd.f32 %v4318_v29, %v4335_v48 }
 0x17e   : > { %v3310_v1 = vpop.f32.mrf.mxu1  ;;  %v3374_v14 = vpop.f32.mrf.mxu0 }
 0x17f   : > { %v3311_v10 = vadd.f32 %v3310_v1, %v3309_v28  ;;  %v3375_v22 = vadd.f32 %v3374_v14, %v3373_v4 }
 0x180   : > { %v3312_v16 = vpop.f32.mrf.mxu1  ;;  %v3376_v17 = vpop.f32.mrf.mxu0 }
 0x181   : > { %v4545_v21 = vadd.f32 %v3311_v10, %v1804_v5  ;;  %v4548_v13 = vadd.f32 %v3375_v22, %v4439_v36  ;;  %v1812_v36 = vadd.f32 %v4322_v35, %v4335_v48 }
 0x182   : > { %v3313_v44 = vpop.f32.mrf.mxu1  ;;  %v3377_v2 = vpop.f32.mrf.mxu0 }
 0x183   : > { %v3314_v24 = vadd.f32 %v3313_v44, %v3312_v16  ;;  %v3378_v33 = vadd.f32 %v3377_v2, %v3376_v17 }
 0x184   : > { %v3315_v31 = vpop.f32.mrf.mxu1  ;;  %v3379_v32 = vpop.f32.mrf.mxu0 }
 0x185   : > { %v4552_v37 = vadd.f32 %v3314_v24, %v1807_v34  ;;  %v4555_v19 = vadd.f32 %v3378_v33, %v4445_v38  ;;  %v1815_v38 = vadd.f32 %v4330_v45, %v4335_v48 }
 0x186   : > { %v3316_v43 = vpop.f32.mrf.mxu1  ;;  %v3380_v54 = vpop.f32.mrf.mxu0 }
 0x187   : > { %v3317_v12 = vadd.f32 %v3316_v43, %v3315_v31  ;;  %v3381_v46 = vadd.f32 %v3380_v54, %v3379_v32 }
 0x188   : > { %v3318_v62 = vpop.f32.mrf.mxu1  ;;  %v3382_v49 = vpop.f32.mrf.mxu0 }
 0x189   : > { %v4559_v52 = vadd.f32 %v3317_v12, %v1812_v36  ;;  %v4562_v29 = vadd.f32 %v3381_v46, %v4451_v56 }
 0x18a   : > { %v3319_v63 = vpop.f32.mrf.mxu1  ;;  %v3383_v0 = vpop.f32.mrf.mxu0 }
 0x18b   : > { %v3320_v53 = vadd.f32 %v3319_v63, %v3318_v62  ;;  %v3384_v59 = vadd.f32 %v3383_v0, %v3382_v49 }
 0x18c   : > { %v3385_v9 = vpop.f32.mrf.mxu0  ;;  %v3449_v28 = vpop.f32.mrf.mxu1 }
 0x18d   : > { %v4566_v4 = vadd.f32 %v3320_v53, %v1815_v38  ;;  %v4569_v35 = vadd.f32 %v3384_v59, %v4457_v60 }
 0x18e   : > { %v3386_v1 = vpop.f32.mrf.mxu0  ;;  %v3450_v14 = vpop.f32.mrf.mxu1 }
 0x18f   : > { %v3387_v5 = vadd.f32 %v3386_v1, %v3385_v9  ;;  %v3451_v10 = vadd.f32 %v3450_v14, %v3449_v28 }
 0x190   : > { %v3388_v56 = vpop.f32.mrf.mxu0  ;;  %v4571_v22 = vpop.f32.mrf.mxu1 }
 0x191   : > { %v4574_v16 = vadd.f32 %v3387_v5, %v4461_v30  ;;  %v4577_v45 = vadd.f32 %v3451_v10, %v4464_v20 }
 0x192   : > { %v3389_v48 = vpop.f32.mrf.mxu0  ;;  %v4579_v17 = vpop.f32.mrf.mxu1 }
 0x193   : > { %v3390_v44 = vadd.f32 %v3389_v48, %v3388_v56 }
 0x194   : > { %v3391_v2 = vpop.f32.mrf.mxu0  ;;  %v4581_v60 = vpop.f32.mrf.mxu1 }
 0x195   : > { %v4584_v34 = vadd.f32 %v3390_v44, %v4468_v42 }
 0x196   : > { %v3392_v24 = vpop.f32.mrf.mxu0  ;;  %v4586_v33 = vpop.f32.mrf.mxu1 }
 0x197   : > { %v3393_v31 = vadd.f32 %v3392_v24, %v3391_v2 }
 0x198   : > { %v3394_v32 = vpop.f32.mrf.mxu0  ;;  %v4588_v30 = vpop.f32.mrf.mxu1 }
 0x199   : > { %v4591_v20 = vadd.f32 %v3393_v31, %v4475_v58 }
 0x19a   : > { %v3395_v43 = vpop.f32.mrf.mxu0  ;;  %v4593_v54 = vpop.f32.mrf.mxu1 }
 0x19b   : > { %v3396_v36 = vadd.f32 %v3395_v43, %v3394_v32 }
 0x19c   : > { %v3397_v12 = vpop.f32.mrf.mxu0  ;;  %v4595_v46 = vpop.f32.mrf.mxu1 }
 0x19d   : > { %v4598_v42 = vadd.f32 %v3396_v36, %v4482_v11 }
 0x19e   : > { %v3398_v62 = vpop.f32.mrf.mxu0  ;;  %v4600_v49 = vpop.f32.mrf.mxu1 }
 0x19f   : > { %v3399_v63 = vadd.f32 %v3398_v62, %v3397_v12 }
 0x1a0   : > { %v3400_v0 = vpop.f32.mrf.mxu0  ;;  %v4602_v38 = vpop.f32.mrf.mxu1 }
 0x1a1   : > { %v4605_v58 = vadd.f32 %v3399_v63, %v4489_v25 }
 0x1a2   : > { %v3401_v53 = vpop.f32.mrf.mxu0  ;;  %v4607_v59 = vpop.f32.mrf.mxu1 }
 0x1a3   : > { %4803 = vst [vmem:[#allocation2_spill] sm:$0xff] %v4605_v58  ;;  %v3402_v9 = vadd.f32 %v3401_v53, %v3400_v0 }
 0x1a4   : > { %v3403_v28 = vpop.f32.mrf.mxu0  ;;  %v4609_v1 = vpop.f32.mrf.mxu1 }
 0x1a5   : > { %v4612_v11 = vadd.f32 %v3402_v9, %v4496_v40 }
 0x1a6   : > { %v3404_v14 = vpop.f32.mrf.mxu0  ;;  %v4614_v5 = vpop.f32.mrf.mxu1 }
 0x1a7   : > { %4804 = vst [vmem:[#allocation3_spill] sm:$0xff] %v4612_v11  ;;  %v3405_v10 = vadd.f32 %v3404_v14, %v3403_v28 }
 0x1a8   : > { %v3406_v56 = vpop.f32.mrf.mxu0  ;;  %v4616_v48 = vpop.f32.mrf.mxu1 }
 0x1a9   : > { %v4619_v25 = vadd.f32 %v3405_v10, %v4503_v6 }
 0x1aa   : > { %v3407_v44 = vpop.f32.mrf.mxu0  ;;  %v4621_v2 = vpop.f32.mrf.mxu1 }
 0x1ab   : > { %4805 = vst [vmem:[#allocation4_spill] sm:$0xff] %v4619_v25  ;;  %v3408_v24 = vadd.f32 %v3407_v44, %v3406_v56 }
 0x1ac   : > { %v3409_v31 = vpop.f32.mrf.mxu0  ;;  %v4623_v32 = vpop.f32.mrf.mxu1 }
 0x1ad   : > { %v4626_v40 = vadd.f32 %v3408_v24, %v4510_v8 }
 0x1ae   : > { %v3410_v43 = vpop.f32.mrf.mxu0  ;;  %v4628_v36 = vpop.f32.mrf.mxu1 }
 0x1af   : > { %4806 = vst [vmem:[#allocation5_spill] sm:$0xff] %v4626_v40  ;;  %v3411_v12 = vadd.f32 %v3410_v43, %v3409_v31 }
 0x1b0   : > { %v3412_v62 = vpop.f32.mrf.mxu0  ;;  %v4630_v63 = vpop.f32.mrf.mxu1 }
 0x1b1   : > { %v4633_v6 = vadd.f32 %v3411_v12, %v4517_v23 }
 0x1b2   : > { %v3413_v0 = vpop.f32.mrf.mxu0  ;;  %v4635_v53 = vpop.f32.mrf.mxu1 }
 0x1b3   : > { %4807 = vst [vmem:[#allocation6_spill] sm:$0xff] %v4633_v6  ;;  %v3414_v9 = vadd.f32 %v3413_v0, %v3412_v62 }
 0x1b4   : > { %v3415_v28 = vpop.f32.mrf.mxu0  ;;  %v4637_v14 = vpop.f32.mrf.mxu1 }
 0x1b5   : > { %v4640_v8 = vadd.f32 %v3414_v9, %v4524_v39 }
 0x1b6   : > { %v3416_v10 = vpop.f32.mrf.mxu0  ;;  %v4642_v56 = vpop.f32.mrf.mxu1 }
 0x1b7   : > { %4808 = vst [vmem:[#allocation7_spill] sm:$0xff] %v4640_v8  ;;  %v3417_v44 = vadd.f32 %v3416_v10, %v3415_v28 }
 0x1b8   : > { %v3418_v24 = vpop.f32.mrf.mxu0  ;;  %v4644_v31 = vpop.f32.mrf.mxu1 }
 0x1b9   : > { %v4647_v23 = vadd.f32 %v3417_v44, %v4531_v55 }
 0x1ba   : > { %v3419_v43 = vpop.f32.mrf.mxu0  ;;  %v4649_v12 = vpop.f32.mrf.mxu1 }
 0x1bb   : > { %4809 = vst [vmem:[#allocation8_spill] sm:$0xff] %v4647_v23  ;;  %v3420_v62 = vadd.f32 %v3419_v43, %v3418_v24 }
 0x1bc   : > { %v3421_v0 = vpop.f32.mrf.mxu0  ;;  %v4651_v6 = vpop.f32.mrf.mxu1 }
 0x1bd   : > { %v4654_v39 = vadd.f32 %v3420_v62, %v4538_v7 }
 0x1be   : > { %v3422_v9 = vpop.f32.mrf.mxu0  ;;  %v4656_v8 = vpop.f32.mrf.mxu1 }
 0x1bf   : > { %4810 = vst [vmem:[#allocation9_spill] sm:$0xff] %v4654_v39  ;;  %v3423_v28 = vadd.f32 %v3422_v9, %v3421_v0 }
 0x1c0   : > { %v3424_v10 = vpop.f32.mrf.mxu0  ;;  %v4658_v11 = vpop.f32.mrf.mxu1 }
 0x1c1   : > { %v4661_v55 = vadd.f32 %v3423_v28, %v4545_v21  ;;  %v3457_v21 = vadd.f32 %v4586_v33, %v4581_v60 }
 0x1c2   : > { %v3425_v44 = vpop.f32.mrf.mxu0  ;;  %v4663_v23 = vpop.f32.mrf.mxu1 }
 0x1c3   : > { %4811 = vst [vmem:[#allocation10_spill] sm:$0xff] %v4661_v55  ;;  %v3426_v24 = vadd.f32 %v3425_v44, %v3424_v10 }
 0x1c4   : > { %v3427_v43 = vpop.f32.mrf.mxu0  ;;  %v4665_v40 = vpop.f32.mrf.mxu1 }
 0x1c5   : > { %v4668_v7 = vadd.f32 %v3426_v24, %v4552_v37  ;;  %v3460_v37 = vadd.f32 %v4593_v54, %v4588_v30  ;;  %v3469_v54 = vadd.f32 %v4614_v5, %v4609_v1  ;;  %v3466_v1 = vadd.f32 %v4607_v59, %v4602_v38 }
 0x1c6   : > { %v3428_v62 = vpop.f32.mrf.mxu0  ;;  %v4670_v39 = vpop.f32.mrf.mxu1 }
 0x1c7   : > { %4812 = vst [vmem:[#allocation11_spill] sm:$0xff] %v4668_v7  ;;  %v3429_v0 = vadd.f32 %v3428_v62, %v3427_v43  ;;  %v3454_v62 = vadd.f32 %v4579_v17, %v4571_v22 }
 0x1c8   : > { %v3430_v9 = vpop.f32.mrf.mxu0  ;;  %v4672_v58 = vpop.f32.mrf.mxu1 }
 0x1c9   : > { %v4677_v28 = vadd.f32 %v3429_v0, %v4559_v52  ;;  %v2183_v52 = vadd.f32 %v3457_v21, %v4478_v47  ;;  %v3463_v47 = vadd.f32 %v4600_v49, %v4595_v46 }
 0x1ca   : > { %v3431_v10 = vpop.f32.mrf.mxu0  ;;  %v4679_v44 = vpop.f32.mrf.mxu1 }
 0x1cb   : > { %4813 = vst [vmem:[#allocation12_spill] sm:$0xff] %v4677_v28  ;;  %v3432_v24 = vadd.f32 %v3431_v10, %v3430_v9  ;;  %v2186_v28 = vadd.f32 %v3460_v37, %v4485_v57  ;;  %v3472_v57 = vadd.f32 %v4621_v2, %v4616_v48  ;;  %v2199_v48 = vadd.f32 %v3469_v54, %v4506_v41 }
 0x1cc   : > { %v4683_v7 = vpop.f32.mrf.mxu1  ;;  %v3587_v43 = vpop.f32.mrf.mxu0  ;;  %v2194_v41 = vadd.f32 %v3466_v1, %v4499_v26  ;;  %v3475_v54 = vadd.f32 %v4628_v36, %v4623_v32 }
 0x1cd   : > { %v4688_v55 = vadd.f32 %v3432_v24, %v4566_v4  ;;  %v2344_v0 = vadd.f32 %v3587_v43, %v2183_v52  ;;  %v2178_v4 = vadd.f32 %v3454_v62, %v4471_v27  ;;  %v2191_v43 = vadd.f32 %v3463_v47, %v4492_v15 }
 0x1ce   : > { %v4691_v60 = vpop.f32.mrf.mxu1  ;;  %v2335_v33 = vpop.f32.mrf.mxu0  ;;  %v2202_v62 = vadd.f32 %v3472_v57, %v4513_v18  ;;  %v3484_v15 = vadd.f32 %v4649_v12, %v4644_v31  ;;  %v2207_v1 = vadd.f32 %v3475_v54, %v4520_v50  ;;  %v3496_v50 = vadd.f32 %v4679_v44, %v4672_v58 }
 0x1cf   : > { %v2336_v9 = vadd.f32 %v2335_v33, %v4577_v45  ;;  %v2464_v10 = vmax.f32 %v2344_v0, 0.0  ;;  %v3481_v0 = vadd.f32 %v4642_v56, %v4637_v14  ;;  %v3478_v14 = vadd.f32 %v4635_v53, %v4630_v63 }
 0x1d0   : > { %v4694_v25 = vpop.f32.mrf.mxu1  ;;  %v3588_v30 = vpop.f32.mrf.mxu0  ;;  %v2234_v44 = vadd.f32 %v3496_v50, %v4569_v35 }
 0x1d1   : > { %v2347_v22 = vadd.f32 %v3588_v30, %v2186_v28  ;;  %v2462_v46 = vmax.f32 %v2336_v9, 0.0  ;;  %v2215_v32 = vadd.f32 %v3481_v0, %v4534_v61  ;;  %v2210_v61 = vadd.f32 %v3478_v14, %v4527_v51 }
 0x1d2   : > { %v4703_v17 = vpop.f32.mrf.mxu1  ;;  %v2338_v21 = vpop.f32.mrf.mxu0 }
 0x1d3   : > { %v2465_v37 = vmax.f32 %v2347_v22, 0.0  ;;  %v2339_v24 = vadd.f32 %v2338_v21, %v2178_v4 }
 0x1d4   : > { %v4714_v27 = vpop.f32.mrf.mxu1  ;;  %v3591_v45 = vpop.f32.mrf.mxu0 }
 0x1d5   : > { %v3010_v49 = vpack.c.bf16 %v2465_v37, %v2464_v10  ;;  %v2463_v5 = vmax.f32 %v2339_v24, 0.0  ;;  %v2360_v59 = vadd.f32 %v3591_v45, %v2199_v48  ;;  %v2218_v45 = vadd.f32 %v3484_v15, %v4541_v3 }
 0x1d6   : > { %v4717_v2 = vpop.f32.mrf.mxu1  ;;  %v2351_v28 = vpop.f32.mrf.mxu0  ;;  %v3487_v48 = vadd.f32 %v4656_v8, %v4651_v6 }
 0x1d7   : > { %3082 = vst [vmem:[%s4712_s21 + $0x8] sm:$0xff] %v3010_v49   ;;  %v3005_v38 = vpack.c.bf16 %v2463_v5, %v2462_v46  ;;  %v2352_v30 = vadd.f32 %v2351_v28, %v2191_v43  ;;  %v2468_v18 = vmax.f32 %v2360_v59, 0.0  ;;  %v3493_v46 = vadd.f32 %v4670_v39, %v4665_v40 }
 0x1d8   : > { %v4722_v52 = vpop.f32.mrf.mxu1  ;;  %v3592_v33 = vpop.f32.mrf.mxu0  ;;  %v3490_v40 = vadd.f32 %v4663_v23, %v4658_v11  ;;  %v2223_v58 = vadd.f32 %v3487_v48, %v4548_v13  ;;  %v3505_v11 = vadd.f32 %v4717_v2, %v4714_v27 }
 0x1d9   : > { %3006 = vst [vmem:[%s4712_s21] sm:$0xff] %v3005_v38   ;;  %v2363_v9 = vadd.f32 %v3592_v33, %v2202_v62  ;;  %v2466_v26 = vmax.f32 %v2352_v30, 0.0  ;;  %v2231_v6 = vadd.f32 %v3493_v46, %v4562_v29  ;;  %v3499_v29 = vadd.f32 %v4691_v60, %v4683_v7 }
 0x1da   : > { %v3507_v22 = vpop.f32.mrf.mxu1  ;;  %v2354_v4 = vpop.f32.mrf.mxu0 }
 0x1db   : > { %v2469_v47 = vmax.f32 %v2363_v9, 0.0  ;;  %v2355_v21 = vadd.f32 %v2354_v4, %v2194_v41  ;;  %v3508_v13 = vadd.f32 %v3507_v22, %v4722_v52  ;;  %v2239_v52 = vadd.f32 %v3499_v29, %v4574_v16 }
 0x1dc   : > { %v4734_v56 = vpop.f32.mrf.mxu1  ;;  %v3595_v57 = vpop.f32.mrf.mxu0 }
 0x1dd   : > { %v3020_v10 = vpack.c.bf16 %v2469_v47, %v2468_v18  ;;  %v2467_v37 = vmax.f32 %v2355_v21, 0.0  ;;  %v2376_v12 = vadd.f32 %v3595_v57, %v2215_v32  ;;  %v2226_v18 = vadd.f32 %v3490_v40, %v4555_v19  ;;  %v4814_v40 = vld [vmem:[#allocation4_spill] sm:$0xff] }
 0x1de   : > { %v4737_v36 = vpop.f32.mrf.mxu1  ;;  %v2367_v24 = vpop.f32.mrf.mxu0  ;;  %v2247_v32 = vadd.f32 %v3505_v11, %v4591_v20  ;;  %v2250_v22 = vadd.f32 %v3508_v13, %v4598_v42 }
 0x1df   : > { %3084 = vst [vmem:[%s4712_s21 + $0x18] sm:$0xff] %v3020_v10   ;;  %v3015_v31 = vpack.c.bf16 %v2467_v37, %v2466_v26  ;;  %v2368_v49 = vadd.f32 %v2367_v24, %v2207_v1  ;;  %v2472_v3 = vmax.f32 %v2376_v12, 0.0  ;;  %v3502_v26 = vadd.f32 %v4703_v17, %v4694_v25 }
 0x1e0   : > { %v4742_v63 = vpop.f32.mrf.mxu1  ;;  %v3596_v53 = vpop.f32.mrf.mxu0  ;;  %v3511_v20 = vadd.f32 %v4737_v36, %v4734_v56 }
 0x1e1   : > { %3083 = vst [vmem:[%s4712_s21 + $0x10] sm:$0xff] %v3015_v31   ;;  %v2379_v5 = vadd.f32 %v3596_v53, %v2218_v45  ;;  %v2470_v33 = vmax.f32 %v2368_v49, 0.0  ;;  %v2242_v53 = vadd.f32 %v3502_v26, %v4584_v34 }
 0x1e2   : > { %v3513_v28 = vpop.f32.mrf.mxu1  ;;  %v2370_v38 = vpop.f32.mrf.mxu0 }
 0x1e3   : > { %v2473_v59 = vmax.f32 %v2379_v5, 0.0  ;;  %v2371_v43 = vadd.f32 %v2370_v38, %v2210_v61  ;;  %v3514_v42 = vadd.f32 %v3513_v28, %v4742_v63 }
 0x1e4   : > { %v3515_v39 = vpop.f32.mrf.mxu1  ;;  %v3599_v62 = vpop.f32.mrf.mxu0 }
 0x1e5   : > { %v3030_v51 = vpack.c.bf16 %v2473_v59, %v2472_v3  ;;  %v2471_v0 = vmax.f32 %v2371_v43, 0.0  ;;  %v2392_v41 = vadd.f32 %v3599_v62, %v2231_v6 }
 0x1e6   : > { %v3516_v8 = vpop.f32.mrf.mxu1  ;;  %v2383_v30 = vpop.f32.mrf.mxu0 }
 0x1e7   : > { %3086 = vst [vmem:[%s4712_s21 + $0x28] sm:$0xff] %v3030_v51   ;;  %v3025_v9 = vpack.c.bf16 %v2471_v0, %v2470_v33  ;;  %v2384_v23 = vadd.f32 %v2383_v30, %v2223_v58  ;;  %v2476_v14 = vmax.f32 %v2392_v41, 0.0  ;;  %v3517_v25 = vadd.f32 %v3516_v8, %v3515_v39  ;;  %v4815_v33 = vld [vmem:[#allocation2_spill] sm:$0xff]  ;;  %v4816_v0 = vld [vmem:[#allocation5_spill] sm:$0xff]  ;;  %v4817_v41 = vld [vmem:[#allocation3_spill] sm:$0xff] }
 0x1e8   : > { %v3518_v54 = vpop.f32.mrf.mxu1  ;;  %v3600_v4 = vpop.f32.mrf.mxu0  ;;  %v2255_v51 = vadd.f32 %v3511_v20, %v4815_v33  ;;  %v2258_v58 = vadd.f32 %v3514_v42, %v4817_v41  ;;  %v4824_v33 = vld [vmem:[#allocation11_spill] sm:$0xff] }
 0x1e9   : > { %3085 = vst [vmem:[%s4712_s21 + $0x20] sm:$0xff] %v3025_v9   ;;  %v2395_v15 = vadd.f32 %v3600_v4, %v2234_v44  ;;  %v2474_v10 = vmax.f32 %v2384_v23, 0.0  ;;  %v2263_v34 = vadd.f32 %v3517_v25, %v4814_v40 }
 0x1ea   : > { %v3519_v47 = vpop.f32.mrf.mxu1  ;;  %v2386_v21 = vpop.f32.mrf.mxu0 }
 0x1eb   : > { %v2477_v35 = vmax.f32 %v2395_v15, 0.0  ;;  %v2387_v57 = vadd.f32 %v2386_v21, %v2226_v18  ;;  %v3520_v5 = vadd.f32 %v3519_v47, %v3518_v54 }
 0x1ec   : > { %v3521_v27 = vpop.f32.mrf.mxu1  ;;  %v3603_v2 = vpop.f32.mrf.mxu0 }
 0x1ed   : > { %v3040_v37 = vpack.c.bf16 %v2477_v35, %v2476_v14  ;;  %v2475_v19 = vmax.f32 %v2387_v57, 0.0  ;;  %v2408_v31 = vadd.f32 %v3603_v2, %v2247_v32  ;;  %v2266_v6 = vadd.f32 %v3520_v5, %v4816_v0  ;;  %v4818_v57 = vld [vmem:[#allocation8_spill] sm:$0xff] }
 0x1ee   : > { %v3522_v7 = vpop.f32.mrf.mxu1  ;;  %v2399_v60 = vpop.f32.mrf.mxu0 }
 0x1ef   : > { %3088 = vst [vmem:[%s4712_s21 + $0x38] sm:$0xff] %v3040_v37   ;;  %v3035_v24 = vpack.c.bf16 %v2475_v19, %v2474_v10  ;;  %v2400_v17 = vadd.f32 %v2399_v60, %v2239_v52  ;;  %v2480_v61 = vmax.f32 %v2408_v31, 0.0  ;;  %v3523_v44 = vadd.f32 %v3522_v7, %v3521_v27  ;;  %v4819_v19 = vld [vmem:[#allocation6_spill] sm:$0xff]  ;;  %v4820_v7 = vld [vmem:[#allocation9_spill] sm:$0xff] }
 0x1f0   : > { %v3524_v12 = vpop.f32.mrf.mxu1  ;;  %v3604_v1 = vpop.f32.mrf.mxu0 }
 0x1f1   : > { %3087 = vst [vmem:[%s4712_s21 + $0x30] sm:$0xff] %v3035_v24   ;;  %v2411_v45 = vadd.f32 %v3604_v1, %v2250_v22  ;;  %v2478_v3 = vmax.f32 %v2400_v17, 0.0  ;;  %v2271_v32 = vadd.f32 %v3523_v44, %v4819_v19 }
 0x1f2   : > { %v3525_v46 = vpop.f32.mrf.mxu1  ;;  %v2402_v49 = vpop.f32.mrf.mxu0 }
 0x1f3   : > { %v2481_v48 = vmax.f32 %v2411_v45, 0.0  ;;  %v2403_v16 = vadd.f32 %v2402_v49, %v2242_v53  ;;  %v3526_v29 = vadd.f32 %v3525_v46, %v3524_v12  ;;  %v4821_v12 = vld [vmem:[#allocation7_spill] sm:$0xff] }
 0x1f4   : > { %v3527_v38 = vpop.f32.mrf.mxu1  ;;  %v3607_v50 = vpop.f32.mrf.mxu0 }
 0x1f5   : > { %v3050_v59 = vpack.c.bf16 %v2481_v48, %v2480_v61  ;;  %v2479_v43 = vmax.f32 %v2403_v16, 0.0  ;;  %v2424_v36 = vadd.f32 %v3607_v50, %v2263_v34  ;;  %v2274_v1 = vadd.f32 %v3526_v29, %v4821_v12 }
 0x1f6   : > { %v3528_v39 = vpop.f32.mrf.mxu1  ;;  %v2415_v62 = vpop.f32.mrf.mxu0 }
 0x1f7   : > { %3090 = vst [vmem:[%s4712_s21 + $0x48] sm:$0xff] %v3050_v59   ;;  %v3045_v56 = vpack.c.bf16 %v2479_v43, %v2478_v3  ;;  %v3529_v63 = vadd.f32 %v3528_v39, %v3527_v38  ;;  %v2416_v28 = vadd.f32 %v2415_v62, %v2255_v51  ;;  %v2484_v11 = vmax.f32 %v2424_v36, 0.0  ;;  %v4822_v43 = vld [vmem:[#allocation10_spill] sm:$0xff]  ;;  %v4823_v62 = vld [vmem:[#allocation12_spill] sm:$0xff] }
 0x1f8   : > { %v3530_v8 = vpop.f32.mrf.mxu1  ;;  %v3608_v30 = vpop.f32.mrf.mxu0 }
 0x1f9   : > { %3089 = vst [vmem:[%s4712_s21 + $0x40] sm:$0xff] %v3045_v56   ;;  %v2427_v9 = vadd.f32 %v3608_v30, %v2266_v6  ;;  %v2482_v13 = vmax.f32 %v2416_v28, 0.0  ;;  %v2279_v26 = vadd.f32 %v3529_v63, %v4818_v57 }
 0x1fa   : > { %v3531_v54 = vpop.f32.mrf.mxu1  ;;  %v2418_v4 = vpop.f32.mrf.mxu0 }
 0x1fb   : > { %v2485_v23 = vmax.f32 %v2427_v9, 0.0  ;;  %v3532_v15 = vadd.f32 %v3531_v54, %v3530_v8  ;;  %v2419_v18 = vadd.f32 %v2418_v4, %v2258_v58 }
 0x1fc   : > { %v3533_v47 = vpop.f32.mrf.mxu1  ;;  %v3611_v21 = vpop.f32.mrf.mxu0 }
 0x1fd   : > { %v3060_v14 = vpack.c.bf16 %v2485_v23, %v2484_v11  ;;  %v2483_v35 = vmax.f32 %v2419_v18, 0.0  ;;  %v2440_v37 = vadd.f32 %v3611_v21, %v2279_v26  ;;  %v2282_v60 = vadd.f32 %v3532_v15, %v4820_v7 }
 0x1fe   : > { %v3534_v2 = vpop.f32.mrf.mxu1  ;;  %v2431_v10 = vpop.f32.mrf.mxu0 }
 0x1ff   : > { %3092 = vst [vmem:[%s4712_s21 + $0x58] sm:$0xff] %v3060_v14   ;;  %v3055_v27 = vpack.c.bf16 %v2483_v35, %v2482_v13  ;;  %v2432_v52 = vadd.f32 %v2431_v10, %v2271_v32  ;;  %v2488_v45 = vmax.f32 %v2440_v37, 0.0  ;;  %v3535_v53 = vadd.f32 %v3534_v2, %v3533_v47 }
 0x200   : > { %v3536_v24 = vpop.f32.mrf.mxu1  ;;  %v3612_v31 = vpop.f32.mrf.mxu0 }
 0x201   : > { %3091 = vst [vmem:[%s4712_s21 + $0x50] sm:$0xff] %v3055_v27   ;;  %v2443_v22 = vadd.f32 %v3612_v31, %v2282_v60  ;;  %v2486_v61 = vmax.f32 %v2432_v52, 0.0  ;;  %v2287_v40 = vadd.f32 %v3535_v53, %v4822_v43 }
 0x202   : > { %v3537_v25 = vpop.f32.mrf.mxu1  ;;  %v2434_v17 = vpop.f32.mrf.mxu0 }
 0x203   : > { %v2489_v20 = vmax.f32 %v2443_v22, 0.0  ;;  %v2435_v46 = vadd.f32 %v2434_v17, %v2274_v1  ;;  %v3538_v16 = vadd.f32 %v3537_v25, %v3536_v24 }
 0x204   : > { %v3539_v49 = vpop.f32.mrf.mxu1  ;;  %v3615_v5 = vpop.f32.mrf.mxu0 }
 0x205   : > { %v3070_v48 = vpack.c.bf16 %v2489_v20, %v2488_v45  ;;  %v2487_v42 = vmax.f32 %v2435_v46, 0.0  ;;  %v2290_v51 = vadd.f32 %v3538_v16, %v4824_v33 }
 0x206   : > { %v3540_v38 = vpop.f32.mrf.mxu1  ;;  %v2447_v50 = vpop.f32.mrf.mxu0 }
 0x207   : > { %3094 = vst [vmem:[%s4712_s21 + $0x68] sm:$0xff] %v3070_v48   ;;  %v3065_v3 = vpack.c.bf16 %v2487_v42, %v2486_v61  ;;  %v3541_v59 = vadd.f32 %v3540_v38, %v3539_v49  ;;  %v2448_v36 = vadd.f32 %v2447_v50, %v2287_v40 }
 0x208   : > { %v3542_v34 = vpop.f32.mrf.mxu1  ;;  %v3616_v39 = vpop.f32.mrf.mxu0 }
 0x209   : > { %3093 = vst [vmem:[%s4712_s21 + $0x60] sm:$0xff] %v3065_v3   ;;  %v2295_v56 = vadd.f32 %v3541_v59, %v4823_v62  ;;  %v2490_v28 = vmax.f32 %v2448_v36, 0.0 }
 0x20a   : > { %v3543_v0 = vpop.f32.mrf.mxu1  ;;  %v2450_v6 = vpop.f32.mrf.mxu0 }
 0x20b   : > { %v3544_v8 = vadd.f32 %v3543_v0, %v3542_v34  ;;  %v2451_v30 = vadd.f32 %v2450_v6, %v2290_v51  ;;  %v2456_v63 = vadd.f32 %v3615_v5, %v2295_v56 }
 0x20d   : > { %v2298_v9 = vadd.f32 %v3544_v8, %v4688_v55  ;;  %v2491_v41 = vmax.f32 %v2451_v30, 0.0  ;;  %v2492_v54 = vmax.f32 %v2456_v63, 0.0 }
 0x20f   : > { %v2459_v58 = vadd.f32 %v3616_v39, %v2298_v9  ;;  %v3075_v44 = vpack.c.bf16 %v2491_v41, %v2490_v28 }
 0x211   : > { %v2493_v4 = vmax.f32 %v2459_v58, 0.0  ;;  %3095 = vst [vmem:[%s4712_s21 + $0x70] sm:$0xff] %v3075_v44  }
 0x213   : > { %v3080_v11 = vpack.c.bf16 %v2493_v4, %v2492_v54 }
 0x215   : > { %3096 = vst [vmem:[%s4712_s21 + $0x78] sm:$0xff] %v3080_v11  }
 0x216 PF: > { %s13_s12 = sadd.s32 1, %s3928_s12  }
 0x217   : > { %p10_p4 = scmp.ge.s32.totalorder %s13_s12, 4  }
 0x219   :  { %12 = sbr.rel (!%p10_p4) target bundleno = 1 (0x1), region = 62 }

// kernel: network_forward.8
= control target key start
LH: loop header
LB: loop body
LE: loop exit
PB: predicated region body
PF: predicated region fallthrough
CT: control target
= control target key end

     0   :  { %s4193_s15 = smov 0   ;;  %s5076_s0 = inlined_call_operand.vmem [shape: bf16[512,1152], index: 0, kind: input, shape index: {}]   ;;  %s5077_s1 = inlined_call_operand.vmem [shape: bf16[1152,128], index: 1, kind: input, shape index: {}]   ;;  %s5078_s2 = inlined_call_operand.vmem [shape: f32[1,128], index: 2, kind: input, shape index: {}]   ;;  %s5079_s3 = inlined_call_operand.vmem [shape: bf16[512,128], index: 3, kind: input, shape index: {}]   ;;  %s5080_s4 = inlined_call_operand.vmem [shape: bf16[512,128], index: 4, kind: output, shape index: {}]  }
   0x1 LB: > { %s2867_s16 = sadd.s32 4294967295, %s4166_s15   ;;  %p2871_p0 = scmp.ge.s32.totalorder %s4166_s15, 1  ;;  %s4166_s15 = sphi %s4193_s15, %s14_s15  }
   0x2   : > { %p175_p1 = scmp.lt.s32.totalorder %s4166_s15, 3 }
   0x4   : > { %p176_p2 = pnand %p2871_p0, %p175_p1 }
   0x6   : > { %179 = sbr.rel (%p176_p2) target bundleno = 536 (0x218), region = 36 }
   0xb   : > { %v3880_v0 = vld [vmem:[%s5077_s1 + $0x78] sm:$0xff]   ;;  %s2872_s19 = sshll.u32 %s2867_s16, 5  ;;  %v3882_v2 = vld [vmem:[%s5077_s1 + $0x70] sm:$0xff]   ;;  %v3884_v4 = vld [vmem:[%s5077_s1 + $0x68] sm:$0xff]  }
   0xc   : > { %v3881_v1 = vld [vmem:[%s5077_s1 + $0x38] sm:$0xff]   ;;  %3335 = vmatprep.subr.bf16.mxu0 %v3880_v0  ;;  %3855 = vmatprep.subr.bf16.mxu1 %v3880_v0  ;;  %p208_p3 = scmp.lt.s32.totalorder %s2872_s19, 63  ;;  %v3883_v3 = vld [vmem:[%s5077_s1 + $0x30] sm:$0xff]   ;;  %v3885_v5 = vld [vmem:[%s5077_s1 + $0x28] sm:$0xff]  }
   0xd   : > { %3336 = vmatpush3.bf16.msra.mxu0 %v3881_v1  ;;  %3863 = vmatpush3.bf16.msra.mxu1 %v3881_v1  ;;  %v3886_v6 = vld [vmem:[%s5077_s1 + $0x60] sm:$0xff]   ;;  %v3888_v8 = vld [vmem:[%s5077_s1 + $0x58] sm:$0xff]   ;;  %v3890_v10 = vld [vmem:[%s5077_s1 + $0x50] sm:$0xff]  }
   0xe   : > { %3337 = vmatprep.subr.bf16.mxu0 %v3882_v2  ;;  %3856 = vmatprep.subr.bf16.mxu1 %v3882_v2  ;;  %s5108_s19 = smov (!%p208_p3, %s2872_s19), 63  ;;  %v3887_v7 = vld [vmem:[%s5077_s1 + $0x20] sm:$0xff]   ;;  %v3889_v9 = vld [vmem:[%s5077_s1 + $0x18] sm:$0xff]   ;;  %v3891_v13 = vld [vmem:[%s5077_s1 + $0x10] sm:$0xff]  }
   0xf   : > { %s3871_s6 = smul.u32 36, %s5108_s19  ;;  %v3892_v14 = vld [vmem:[%s5077_s1 + $0x48] sm:$0xff]   ;;  %v3894_v16 = vld [vmem:[%s5077_s1 + $0x40] sm:$0xff]   ;;  %v3902_v18 = vld [vmem:[%s5077_s1 + $0xf8] sm:$0xff]  }
  0x10   : > { %v3893_v15 = vld [vmem:[%s5077_s1 + $0x8] sm:$0xff]   ;;  %v3895_v17 = vld [vmem:[%s5077_s1] sm:$0xff]   ;;  %v3905_v21 = vld [vmem:[%s5077_s1 + $0x178] sm:$0xff]  }
  0x11   : > { %3338 = vmatpush3.bf16.msra.mxu0 %v3883_v3  ;;  %3864 = vmatpush3.bf16.msra.mxu1 %v3883_v3  ;;  %s4234_s13 = scalar_lea.vmem %s5076_s0, %s3871_s6  ;;  %v3903_v22 = vld [vmem:[%s5077_s1 + $0xb8] sm:$0xff]   ;;  %v3904_v23 = vld [vmem:[%s5077_s1 + $0xf0] sm:$0xff]   ;;  %v3914_v31 = vld [vmem:[%s5077_s1 + $0xe8] sm:$0xff]  }
  0x12   : > { %3339 = vmatprep.subr.bf16.mxu0 %v3884_v4  ;;  %3857 = vmatprep.subr.bf16.mxu1 %v3884_v4  ;;  %v3898_v11 = vld [vmem:[%s4234_s13 + $0x4] ss:$36 sps:$4 sm:$0xff]   ;;  %v3907_v24 = vld [vmem:[%s5077_s1 + $0x138] sm:$0xff]   ;;  %v3908_v25 = vld [vmem:[%s4234_s13 + $0x4c] ss:$36 sps:$4 sm:$0xff]  }
  0x13   : > { %v3901_v12 = vld [vmem:[%s4234_s13 + $0x364] ss:$36 sps:$4 sm:$0xff]   ;;  %1738 = vmatprep.mubr.bf16.mxu0 %v3898_v11  ;;  %v3910_v26 = vld [vmem:[%s4234_s13 + $0x3ac] ss:$36 sps:$4 sm:$0xff]   ;;  %v3918_v35 = vld [vmem:[%s4234_s13 + $0x94] ss:$36 sps:$4 sm:$0xff]  }
  0x14   : > { %1834 = vmatprep.mubr.bf16.mxu1 %v3901_v12  ;;  %v3896_v19 = vld [vmem:[%s4234_s13] ss:$36 sps:$4 sm:$0xff]   ;;  %v3906_v27 = vld [vmem:[%s5077_s1 + $0xb0] sm:$0xff]   ;;  %v3912_v29 = vld [vmem:[%s4234_s13 + $0x48] ss:$36 sps:$4 sm:$0xff]  }
  0x15   : > { %3340 = vmatpush3.bf16.msra.mxu0 %v3885_v5  ;;  %3865 = vmatpush3.bf16.msra.mxu1 %v3885_v5  ;;  %v3899_v20 = vld [vmem:[%s4234_s13 + $0x360] ss:$36 sps:$4 sm:$0xff]   ;;  %v3925_v28 = vld [vmem:[%s5077_s1 + $0x170] sm:$0xff]   ;;  %v3913_v30 = vld [vmem:[%s4234_s13 + $0x3a8] ss:$36 sps:$4 sm:$0xff]  }
  0x16   : > { %3341 = vmatprep.subr.bf16.mxu0 %v3886_v6  ;;  %3858 = vmatprep.subr.bf16.mxu1 %v3886_v6  ;;  %v3915_v32 = vld [vmem:[%s5077_s1 + $0xa8] sm:$0xff]   ;;  %v3927_v33 = vld [vmem:[%s5077_s1 + $0x130] sm:$0xff]   ;;  %v3916_v34 = vld [vmem:[%s5077_s1 + $0xe0] sm:$0xff]  }
  0x17   : > { %v3920_v36 = vld [vmem:[%s4234_s13 + $0x3f4] ss:$36 sps:$4 sm:$0xff]   ;;  %v3917_v37 = vld [vmem:[%s5077_s1 + $0xa0] sm:$0xff]   ;;  %v3939_v43 = vld [vmem:[%s5077_s1 + $0x168] sm:$0xff]  }
  0x18   : > { %v3922_v38 = vld [vmem:[%s4234_s13 + $0x90] ss:$36 sps:$4 sm:$0xff]   ;;  %v3924_v40 = vld [vmem:[%s5077_s1 + $0xd8] sm:$0xff]   ;;  %v3941_v46 = vld [vmem:[%s5077_s1 + $0x128] sm:$0xff]  }
  0x19   : > { %3342 = vmatpush3.bf16.msra.mxu0 %v3887_v7  ;;  %3866 = vmatpush3.bf16.msra.mxu1 %v3887_v7  ;;  %v3923_v39 = vld [vmem:[%s4234_s13 + $0x3f0] ss:$36 sps:$4 sm:$0xff]   ;;  %v3926_v41 = vld [vmem:[%s5077_s1 + $0x98] sm:$0xff]   ;;  %v3936_v48 = vld [vmem:[%s5077_s1 + $0xc8] sm:$0xff]  }
  0x1a   : > { %3343 = vmatprep.subr.bf16.mxu0 %v3888_v8  ;;  %3859 = vmatprep.subr.bf16.mxu1 %v3888_v8  ;;  %v3928_v42 = vld [vmem:[%s5077_s1 + $0xd0] sm:$0xff]   ;;  %v3930_v44 = vld [vmem:[%s4234_s13 + $0xdc] ss:$36 sps:$4 sm:$0xff]   ;;  %v3937_v51 = vld [vmem:[%s5077_s1 + $0x88] sm:$0xff]  }
  0x1b   : > { %v3932_v45 = vld [vmem:[%s4234_s13 + $0x43c] ss:$36 sps:$4 sm:$0xff]   ;;  %v3929_v47 = vld [vmem:[%s5077_s1 + $0x90] sm:$0xff]   ;;  %v3942_v53 = vld [vmem:[%s4234_s13 + $0x124] ss:$36 sps:$4 sm:$0xff]  }
  0x1c   : > { %v3934_v49 = vld [vmem:[%s4234_s13 + $0xd8] ss:$36 sps:$4 sm:$0xff]   ;;  %v3938_v52 = vld [vmem:[%s5077_s1 + $0xc0] sm:$0xff]   ;;  %v3946_v54 = vld [vmem:[%s4234_s13 + $0xc] ss:$36 sps:$4 sm:$0xff]  }
  0x1d   : > { %3344 = vmatpush3.bf16.msra.mxu0 %v3889_v9  ;;  %3867 = vmatpush3.bf16.msra.mxu1 %v3889_v9  ;;  %v3935_v50 = vld [vmem:[%s4234_s13 + $0x438] ss:$36 sps:$4 sm:$0xff]   ;;  %v3956_v55 = vld [vmem:[%s5077_s1 + $0x160] sm:$0xff]   ;;  %v3944_v58 = vld [vmem:[%s4234_s13 + $0x8] ss:$36 sps:$4 sm:$0xff]  }
  0x1e   : > { %3345 = vmatprep.subr.bf16.mxu0 %v3890_v10  ;;  %3860 = vmatprep.subr.bf16.mxu1 %v3890_v10  ;;  %v3957_v56 = vld [vmem:[%s5077_s1 + $0x120] sm:$0xff]   ;;  %v3948_v60 = vld [vmem:[%s5077_s1 + $0x1f8] sm:$0xff]   ;;  %v3950_v62 = vld [vmem:[%s4234_s13 + $0x16c] ss:$36 sps:$4 sm:$0xff]  }
  0x1f   : > { %v3940_v57 = vld [vmem:[%s5077_s1 + $0x80] sm:$0xff]   ;;  %v3949_v61 = vld [vmem:[%s5077_s1 + $0x1b8] sm:$0xff]   ;;  %v3964_v1 = vld [vmem:[%s5077_s1 + $0x1f0] sm:$0xff]  }
  0x20   : > { %v3947_v59 = vld [vmem:[%s4234_s13 + $0x120] ss:$36 sps:$4 sm:$0xff]   ;;  %v3952_v63 = vld [vmem:[%s4234_s13 + $0x54] ss:$36 sps:$4 sm:$0xff]   ;;  %v3954_v4 = vld [vmem:[%s4234_s13 + $0x168] ss:$36 sps:$4 sm:$0xff]  }
  0x21   : > { %3346 = vmatpush3.bf16.msra.mxu0 %v3891_v13  ;;  %3868 = vmatpush3.bf16.msra.mxu1 %v3891_v13  ;;  %v3966_v0 = vld [vmem:[%s5077_s1 + $0x158] sm:$0xff]   ;;  %v3965_v3 = vld [vmem:[%s5077_s1 + $0x1b0] sm:$0xff]   ;;  %v3981_v9 = vld [vmem:[%s5077_s1 + $0x1e8] sm:$0xff]  }
  0x22   : > { %3347 = vmatprep.subr.bf16.mxu0 %v3892_v14  ;;  %3861 = vmatprep.subr.bf16.mxu1 %v3892_v14  ;;  %v3967_v2 = vld [vmem:[%s5077_s1 + $0x118] sm:$0xff]   ;;  %v3955_v5 = vld [vmem:[%s4234_s13 + $0x50] ss:$36 sps:$4 sm:$0xff]   ;;  %v3983_v11 = vld [vmem:[%s5077_s1 + $0x1a8] sm:$0xff]  }
  0x23   : > { %v3958_v6 = vld [vmem:[%s4234_s13 + $0x1b4] ss:$36 sps:$4 sm:$0xff]   ;;  %v3960_v7 = vld [vmem:[%s4234_s13 + $0x9c] ss:$36 sps:$4 sm:$0xff]  }
  0x24   : > { %v3980_v8 = vld [vmem:[%s5077_s1 + $0x150] sm:$0xff]   ;;  %v3963_v13 = vld [vmem:[%s4234_s13 + $0x98] ss:$36 sps:$4 sm:$0xff]  }
  0x25   : > { %3348 = vmatpush3.bf16.msra.mxu0 %v3893_v15  ;;  %3869 = vmatpush3.bf16.msra.mxu1 %v3893_v15  ;;  %v3982_v10 = vld [vmem:[%s5077_s1 + $0x110] sm:$0xff]   ;;  %v3968_v14 = vld [vmem:[%s4234_s13 + $0x1fc] ss:$36 sps:$4 sm:$0xff]   ;;  %v3990_v15 = vld [vmem:[%s5077_s1 + $0x148] sm:$0xff]  }
  0x26   : > { %3349 = vmatprep.subr.bf16.mxu0 %v3894_v16  ;;  %3862 = vmatprep.subr.bf16.mxu1 %v3894_v16  ;;  %v3962_v12 = vld [vmem:[%s4234_s13 + $0x1b0] ss:$36 sps:$4 sm:$0xff]   ;;  %v3991_v16 = vld [vmem:[%s5077_s1 + $0x108] sm:$0xff]  }
  0x29   : > { %3350 = vmatpush3.bf16.msra.mxu0 %v3895_v17  ;;  %3870 = vmatpush3.bf16.msra.mxu1 %v3895_v17  ;;  %v3970_v17 = vld [vmem:[%s4234_s13 + $0xe4] ss:$36 sps:$4 sm:$0xff]  }
  0x2a   : > { %3447 = vmatprep.subr.bf16.mxu1 %v3902_v18  ;;  %3559 = vmatprep.subr.bf16.mxu0 %v3905_v21  ;;  %v3998_v18 = vld [vmem:[%s5077_s1 + $0x1e0] sm:$0xff]  }
  0x2b   : > { %v3973_v21 = vld [vmem:[%s4234_s13 + $0xe0] ss:$36 sps:$4 sm:$0xff]  }
  0x2c   : > { %1739 = vmatmul.mubr.bf16.vlgmr.msra.gmra.mxu0 %v3896_v19  ;;  %1835 = vmatmul.mubr.bf16.vlgmr.msra.gmra.mxu1 %v3899_v20  ;;  %v3999_v19 = vld [vmem:[%s5077_s1 + $0x1a0] sm:$0xff]   ;;  %v3972_v20 = vld [vmem:[%s4234_s13 + $0x1f8] ss:$36 sps:$4 sm:$0xff]  }
  0x2d   : > { %3448 = vmatpush3.bf16.msra.mxu1 %v3903_v22  ;;  %3560 = vmatpush3.bf16.msra.mxu0 %v3907_v24  ;;  %v3974_v22 = vld [vmem:[%s4234_s13 + $0x244] ss:$36 sps:$4 sm:$0xff]  }
  0x2e   : > { %3449 = vmatprep.subr.bf16.mxu1 %v3904_v23  ;;  %1746 = vmatprep.mubr.bf16.mxu0 %v3908_v25  ;;  %v3976_v23 = vld [vmem:[%s4234_s13 + $0x12c] ss:$36 sps:$4 sm:$0xff]   ;;  %v4006_v24 = vld [vmem:[%s5077_s1 + $0x140] sm:$0xff]  }
  0x2f   : > { %1842 = vmatprep.mubr.bf16.mxu1 %v3910_v26  ;;  %3561 = vmatprep.subr.bf16.mxu0 %v3925_v28  ;;  %v4007_v25 = vld [vmem:[%s5077_s1 + $0x100] sm:$0xff]   ;;  %v4014_v26 = vld [vmem:[%s5077_s1 + $0x1d8] sm:$0xff]  }
  0x30   : > { %v4015_v28 = vld [vmem:[%s5077_s1 + $0x198] sm:$0xff]  }
  0x31   : > { %3450 = vmatpush3.bf16.msra.mxu1 %v3906_v27  ;;  %3562 = vmatpush3.bf16.msra.mxu0 %v3927_v33  ;;  %v3978_v27 = vld [vmem:[%s4234_s13 + $0x240] ss:$36 sps:$4 sm:$0xff]   ;;  %v4029_v33 = vld [vmem:[%s5077_s1 + $0x1d0] sm:$0xff]  }
  0x32   : > { %3451 = vmatprep.subr.bf16.mxu1 %v3914_v31  ;;  %3563 = vmatprep.subr.bf16.mxu0 %v3939_v43  ;;  %v3984_v31 = vld [vmem:[%s4234_s13 + $0x28c] ss:$36 sps:$4 sm:$0xff]   ;;  %v4000_v43 = vld [vmem:[%s4234_s13 + $0x31c] ss:$36 sps:$4 sm:$0xff]  }
  0x34   : > { %1747 = vmatmul.mubr.bf16.gmra.mxu0 %v3912_v29  ;;  %1843 = vmatmul.mubr.bf16.gmra.mxu1 %v3913_v30  ;;  %v4016_v29 = vld [vmem:[%s5077_s1 + $0x238] sm:$0xff]   ;;  %v3979_v30 = vld [vmem:[%s4234_s13 + $0x128] ss:$36 sps:$4 sm:$0xff]  }
  0x35   : > { %3452 = vmatpush3.bf16.msra.mxu1 %v3915_v32  ;;  %1754 = vmatprep.mubr.bf16.mxu0 %v3918_v35  ;;  %v3986_v32 = vld [vmem:[%s4234_s13 + $0x174] ss:$36 sps:$4 sm:$0xff]  }
  0x36   : > { %3453 = vmatprep.subr.bf16.mxu1 %v3916_v34  ;;  %1850 = vmatprep.mubr.bf16.mxu1 %v3920_v36  ;;  %v3988_v34 = vld [vmem:[%s4234_s13 + $0x288] ss:$36 sps:$4 sm:$0xff]   ;;  %v4030_v35 = vld [vmem:[%s5077_s1 + $0x190] sm:$0xff]  }
  0x37   : > { %3564 = vmatpush3.bf16.msra.mxu0 %v3941_v46  ;;  %v3989_v36 = vld [vmem:[%s4234_s13 + $0x170] ss:$36 sps:$4 sm:$0xff]   ;;  %v4005_v46 = vld [vmem:[%s4234_s13 + $0x200] ss:$36 sps:$4 sm:$0xff]  }
  0x38   : > { %3565 = vmatprep.subr.bf16.mxu0 %v3956_v55  ;;  %v4031_v55 = vld [vmem:[%s5077_s1 + $0x230] sm:$0xff]  }
  0x39   : > { %3454 = vmatpush3.bf16.msra.mxu1 %v3917_v37  ;;  %v3992_v37 = vld [vmem:[%s4234_s13 + $0x2d4] ss:$36 sps:$4 sm:$0xff]  }
  0x3a   : > { %3455 = vmatprep.subr.bf16.mxu1 %v3924_v40  ;;  %v3997_v40 = vld [vmem:[%s4234_s13 + $0x1b8] ss:$36 sps:$4 sm:$0xff]  }
  0x3b   : > { %3566 = vmatpush3.bf16.msra.mxu0 %v3957_v56  ;;  %v4046_v56 = vld [vmem:[%s5077_s1 + $0x228] sm:$0xff]  }
  0x3c   : > { %1755 = vmatmul.mubr.bf16.gmra.mxu0 %v3922_v38  ;;  %1851 = vmatmul.mubr.bf16.gmra.mxu1 %v3923_v39  ;;  %v3994_v38 = vld [vmem:[%s4234_s13 + $0x1bc] ss:$36 sps:$4 sm:$0xff]   ;;  %v3996_v39 = vld [vmem:[%s4234_s13 + $0x2d0] ss:$36 sps:$4 sm:$0xff]  }
  0x3d   : > { %3456 = vmatpush3.bf16.msra.mxu1 %v3926_v41  ;;  %1762 = vmatprep.mubr.bf16.mxu0 %v3930_v44  ;;  %v4044_v41 = vld [vmem:[%s5077_s1 + $0x1c8] sm:$0xff]  }
  0x3e   : > { %3457 = vmatprep.subr.bf16.mxu1 %v3928_v42  ;;  %1858 = vmatprep.mubr.bf16.mxu1 %v3932_v45  ;;  %v4045_v42 = vld [vmem:[%s5077_s1 + $0x188] sm:$0xff]   ;;  %v4004_v45 = vld [vmem:[%s4234_s13 + $0x318] ss:$36 sps:$4 sm:$0xff]  }
  0x3f   : > { %3567 = vmatprep.subr.bf16.mxu0 %v3966_v0  ;;  %v4002_v44 = vld [vmem:[%s4234_s13 + $0x204] ss:$36 sps:$4 sm:$0xff]  }
  0x40   : > { %3568 = vmatpush3.bf16.msra.mxu0 %v3967_v2  ;;  %v4028_v0 = vld [vmem:[%s4234_s13 + $0xa0] ss:$36 sps:$4 sm:$0xff]   ;;  %v4034_v2 = vld [vmem:[%s4234_s13 + $0xec] ss:$36 sps:$4 sm:$0xff]  }
  0x41   : > { %3458 = vmatpush3.bf16.msra.mxu1 %v3929_v47  ;;  %3569 = vmatprep.subr.bf16.mxu0 %v3980_v8  ;;  %v4059_v47 = vld [vmem:[%s5077_s1 + $0x1c0] sm:$0xff]   ;;  %v4040_v8 = vld [vmem:[%s4234_s13 + $0x134] ss:$36 sps:$4 sm:$0xff]  }
  0x42   : > { %3459 = vmatprep.subr.bf16.mxu1 %v3936_v48  ;;  %v4060_v48 = vld [vmem:[%s5077_s1 + $0x180] sm:$0xff]  }
  0x44   : > { %1763 = vmatmul.mubr.bf16.gmra.mxu0 %v3934_v49  ;;  %1859 = vmatmul.mubr.bf16.gmra.mxu1 %v3935_v50  ;;  %v4008_v49 = vld [vmem:[%s4234_s13 + $0x24c] ss:$36 sps:$4 sm:$0xff]   ;;  %v4012_v50 = vld [vmem:[%s4234_s13 + $0x14] ss:$36 sps:$4 sm:$0xff]  }
  0x45   : > { %3460 = vmatpush3.bf16.msra.mxu1 %v3937_v51  ;;  %1770 = vmatprep.mubr.bf16.mxu0 %v3942_v53  ;;  %v4010_v51 = vld [vmem:[%s4234_s13 + $0x10] ss:$36 sps:$4 sm:$0xff]  }
  0x46   : > { %3461 = vmatprep.subr.bf16.mxu1 %v3938_v52  ;;  %1899 = vmatprep.mubr.bf16.mxu1 %v3946_v54  ;;  %v4013_v52 = vld [vmem:[%s4234_s13 + $0x248] ss:$36 sps:$4 sm:$0xff]   ;;  %v4017_v53 = vld [vmem:[%s4234_s13 + $0x294] ss:$36 sps:$4 sm:$0xff]   ;;  %v4019_v54 = vld [vmem:[%s4234_s13 + $0x5c] ss:$36 sps:$4 sm:$0xff]  }
  0x47   : > { %3570 = vmatpush3.bf16.msra.mxu0 %v3982_v10  ;;  %v4042_v10 = vld [vmem:[%s4234_s13 + $0x368] ss:$36 sps:$4 sm:$0xff]  }
  0x48   : > { %3571 = vmatprep.subr.bf16.mxu0 %v3990_v15  ;;  %v4052_v15 = vld [vmem:[%s4234_s13 + $0x178] ss:$36 sps:$4 sm:$0xff]  }
  0x49   : > { %3462 = vmatpush3.bf16.msra.mxu1 %v3940_v57  ;;  %v4021_v57 = vld [vmem:[%s4234_s13 + $0x290] ss:$36 sps:$4 sm:$0xff]  }
  0x4a   : > { %3671 = vmatprep.subr.bf16.mxu1 %v3948_v60  ;;  %v4025_v60 = vld [vmem:[%s4234_s13 + $0xa4] ss:$36 sps:$4 sm:$0xff]  }
  0x4b   : > { %3572 = vmatpush3.bf16.msra.mxu0 %v3991_v16  ;;  %v4053_v16 = vld [vmem:[%s4234_s13 + $0x3fc] ss:$36 sps:$4 sm:$0xff]  }
  0x4c   : > { %1771 = vmatmul.mubr.bf16.gmra.mxu0 %v3947_v59  ;;  %1900 = vmatmul.mubr.bf16.vlgmr.msra.gmra.mxu1 %v3944_v58  ;;  %v4022_v58 = vld [vmem:[%s4234_s13 + $0x58] ss:$36 sps:$4 sm:$0xff]  }
  0x4d   : > { %3672 = vmatpush3.bf16.msra.mxu1 %v3949_v61  ;;  %1778 = vmatprep.mubr.bf16.mxu0 %v3950_v62  ;;  %v4023_v59 = vld [vmem:[%s4234_s13 + $0x2dc] ss:$36 sps:$4 sm:$0xff]  }
  0x4e   : > { %1907 = vmatprep.mubr.bf16.mxu1 %v3952_v63  ;;  %3673 = vmatprep.subr.bf16.mxu1 %v3964_v1  ;;  %v4061_v61 = vld [vmem:[%s5077_s1 + $0x220] sm:$0xff]   ;;  %v4027_v62 = vld [vmem:[%s4234_s13 + $0x2d8] ss:$36 sps:$4 sm:$0xff]  }
  0x4f   : > { %3573 = vmatprep.subr.bf16.mxu0 %v4006_v24  ;;  %v4074_v63 = vld [vmem:[%s5077_s1 + $0x218] sm:$0xff]   ;;  %v4032_v1 = vld [vmem:[%s4234_s13 + $0x324] ss:$36 sps:$4 sm:$0xff]  }
  0x50   : > { %3574 = vmatpush3.bf16.msra.mxu0 %v4007_v25  ;;  %v4068_v24 = vld [vmem:[%s4234_s13 + $0x254] ss:$36 sps:$4 sm:$0xff]   ;;  %v4072_v25 = vld [vmem:[%s4234_s13 + $0x1c] ss:$36 sps:$4 sm:$0xff]  }
  0x51   : > { %3674 = vmatpush3.bf16.msra.mxu1 %v3965_v3  ;;  %3807 = vmatprep.subr.bf16.mxu0 %v4016_v29  ;;  %v4087_v3 = vld [vmem:[%s5077_s1 + $0x210] sm:$0xff]  }
  0x52   : > { %3675 = vmatprep.subr.bf16.mxu1 %v3981_v9  ;;  %v4113_v9 = vld [vmem:[%s5077_s1 + $0x200] sm:$0xff]  }
  0x54   : > { %1779 = vmatmul.mubr.bf16.gmra.mxu0 %v3954_v4  ;;  %1908 = vmatmul.mubr.bf16.gmra.mxu1 %v3955_v5  ;;  %v4036_v4 = vld [vmem:[%s4234_s13 + $0x320] ss:$36 sps:$4 sm:$0xff]   ;;  %v4100_v5 = vld [vmem:[%s5077_s1 + $0x208] sm:$0xff]  }
  0x55   : > { %1786 = vmatprep.mubr.bf16.mxu0 %v3958_v6  ;;  %1915 = vmatprep.mubr.bf16.mxu1 %v3960_v7  ;;  %v4037_v6 = vld [vmem:[%s4234_s13 + $0xe8] ss:$36 sps:$4 sm:$0xff]  }
  0x56   : > { %3676 = vmatpush3.bf16.msra.mxu1 %v3983_v11  ;;  %v4038_v7 = vld [vmem:[%s4234_s13 + $0x36c] ss:$36 sps:$4 sm:$0xff]  }
  0x57   : > { %3677 = vmatprep.subr.bf16.mxu1 %v3998_v18  ;;  %v4043_v11 = vld [vmem:[%s4234_s13 + $0x130] ss:$36 sps:$4 sm:$0xff]   ;;  %v4057_v18 = vld [vmem:[%s4234_s13 + $0x3f8] ss:$36 sps:$4 sm:$0xff]  }
  0x5a   : > { %3678 = vmatpush3.bf16.msra.mxu1 %v3999_v19  ;;  %v4058_v19 = vld [vmem:[%s4234_s13 + $0x1c0] ss:$36 sps:$4 sm:$0xff]  }
  0x5b   : > { %3679 = vmatprep.subr.bf16.mxu1 %v4014_v26  ;;  %v4070_v26 = vld [vmem:[%s4234_s13 + $0x18] ss:$36 sps:$4 sm:$0xff]  }
  0x5c   : > { %1787 = vmatmul.mubr.bf16.gmra.mxu0 %v3962_v12  ;;  %1916 = vmatmul.mubr.bf16.gmra.mxu1 %v3963_v13  ;;  %v4047_v12 = vld [vmem:[%s4234_s13 + $0x3b4] ss:$36 sps:$4 sm:$0xff]   ;;  %v4049_v13 = vld [vmem:[%s4234_s13 + $0x17c] ss:$36 sps:$4 sm:$0xff]  }
  0x5d   : > { %1794 = vmatprep.mubr.bf16.mxu0 %v3968_v14  ;;  %1923 = vmatprep.mubr.bf16.mxu1 %v3970_v17  ;;  %v4051_v14 = vld [vmem:[%s4234_s13 + $0x3b0] ss:$36 sps:$4 sm:$0xff]   ;;  %v4055_v17 = vld [vmem:[%s4234_s13 + $0x1c4] ss:$36 sps:$4 sm:$0xff]  }
  0x5e   : > { %3680 = vmatpush3.bf16.msra.mxu1 %v4015_v28  ;;  %v4075_v28 = vld [vmem:[%s4234_s13 + $0x29c] ss:$36 sps:$4 sm:$0xff]  }
  0x5f   : > { %3681 = vmatprep.subr.bf16.mxu1 %v4029_v33  ;;  %v4083_v33 = vld [vmem:[%s4234_s13 + $0xac] ss:$36 sps:$4 sm:$0xff]  }
  0x62   : > { %3682 = vmatpush3.bf16.msra.mxu1 %v4030_v35  ;;  %v4086_v35 = vld [vmem:[%s4234_s13 + $0xa8] ss:$36 sps:$4 sm:$0xff]  }
  0x63   : > { %3683 = vmatprep.subr.bf16.mxu1 %v4044_v41  ;;  %v4096_v41 = vld [vmem:[%s4234_s13 + $0x13c] ss:$36 sps:$4 sm:$0xff]  }
  0x64   : > { %1795 = vmatmul.mubr.bf16.gmra.mxu0 %v3972_v20  ;;  %1924 = vmatmul.mubr.bf16.gmra.mxu1 %v3973_v21  ;;  %v4062_v20 = vld [vmem:[%s4234_s13 + $0x444] ss:$36 sps:$4 sm:$0xff]   ;;  %v4064_v21 = vld [vmem:[%s4234_s13 + $0x20c] ss:$36 sps:$4 sm:$0xff]  }
  0x65   : > { %1802 = vmatprep.mubr.bf16.mxu0 %v3974_v22  ;;  %1931 = vmatprep.mubr.bf16.mxu1 %v3976_v23  ;;  %v4066_v22 = vld [vmem:[%s4234_s13 + $0x440] ss:$36 sps:$4 sm:$0xff]   ;;  %v4067_v23 = vld [vmem:[%s4234_s13 + $0x208] ss:$36 sps:$4 sm:$0xff]  }
  0x66   : > { %3684 = vmatpush3.bf16.msra.mxu1 %v4045_v42  ;;  %v4098_v42 = vld [vmem:[%s4234_s13 + $0x370] ss:$36 sps:$4 sm:$0xff]  }
  0x67   : > { %3685 = vmatprep.subr.bf16.mxu1 %v4059_v47 }
  0x6a   : > { %3686 = vmatpush3.bf16.msra.mxu1 %v4060_v48 }
  0x6c   : > { %1803 = vmatmul.mubr.bf16.gmra.mxu0 %v3978_v27  ;;  %1932 = vmatmul.mubr.bf16.gmra.mxu1 %v3979_v30  ;;  %v4073_v27 = vld [vmem:[%s4234_s13 + $0x250] ss:$36 sps:$4 sm:$0xff]   ;;  %v4079_v30 = vld [vmem:[%s4234_s13 + $0x298] ss:$36 sps:$4 sm:$0xff]  }
  0x6d   : > { %1810 = vmatprep.mubr.bf16.mxu0 %v3984_v31  ;;  %1939 = vmatprep.mubr.bf16.mxu1 %v3986_v32  ;;  %v4080_v31 = vld [vmem:[%s4234_s13 + $0x60] ss:$36 sps:$4 sm:$0xff]  }
  0x6e   : > { %v4081_v32 = vld [vmem:[%s4234_s13 + $0x2e4] ss:$36 sps:$4 sm:$0xff]  }
  0x74   : > { %1811 = vmatmul.mubr.bf16.gmra.mxu0 %v3988_v34  ;;  %1940 = vmatmul.mubr.bf16.gmra.mxu1 %v3989_v36  ;;  %v4085_v34 = vld [vmem:[%s4234_s13 + $0x2e0] ss:$36 sps:$4 sm:$0xff]   ;;  %v4088_v36 = vld [vmem:[%s4234_s13 + $0x32c] ss:$36 sps:$4 sm:$0xff]  }
  0x75   : > { %1818 = vmatprep.mubr.bf16.mxu0 %v3992_v37  ;;  %1947 = vmatprep.mubr.bf16.mxu1 %v3994_v38  ;;  %v4090_v37 = vld [vmem:[%s4234_s13 + $0xf4] ss:$36 sps:$4 sm:$0xff]   ;;  %v4092_v38 = vld [vmem:[%s4234_s13 + $0x328] ss:$36 sps:$4 sm:$0xff]  }
  0x7c   : > { %1819 = vmatmul.mubr.bf16.gmra.mxu0 %v3996_v39  ;;  %1948 = vmatmul.mubr.bf16.gmra.mxu1 %v3997_v40  ;;  %v4093_v39 = vld [vmem:[%s4234_s13 + $0xf0] ss:$36 sps:$4 sm:$0xff]  }
  0x7d   : > { %1826 = vmatprep.mubr.bf16.mxu0 %v4000_v43  ;;  %1955 = vmatprep.mubr.bf16.mxu1 %v4002_v44  ;;  %v4094_v40 = vld [vmem:[%s4234_s13 + $0x374] ss:$36 sps:$4 sm:$0xff]   ;;  %v4101_v44 = vld [vmem:[%s4234_s13 + $0x3bc] ss:$36 sps:$4 sm:$0xff]  }
  0x7e   : > { %v4099_v43 = vld [vmem:[%s4234_s13 + $0x138] ss:$36 sps:$4 sm:$0xff]  }
  0x84   : > { %1827 = vmatmul.mubr.bf16.gmra.mxu0 %v4004_v45  ;;  %1956 = vmatmul.mubr.bf16.gmra.mxu1 %v4005_v46  ;;  %v4103_v45 = vld [vmem:[%s4234_s13 + $0x184] ss:$36 sps:$4 sm:$0xff]  }
  0x85   : > { %1963 = vmatprep.mubr.bf16.mxu1 %v4008_v49  ;;  %2060 = vmatprep.mubr.bf16.mxu0 %v4012_v50 }
  0x8c   : > { %1964 = vmatmul.mubr.bf16.gmra.mxu1 %v4013_v52  ;;  %2061 = vmatmul.mubr.bf16.vlgmr.msra.gmra.mxu0 %v4010_v51 }
  0x8d   : > { %3808 = vmatpush3.bf16.msra.mxu0 %v4016_v29  ;;  %1971 = vmatprep.mubr.bf16.mxu1 %v4017_v53  ;;  %v4077_v29 = vld [vmem:[%s4234_s13 + $0x64] ss:$36 sps:$4 sm:$0xff]  }
  0x8e   : > { %2068 = vmatprep.mubr.bf16.mxu0 %v4019_v54  ;;  %3809 = vmatprep.subr.bf16.mxu0 %v4031_v55  ;;  %v4105_v54 = vld [vmem:[%s4234_s13 + $0x3b8] ss:$36 sps:$4 sm:$0xff]  }
  0x91   : > { %3810 = vmatpush3.bf16.msra.mxu0 %v4031_v55  ;;  %v4106_v55 = vld [vmem:[%s4234_s13 + $0x180] ss:$36 sps:$4 sm:$0xff]  }
  0x92   : > { %3811 = vmatprep.subr.bf16.mxu0 %v4046_v56 }
  0x94   : > { %1972 = vmatmul.mubr.bf16.gmra.mxu1 %v4021_v57  ;;  %2069 = vmatmul.mubr.bf16.gmra.mxu0 %v4022_v58  ;;  %v4109_v57 = vld [vmem:[%s4234_s13 + $0x1cc] ss:$36 sps:$4 sm:$0xff]  }
  0x95   : > { %1979 = vmatprep.mubr.bf16.mxu1 %v4023_v59  ;;  %2076 = vmatprep.mubr.bf16.mxu0 %v4025_v60 }
  0x96   : > { %3812 = vmatpush3.bf16.msra.mxu0 %v4046_v56  ;;  %v4107_v56 = vld [vmem:[%s4234_s13 + $0x404] ss:$36 sps:$4 sm:$0xff]  }
  0x97   : > { %3813 = vmatprep.subr.bf16.mxu0 %v4061_v61 }
  0x9a   : > { %3814 = vmatpush3.bf16.msra.mxu0 %v4061_v61 }
  0x9b   : > { %3815 = vmatprep.subr.bf16.mxu0 %v4074_v63 }
  0x9c   : > { %1980 = vmatmul.mubr.bf16.gmra.mxu1 %v4027_v62  ;;  %2077 = vmatmul.mubr.bf16.gmra.mxu0 %v4028_v0 }
  0x9d   : > { %1987 = vmatprep.mubr.bf16.mxu1 %v4032_v1  ;;  %2084 = vmatprep.mubr.bf16.mxu0 %v4034_v2 }
  0x9e   : > { %3816 = vmatpush3.bf16.msra.mxu0 %v4074_v63 }
  0x9f   : > { %3817 = vmatprep.subr.bf16.mxu0 %v4087_v3 }
  0xa2   : > { %3818 = vmatpush3.bf16.msra.mxu0 %v4087_v3 }
  0xa3   : > { %3819 = vmatprep.subr.bf16.mxu0 %v4100_v5 }
  0xa4   : > { %1988 = vmatmul.mubr.bf16.gmra.mxu1 %v4036_v4  ;;  %2085 = vmatmul.mubr.bf16.gmra.mxu0 %v4037_v6  ;;  %v4111_v6 = vld [vmem:[%s4234_s13 + $0x400] ss:$36 sps:$4 sm:$0xff]  }
  0xa5   : > { %1995 = vmatprep.mubr.bf16.mxu1 %v4038_v7  ;;  %2092 = vmatprep.mubr.bf16.mxu0 %v4040_v8  ;;  %v4112_v7 = vld [vmem:[%s4234_s13 + $0x1c8] ss:$36 sps:$4 sm:$0xff]  }
  0xa6   : > { %3820 = vmatpush3.bf16.msra.mxu0 %v4100_v5  ;;  %v4114_v8 = vld [vmem:[%s4234_s13 + $0x44c] ss:$36 sps:$4 sm:$0xff]  }
  0xa7   : > { %3821 = vmatprep.subr.bf16.mxu0 %v4113_v9 }
  0xaa   : > { %3822 = vmatpush3.bf16.msra.mxu0 %v4113_v9  ;;  %v4116_v9 = vld [vmem:[%s4234_s13 + $0x214] ss:$36 sps:$4 sm:$0xff]  }
  0xac   : > { %1996 = vmatmul.mubr.bf16.gmra.mxu1 %v4042_v10  ;;  %2093 = vmatmul.mubr.bf16.gmra.mxu0 %v4043_v11 }
  0xad   : > { %2003 = vmatprep.mubr.bf16.mxu1 %v4047_v12  ;;  %2100 = vmatprep.mubr.bf16.mxu0 %v4049_v13 }
  0xb4   : > { %2004 = vmatmul.mubr.bf16.gmra.mxu1 %v4051_v14  ;;  %2101 = vmatmul.mubr.bf16.gmra.mxu0 %v4052_v15 }
  0xb5   : > { %2011 = vmatprep.mubr.bf16.mxu1 %v4053_v16  ;;  %2108 = vmatprep.mubr.bf16.mxu0 %v4055_v17 }
  0xbc   : > { %2012 = vmatmul.mubr.bf16.gmra.mxu1 %v4057_v18  ;;  %2109 = vmatmul.mubr.bf16.gmra.mxu0 %v4058_v19 }
  0xbd   : > { %2019 = vmatprep.mubr.bf16.mxu1 %v4062_v20  ;;  %2116 = vmatprep.mubr.bf16.mxu0 %v4064_v21 }
  0xc4   : > { %2020 = vmatmul.mubr.bf16.gmra.mxu1 %v4066_v22  ;;  %2117 = vmatmul.mubr.bf16.gmra.mxu0 %v4067_v23  ;;  %v4118_v22 = vld [vmem:[%s4234_s13 + $0x448] ss:$36 sps:$4 sm:$0xff]   ;;  %v4119_v23 = vld [vmem:[%s4234_s13 + $0x210] ss:$36 sps:$4 sm:$0xff]  }
  0xc5   : > { %2124 = vmatprep.mubr.bf16.mxu0 %v4068_v24  ;;  %2221 = vmatprep.mubr.bf16.mxu1 %v4072_v25  ;;  %v4122_v24 = vld [vmem:[%s4234_s13 + $0x25c] ss:$36 sps:$4 sm:$0xff]  }
  0xc6   : > { %v4123_v25 = vld [vmem:[%s4234_s13 + $0x20] ss:$36 sps:$4 sm:$0xff]  }
  0xcc   : > { %2125 = vmatmul.mubr.bf16.gmra.mxu0 %v4073_v27  ;;  %2222 = vmatmul.mubr.bf16.vlgmr.msra.gmra.mxu1 %v4070_v26 }
  0xcd   : > { %2132 = vmatprep.mubr.bf16.mxu0 %v4075_v28  ;;  %2229 = vmatprep.mubr.bf16.mxu1 %v4077_v29 }
  0xd4   : > { %2133 = vmatmul.mubr.bf16.gmra.mxu0 %v4079_v30  ;;  %2230 = vmatmul.mubr.bf16.gmra.mxu1 %v4080_v31 }
  0xd5   : > { %2140 = vmatprep.mubr.bf16.mxu0 %v4081_v32  ;;  %2237 = vmatprep.mubr.bf16.mxu1 %v4083_v33 }
  0xdc   : > { %2141 = vmatmul.mubr.bf16.gmra.mxu0 %v4085_v34  ;;  %2238 = vmatmul.mubr.bf16.gmra.mxu1 %v4086_v35 }
  0xdd   : > { %2148 = vmatprep.mubr.bf16.mxu0 %v4088_v36  ;;  %2245 = vmatprep.mubr.bf16.mxu1 %v4090_v37 }
  0xe4   : > { %2149 = vmatmul.mubr.bf16.gmra.mxu0 %v4092_v38  ;;  %2246 = vmatmul.mubr.bf16.gmra.mxu1 %v4093_v39  ;;  %v4120_v38 = vld [vmem:[%s4234_s13 + $0x258] ss:$36 sps:$4 sm:$0xff]   ;;  %v4124_v39 = vld [vmem:[%s4234_s13 + $0x68] ss:$36 sps:$4 sm:$0xff]  }
  0xe5   : > { %2156 = vmatprep.mubr.bf16.mxu0 %v4094_v40  ;;  %2253 = vmatprep.mubr.bf16.mxu1 %v4096_v41  ;;  %v4127_v40 = vld [vmem:[%s4234_s13 + $0x2a4] ss:$36 sps:$4 sm:$0xff]   ;;  %v4128_v41 = vld [vmem:[%s4234_s13 + $0xb0] ss:$36 sps:$4 sm:$0xff]  }
  0xec   : > { %v3351_v46 = vpop.f32.mrf.mxu0  ;;  %v3423_v47 = vpop.f32.mrf.mxu1  ;;  %2157 = vmatmul.mubr.bf16.gmra.mxu0 %v4098_v42  ;;  %2254 = vmatmul.mubr.bf16.gmra.mxu1 %v4099_v43 }
  0xed   : > { %2164 = vmatprep.mubr.bf16.mxu0 %v4101_v44  ;;  %2261 = vmatprep.mubr.bf16.mxu1 %v4103_v45 }
  0xee   : > { %v3352_v48 = vpop.f32.mrf.mxu0  ;;  %v3424_v49 = vpop.f32.mrf.mxu1 }
  0xef   : > { %v4527_v50 = vadd.f32 %v3352_v48, %v3351_v46  ;;  %v4529_v51 = vadd.f32 %v3424_v49, %v3423_v47  ;;  %v4578_v48 = vld [vmem:[%s5078_s2] ss:$0 sm:$0xff] }
  0xf0   : > { %v3354_v52 = vpop.f32.mrf.mxu0  ;;  %v3426_v53 = vpop.f32.mrf.mxu1 }
  0xf2   : > { %v3355_v58 = vpop.f32.mrf.mxu0  ;;  %v3427_v59 = vpop.f32.mrf.mxu1 }
  0xf3   : > { %v4535_v60 = vadd.f32 %v3355_v58, %v3354_v52  ;;  %v4537_v61 = vadd.f32 %v3427_v59, %v3426_v53  ;;  %v1741_v53 = vadd.f32 %v4527_v50, %v4578_v48  ;;  %v4125_v58 = vld [vmem:[%s4234_s13 + $0x2a0] ss:$36 sps:$4 sm:$0xff]   ;;  %v4129_v59 = vld [vmem:[%s4234_s13 + $0xf8] ss:$36 sps:$4 sm:$0xff]  }
  0xf4   : > { %v3357_v62 = vpop.f32.mrf.mxu0  ;;  %v3429_v63 = vpop.f32.mrf.mxu1  ;;  %2165 = vmatmul.mubr.bf16.gmra.mxu0 %v4105_v54  ;;  %2262 = vmatmul.mubr.bf16.gmra.mxu1 %v4106_v55 }
  0xf5   : > { %2172 = vmatprep.mubr.bf16.mxu0 %v4107_v56  ;;  %2269 = vmatprep.mubr.bf16.mxu1 %v4109_v57 }
  0xf6   : > { %v3358_v0 = vpop.f32.mrf.mxu0  ;;  %v3430_v1 = vpop.f32.mrf.mxu1 }
  0xf7   : > { %v4539_v2 = vadd.f32 %v3358_v0, %v3357_v62  ;;  %v4541_v3 = vadd.f32 %v3430_v1, %v3429_v63  ;;  %v4132_v63 = vld [vmem:[%s4234_s13 + $0x2ec] ss:$36 sps:$4 sm:$0xff]   ;;  %v4133_v0 = vld [vmem:[%s4234_s13 + $0x140] ss:$36 sps:$4 sm:$0xff]  }
  0xf8   : > { %v3360_v4 = vpop.f32.mrf.mxu0  ;;  %v3432_v5 = vpop.f32.mrf.mxu1 }
  0xfa   : > { %v3361_v10 = vpop.f32.mrf.mxu0  ;;  %v3433_v11 = vpop.f32.mrf.mxu1 }
  0xfb   : > { %v4547_v12 = vadd.f32 %v3361_v10, %v3360_v4  ;;  %v4549_v13 = vadd.f32 %v3433_v11, %v3432_v5  ;;  %v1744_v5 = vadd.f32 %v4535_v60, %v4578_v48  ;;  %v1749_v60 = vadd.f32 %v4539_v2, %v4578_v48 }
  0xfc   : > { %v3363_v14 = vpop.f32.mrf.mxu0  ;;  %v3435_v15 = vpop.f32.mrf.mxu1  ;;  %2173 = vmatmul.mubr.bf16.gmra.mxu0 %v4111_v6  ;;  %2270 = vmatmul.mubr.bf16.gmra.mxu1 %v4112_v7 }
  0xfd   : > { %2180 = vmatprep.mubr.bf16.mxu0 %v4114_v8  ;;  %2277 = vmatprep.mubr.bf16.mxu1 %v4116_v9 }
  0xfe   : > { %v3364_v16 = vpop.f32.mrf.mxu0  ;;  %v3436_v17 = vpop.f32.mrf.mxu1 }
  0xff   : > { %v4551_v18 = vadd.f32 %v3364_v16, %v3363_v14  ;;  %v4553_v19 = vadd.f32 %v3436_v17, %v3435_v15 }
 0x100   : > { %v3366_v20 = vpop.f32.mrf.mxu0  ;;  %v3438_v21 = vpop.f32.mrf.mxu1 }
 0x102   : > { %v3367_v26 = vpop.f32.mrf.mxu0  ;;  %v3439_v27 = vpop.f32.mrf.mxu1 }
 0x103   : > { %v4559_v28 = vadd.f32 %v3367_v26, %v3366_v20  ;;  %v4561_v29 = vadd.f32 %v3439_v27, %v3438_v21  ;;  %v4130_v20 = vld [vmem:[%s4234_s13 + $0x2e8] ss:$36 sps:$4 sm:$0xff]   ;;  %v1752_v27 = vadd.f32 %v4547_v12, %v4578_v48  ;;  %v1757_v12 = vadd.f32 %v4551_v18, %v4578_v48 }
 0x104   : > { %v3369_v30 = vpop.f32.mrf.mxu0  ;;  %v3441_v31 = vpop.f32.mrf.mxu1  ;;  %2181 = vmatmul.mubr.bf16.gmra.mxu0 %v4118_v22  ;;  %2278 = vmatmul.mubr.bf16.gmra.mxu1 %v4119_v23  ;;  %v4134_v21 = vld [vmem:[%s4234_s13 + $0x188] ss:$36 sps:$4 sm:$0xff]   ;;  %v4137_v23 = vld [vmem:[%s4234_s13 + $0x334] ss:$36 sps:$4 sm:$0xff]  }
 0x105   : > { %2285 = vmatprep.mubr.bf16.mxu1 %v4122_v24  ;;  %3823 = vmatprep.mubr.bf16.mxu0 %v4123_v25  ;;  %v4138_v24 = vld [vmem:[%s4234_s13 + $0x1d0] ss:$36 sps:$4 sm:$0xff]  }
 0x106   : > { %v3370_v32 = vpop.f32.mrf.mxu0  ;;  %v3442_v33 = vpop.f32.mrf.mxu1 }
 0x107   : > { %v4563_v34 = vadd.f32 %v3370_v32, %v3369_v30  ;;  %v4565_v35 = vadd.f32 %v3442_v33, %v3441_v31 }
 0x108   : > { %v3372_v36 = vpop.f32.mrf.mxu0  ;;  %v3444_v37 = vpop.f32.mrf.mxu1 }
 0x10a   : > { %v3373_v42 = vpop.f32.mrf.mxu0  ;;  %v3445_v43 = vpop.f32.mrf.mxu1 }
 0x10b   : > { %v4571_v44 = vadd.f32 %v3373_v42, %v3372_v36  ;;  %v4573_v45 = vadd.f32 %v3445_v43, %v3444_v37  ;;  %v4135_v42 = vld [vmem:[%s4234_s13 + $0x330] ss:$36 sps:$4 sm:$0xff]   ;;  %v4139_v43 = vld [vmem:[%s4234_s13 + $0x218] ss:$36 sps:$4 sm:$0xff]  }
 0x10c   : > { %v3375_v46 = vpop.f32.mrf.mxu0  ;;  %v3463_v47 = vpop.f32.mrf.mxu1  ;;  %2286 = vmatmul.mubr.bf16.gmra.mxu1 %v4120_v38  ;;  %3824 = vmatmul.mubr.bf16.vlgmr.msra.gmra.mxu0 %v4124_v39 }
 0x10d   : > { %2293 = vmatprep.mubr.bf16.mxu1 %v4127_v40  ;;  %3827 = vmatprep.mubr.bf16.mxu0 %v4128_v41 }
 0x10e   : > { %v3376_v49 = vpop.f32.mrf.mxu0  ;;  %v3464_v52 = vpop.f32.mrf.mxu1 }
 0x10f   : > { %v4582_v54 = vadd.f32 %v3376_v49, %v3375_v46  ;;  %v3465_v55 = vadd.f32 %v3464_v52, %v3463_v47  ;;  %v4142_v47 = vld [vmem:[%s4234_s13 + $0x37c] ss:$36 sps:$4 sm:$0xff]  }
 0x110   : > { %v3378_v56 = vpop.f32.mrf.mxu0  ;;  %v3466_v57 = vpop.f32.mrf.mxu1  ;;  %v4143_v49 = vld [vmem:[%s4234_s13 + $0x260] ss:$36 sps:$4 sm:$0xff]  }
 0x111   : > { %v4586_v62 = vadd.f32 %v3465_v55, %v1741_v53  ;;  %v1760_v55 = vadd.f32 %v4559_v28, %v4578_v48  ;;  %v1765_v28 = vadd.f32 %v4563_v34, %v4578_v48 }
 0x112   : > { %v3379_v1 = vpop.f32.mrf.mxu0  ;;  %v3467_v4 = vpop.f32.mrf.mxu1 }
 0x113   : > { %v4592_v6 = vadd.f32 %v3379_v1, %v3378_v56  ;;  %v3468_v50 = vadd.f32 %v3467_v4, %v3466_v57 }
 0x114   : > { %v3381_v7 = vpop.f32.mrf.mxu0  ;;  %v3469_v8 = vpop.f32.mrf.mxu1  ;;  %2294 = vmatmul.mubr.bf16.gmra.mxu1 %v4125_v58  ;;  %3828 = vmatmul.mubr.bf16.gmra.mxu0 %v4129_v59 }
 0x115   : > { %v4594_v9 = vadd.f32 %v3468_v50, %v1744_v5  ;;  %2301 = vmatprep.mubr.bf16.mxu1 %v4132_v63  ;;  %3831 = vmatprep.mubr.bf16.mxu0 %v4133_v0 }
 0x116   : > { %v3382_v10 = vpop.f32.mrf.mxu0  ;;  %v3470_v11 = vpop.f32.mrf.mxu1 }
 0x117   : > { %v4598_v14 = vadd.f32 %v3382_v10, %v3381_v7  ;;  %v3471_v15 = vadd.f32 %v3470_v11, %v3469_v8  ;;  %v4140_v7 = vld [vmem:[%s4234_s13 + $0x378] ss:$36 sps:$4 sm:$0xff]   ;;  %v4144_v8 = vld [vmem:[%s4234_s13 + $0x2a8] ss:$36 sps:$4 sm:$0xff]  }
 0x118   : > { %v3384_v16 = vpop.f32.mrf.mxu0  ;;  %v3472_v17 = vpop.f32.mrf.mxu1  ;;  %v4147_v11 = vld [vmem:[%s4234_s13 + $0x3c4] ss:$36 sps:$4 sm:$0xff]  }
 0x119   : > { %v4602_v22 = vadd.f32 %v3471_v15, %v1749_v60  ;;  %v4148_v60 = vld [vmem:[%s4234_s13 + $0x2f0] ss:$36 sps:$4 sm:$0xff]  }
 0x11a   : > { %v3385_v25 = vpop.f32.mrf.mxu0  ;;  %v3473_v26 = vpop.f32.mrf.mxu1 }
 0x11b   : > { %v4608_v30 = vadd.f32 %v3385_v25, %v3384_v16  ;;  %v3474_v2 = vadd.f32 %v3473_v26, %v3472_v17  ;;  %v1768_v17 = vadd.f32 %v4571_v44, %v4578_v48  ;;  %v1773_v44 = vadd.f32 %v4582_v54, %v4578_v48 }
 0x11c   : > { %v3387_v31 = vpop.f32.mrf.mxu0  ;;  %v3475_v32 = vpop.f32.mrf.mxu1  ;;  %2302 = vmatmul.mubr.bf16.gmra.mxu1 %v4130_v20  ;;  %3832 = vmatmul.mubr.bf16.gmra.mxu0 %v4134_v21 }
 0x11d   : > { %v4610_v33 = vadd.f32 %v3474_v2, %v1752_v27  ;;  %2309 = vmatprep.mubr.bf16.mxu1 %v4137_v23  ;;  %3835 = vmatprep.mubr.bf16.mxu0 %v4138_v24 }
 0x11e   : > { %v3388_v36 = vpop.f32.mrf.mxu0  ;;  %v3476_v37 = vpop.f32.mrf.mxu1 }
 0x11f   : > { %v4614_v38 = vadd.f32 %v3388_v36, %v3387_v31  ;;  %v3477_v39 = vadd.f32 %v3476_v37, %v3475_v32  ;;  %v4145_v36 = vld [vmem:[%s4234_s13 + $0x3c0] ss:$36 sps:$4 sm:$0xff]   ;;  %v4149_v37 = vld [vmem:[%s4234_s13 + $0x338] ss:$36 sps:$4 sm:$0xff]  }
 0x120   : > { %v3390_v40 = vpop.f32.mrf.mxu0  ;;  %v3478_v41 = vpop.f32.mrf.mxu1 }
 0x121   : > { %v4618_v46 = vadd.f32 %v3477_v39, %v1757_v12  ;;  %v4152_v39 = vld [vmem:[%s4234_s13 + $0x40c] ss:$36 sps:$4 sm:$0xff]  }
 0x122   : > { %v3391_v52 = vpop.f32.mrf.mxu0  ;;  %v3479_v53 = vpop.f32.mrf.mxu1 }
 0x123   : > { %v4624_v56 = vadd.f32 %v3391_v52, %v3390_v40  ;;  %v3480_v18 = vadd.f32 %v3479_v53, %v3478_v41  ;;  %v4153_v40 = vld [vmem:[%s4234_s13 + $0x380] ss:$36 sps:$4 sm:$0xff]  }
 0x124   : > { %v3393_v57 = vpop.f32.mrf.mxu0  ;;  %v3481_v58 = vpop.f32.mrf.mxu1  ;;  %2310 = vmatmul.mubr.bf16.gmra.mxu1 %v4135_v42  ;;  %3836 = vmatmul.mubr.bf16.gmra.mxu0 %v4139_v43  ;;  %v1776_v43 = vadd.f32 %v4592_v6, %v4578_v48  ;;  %v1781_v6 = vadd.f32 %v4598_v14, %v4578_v48 }
 0x125   : > { %v4626_v59 = vadd.f32 %v3480_v18, %v1760_v55  ;;  %2317 = vmatprep.mubr.bf16.mxu1 %v4142_v47  ;;  %3839 = vmatprep.mubr.bf16.mxu0 %v4143_v49 }
 0x126   : > { %v3394_v63 = vpop.f32.mrf.mxu0  ;;  %v3482_v0 = vpop.f32.mrf.mxu1 }
 0x127   : > { %v4630_v1 = vadd.f32 %v3394_v63, %v3393_v57  ;;  %v3483_v4 = vadd.f32 %v3482_v0, %v3481_v58 }
 0x128   : > { %v3396_v5 = vpop.f32.mrf.mxu0  ;;  %v3484_v50 = vpop.f32.mrf.mxu1 }
 0x129   : > { %v4634_v10 = vadd.f32 %v3483_v4, %v1765_v28  ;;  %v4150_v28 = vld [vmem:[%s4234_s13 + $0x408] ss:$36 sps:$4 sm:$0xff]  }
 0x12a   : > { %v3397_v15 = vpop.f32.mrf.mxu0  ;;  %v3485_v16 = vpop.f32.mrf.mxu1  ;;  %v4154_v4 = vld [vmem:[%s4234_s13 + $0x3c8] ss:$36 sps:$4 sm:$0xff]  }
 0x12b   : > { %v4640_v20 = vadd.f32 %v3397_v15, %v3396_v5  ;;  %v3486_v34 = vadd.f32 %v3485_v16, %v3484_v50  ;;  %v4157_v50 = vld [vmem:[%s4234_s13 + $0x454] ss:$36 sps:$4 sm:$0xff]  }
 0x12c   : > { %v3399_v21 = vpop.f32.mrf.mxu0  ;;  %v3487_v23 = vpop.f32.mrf.mxu1  ;;  %2318 = vmatmul.mubr.bf16.gmra.mxu1 %v4140_v7  ;;  %3840 = vmatmul.mubr.bf16.gmra.mxu0 %v4144_v8  ;;  %v4158_v7 = vld [vmem:[%s4234_s13 + $0x410] ss:$36 sps:$4 sm:$0xff]  }
 0x12d   : > { %v4642_v24 = vadd.f32 %v3486_v34, %v1768_v17  ;;  %2325 = vmatprep.mubr.bf16.mxu1 %v4147_v11  ;;  %3843 = vmatprep.mubr.bf16.mxu0 %v4148_v60  ;;  %v1784_v60 = vadd.f32 %v4608_v30, %v4578_v48 }
 0x12e   : > { %v3400_v25 = vpop.f32.mrf.mxu0  ;;  %v3488_v26 = vpop.f32.mrf.mxu1 }
 0x12f   : > { %v4646_v27 = vadd.f32 %v3400_v25, %v3399_v21  ;;  %v3489_v2 = vadd.f32 %v3488_v26, %v3487_v23  ;;  %v1789_v25 = vadd.f32 %v4614_v38, %v4578_v48 }
 0x130   : > { %v3402_v31 = vpop.f32.mrf.mxu0  ;;  %v3490_v32 = vpop.f32.mrf.mxu1 }
 0x131   : > { %v4650_v12 = vadd.f32 %v3489_v2, %v1773_v44 }
 0x132   : > { %v3403_v41 = vpop.f32.mrf.mxu0  ;;  %v3491_v42 = vpop.f32.mrf.mxu1 }
 0x133   : > { %v4656_v47 = vadd.f32 %v3403_v41, %v3402_v31  ;;  %v3492_v54 = vadd.f32 %v3491_v42, %v3490_v32  ;;  %v4155_v31 = vld [vmem:[%s4234_s13 + $0x450] ss:$36 sps:$4 sm:$0xff]   ;;  %v4159_v32 = vld [vmem:[%s4234_s13 + $0x458] ss:$36 sps:$4 sm:$0xff]   ;;  %s2875_s13 = sshll.u32 %s5108_s19, 2 }
 0x134   : > { %v3405_v49 = vpop.f32.mrf.mxu0  ;;  %v3493_v52 = vpop.f32.mrf.mxu1  ;;  %2326 = vmatmul.mubr.bf16.gmra.mxu1 %v4145_v36  ;;  %3844 = vmatmul.mubr.bf16.gmra.mxu0 %v4149_v37  ;;  %s4923_s5 = scalar_lea.vmem %s5079_s3, %s2875_s13  ;;  %s4971_s8 = scalar_lea.vmem %s5080_s4, %s2875_s13 }
 0x135   : > { %v4658_v53 = vadd.f32 %v3492_v54, %v1776_v43  ;;  %2333 = vmatprep.mubr.bf16.mxu1 %v4152_v39  ;;  %3847 = vmatprep.mubr.bf16.mxu0 %v4153_v40  ;;  %v1792_v40 = vadd.f32 %v4624_v56, %v4578_v48 }
 0x136   : > { %v3406_v55 = vpop.f32.mrf.mxu0  ;;  %v3494_v18 = vpop.f32.mrf.mxu1 }
 0x137   : > { %v4662_v57 = vadd.f32 %v3406_v55, %v3405_v49  ;;  %v3495_v58 = vadd.f32 %v3494_v18, %v3493_v52  ;;  %v1797_v55 = vadd.f32 %v4630_v1, %v4578_v48 }
 0x138   : > { %v3408_v63 = vpop.f32.mrf.mxu0  ;;  %v3496_v0 = vpop.f32.mrf.mxu1 }
 0x139   : > { %v4666_v5 = vadd.f32 %v3495_v58, %v1781_v6 }
 0x13a   : > { %v3409_v8 = vpop.f32.mrf.mxu0  ;;  %v3497_v11 = vpop.f32.mrf.mxu1 }
 0x13b   : > { %v4672_v15 = vadd.f32 %v3409_v8, %v3408_v63  ;;  %v3498_v14 = vadd.f32 %v3497_v11, %v3496_v0 }
 0x13c   : > { %v3411_v16 = vpop.f32.mrf.mxu0  ;;  %v3499_v17 = vpop.f32.mrf.mxu1  ;;  %2334 = vmatmul.mubr.bf16.gmra.mxu1 %v4150_v28  ;;  %3848 = vmatmul.mubr.bf16.gmra.mxu0 %v4154_v4  ;;  %v1800_v4 = vadd.f32 %v4640_v20, %v4578_v48 }
 0x13d   : > { %v4674_v34 = vadd.f32 %v3498_v14, %v1784_v60  ;;  %2341 = vmatprep.mubr.bf16.mxu1 %v4157_v50  ;;  %3851 = vmatprep.mubr.bf16.mxu0 %v4158_v7 }
 0x13e   : > { %v3412_v21 = vpop.f32.mrf.mxu0  ;;  %v3500_v23 = vpop.f32.mrf.mxu1 }
 0x13f   : > { %v4678_v26 = vadd.f32 %v3412_v21, %v3411_v16  ;;  %v3501_v30 = vadd.f32 %v3500_v23, %v3499_v17  ;;  %v1805_v16 = vadd.f32 %v4646_v27, %v4578_v48 }
 0x140   : > { %v3414_v44 = vpop.f32.mrf.mxu0  ;;  %v3502_v2 = vpop.f32.mrf.mxu1 }
 0x141   : > { %v4682_v36 = vadd.f32 %v3501_v30, %v1789_v25 }
 0x142   : > { %v3415_v37 = vpop.f32.mrf.mxu0  ;;  %v3503_v39 = vpop.f32.mrf.mxu1 }
 0x143   : > { %v4686_v41 = vadd.f32 %v3415_v37, %v3414_v44  ;;  %v3504_v42 = vadd.f32 %v3503_v39, %v3502_v2 }
 0x144   : > { %v3417_v43 = vpop.f32.mrf.mxu0  ;;  %v3505_v54 = vpop.f32.mrf.mxu1  ;;  %2342 = vmatmul.mubr.bf16.gmra.mxu1 %v4155_v31  ;;  %3852 = vmatmul.mubr.bf16.gmra.mxu0 %v4159_v32  ;;  %v1808_v31 = vadd.f32 %v4656_v47, %v4578_v48 }
 0x145   : > { %v4688_v38 = vadd.f32 %v3504_v42, %v1792_v40 }
 0x146   : > { %v3418_v49 = vpop.f32.mrf.mxu0  ;;  %v3506_v52 = vpop.f32.mrf.mxu1 }
 0x147   : > { %v4692_v18 = vadd.f32 %v3418_v49, %v3417_v43  ;;  %v3507_v6 = vadd.f32 %v3506_v52, %v3505_v54 }
 0x148   : > { %v3420_v58 = vpop.f32.mrf.mxu0  ;;  %v3508_v63 = vpop.f32.mrf.mxu1 }
 0x149   : > { %v4694_v56 = vadd.f32 %v3507_v6, %v1797_v55 }
 0x14a   : > { %v3421_v0 = vpop.f32.mrf.mxu0  ;;  %v3509_v28 = vpop.f32.mrf.mxu1 }
 0x14b   : > { %v4698_v50 = vadd.f32 %v3421_v0, %v3420_v58  ;;  %v3510_v7 = vadd.f32 %v3509_v28, %v3508_v63 }
 0x14c   : > { %v3511_v8 = vpop.f32.mrf.mxu1  ;;  %v3575_v11 = vpop.f32.mrf.mxu0 }
 0x14d   : > { %v4700_v60 = vadd.f32 %v3510_v7, %v1800_v4 }
 0x14e   : > { %v3512_v1 = vpop.f32.mrf.mxu1  ;;  %v3576_v14 = vpop.f32.mrf.mxu0 }
 0x14f   : > { %v3513_v17 = vadd.f32 %v3512_v1, %v3511_v8  ;;  %v3577_v21 = vadd.f32 %v3576_v14, %v3575_v11 }
 0x150   : > { %v3514_v23 = vpop.f32.mrf.mxu1  ;;  %v3578_v25 = vpop.f32.mrf.mxu0 }
 0x151   : > { %v4704_v30 = vadd.f32 %v3513_v17, %v1805_v16  ;;  %v4707_v20 = vadd.f32 %v3577_v21, %v4586_v62  ;;  %v1813_v62 = vadd.f32 %v4662_v57, %v4578_v48 }
 0x152   : > { %v3515_v44 = vpop.f32.mrf.mxu1  ;;  %v3579_v2 = vpop.f32.mrf.mxu0 }
 0x153   : > { %v3516_v32 = vadd.f32 %v3515_v44, %v3514_v23  ;;  %v3580_v37 = vadd.f32 %v3579_v2, %v3578_v25 }
 0x154   : > { %v3517_v39 = vpop.f32.mrf.mxu1  ;;  %v3581_v40 = vpop.f32.mrf.mxu0 }
 0x155   : > { %v4711_v42 = vadd.f32 %v3516_v32, %v1808_v31  ;;  %v4714_v27 = vadd.f32 %v3580_v37, %v4594_v9  ;;  %v1816_v9 = vadd.f32 %v4672_v15, %v4578_v48 }
 0x156   : > { %v3518_v43 = vpop.f32.mrf.mxu1  ;;  %v3582_v54 = vpop.f32.mrf.mxu0 }
 0x157   : > { %v3519_v49 = vadd.f32 %v3518_v43, %v3517_v39  ;;  %v3583_v52 = vadd.f32 %v3582_v54, %v3581_v40 }
 0x158   : > { %v3520_v55 = vpop.f32.mrf.mxu1  ;;  %v3584_v6 = vpop.f32.mrf.mxu0 }
 0x159   : > { %v4718_v58 = vadd.f32 %v3519_v49, %v1813_v62  ;;  %v4721_v47 = vadd.f32 %v3583_v52, %v4602_v22  ;;  %v1821_v22 = vadd.f32 %v4678_v26, %v4578_v48 }
 0x15a   : > { %v3521_v63 = vpop.f32.mrf.mxu1  ;;  %v3585_v0 = vpop.f32.mrf.mxu0 }
 0x15b   : > { %v3522_v28 = vadd.f32 %v3521_v63, %v3520_v55  ;;  %v3586_v4 = vadd.f32 %v3585_v0, %v3584_v6 }
 0x15c   : > { %v3523_v7 = vpop.f32.mrf.mxu1  ;;  %v3587_v8 = vpop.f32.mrf.mxu0 }
 0x15d   : > { %v4725_v11 = vadd.f32 %v3522_v28, %v1816_v9  ;;  %v4728_v57 = vadd.f32 %v3586_v4, %v4610_v33  ;;  %v1824_v33 = vadd.f32 %v4686_v41, %v4578_v48 }
 0x15e   : > { %v3524_v1 = vpop.f32.mrf.mxu1  ;;  %v3588_v14 = vpop.f32.mrf.mxu0 }
 0x15f   : > { %v3525_v16 = vadd.f32 %v3524_v1, %v3523_v7  ;;  %v3589_v17 = vadd.f32 %v3588_v14, %v3587_v8 }
 0x160   : > { %v3526_v21 = vpop.f32.mrf.mxu1  ;;  %v3590_v23 = vpop.f32.mrf.mxu0 }
 0x161   : > { %v4732_v25 = vadd.f32 %v3525_v16, %v1821_v22  ;;  %v4735_v15 = vadd.f32 %v3589_v17, %v4618_v46  ;;  %v1829_v46 = vadd.f32 %v4692_v18, %v4578_v48 }
 0x162   : > { %v3527_v44 = vpop.f32.mrf.mxu1  ;;  %v3591_v2 = vpop.f32.mrf.mxu0 }
 0x163   : > { %v3528_v31 = vadd.f32 %v3527_v44, %v3526_v21  ;;  %v3592_v32 = vadd.f32 %v3591_v2, %v3590_v23 }
 0x164   : > { %v3529_v37 = vpop.f32.mrf.mxu1  ;;  %v3593_v39 = vpop.f32.mrf.mxu0 }
 0x165   : > { %v4739_v40 = vadd.f32 %v3528_v31, %v1824_v33  ;;  %v4742_v26 = vadd.f32 %v3592_v32, %v4626_v59  ;;  %v1832_v59 = vadd.f32 %v4698_v50, %v4578_v48 }
 0x166   : > { %v3530_v43 = vpop.f32.mrf.mxu1  ;;  %v3594_v54 = vpop.f32.mrf.mxu0 }
 0x167   : > { %v3531_v62 = vadd.f32 %v3530_v43, %v3529_v37  ;;  %v3595_v49 = vadd.f32 %v3594_v54, %v3593_v39 }
 0x168   : > { %v3532_v52 = vpop.f32.mrf.mxu1  ;;  %v3596_v55 = vpop.f32.mrf.mxu0 }
 0x169   : > { %v4746_v6 = vadd.f32 %v3531_v62, %v1829_v46  ;;  %v4749_v41 = vadd.f32 %v3595_v49, %v4634_v10  ;;  %v1837_v10 = vadd.f32 %v4529_v51, %v4578_v48 }
 0x16a   : > { %v3533_v63 = vpop.f32.mrf.mxu1  ;;  %v3597_v0 = vpop.f32.mrf.mxu0 }
 0x16b   : > { %v3534_v9 = vadd.f32 %v3533_v63, %v3532_v52  ;;  %v3598_v28 = vadd.f32 %v3597_v0, %v3596_v55 }
 0x16c   : > { %v3535_v4 = vpop.f32.mrf.mxu1  ;;  %v3599_v7 = vpop.f32.mrf.mxu0 }
 0x16d   : > { %v4753_v8 = vadd.f32 %v3534_v9, %v1832_v59  ;;  %v4756_v18 = vadd.f32 %v3598_v28, %v4642_v24  ;;  %v1840_v24 = vadd.f32 %v4537_v61, %v4578_v48 }
 0x16e   : > { %v3536_v1 = vpop.f32.mrf.mxu1  ;;  %v3600_v14 = vpop.f32.mrf.mxu0 }
 0x16f   : > { %v3537_v22 = vadd.f32 %v3536_v1, %v3535_v4  ;;  %v3601_v16 = vadd.f32 %v3600_v14, %v3599_v7 }
 0x170   : > { %v3538_v17 = vpop.f32.mrf.mxu1  ;;  %v3602_v21 = vpop.f32.mrf.mxu0 }
 0x171   : > { %v4760_v23 = vadd.f32 %v3537_v22, %v1837_v10  ;;  %v4763_v50 = vadd.f32 %v3601_v16, %v4650_v12  ;;  %v1845_v12 = vadd.f32 %v4541_v3, %v4578_v48 }
 0x172   : > { %v3539_v44 = vpop.f32.mrf.mxu1  ;;  %v3603_v2 = vpop.f32.mrf.mxu0 }
 0x173   : > { %v3540_v33 = vadd.f32 %v3539_v44, %v3538_v17  ;;  %v3604_v31 = vadd.f32 %v3603_v2, %v3602_v21 }
 0x174   : > { %v3541_v32 = vpop.f32.mrf.mxu1  ;;  %v3605_v37 = vpop.f32.mrf.mxu0 }
 0x175   : > { %v4767_v39 = vadd.f32 %v3540_v33, %v1840_v24  ;;  %v4770_v51 = vadd.f32 %v3604_v31, %v4658_v53  ;;  %v1848_v53 = vadd.f32 %v4549_v13, %v4578_v48 }
 0x176   : > { %v3542_v43 = vpop.f32.mrf.mxu1  ;;  %v3606_v54 = vpop.f32.mrf.mxu0 }
 0x177   : > { %v3543_v46 = vadd.f32 %v3542_v43, %v3541_v32  ;;  %v3607_v62 = vadd.f32 %v3606_v54, %v3605_v37 }
 0x178   : > { %v3544_v49 = vpop.f32.mrf.mxu1  ;;  %v3608_v52 = vpop.f32.mrf.mxu0 }
 0x179   : > { %v4774_v55 = vadd.f32 %v3543_v46, %v1845_v12  ;;  %v4777_v61 = vadd.f32 %v3607_v62, %v4666_v5  ;;  %v1853_v5 = vadd.f32 %v4553_v19, %v4578_v48 }
 0x17a   : > { %v3545_v63 = vpop.f32.mrf.mxu1  ;;  %v3609_v0 = vpop.f32.mrf.mxu0 }
 0x17b   : > { %v3546_v59 = vadd.f32 %v3545_v63, %v3544_v49  ;;  %v3610_v9 = vadd.f32 %v3609_v0, %v3608_v52 }
 0x17c   : > { %v3547_v28 = vpop.f32.mrf.mxu1  ;;  %v3611_v4 = vpop.f32.mrf.mxu0 }
 0x17d   : > { %v4781_v7 = vadd.f32 %v3546_v59, %v1848_v53  ;;  %v4784_v3 = vadd.f32 %v3610_v9, %v4674_v34  ;;  %v1856_v34 = vadd.f32 %v4561_v29, %v4578_v48 }
 0x17e   : > { %v3548_v1 = vpop.f32.mrf.mxu1  ;;  %v3612_v14 = vpop.f32.mrf.mxu0 }
 0x17f   : > { %v3549_v10 = vadd.f32 %v3548_v1, %v3547_v28  ;;  %v3613_v22 = vadd.f32 %v3612_v14, %v3611_v4 }
 0x180   : > { %v3550_v16 = vpop.f32.mrf.mxu1  ;;  %v3614_v17 = vpop.f32.mrf.mxu0 }
 0x181   : > { %v4788_v21 = vadd.f32 %v3549_v10, %v1853_v5  ;;  %v4791_v13 = vadd.f32 %v3613_v22, %v4682_v36  ;;  %v1861_v36 = vadd.f32 %v4565_v35, %v4578_v48 }
 0x182   : > { %v3551_v44 = vpop.f32.mrf.mxu1  ;;  %v3615_v2 = vpop.f32.mrf.mxu0 }
 0x183   : > { %v3552_v24 = vadd.f32 %v3551_v44, %v3550_v16  ;;  %v3616_v33 = vadd.f32 %v3615_v2, %v3614_v17 }
 0x184   : > { %v3553_v31 = vpop.f32.mrf.mxu1  ;;  %v3617_v32 = vpop.f32.mrf.mxu0 }
 0x185   : > { %v4795_v37 = vadd.f32 %v3552_v24, %v1856_v34  ;;  %v4798_v19 = vadd.f32 %v3616_v33, %v4688_v38  ;;  %v1864_v38 = vadd.f32 %v4573_v45, %v4578_v48 }
 0x186   : > { %v3554_v43 = vpop.f32.mrf.mxu1  ;;  %v3618_v54 = vpop.f32.mrf.mxu0 }
 0x187   : > { %v3555_v12 = vadd.f32 %v3554_v43, %v3553_v31  ;;  %v3619_v46 = vadd.f32 %v3618_v54, %v3617_v32 }
 0x188   : > { %v3556_v62 = vpop.f32.mrf.mxu1  ;;  %v3620_v49 = vpop.f32.mrf.mxu0 }
 0x189   : > { %v4802_v52 = vadd.f32 %v3555_v12, %v1861_v36  ;;  %v4805_v29 = vadd.f32 %v3619_v46, %v4694_v56 }
 0x18a   : > { %v3557_v63 = vpop.f32.mrf.mxu1  ;;  %v3621_v0 = vpop.f32.mrf.mxu0 }
 0x18b   : > { %v3558_v53 = vadd.f32 %v3557_v63, %v3556_v62  ;;  %v3622_v59 = vadd.f32 %v3621_v0, %v3620_v49 }
 0x18c   : > { %v3623_v9 = vpop.f32.mrf.mxu0  ;;  %v3687_v28 = vpop.f32.mrf.mxu1 }
 0x18d   : > { %v4809_v4 = vadd.f32 %v3558_v53, %v1864_v38  ;;  %v4812_v35 = vadd.f32 %v3622_v59, %v4700_v60 }
 0x18e   : > { %v3624_v1 = vpop.f32.mrf.mxu0  ;;  %v3688_v14 = vpop.f32.mrf.mxu1 }
 0x18f   : > { %v3625_v5 = vadd.f32 %v3624_v1, %v3623_v9  ;;  %v3689_v10 = vadd.f32 %v3688_v14, %v3687_v28 }
 0x190   : > { %v3626_v56 = vpop.f32.mrf.mxu0  ;;  %v4814_v22 = vpop.f32.mrf.mxu1 }
 0x191   : > { %v4817_v16 = vadd.f32 %v3625_v5, %v4704_v30  ;;  %v4820_v45 = vadd.f32 %v3689_v10, %v4707_v20 }
 0x192   : > { %v3627_v48 = vpop.f32.mrf.mxu0  ;;  %v4822_v17 = vpop.f32.mrf.mxu1 }
 0x193   : > { %v3628_v44 = vadd.f32 %v3627_v48, %v3626_v56 }
 0x194   : > { %v3629_v2 = vpop.f32.mrf.mxu0  ;;  %v4824_v60 = vpop.f32.mrf.mxu1 }
 0x195   : > { %v4827_v34 = vadd.f32 %v3628_v44, %v4711_v42 }
 0x196   : > { %v3630_v24 = vpop.f32.mrf.mxu0  ;;  %v4829_v33 = vpop.f32.mrf.mxu1 }
 0x197   : > { %5081 = vst [vmem:[#allocation2_spill] sm:$0xff] %v4827_v34  ;;  %v3631_v31 = vadd.f32 %v3630_v24, %v3629_v2 }
 0x198   : > { %v3632_v32 = vpop.f32.mrf.mxu0  ;;  %v4831_v30 = vpop.f32.mrf.mxu1 }
 0x199   : > { %v4834_v20 = vadd.f32 %v3631_v31, %v4718_v58 }
 0x19a   : > { %v3633_v43 = vpop.f32.mrf.mxu0  ;;  %v4836_v54 = vpop.f32.mrf.mxu1 }
 0x19b   : > { %v3634_v36 = vadd.f32 %v3633_v43, %v3632_v32 }
 0x19c   : > { %v3635_v12 = vpop.f32.mrf.mxu0  ;;  %v4838_v46 = vpop.f32.mrf.mxu1 }
 0x19d   : > { %v4841_v42 = vadd.f32 %v3634_v36, %v4725_v11 }
 0x19e   : > { %v3636_v62 = vpop.f32.mrf.mxu0  ;;  %v4843_v49 = vpop.f32.mrf.mxu1 }
 0x19f   : > { %v3637_v63 = vadd.f32 %v3636_v62, %v3635_v12 }
 0x1a0   : > { %v3638_v0 = vpop.f32.mrf.mxu0  ;;  %v4845_v38 = vpop.f32.mrf.mxu1 }
 0x1a1   : > { %v4848_v58 = vadd.f32 %v3637_v63, %v4732_v25 }
 0x1a2   : > { %v3639_v53 = vpop.f32.mrf.mxu0  ;;  %v4850_v59 = vpop.f32.mrf.mxu1 }
 0x1a3   : > { %5082 = vst [vmem:[#allocation3_spill] sm:$0xff] %v4848_v58  ;;  %v3640_v9 = vadd.f32 %v3639_v53, %v3638_v0  ;;  %v3692_v58 = vadd.f32 %v4822_v17, %v4814_v22 }
 0x1a4   : > { %v3641_v28 = vpop.f32.mrf.mxu0  ;;  %v4852_v1 = vpop.f32.mrf.mxu1 }
 0x1a5   : > { %v4855_v11 = vadd.f32 %v3640_v9, %v4739_v40 }
 0x1a6   : > { %v3642_v14 = vpop.f32.mrf.mxu0  ;;  %v4857_v5 = vpop.f32.mrf.mxu1 }
 0x1a7   : > { %5083 = vst [vmem:[#allocation4_spill] sm:$0xff] %v4855_v11  ;;  %v3643_v10 = vadd.f32 %v3642_v14, %v3641_v28 }
 0x1a8   : > { %v3644_v56 = vpop.f32.mrf.mxu0  ;;  %v4859_v48 = vpop.f32.mrf.mxu1 }
 0x1a9   : > { %v4862_v25 = vadd.f32 %v3643_v10, %v4746_v6 }
 0x1aa   : > { %v3645_v44 = vpop.f32.mrf.mxu0  ;;  %v4864_v2 = vpop.f32.mrf.mxu1 }
 0x1ab   : > { %5084 = vst [vmem:[#allocation5_spill] sm:$0xff] %v4862_v25  ;;  %v3646_v24 = vadd.f32 %v3645_v44, %v3644_v56 }
 0x1ac   : > { %v3647_v31 = vpop.f32.mrf.mxu0  ;;  %v4866_v32 = vpop.f32.mrf.mxu1 }
 0x1ad   : > { %v4869_v40 = vadd.f32 %v3646_v24, %v4753_v8 }
 0x1ae   : > { %v3648_v43 = vpop.f32.mrf.mxu0  ;;  %v4871_v36 = vpop.f32.mrf.mxu1 }
 0x1af   : > { %5085 = vst [vmem:[#allocation6_spill] sm:$0xff] %v4869_v40  ;;  %v3649_v12 = vadd.f32 %v3648_v43, %v3647_v31 }
 0x1b0   : > { %v3650_v62 = vpop.f32.mrf.mxu0  ;;  %v4873_v63 = vpop.f32.mrf.mxu1 }
 0x1b1   : > { %v4876_v6 = vadd.f32 %v3649_v12, %v4760_v23 }
 0x1b2   : > { %v3651_v0 = vpop.f32.mrf.mxu0  ;;  %v4878_v53 = vpop.f32.mrf.mxu1 }
 0x1b3   : > { %5086 = vst [vmem:[#allocation7_spill] sm:$0xff] %v4876_v6  ;;  %v3652_v9 = vadd.f32 %v3651_v0, %v3650_v62 }
 0x1b4   : > { %v3653_v28 = vpop.f32.mrf.mxu0  ;;  %v4880_v14 = vpop.f32.mrf.mxu1 }
 0x1b5   : > { %v4883_v8 = vadd.f32 %v3652_v9, %v4767_v39 }
 0x1b6   : > { %v3654_v10 = vpop.f32.mrf.mxu0  ;;  %v4885_v56 = vpop.f32.mrf.mxu1 }
 0x1b7   : > { %5087 = vst [vmem:[#allocation8_spill] sm:$0xff] %v4883_v8  ;;  %v3655_v44 = vadd.f32 %v3654_v10, %v3653_v28 }
 0x1b8   : > { %v3656_v24 = vpop.f32.mrf.mxu0  ;;  %v4887_v31 = vpop.f32.mrf.mxu1 }
 0x1b9   : > { %v4890_v23 = vadd.f32 %v3655_v44, %v4774_v55 }
 0x1ba   : > { %v3657_v43 = vpop.f32.mrf.mxu0  ;;  %v4892_v12 = vpop.f32.mrf.mxu1 }
 0x1bb   : > { %5088 = vst [vmem:[#allocation9_spill] sm:$0xff] %v4890_v23  ;;  %v3658_v62 = vadd.f32 %v3657_v43, %v3656_v24 }
 0x1bc   : > { %v3659_v0 = vpop.f32.mrf.mxu0  ;;  %v4894_v6 = vpop.f32.mrf.mxu1 }
 0x1bd   : > { %v4897_v39 = vadd.f32 %v3658_v62, %v4781_v7 }
 0x1be   : > { %v3660_v9 = vpop.f32.mrf.mxu0  ;;  %v4899_v8 = vpop.f32.mrf.mxu1 }
 0x1bf   : > { %5089 = vst [vmem:[#allocation10_spill] sm:$0xff] %v4897_v39  ;;  %v3661_v28 = vadd.f32 %v3660_v9, %v3659_v0  ;;  %v3695_v0 = vadd.f32 %v4829_v33, %v4824_v60  ;;  %v3698_v60 = vadd.f32 %v4836_v54, %v4831_v30 }
 0x1c0   : > { %v3662_v10 = vpop.f32.mrf.mxu0  ;;  %v4901_v11 = vpop.f32.mrf.mxu1 }
 0x1c1   : > { %v4904_v55 = vadd.f32 %v3661_v28, %v4788_v21 }
 0x1c2   : > { %v3663_v44 = vpop.f32.mrf.mxu0  ;;  %v4906_v23 = vpop.f32.mrf.mxu1 }
 0x1c3   : > { %5090 = vst [vmem:[#allocation11_spill] sm:$0xff] %v4904_v55  ;;  %v3664_v24 = vadd.f32 %v3663_v44, %v3662_v10 }
 0x1c4   : > { %v3665_v43 = vpop.f32.mrf.mxu0  ;;  %v4908_v40 = vpop.f32.mrf.mxu1 }
 0x1c5   : > { %v4912_v7 = vadd.f32 %v3664_v24, %v4795_v37  ;;  %v3305_v24 = vld [vmem:[%s4923_s5 + $0x8] sm:$0xff]  }
 0x1c6   : > { %v3666_v62 = vpop.f32.mrf.mxu0  ;;  %v4914_v39 = vpop.f32.mrf.mxu1 }
 0x1c7   : > { %5091 = vst [vmem:[#allocation12_spill] sm:$0xff] %v4912_v7  ;;  %v3667_v9 = vadd.f32 %v3666_v62, %v3665_v43  ;;  %v2232_v43 = vadd.f32 %v3695_v0, %v4721_v47  ;;  %v3162_v62 = vld [vmem:[%s4923_s5] sm:$0xff]   ;;  %v3707_v47 = vadd.f32 %v4857_v5, %v4852_v1  ;;  %v2235_v0 = vadd.f32 %v3698_v60, %v4728_v57  ;;  %v3306_v60 = vld [vmem:[%s4923_s5 + $0x10] sm:$0xff]  }
 0x1c8   : > { %v3668_v21 = vpop.f32.mrf.mxu0  ;;  %v4925_v28 = vpop.f32.mrf.mxu1  ;;  %v3163_v30 = vunpack.c.l.bf16 %v3162_v62  ;;  %v3710_v1 = vadd.f32 %v4864_v2, %v4859_v48 }
 0x1c9   : > { %v4928_v37 = vadd.f32 %v3667_v9, %v4802_v52 }
 0x1ca   : > { %v3669_v10 = vpop.f32.mrf.mxu0  ;;  %v4930_v44 = vpop.f32.mrf.mxu1 }
 0x1cb   : > { %5092 = vst [vmem:[#allocation13_spill] sm:$0xff] %v4928_v37  ;;  %v3670_v33 = vadd.f32 %v3669_v10, %v3668_v21  ;;  %v3167_v37 = vunpack.c.l.bf16 %v3305_v24  ;;  %v3168_v21 = vunpack.c.h.bf16 %v3305_v24 }
 0x1cc   : > { %v4937_v7 = vpop.f32.mrf.mxu1  ;;  %v3825_v55 = vpop.f32.mrf.mxu0 }
 0x1cd   : > { %v4942_v52 = vadd.f32 %v3670_v33, %v4809_v4  ;;  %v2393_v9 = vadd.f32 %v3825_v55, %v2232_v43  ;;  %v2227_v55 = vadd.f32 %v3692_v58, %v4714_v27  ;;  %v3164_v33 = vunpack.c.h.bf16 %v3162_v62  ;;  %v3307_v43 = vld [vmem:[%s4923_s5 + $0x18] sm:$0xff]  }
 0x1ce   : > { %v4944_v25 = vpop.f32.mrf.mxu1  ;;  %v2384_v34 = vpop.f32.mrf.mxu0  ;;  %v3704_v27 = vadd.f32 %v4850_v59, %v4845_v38  ;;  %v3171_v59 = vunpack.c.l.bf16 %v3306_v60 }
 0x1cf   : > { %5093 = vst [vmem:[#allocation14_spill] sm:$0xff] %v4942_v52  ;;  %v2385_v54 = vadd.f32 %v2384_v34, %v4820_v45  ;;  %v2577_v17 = vadd.f32 %v3167_v37, %v2393_v9  ;;  %v3701_v52 = vadd.f32 %v4843_v49, %v4838_v46  ;;  %v2248_v37 = vadd.f32 %v3707_v47, %v4749_v41 }
 0x1d0   : > { %v4950_v22 = vpop.f32.mrf.mxu1  ;;  %v3826_v4 = vpop.f32.mrf.mxu0  ;;  %v3175_v46 = vunpack.c.l.bf16 %v3307_v43  ;;  %v2251_v47 = vadd.f32 %v3710_v1, %v4756_v18  ;;  %v2243_v18 = vadd.f32 %v3704_v27, %v4742_v26  ;;  %v3716_v26 = vadd.f32 %v4878_v53, %v4873_v63 }
 0x1d1   : > { %v2396_v10 = vadd.f32 %v3826_v4, %v2235_v0  ;;  %v2575_v34 = vadd.f32 %v3163_v30, %v2385_v54  ;;  %v2609_v49 = vmax.f32 %v2577_v17, 0.0  ;;  %v2240_v30 = vadd.f32 %v3701_v52, %v4735_v15 }
 0x1d2   : > { %v4958_v45 = vpop.f32.mrf.mxu1  ;;  %v2387_v57 = vpop.f32.mrf.mxu0  ;;  %v3176_v54 = vunpack.c.h.bf16 %v3307_v43  ;;  %v3719_v0 = vadd.f32 %v4885_v56, %v4880_v14  ;;  %v3309_v43 = vld [vmem:[%s4923_s5 + $0x28] sm:$0xff]   ;;  %v3713_v14 = vadd.f32 %v4871_v36, %v4866_v32  ;;  %v3722_v56 = vadd.f32 %v4892_v12, %v4887_v31 }
 0x1d3   : > { %v2578_v5 = vadd.f32 %v3168_v21, %v2396_v10  ;;  %v2388_v24 = vadd.f32 %v2387_v57, %v2227_v55  ;;  %v2607_v21 = vmax.f32 %v2575_v34, 0.0  ;;  %v3172_v57 = vunpack.c.h.bf16 %v3306_v60 }
 0x1d4   : > { %v4964_v58 = vpop.f32.mrf.mxu1  ;;  %v3829_v62 = vpop.f32.mrf.mxu0  ;;  %v3183_v32 = vunpack.c.l.bf16 %v3309_v43  ;;  %v3731_v63 = vadd.f32 %v4914_v39, %v4908_v40  ;;  %v3725_v40 = vadd.f32 %v4899_v8, %v4894_v6  ;;  %v3734_v39 = vadd.f32 %v4930_v44, %v4925_v28 }
 0x1d5   : > { %v2610_v9 = vmax.f32 %v2578_v5, 0.0  ;;  %v2576_v48 = vadd.f32 %v3164_v33, %v2388_v24  ;;  %v2409_v2 = vadd.f32 %v3829_v62, %v2248_v37  ;;  %v2264_v62 = vadd.f32 %v3719_v0, %v4777_v61 }
 0x1d6   : > { %v4973_v41 = vpop.f32.mrf.mxu1  ;;  %v2400_v38 = vpop.f32.mrf.mxu0  ;;  %v2267_v61 = vadd.f32 %v3722_v56, %v4784_v3  ;;  %v2259_v3 = vadd.f32 %v3716_v26, %v4770_v51  ;;  %v3310_v56 = vld [vmem:[%s4923_s5 + $0x30] sm:$0xff]   ;;  %v3728_v51 = vadd.f32 %v4906_v23, %v4901_v11 }
 0x1d7   : > { %v3233_v4 = vpack.c.bf16 %v2610_v9, %v2609_v49  ;;  %v2608_v17 = vmax.f32 %v2576_v48, 0.0  ;;  %v2401_v10 = vadd.f32 %v2400_v38, %v2240_v30  ;;  %v2581_v52 = vadd.f32 %v3175_v46, %v2409_v2  ;;  %v3308_v46 = vld [vmem:[%s4923_s5 + $0x20] sm:$0xff]  }
 0x1d8   : > { %v4979_v55 = vpop.f32.mrf.mxu1  ;;  %v3830_v33 = vpop.f32.mrf.mxu0  ;;  %v2256_v2 = vadd.f32 %v3713_v14, %v4763_v50  ;;  %v3179_v38 = vunpack.c.l.bf16 %v3308_v46  ;;  %v2280_v14 = vadd.f32 %v3731_v63, %v4805_v29  ;;  %v3187_v26 = vunpack.c.l.bf16 %v3310_v56 }
 0x1d9   : > { %3320 = vst [vmem:[%s4971_s8 + $0x8] sm:$0xff] %v3233_v4   ;;  %v3228_v15 = vpack.c.bf16 %v2608_v17, %v2607_v21  ;;  %v2412_v5 = vadd.f32 %v3830_v33, %v2251_v47  ;;  %v2579_v24 = vadd.f32 %v3171_v59, %v2401_v10  ;;  %v2613_v36 = vmax.f32 %v2581_v52, 0.0 }
 0x1da   : > { %v4988_v1 = vpop.f32.mrf.mxu1  ;;  %v2403_v34 = vpop.f32.mrf.mxu0  ;;  %v3184_v59 = vunpack.c.h.bf16 %v3309_v43  ;;  %v3180_v17 = vunpack.c.h.bf16 %v3308_v46  ;;  %v2283_v29 = vadd.f32 %v3734_v39, %v4812_v35  ;;  %v3743_v11 = vadd.f32 %v4973_v41, %v4964_v58  ;;  %v3313_v35 = vld [vmem:[%s4923_s5 + $0x48] sm:$0xff]  }
 0x1db   : > { %3229 = vst [vmem:[%s4971_s8] sm:$0xff] %v3228_v15   ;;  %v2582_v37 = vadd.f32 %v3176_v54, %v2412_v5  ;;  %v2404_v60 = vadd.f32 %v2403_v34, %v2243_v18  ;;  %v2611_v53 = vmax.f32 %v2579_v24, 0.0  ;;  %v3746_v58 = vadd.f32 %v4988_v1, %v4979_v55 }
 0x1dc   : > { %v4995_v27 = vpop.f32.mrf.mxu1  ;;  %v3833_v49 = vpop.f32.mrf.mxu0  ;;  %v3200_v39 = vunpack.c.h.bf16 %v3313_v35 }
 0x1dd   : > { %v2614_v9 = vmax.f32 %v2582_v37, 0.0  ;;  %v2580_v31 = vadd.f32 %v3172_v57, %v2404_v60  ;;  %v2425_v12 = vadd.f32 %v3833_v49, %v2264_v62  ;;  %v3311_v57 = vld [vmem:[%s4923_s5 + $0x38] sm:$0xff]   ;;  %v2272_v62 = vadd.f32 %v3725_v40, %v4791_v13 }
 0x1de   : > { %v4997_v48 = vpop.f32.mrf.mxu1  ;;  %v2416_v30 = vpop.f32.mrf.mxu0  ;;  %v3191_v37 = vunpack.c.l.bf16 %v3311_v57  ;;  %v3192_v49 = vunpack.c.h.bf16 %v3311_v57 }
 0x1df   : > { %v3243_v47 = vpack.c.bf16 %v2614_v9, %v2613_v36  ;;  %v2612_v54 = vmax.f32 %v2580_v31, 0.0  ;;  %v2417_v0 = vadd.f32 %v2416_v30, %v2256_v2  ;;  %v2585_v10 = vadd.f32 %v3183_v32, %v2425_v12 }
 0x1e0   : > { %v5003_v21 = vpop.f32.mrf.mxu1  ;;  %v3834_v4 = vpop.f32.mrf.mxu0  ;;  %v3188_v2 = vunpack.c.h.bf16 %v3310_v56 }
 0x1e1   : > { %3322 = vst [vmem:[%s4971_s8 + $0x18] sm:$0xff] %v3243_v47   ;;  %v3238_v50 = vpack.c.bf16 %v2612_v54, %v2611_v53  ;;  %v2428_v33 = vadd.f32 %v3834_v4, %v2267_v61  ;;  %v2583_v5 = vadd.f32 %v3179_v38, %v2417_v0  ;;  %v2617_v6 = vmax.f32 %v2585_v10, 0.0  ;;  %v3312_v4 = vld [vmem:[%s4923_s5 + $0x40] sm:$0xff]  }
 0x1e2   : > { %v5012_v15 = vpop.f32.mrf.mxu1  ;;  %v2419_v52 = vpop.f32.mrf.mxu0  ;;  %v2275_v61 = vadd.f32 %v3728_v51, %v4798_v19  ;;  %v2296_v0 = vadd.f32 %v3743_v11, %v4834_v20  ;;  %v3199_v10 = vunpack.c.l.bf16 %v3313_v35  ;;  %v3195_v40 = vunpack.c.l.bf16 %v3312_v4 }
 0x1e3   : > { %3321 = vst [vmem:[%s4971_s8 + $0x10] sm:$0xff] %v3238_v50   ;;  %v2586_v18 = vadd.f32 %v3184_v59, %v2428_v33  ;;  %v2420_v43 = vadd.f32 %v2419_v52, %v2259_v3  ;;  %v2615_v23 = vmax.f32 %v2583_v5, 0.0  ;;  %v3737_v59 = vadd.f32 %v4944_v25, %v4937_v7 }
 0x1e4   : > { %v3753_v34 = vpop.f32.mrf.mxu1  ;;  %v3837_v24 = vpop.f32.mrf.mxu0  ;;  %v2299_v20 = vadd.f32 %v3746_v58, %v4841_v42  ;;  %v3196_v56 = vunpack.c.h.bf16 %v3312_v4  ;;  %v3749_v42 = vadd.f32 %v4997_v48, %v4995_v27  ;;  %v3752_v11 = vadd.f32 %v5012_v15, %v5003_v21 }
 0x1e5   : > { %v2618_v8 = vmax.f32 %v2586_v18, 0.0  ;;  %v2584_v60 = vadd.f32 %v3180_v17, %v2420_v43  ;;  %v2441_v28 = vadd.f32 %v3837_v24, %v2280_v14  ;;  %v3740_v17 = vadd.f32 %v4958_v45, %v4950_v22 }
 0x1e6   : > { %v3754_v44 = vpop.f32.mrf.mxu1  ;;  %v2432_v46 = vpop.f32.mrf.mxu0  ;;  %v2288_v3 = vadd.f32 %v3737_v59, %v4817_v16 }
 0x1e7   : > { %v3253_v32 = vpack.c.bf16 %v2618_v8, %v2617_v6  ;;  %v2616_v36 = vmax.f32 %v2584_v60, 0.0  ;;  %v2433_v9 = vadd.f32 %v2432_v46, %v2272_v62  ;;  %v2589_v30 = vadd.f32 %v3191_v37, %v2441_v28  ;;  %v5094_v37 = vld [vmem:[#allocation2_spill] sm:$0xff]  ;;  %v3315_v8 = vld [vmem:[%s4923_s5 + $0x58] sm:$0xff]  }
 0x1e8   : > { %v3756_v31 = vpop.f32.mrf.mxu1  ;;  %v3838_v12 = vpop.f32.mrf.mxu0  ;;  %v3755_v52 = vadd.f32 %v3754_v44, %v3753_v34  ;;  %v2291_v6 = vadd.f32 %v3740_v17, %v5094_v37  ;;  %v3208_v59 = vunpack.c.h.bf16 %v3315_v8 }
 0x1e9   : > { %3324 = vst [vmem:[%s4971_s8 + $0x28] sm:$0xff] %v3253_v32   ;;  %v3248_v13 = vpack.c.bf16 %v2616_v36, %v2615_v23  ;;  %v2444_v38 = vadd.f32 %v3838_v12, %v2283_v29  ;;  %v2587_v53 = vadd.f32 %v3187_v26, %v2433_v9  ;;  %v2621_v25 = vmax.f32 %v2589_v30, 0.0  ;;  %v5095_v26 = vld [vmem:[#allocation5_spill] sm:$0xff] }
 0x1ea   : > { %v3757_v41 = vpop.f32.mrf.mxu1  ;;  %v2435_v63 = vpop.f32.mrf.mxu0  ;;  %v2312_v29 = vadd.f32 %v3755_v52, %v5095_v26  ;;  %v3207_v36 = vunpack.c.l.bf16 %v3315_v8 }
 0x1eb   : > { %3323 = vst [vmem:[%s4971_s8 + $0x20] sm:$0xff] %v3248_v13   ;;  %v2590_v47 = vadd.f32 %v3192_v49, %v2444_v38  ;;  %v2436_v54 = vadd.f32 %v2435_v63, %v2275_v61  ;;  %v2619_v22 = vmax.f32 %v2587_v53, 0.0  ;;  %v3758_v34 = vadd.f32 %v3757_v41, %v3756_v31  ;;  %v3314_v49 = vld [vmem:[%s4923_s5 + $0x50] sm:$0xff]   ;;  %v5096_v31 = vld [vmem:[#allocation3_spill] sm:$0xff]  ;;  %v5097_v61 = vld [vmem:[#allocation6_spill] sm:$0xff] }
 0x1ec   : > { %v5035_v19 = vpop.f32.mrf.mxu1  ;;  %v3841_v50 = vpop.f32.mrf.mxu0  ;;  %v2304_v13 = vadd.f32 %v3749_v42, %v5096_v31  ;;  %v3203_v38 = vunpack.c.l.bf16 %v3314_v49 }
 0x1ed   : > { %v2622_v7 = vmax.f32 %v2590_v47, 0.0  ;;  %v2588_v33 = vadd.f32 %v3188_v2, %v2436_v54  ;;  %v2457_v55 = vadd.f32 %v3841_v50, %v2296_v0  ;;  %v2315_v35 = vadd.f32 %v3758_v34, %v5097_v61  ;;  %v5098_v50 = vld [vmem:[#allocation4_spill] sm:$0xff] }
 0x1ee   : > { %v3760_v1 = vpop.f32.mrf.mxu1  ;;  %v2448_v57 = vpop.f32.mrf.mxu0  ;;  %v3204_v54 = vunpack.c.h.bf16 %v3314_v49 }
 0x1ef   : > { %v3263_v45 = vpack.c.bf16 %v2622_v7, %v2621_v25  ;;  %v2620_v5 = vmax.f32 %v2588_v33, 0.0  ;;  %v2449_v18 = vadd.f32 %v2448_v57, %v2288_v3  ;;  %v2593_v24 = vadd.f32 %v3199_v10, %v2457_v55  ;;  %v3317_v25 = vld [vmem:[%s4923_s5 + $0x68] sm:$0xff]   ;;  %v5099_v3 = vld [vmem:[#allocation9_spill] sm:$0xff] }
 0x1f0   : > { %v3762_v43 = vpop.f32.mrf.mxu1  ;;  %v3842_v14 = vpop.f32.mrf.mxu0  ;;  %v2307_v10 = vadd.f32 %v3752_v11, %v5098_v50  ;;  %v3761_v7 = vadd.f32 %v3760_v1, %v5035_v19  ;;  %v5100_v1 = vld [vmem:[#allocation7_spill] sm:$0xff]  ;;  %v3216_v42 = vunpack.c.h.bf16 %v3317_v25 }
 0x1f1   : > { %3326 = vst [vmem:[%s4971_s8 + $0x38] sm:$0xff] %v3263_v45   ;;  %v3258_v51 = vpack.c.bf16 %v2620_v5, %v2619_v22  ;;  %v2460_v16 = vadd.f32 %v3842_v14, %v2299_v20  ;;  %v2591_v44 = vadd.f32 %v3195_v40, %v2449_v18  ;;  %v2625_v9 = vmax.f32 %v2593_v24, 0.0  ;;  %v3316_v22 = vld [vmem:[%s4923_s5 + $0x60] sm:$0xff]  }
 0x1f2   : > { %v3763_v60 = vpop.f32.mrf.mxu1  ;;  %v2451_v28 = vpop.f32.mrf.mxu0  ;;  %v3215_v14 = vunpack.c.l.bf16 %v3317_v25  ;;  %v2320_v37 = vadd.f32 %v3761_v7, %v5100_v1  ;;  %v3211_v8 = vunpack.c.l.bf16 %v3316_v22  ;;  %v3212_v49 = vunpack.c.h.bf16 %v3316_v22 }
 0x1f3   : > { %3325 = vst [vmem:[%s4971_s8 + $0x30] sm:$0xff] %v3258_v51   ;;  %v2594_v62 = vadd.f32 %v3200_v39, %v2460_v16  ;;  %v2452_v46 = vadd.f32 %v2451_v28, %v2291_v6  ;;  %v2623_v58 = vmax.f32 %v2591_v44, 0.0  ;;  %v3764_v45 = vadd.f32 %v3763_v60, %v3762_v43 }
 0x1f4   : > { %v3765_v23 = vpop.f32.mrf.mxu1  ;;  %v3845_v32 = vpop.f32.mrf.mxu0 }
 0x1f5   : > { %v2626_v12 = vmax.f32 %v2594_v62, 0.0  ;;  %v2592_v2 = vadd.f32 %v3196_v56, %v2452_v46  ;;  %v2473_v27 = vadd.f32 %v3845_v32, %v2312_v29  ;;  %v5101_v62 = vld [vmem:[#allocation10_spill] sm:$0xff] }
 0x1f6   : > { %v3766_v48 = vpop.f32.mrf.mxu1  ;;  %v2464_v30 = vpop.f32.mrf.mxu0 }
 0x1f7   : > { %v3273_v41 = vpack.c.bf16 %v2626_v12, %v2625_v9  ;;  %v2624_v21 = vmax.f32 %v2592_v2, 0.0  ;;  %v3767_v15 = vadd.f32 %v3766_v48, %v3765_v23  ;;  %v2465_v63 = vadd.f32 %v2464_v30, %v2304_v13  ;;  %v3318_v13 = vld [vmem:[%s4923_s5 + $0x70] sm:$0xff]  }
 0x1f8   : > { %v3768_v53 = vpop.f32.mrf.mxu1  ;;  %v3846_v47 = vpop.f32.mrf.mxu0  ;;  %v2597_v4 = vadd.f32 %v3207_v36, %v2473_v27  ;;  %v5102_v36 = vld [vmem:[#allocation8_spill] sm:$0xff] }
 0x1f9   : > { %3328 = vst [vmem:[%s4971_s8 + $0x48] sm:$0xff] %v3273_v41   ;;  %v3268_v0 = vpack.c.bf16 %v2624_v21, %v2623_v58  ;;  %v2476_v17 = vadd.f32 %v3846_v47, %v2315_v35  ;;  %v2328_v57 = vadd.f32 %v3767_v15, %v5099_v3  ;;  %v2595_v40 = vadd.f32 %v3203_v38, %v2465_v63  ;;  %v5103_v41 = vld [vmem:[#allocation11_spill] sm:$0xff]  ;;  %v5105_v3 = vld [vmem:[#allocation12_spill] sm:$0xff] }
 0x1fa   : > { %v3769_v33 = vpop.f32.mrf.mxu1  ;;  %v2467_v55 = vpop.f32.mrf.mxu0  ;;  %v2629_v56 = vmax.f32 %v2597_v4, 0.0  ;;  %v2323_v9 = vadd.f32 %v3764_v45, %v5102_v36  ;;  %v3219_v47 = vunpack.c.l.bf16 %v3318_v13 }
 0x1fb   : > { %3327 = vst [vmem:[%s4971_s8 + $0x40] sm:$0xff] %v3268_v0   ;;  %v2598_v20 = vadd.f32 %v3208_v59, %v2476_v17  ;;  %v3770_v39 = vadd.f32 %v3769_v33, %v3768_v53  ;;  %v2468_v52 = vadd.f32 %v2467_v55, %v2307_v10  ;;  %v2627_v34 = vmax.f32 %v2595_v40, 0.0  ;;  %v3319_v17 = vld [vmem:[%s4923_s5 + $0x78] sm:$0xff]  }
 0x1fc   : > { %v3771_v5 = vpop.f32.mrf.mxu1  ;;  %v3849_v18 = vpop.f32.mrf.mxu0  ;;  %v5104_v33 = vld [vmem:[#allocation13_spill] sm:$0xff]  ;;  %v3220_v40 = vunpack.c.h.bf16 %v3318_v13 }
 0x1fd   : > { %v2630_v51 = vmax.f32 %v2598_v20, 0.0  ;;  %v2596_v24 = vadd.f32 %v3204_v54, %v2468_v52  ;;  %v2489_v16 = vadd.f32 %v3849_v18, %v2328_v57  ;;  %v2331_v43 = vadd.f32 %v3770_v39, %v5101_v62 }
 0x1fe   : > { %v3772_v19 = vpop.f32.mrf.mxu1  ;;  %v2480_v6 = vpop.f32.mrf.mxu0  ;;  %v3223_v20 = vunpack.c.l.bf16 %v3319_v17 }
 0x1ff   : > { %v3283_v28 = vpack.c.bf16 %v2630_v51, %v2629_v56  ;;  %v2628_v44 = vmax.f32 %v2596_v24, 0.0  ;;  %v2601_v60 = vadd.f32 %v3215_v14, %v2489_v16  ;;  %v2481_v46 = vadd.f32 %v2480_v6, %v2320_v37  ;;  %v5106_v14 = vld [vmem:[#allocation14_spill] sm:$0xff] }
 0x200   : > { %v3774_v26 = vpop.f32.mrf.mxu1  ;;  %v3850_v29 = vpop.f32.mrf.mxu0  ;;  %v3773_v23 = vadd.f32 %v3772_v19, %v3771_v5  ;;  %v3224_v51 = vunpack.c.h.bf16 %v3319_v17 }
 0x201   : > { %3330 = vst [vmem:[%s4971_s8 + $0x58] sm:$0xff] %v3283_v28   ;;  %v3278_v11 = vpack.c.bf16 %v2628_v44, %v2627_v34  ;;  %v2492_v32 = vadd.f32 %v3850_v29, %v2331_v43  ;;  %v2599_v12 = vadd.f32 %v3211_v8, %v2481_v46  ;;  %v2633_v30 = vmax.f32 %v2601_v60, 0.0 }
 0x202   : > { %v3775_v2 = vpop.f32.mrf.mxu1  ;;  %v2483_v27 = vpop.f32.mrf.mxu0  ;;  %v2336_v21 = vadd.f32 %v3773_v23, %v5103_v41 }
 0x203   : > { %3329 = vst [vmem:[%s4971_s8 + $0x50] sm:$0xff] %v3278_v11   ;;  %v2602_v48 = vadd.f32 %v3216_v42, %v2492_v32  ;;  %v2484_v31 = vadd.f32 %v2483_v27, %v2323_v9  ;;  %v3776_v59 = vadd.f32 %v3775_v2, %v3774_v26  ;;  %v2631_v15 = vmax.f32 %v2599_v12, 0.0 }
 0x204   : > { %v3777_v38 = vpop.f32.mrf.mxu1  ;;  %v3853_v61 = vpop.f32.mrf.mxu0 }
 0x205   : > { %v2634_v35 = vmax.f32 %v2602_v48, 0.0  ;;  %v2600_v58 = vadd.f32 %v3212_v49, %v2484_v31  ;;  %v2339_v57 = vadd.f32 %v3776_v59, %v5105_v3 }
 0x206   : > { %v3778_v63 = vpop.f32.mrf.mxu1  ;;  %v2496_v53 = vpop.f32.mrf.mxu0 }
 0x207   : > { %v3293_v54 = vpack.c.bf16 %v2634_v35, %v2633_v30  ;;  %v2632_v0 = vmax.f32 %v2600_v58, 0.0  ;;  %v3779_v4 = vadd.f32 %v3778_v63, %v3777_v38  ;;  %v2497_v50 = vadd.f32 %v2496_v53, %v2336_v21 }
 0x208   : > { %v3780_v10 = vpop.f32.mrf.mxu1  ;;  %v3854_v25 = vpop.f32.mrf.mxu0 }
 0x209   : > { %3332 = vst [vmem:[%s4971_s8 + $0x68] sm:$0xff] %v3293_v54   ;;  %v3288_v7 = vpack.c.bf16 %v2632_v0, %v2631_v15  ;;  %v2344_v55 = vadd.f32 %v3779_v4, %v5104_v33  ;;  %v2603_v45 = vadd.f32 %v3219_v47, %v2497_v50 }
 0x20a   : > { %v3781_v39 = vpop.f32.mrf.mxu1  ;;  %v2499_v52 = vpop.f32.mrf.mxu0 }
 0x20b   : > { %3331 = vst [vmem:[%s4971_s8 + $0x60] sm:$0xff] %v3288_v7   ;;  %v2505_v22 = vadd.f32 %v3853_v61, %v2344_v55  ;;  %v3782_v5 = vadd.f32 %v3781_v39, %v3780_v10  ;;  %v2500_v18 = vadd.f32 %v2499_v52, %v2339_v57  ;;  %v2635_v19 = vmax.f32 %v2603_v45, 0.0 }
 0x20d   : > { %v2347_v56 = vadd.f32 %v3782_v5, %v5106_v14  ;;  %v2604_v24 = vadd.f32 %v3220_v40, %v2500_v18  ;;  %v2605_v16 = vadd.f32 %v3223_v20, %v2505_v22 }
 0x20f   : > { %v2508_v1 = vadd.f32 %v3854_v25, %v2347_v56  ;;  %v2636_v37 = vmax.f32 %v2604_v24, 0.0  ;;  %v2637_v42 = vmax.f32 %v2605_v16, 0.0 }
 0x211   : > { %v2606_v6 = vadd.f32 %v3224_v51, %v2508_v1  ;;  %v3298_v8 = vpack.c.bf16 %v2636_v37, %v2635_v19 }
 0x213   : > { %v2638_v34 = vmax.f32 %v2606_v6, 0.0  ;;  %3333 = vst [vmem:[%s4971_s8 + $0x70] sm:$0xff] %v3298_v8  }
 0x215   : > { %v3303_v28 = vpack.c.bf16 %v2638_v34, %v2637_v42 }
 0x217   : > { %3334 = vst [vmem:[%s4971_s8 + $0x78] sm:$0xff] %v3303_v28  }
 0x218 PF: > { %s14_s15 = sadd.s32 1, %s4166_s15  }
 0x219   : > { %p11_p4 = scmp.ge.s32.totalorder %s14_s15, 4  }
 0x21b   :  { %13 = sbr.rel (!%p11_p4) target bundleno = 1 (0x1), region = 69 }

// kernel: network_forward.10
= control target key start
LH: loop header
LB: loop body
LE: loop exit
PB: predicated region body
PF: predicated region fallthrough
CT: control target
= control target key end

     0   :  { %s3896_s15 = smov 0   ;;  %s4765_s0 = inlined_call_operand.vmem [shape: bf16[512,1152], index: 0, kind: input, shape index: {}]   ;;  %s4766_s1 = inlined_call_operand.vmem [shape: bf16[1152,128], index: 1, kind: input, shape index: {}]   ;;  %s4767_s2 = inlined_call_operand.vmem [shape: f32[1,128], index: 2, kind: input, shape index: {}]   ;;  %s4768_s3 = inlined_call_operand.vmem [shape: bf16[512,128], index: 3, kind: input, shape index: {}]   ;;  %s4769_s4 = inlined_call_operand.vmem [shape: f32[2,1,128], index: 4, kind: output, shape index: {}]  }
   0x1 LB: > { %s3902_s16 = sadd.s32 4294967295, %s3869_s15   ;;  %p2735_p0 = scmp.ge.s32.totalorder %s3869_s15, 1  ;;  %s3869_s15 = sphi %s3896_s15, %s14_s15  }
   0x2   : > { %p175_p1 = scmp.lt.s32.totalorder %s3869_s15, 3 }
   0x4   : > { %p176_p2 = pnand %p2735_p0, %p175_p1 }
   0x6   : > { %179 = sbr.rel (%p176_p2) target bundleno = 548 (0x224), region = 36 }
   0xb   : > { %v3583_v0 = vld [vmem:[%s4766_s1 + $0x78] sm:$0xff]   ;;  %s2736_s19 = sshll.u32 %s3902_s16, 5  ;;  %v3585_v2 = vld [vmem:[%s4766_s1 + $0x70] sm:$0xff]   ;;  %v3587_v4 = vld [vmem:[%s4766_s1 + $0x68] sm:$0xff]   ;;  %p218_p4 = scmp.lt.s32.totalorder %s3902_s16, 1 }
   0xc   : > { %v3584_v1 = vld [vmem:[%s4766_s1 + $0x38] sm:$0xff]   ;;  %3038 = vmatprep.subr.bf16.mxu0 %v3583_v0  ;;  %3558 = vmatprep.subr.bf16.mxu1 %v3583_v0  ;;  %p206_p3 = scmp.lt.s32.totalorder %s2736_s19, 63  ;;  %v3586_v3 = vld [vmem:[%s4766_s1 + $0x30] sm:$0xff]   ;;  %v3588_v5 = vld [vmem:[%s4766_s1 + $0x28] sm:$0xff]  }
   0xd   : > { %3039 = vmatpush3.bf16.msra.mxu0 %v3584_v1  ;;  %3566 = vmatpush3.bf16.msra.mxu1 %v3584_v1  ;;  %v3589_v6 = vld [vmem:[%s4766_s1 + $0x60] sm:$0xff]   ;;  %v3591_v8 = vld [vmem:[%s4766_s1 + $0x58] sm:$0xff]   ;;  %v3593_v10 = vld [vmem:[%s4766_s1 + $0x50] sm:$0xff]   ;;  %s4805_s16 = smov (!%p218_p4, %s3902_s16), 1 }
   0xe   : > { %3040 = vmatprep.subr.bf16.mxu0 %v3585_v2  ;;  %3559 = vmatprep.subr.bf16.mxu1 %v3585_v2  ;;  %s4803_s19 = smov (!%p206_p3, %s2736_s19), 63  ;;  %v3590_v7 = vld [vmem:[%s4766_s1 + $0x20] sm:$0xff]   ;;  %v3592_v9 = vld [vmem:[%s4766_s1 + $0x18] sm:$0xff]   ;;  %v3594_v13 = vld [vmem:[%s4766_s1 + $0x10] sm:$0xff]   ;;  %s220_s14 = scalar_lea.vmem %s4769_s4, %s4805_s16 }
   0xf   : > { %s3574_s6 = smul.u32 36, %s4803_s19  ;;  %v3595_v14 = vld [vmem:[%s4766_s1 + $0x48] sm:$0xff]   ;;  %v3597_v16 = vld [vmem:[%s4766_s1 + $0x40] sm:$0xff]   ;;  %v3605_v18 = vld [vmem:[%s4766_s1 + $0xf8] sm:$0xff]  }
  0x10   : > { %v3596_v15 = vld [vmem:[%s4766_s1 + $0x8] sm:$0xff]   ;;  %v3598_v17 = vld [vmem:[%s4766_s1] sm:$0xff]   ;;  %v3606_v21 = vld [vmem:[%s4766_s1 + $0x178] sm:$0xff]  }
  0x11   : > { %3041 = vmatpush3.bf16.msra.mxu0 %v3586_v3  ;;  %3567 = vmatpush3.bf16.msra.mxu1 %v3586_v3  ;;  %s3940_s13 = scalar_lea.vmem %s4765_s0, %s3574_s6  ;;  %v3607_v22 = vld [vmem:[%s4766_s1 + $0xb8] sm:$0xff]   ;;  %v3609_v24 = vld [vmem:[%s4766_s1 + $0xf0] sm:$0xff]   ;;  %v3617_v32 = vld [vmem:[%s4766_s1 + $0xe8] sm:$0xff]  }
  0x12   : > { %3042 = vmatprep.subr.bf16.mxu0 %v3587_v4  ;;  %3560 = vmatprep.subr.bf16.mxu1 %v3587_v4  ;;  %v3601_v11 = vld [vmem:[%s3940_s13 + $0x4] ss:$36 sps:$4 sm:$0xff]   ;;  %v3608_v23 = vld [vmem:[%s4766_s1 + $0x138] sm:$0xff]   ;;  %v3611_v25 = vld [vmem:[%s3940_s13 + $0x4c] ss:$36 sps:$4 sm:$0xff]  }
  0x13   : > { %v3604_v12 = vld [vmem:[%s3940_s13 + $0x364] ss:$36 sps:$4 sm:$0xff]   ;;  %1733 = vmatprep.mubr.bf16.mxu0 %v3601_v11  ;;  %v3613_v26 = vld [vmem:[%s3940_s13 + $0x3ac] ss:$36 sps:$4 sm:$0xff]   ;;  %v3623_v35 = vld [vmem:[%s3940_s13 + $0x94] ss:$36 sps:$4 sm:$0xff]  }
  0x14   : > { %1829 = vmatprep.mubr.bf16.mxu1 %v3604_v12  ;;  %v3599_v19 = vld [vmem:[%s3940_s13] ss:$36 sps:$4 sm:$0xff]   ;;  %v3620_v27 = vld [vmem:[%s4766_s1 + $0x170] sm:$0xff]   ;;  %v3615_v30 = vld [vmem:[%s3940_s13 + $0x48] ss:$36 sps:$4 sm:$0xff]  }
  0x15   : > { %3043 = vmatpush3.bf16.msra.mxu0 %v3588_v5  ;;  %3568 = vmatpush3.bf16.msra.mxu1 %v3588_v5  ;;  %v3602_v20 = vld [vmem:[%s3940_s13 + $0x360] ss:$36 sps:$4 sm:$0xff]   ;;  %v3610_v28 = vld [vmem:[%s4766_s1 + $0xb0] sm:$0xff]   ;;  %v3616_v31 = vld [vmem:[%s3940_s13 + $0x3a8] ss:$36 sps:$4 sm:$0xff]  }
  0x16   : > { %3044 = vmatprep.subr.bf16.mxu0 %v3589_v6  ;;  %3561 = vmatprep.subr.bf16.mxu1 %v3589_v6  ;;  %v3622_v29 = vld [vmem:[%s4766_s1 + $0x130] sm:$0xff]   ;;  %v3618_v33 = vld [vmem:[%s4766_s1 + $0xa8] sm:$0xff]   ;;  %v3619_v34 = vld [vmem:[%s4766_s1 + $0xe0] sm:$0xff]  }
  0x17   : > { %v3625_v36 = vld [vmem:[%s3940_s13 + $0x3f4] ss:$36 sps:$4 sm:$0xff]   ;;  %v3621_v37 = vld [vmem:[%s4766_s1 + $0xa0] sm:$0xff]   ;;  %v3640_v41 = vld [vmem:[%s4766_s1 + $0x168] sm:$0xff]  }
  0x18   : > { %v3629_v38 = vld [vmem:[%s4766_s1 + $0xd8] sm:$0xff]   ;;  %v3627_v39 = vld [vmem:[%s3940_s13 + $0x90] ss:$36 sps:$4 sm:$0xff]   ;;  %v3642_v44 = vld [vmem:[%s4766_s1 + $0x128] sm:$0xff]  }
  0x19   : > { %3045 = vmatpush3.bf16.msra.mxu0 %v3590_v7  ;;  %3569 = vmatpush3.bf16.msra.mxu1 %v3590_v7  ;;  %v3628_v40 = vld [vmem:[%s3940_s13 + $0x3f0] ss:$36 sps:$4 sm:$0xff]   ;;  %v3630_v42 = vld [vmem:[%s4766_s1 + $0x98] sm:$0xff]   ;;  %v3639_v50 = vld [vmem:[%s4766_s1 + $0xc8] sm:$0xff]  }
  0x1a   : > { %3046 = vmatprep.subr.bf16.mxu0 %v3591_v8  ;;  %3562 = vmatprep.subr.bf16.mxu1 %v3591_v8  ;;  %v3631_v43 = vld [vmem:[%s4766_s1 + $0xd0] sm:$0xff]   ;;  %v3633_v45 = vld [vmem:[%s3940_s13 + $0xdc] ss:$36 sps:$4 sm:$0xff]   ;;  %v3641_v51 = vld [vmem:[%s4766_s1 + $0x88] sm:$0xff]  }
  0x1b   : > { %v3635_v46 = vld [vmem:[%s3940_s13 + $0x43c] ss:$36 sps:$4 sm:$0xff]   ;;  %v3632_v47 = vld [vmem:[%s4766_s1 + $0x90] sm:$0xff]   ;;  %v3645_v52 = vld [vmem:[%s3940_s13 + $0x124] ss:$36 sps:$4 sm:$0xff]  }
  0x1c   : > { %v3637_v48 = vld [vmem:[%s3940_s13 + $0xd8] ss:$36 sps:$4 sm:$0xff]   ;;  %v3643_v53 = vld [vmem:[%s4766_s1 + $0xc0] sm:$0xff]   ;;  %v3649_v56 = vld [vmem:[%s3940_s13 + $0xc] ss:$36 sps:$4 sm:$0xff]  }
  0x1d   : > { %3047 = vmatpush3.bf16.msra.mxu0 %v3592_v9  ;;  %3570 = vmatpush3.bf16.msra.mxu1 %v3592_v9  ;;  %v3638_v49 = vld [vmem:[%s3940_s13 + $0x438] ss:$36 sps:$4 sm:$0xff]   ;;  %v3653_v54 = vld [vmem:[%s4766_s1 + $0x160] sm:$0xff]   ;;  %v3647_v58 = vld [vmem:[%s3940_s13 + $0x8] ss:$36 sps:$4 sm:$0xff]  }
  0x1e   : > { %3048 = vmatprep.subr.bf16.mxu0 %v3593_v10  ;;  %3563 = vmatprep.subr.bf16.mxu1 %v3593_v10  ;;  %v3654_v55 = vld [vmem:[%s4766_s1 + $0x120] sm:$0xff]   ;;  %v3651_v60 = vld [vmem:[%s4766_s1 + $0x1f8] sm:$0xff]   ;;  %v3655_v62 = vld [vmem:[%s3940_s13 + $0x16c] ss:$36 sps:$4 sm:$0xff]  }
  0x1f   : > { %v3644_v57 = vld [vmem:[%s4766_s1 + $0x80] sm:$0xff]   ;;  %v3652_v61 = vld [vmem:[%s4766_s1 + $0x1b8] sm:$0xff]   ;;  %v3668_v2 = vld [vmem:[%s4766_s1 + $0x1f0] sm:$0xff]  }
  0x20   : > { %v3650_v59 = vld [vmem:[%s3940_s13 + $0x120] ss:$36 sps:$4 sm:$0xff]   ;;  %v3667_v63 = vld [vmem:[%s4766_s1 + $0x158] sm:$0xff]   ;;  %v3670_v3 = vld [vmem:[%s4766_s1 + $0x1b0] sm:$0xff]  }
  0x21   : > { %3049 = vmatpush3.bf16.msra.mxu0 %v3594_v13  ;;  %3571 = vmatpush3.bf16.msra.mxu1 %v3594_v13  ;;  %v3657_v0 = vld [vmem:[%s3940_s13 + $0x54] ss:$36 sps:$4 sm:$0xff]   ;;  %v3659_v4 = vld [vmem:[%s3940_s13 + $0x168] ss:$36 sps:$4 sm:$0xff]   ;;  %v3663_v9 = vld [vmem:[%s3940_s13 + $0x9c] ss:$36 sps:$4 sm:$0xff]  }
  0x22   : > { %3050 = vmatprep.subr.bf16.mxu0 %v3595_v14  ;;  %3564 = vmatprep.subr.bf16.mxu1 %v3595_v14  ;;  %v3669_v1 = vld [vmem:[%s4766_s1 + $0x118] sm:$0xff]   ;;  %v3677_v5 = vld [vmem:[%s4766_s1 + $0x150] sm:$0xff]   ;;  %v3685_v10 = vld [vmem:[%s4766_s1 + $0x1e8] sm:$0xff]  }
  0x23   : > { %v3678_v6 = vld [vmem:[%s4766_s1 + $0x110] sm:$0xff]   ;;  %v3686_v11 = vld [vmem:[%s4766_s1 + $0x1a8] sm:$0xff]   ;;  %v3666_v13 = vld [vmem:[%s3940_s13 + $0x98] ss:$36 sps:$4 sm:$0xff]  }
  0x24   : > { %v3660_v7 = vld [vmem:[%s3940_s13 + $0x50] ss:$36 sps:$4 sm:$0xff]   ;;  %v3671_v14 = vld [vmem:[%s3940_s13 + $0x1fc] ss:$36 sps:$4 sm:$0xff]  }
  0x25   : > { %3051 = vmatpush3.bf16.msra.mxu0 %v3596_v15  ;;  %3572 = vmatpush3.bf16.msra.mxu1 %v3596_v15  ;;  %v3661_v8 = vld [vmem:[%s3940_s13 + $0x1b4] ss:$36 sps:$4 sm:$0xff]   ;;  %v3693_v15 = vld [vmem:[%s4766_s1 + $0x148] sm:$0xff]  }
  0x26   : > { %3052 = vmatprep.subr.bf16.mxu0 %v3597_v16  ;;  %3565 = vmatprep.subr.bf16.mxu1 %v3597_v16  ;;  %v3665_v12 = vld [vmem:[%s3940_s13 + $0x1b0] ss:$36 sps:$4 sm:$0xff]   ;;  %v3694_v16 = vld [vmem:[%s4766_s1 + $0x108] sm:$0xff]  }
  0x29   : > { %3053 = vmatpush3.bf16.msra.mxu0 %v3598_v17  ;;  %3573 = vmatpush3.bf16.msra.mxu1 %v3598_v17  ;;  %v3673_v17 = vld [vmem:[%s3940_s13 + $0xe4] ss:$36 sps:$4 sm:$0xff]  }
  0x2a   : > { %3150 = vmatprep.subr.bf16.mxu1 %v3605_v18  ;;  %3262 = vmatprep.subr.bf16.mxu0 %v3606_v21  ;;  %v3701_v18 = vld [vmem:[%s4766_s1 + $0x1e0] sm:$0xff]  }
  0x2b   : > { %v3703_v21 = vld [vmem:[%s4766_s1 + $0x140] sm:$0xff]  }
  0x2c   : > { %1734 = vmatmul.mubr.bf16.vlgmr.msra.gmra.mxu0 %v3599_v19  ;;  %1830 = vmatmul.mubr.bf16.vlgmr.msra.gmra.mxu1 %v3602_v20  ;;  %v3702_v19 = vld [vmem:[%s4766_s1 + $0x1a0] sm:$0xff]   ;;  %v3675_v20 = vld [vmem:[%s3940_s13 + $0x1f8] ss:$36 sps:$4 sm:$0xff]  }
  0x2d   : > { %3151 = vmatpush3.bf16.msra.mxu1 %v3607_v22  ;;  %3263 = vmatpush3.bf16.msra.mxu0 %v3608_v23  ;;  %v3704_v22 = vld [vmem:[%s4766_s1 + $0x100] sm:$0xff]  }
  0x2e   : > { %3152 = vmatprep.subr.bf16.mxu1 %v3609_v24  ;;  %1741 = vmatprep.mubr.bf16.mxu0 %v3611_v25  ;;  %v3676_v23 = vld [vmem:[%s3940_s13 + $0xe0] ss:$36 sps:$4 sm:$0xff]   ;;  %v3681_v25 = vld [vmem:[%s3940_s13 + $0x12c] ss:$36 sps:$4 sm:$0xff]  }
  0x2f   : > { %1837 = vmatprep.mubr.bf16.mxu1 %v3613_v26  ;;  %3264 = vmatprep.subr.bf16.mxu0 %v3620_v27  ;;  %v3679_v24 = vld [vmem:[%s3940_s13 + $0x244] ss:$36 sps:$4 sm:$0xff]   ;;  %v3717_v26 = vld [vmem:[%s4766_s1 + $0x1d8] sm:$0xff]  }
  0x30   : > { %v3683_v27 = vld [vmem:[%s3940_s13 + $0x240] ss:$36 sps:$4 sm:$0xff]  }
  0x31   : > { %3153 = vmatpush3.bf16.msra.mxu1 %v3610_v28  ;;  %3265 = vmatpush3.bf16.msra.mxu0 %v3622_v29  ;;  %v3718_v28 = vld [vmem:[%s4766_s1 + $0x238] sm:$0xff]  }
  0x32   : > { %3154 = vmatprep.subr.bf16.mxu1 %v3617_v32  ;;  %3266 = vmatprep.subr.bf16.mxu0 %v3640_v41  ;;  %v3719_v29 = vld [vmem:[%s4766_s1 + $0x198] sm:$0xff]   ;;  %v3747_v41 = vld [vmem:[%s4766_s1 + $0x1c8] sm:$0xff]  }
  0x33   : > { %v3689_v32 = vld [vmem:[%s3940_s13 + $0x174] ss:$36 sps:$4 sm:$0xff]  }
  0x34   : > { %1742 = vmatmul.mubr.bf16.gmra.mxu0 %v3615_v30  ;;  %1838 = vmatmul.mubr.bf16.gmra.mxu1 %v3616_v31  ;;  %v3684_v30 = vld [vmem:[%s3940_s13 + $0x128] ss:$36 sps:$4 sm:$0xff]  }
  0x35   : > { %3155 = vmatpush3.bf16.msra.mxu1 %v3618_v33  ;;  %1749 = vmatprep.mubr.bf16.mxu0 %v3623_v35  ;;  %v3687_v31 = vld [vmem:[%s3940_s13 + $0x28c] ss:$36 sps:$4 sm:$0xff]  }
  0x36   : > { %3156 = vmatprep.subr.bf16.mxu1 %v3619_v34  ;;  %1845 = vmatprep.mubr.bf16.mxu1 %v3625_v36  ;;  %v3732_v33 = vld [vmem:[%s4766_s1 + $0x1d0] sm:$0xff]   ;;  %v3691_v34 = vld [vmem:[%s3940_s13 + $0x288] ss:$36 sps:$4 sm:$0xff]  }
  0x37   : > { %3267 = vmatpush3.bf16.msra.mxu0 %v3642_v44  ;;  %v3692_v35 = vld [vmem:[%s3940_s13 + $0x170] ss:$36 sps:$4 sm:$0xff]   ;;  %v3707_v44 = vld [vmem:[%s3940_s13 + $0x204] ss:$36 sps:$4 sm:$0xff]  }
  0x38   : > { %3268 = vmatprep.subr.bf16.mxu0 %v3653_v54  ;;  %v3734_v36 = vld [vmem:[%s4766_s1 + $0x190] sm:$0xff]   ;;  %v3722_v54 = vld [vmem:[%s3940_s13 + $0x5c] ss:$36 sps:$4 sm:$0xff]  }
  0x39   : > { %3157 = vmatpush3.bf16.msra.mxu1 %v3621_v37  ;;  %v3695_v37 = vld [vmem:[%s3940_s13 + $0x2d4] ss:$36 sps:$4 sm:$0xff]  }
  0x3a   : > { %3158 = vmatprep.subr.bf16.mxu1 %v3629_v38  ;;  %v3697_v38 = vld [vmem:[%s3940_s13 + $0x1bc] ss:$36 sps:$4 sm:$0xff]  }
  0x3b   : > { %3269 = vmatpush3.bf16.msra.mxu0 %v3654_v55  ;;  %v3733_v55 = vld [vmem:[%s4766_s1 + $0x230] sm:$0xff]  }
  0x3c   : > { %1750 = vmatmul.mubr.bf16.gmra.mxu0 %v3627_v39  ;;  %1846 = vmatmul.mubr.bf16.gmra.mxu1 %v3628_v40  ;;  %v3699_v39 = vld [vmem:[%s3940_s13 + $0x2d0] ss:$36 sps:$4 sm:$0xff]   ;;  %v3700_v40 = vld [vmem:[%s3940_s13 + $0x1b8] ss:$36 sps:$4 sm:$0xff]  }
  0x3d   : > { %3159 = vmatpush3.bf16.msra.mxu1 %v3630_v42  ;;  %1757 = vmatprep.mubr.bf16.mxu0 %v3633_v45  ;;  %v3705_v42 = vld [vmem:[%s3940_s13 + $0x31c] ss:$36 sps:$4 sm:$0xff]  }
  0x3e   : > { %3160 = vmatprep.subr.bf16.mxu1 %v3631_v43  ;;  %1853 = vmatprep.mubr.bf16.mxu1 %v3635_v46  ;;  %v3749_v43 = vld [vmem:[%s4766_s1 + $0x188] sm:$0xff]   ;;  %v3709_v45 = vld [vmem:[%s3940_s13 + $0x318] ss:$36 sps:$4 sm:$0xff]   ;;  %v3710_v46 = vld [vmem:[%s3940_s13 + $0x200] ss:$36 sps:$4 sm:$0xff]  }
  0x3f   : > { %3270 = vmatprep.subr.bf16.mxu0 %v3667_v63  ;;  %v3777_v63 = vld [vmem:[%s4766_s1 + $0x218] sm:$0xff]  }
  0x40   : > { %3271 = vmatpush3.bf16.msra.mxu0 %v3669_v1  ;;  %v3735_v1 = vld [vmem:[%s3940_s13 + $0x324] ss:$36 sps:$4 sm:$0xff]  }
  0x41   : > { %3161 = vmatpush3.bf16.msra.mxu1 %v3632_v47  ;;  %3272 = vmatprep.subr.bf16.mxu0 %v3677_v5  ;;  %v3762_v47 = vld [vmem:[%s4766_s1 + $0x1c0] sm:$0xff]   ;;  %v3803_v5 = vld [vmem:[%s4766_s1 + $0x208] sm:$0xff]  }
  0x42   : > { %3162 = vmatprep.subr.bf16.mxu1 %v3639_v50  ;;  %v3715_v50 = vld [vmem:[%s3940_s13 + $0x14] ss:$36 sps:$4 sm:$0xff]  }
  0x44   : > { %1758 = vmatmul.mubr.bf16.gmra.mxu0 %v3637_v48  ;;  %1854 = vmatmul.mubr.bf16.gmra.mxu1 %v3638_v49  ;;  %v3711_v48 = vld [vmem:[%s3940_s13 + $0x24c] ss:$36 sps:$4 sm:$0xff]   ;;  %v3764_v49 = vld [vmem:[%s4766_s1 + $0x180] sm:$0xff]  }
  0x45   : > { %3163 = vmatpush3.bf16.msra.mxu1 %v3641_v51  ;;  %1765 = vmatprep.mubr.bf16.mxu0 %v3645_v52  ;;  %v3713_v51 = vld [vmem:[%s3940_s13 + $0x10] ss:$36 sps:$4 sm:$0xff]   ;;  %v3716_v52 = vld [vmem:[%s3940_s13 + $0x248] ss:$36 sps:$4 sm:$0xff]  }
  0x46   : > { %3164 = vmatprep.subr.bf16.mxu1 %v3643_v53  ;;  %1894 = vmatprep.mubr.bf16.mxu1 %v3649_v56  ;;  %v3720_v53 = vld [vmem:[%s3940_s13 + $0x294] ss:$36 sps:$4 sm:$0xff]   ;;  %v3748_v56 = vld [vmem:[%s4766_s1 + $0x228] sm:$0xff]  }
  0x47   : > { %3273 = vmatpush3.bf16.msra.mxu0 %v3678_v6  ;;  %v3740_v6 = vld [vmem:[%s3940_s13 + $0xe8] ss:$36 sps:$4 sm:$0xff]  }
  0x48   : > { %3274 = vmatprep.subr.bf16.mxu0 %v3693_v15  ;;  %v3755_v15 = vld [vmem:[%s3940_s13 + $0x178] ss:$36 sps:$4 sm:$0xff]  }
  0x49   : > { %3165 = vmatpush3.bf16.msra.mxu1 %v3644_v57  ;;  %v3724_v57 = vld [vmem:[%s3940_s13 + $0x290] ss:$36 sps:$4 sm:$0xff]  }
  0x4a   : > { %3374 = vmatprep.subr.bf16.mxu1 %v3651_v60  ;;  %v3728_v60 = vld [vmem:[%s3940_s13 + $0xa4] ss:$36 sps:$4 sm:$0xff]  }
  0x4b   : > { %3275 = vmatpush3.bf16.msra.mxu0 %v3694_v16  ;;  %v3756_v16 = vld [vmem:[%s3940_s13 + $0x3fc] ss:$36 sps:$4 sm:$0xff]  }
  0x4c   : > { %1766 = vmatmul.mubr.bf16.gmra.mxu0 %v3650_v59  ;;  %1895 = vmatmul.mubr.bf16.vlgmr.msra.gmra.mxu1 %v3647_v58  ;;  %v3725_v58 = vld [vmem:[%s3940_s13 + $0x58] ss:$36 sps:$4 sm:$0xff]  }
  0x4d   : > { %3375 = vmatpush3.bf16.msra.mxu1 %v3652_v61  ;;  %1773 = vmatprep.mubr.bf16.mxu0 %v3655_v62  ;;  %v3726_v59 = vld [vmem:[%s3940_s13 + $0x2dc] ss:$36 sps:$4 sm:$0xff]  }
  0x4e   : > { %1902 = vmatprep.mubr.bf16.mxu1 %v3657_v0  ;;  %3376 = vmatprep.subr.bf16.mxu1 %v3668_v2  ;;  %v3763_v61 = vld [vmem:[%s4766_s1 + $0x220] sm:$0xff]   ;;  %v3730_v62 = vld [vmem:[%s3940_s13 + $0x2d8] ss:$36 sps:$4 sm:$0xff]   ;;  %v3737_v2 = vld [vmem:[%s3940_s13 + $0xec] ss:$36 sps:$4 sm:$0xff]  }
  0x4f   : > { %3276 = vmatprep.subr.bf16.mxu0 %v3703_v21  ;;  %v3731_v0 = vld [vmem:[%s3940_s13 + $0xa0] ss:$36 sps:$4 sm:$0xff]   ;;  %v3767_v21 = vld [vmem:[%s3940_s13 + $0x20c] ss:$36 sps:$4 sm:$0xff]  }
  0x50   : > { %3277 = vmatpush3.bf16.msra.mxu0 %v3704_v22  ;;  %v3769_v22 = vld [vmem:[%s3940_s13 + $0x440] ss:$36 sps:$4 sm:$0xff]  }
  0x51   : > { %3377 = vmatpush3.bf16.msra.mxu1 %v3670_v3  ;;  %3510 = vmatprep.subr.bf16.mxu0 %v3718_v28  ;;  %v3790_v3 = vld [vmem:[%s4766_s1 + $0x210] sm:$0xff]  }
  0x52   : > { %3378 = vmatprep.subr.bf16.mxu1 %v3685_v10  ;;  %v3745_v10 = vld [vmem:[%s3940_s13 + $0x368] ss:$36 sps:$4 sm:$0xff]  }
  0x54   : > { %1774 = vmatmul.mubr.bf16.gmra.mxu0 %v3659_v4  ;;  %1903 = vmatmul.mubr.bf16.gmra.mxu1 %v3660_v7  ;;  %v3739_v4 = vld [vmem:[%s3940_s13 + $0x320] ss:$36 sps:$4 sm:$0xff]   ;;  %v3741_v7 = vld [vmem:[%s3940_s13 + $0x36c] ss:$36 sps:$4 sm:$0xff]  }
  0x55   : > { %1781 = vmatprep.mubr.bf16.mxu0 %v3661_v8  ;;  %1910 = vmatprep.mubr.bf16.mxu1 %v3663_v9  ;;  %v3743_v8 = vld [vmem:[%s3940_s13 + $0x134] ss:$36 sps:$4 sm:$0xff]   ;;  %v3816_v9 = vld [vmem:[%s4766_s1 + $0x200] sm:$0xff]  }
  0x56   : > { %3379 = vmatpush3.bf16.msra.mxu1 %v3686_v11  ;;  %v3746_v11 = vld [vmem:[%s3940_s13 + $0x130] ss:$36 sps:$4 sm:$0xff]  }
  0x57   : > { %3380 = vmatprep.subr.bf16.mxu1 %v3701_v18  ;;  %v3760_v18 = vld [vmem:[%s3940_s13 + $0x3f8] ss:$36 sps:$4 sm:$0xff]  }
  0x5a   : > { %3381 = vmatpush3.bf16.msra.mxu1 %v3702_v19  ;;  %v3761_v19 = vld [vmem:[%s3940_s13 + $0x1c0] ss:$36 sps:$4 sm:$0xff]  }
  0x5b   : > { %3382 = vmatprep.subr.bf16.mxu1 %v3717_v26  ;;  %v3773_v26 = vld [vmem:[%s3940_s13 + $0x18] ss:$36 sps:$4 sm:$0xff]  }
  0x5c   : > { %1782 = vmatmul.mubr.bf16.gmra.mxu0 %v3665_v12  ;;  %1911 = vmatmul.mubr.bf16.gmra.mxu1 %v3666_v13  ;;  %v3750_v12 = vld [vmem:[%s3940_s13 + $0x3b4] ss:$36 sps:$4 sm:$0xff]   ;;  %v3752_v13 = vld [vmem:[%s3940_s13 + $0x17c] ss:$36 sps:$4 sm:$0xff]  }
  0x5d   : > { %1789 = vmatprep.mubr.bf16.mxu0 %v3671_v14  ;;  %1918 = vmatprep.mubr.bf16.mxu1 %v3673_v17  ;;  %v3754_v14 = vld [vmem:[%s3940_s13 + $0x3b0] ss:$36 sps:$4 sm:$0xff]   ;;  %v3758_v17 = vld [vmem:[%s3940_s13 + $0x1c4] ss:$36 sps:$4 sm:$0xff]  }
  0x5e   : > { %3383 = vmatpush3.bf16.msra.mxu1 %v3719_v29  ;;  %v3780_v29 = vld [vmem:[%s3940_s13 + $0x64] ss:$36 sps:$4 sm:$0xff]  }
  0x5f   : > { %3384 = vmatprep.subr.bf16.mxu1 %v3732_v33  ;;  %v3786_v33 = vld [vmem:[%s3940_s13 + $0xac] ss:$36 sps:$4 sm:$0xff]  }
  0x62   : > { %3385 = vmatpush3.bf16.msra.mxu1 %v3734_v36  ;;  %v3791_v36 = vld [vmem:[%s3940_s13 + $0x32c] ss:$36 sps:$4 sm:$0xff]  }
  0x63   : > { %3386 = vmatprep.subr.bf16.mxu1 %v3747_v41  ;;  %v3799_v41 = vld [vmem:[%s3940_s13 + $0x13c] ss:$36 sps:$4 sm:$0xff]  }
  0x64   : > { %1790 = vmatmul.mubr.bf16.gmra.mxu0 %v3675_v20  ;;  %1919 = vmatmul.mubr.bf16.gmra.mxu1 %v3676_v23  ;;  %v3765_v20 = vld [vmem:[%s3940_s13 + $0x444] ss:$36 sps:$4 sm:$0xff]  }
  0x65   : > { %1797 = vmatprep.mubr.bf16.mxu0 %v3679_v24  ;;  %1926 = vmatprep.mubr.bf16.mxu1 %v3681_v25  ;;  %v3770_v23 = vld [vmem:[%s3940_s13 + $0x208] ss:$36 sps:$4 sm:$0xff]   ;;  %v3771_v24 = vld [vmem:[%s3940_s13 + $0x254] ss:$36 sps:$4 sm:$0xff]   ;;  %v3775_v25 = vld [vmem:[%s3940_s13 + $0x1c] ss:$36 sps:$4 sm:$0xff]  }
  0x66   : > { %3387 = vmatpush3.bf16.msra.mxu1 %v3749_v43  ;;  %v3802_v43 = vld [vmem:[%s3940_s13 + $0x138] ss:$36 sps:$4 sm:$0xff]  }
  0x67   : > { %3388 = vmatprep.subr.bf16.mxu1 %v3762_v47 }
  0x6a   : > { %3389 = vmatpush3.bf16.msra.mxu1 %v3764_v49 }
  0x6c   : > { %1798 = vmatmul.mubr.bf16.gmra.mxu0 %v3683_v27  ;;  %1927 = vmatmul.mubr.bf16.gmra.mxu1 %v3684_v30  ;;  %v3776_v27 = vld [vmem:[%s3940_s13 + $0x250] ss:$36 sps:$4 sm:$0xff]   ;;  %v3782_v30 = vld [vmem:[%s3940_s13 + $0x298] ss:$36 sps:$4 sm:$0xff]  }
  0x6d   : > { %1805 = vmatprep.mubr.bf16.mxu0 %v3687_v31  ;;  %1934 = vmatprep.mubr.bf16.mxu1 %v3689_v32  ;;  %v3783_v31 = vld [vmem:[%s3940_s13 + $0x60] ss:$36 sps:$4 sm:$0xff]  }
  0x6e   : > { %v3784_v32 = vld [vmem:[%s3940_s13 + $0x2e4] ss:$36 sps:$4 sm:$0xff]  }
  0x74   : > { %1806 = vmatmul.mubr.bf16.gmra.mxu0 %v3691_v34  ;;  %1935 = vmatmul.mubr.bf16.gmra.mxu1 %v3692_v35  ;;  %v3788_v34 = vld [vmem:[%s3940_s13 + $0x2e0] ss:$36 sps:$4 sm:$0xff]   ;;  %v3789_v35 = vld [vmem:[%s3940_s13 + $0xa8] ss:$36 sps:$4 sm:$0xff]  }
  0x75   : > { %1813 = vmatprep.mubr.bf16.mxu0 %v3695_v37  ;;  %1942 = vmatprep.mubr.bf16.mxu1 %v3697_v38  ;;  %v3793_v37 = vld [vmem:[%s3940_s13 + $0xf4] ss:$36 sps:$4 sm:$0xff]   ;;  %v3795_v38 = vld [vmem:[%s3940_s13 + $0x328] ss:$36 sps:$4 sm:$0xff]  }
  0x7c   : > { %1814 = vmatmul.mubr.bf16.gmra.mxu0 %v3699_v39  ;;  %1943 = vmatmul.mubr.bf16.gmra.mxu1 %v3700_v40  ;;  %v3796_v39 = vld [vmem:[%s3940_s13 + $0xf0] ss:$36 sps:$4 sm:$0xff]  }
  0x7d   : > { %1821 = vmatprep.mubr.bf16.mxu0 %v3705_v42  ;;  %1950 = vmatprep.mubr.bf16.mxu1 %v3707_v44  ;;  %v3797_v40 = vld [vmem:[%s3940_s13 + $0x374] ss:$36 sps:$4 sm:$0xff]   ;;  %v3804_v44 = vld [vmem:[%s3940_s13 + $0x3bc] ss:$36 sps:$4 sm:$0xff]  }
  0x7e   : > { %v3801_v42 = vld [vmem:[%s3940_s13 + $0x370] ss:$36 sps:$4 sm:$0xff]  }
  0x84   : > { %1822 = vmatmul.mubr.bf16.gmra.mxu0 %v3709_v45  ;;  %1951 = vmatmul.mubr.bf16.gmra.mxu1 %v3710_v46  ;;  %v3806_v45 = vld [vmem:[%s3940_s13 + $0x184] ss:$36 sps:$4 sm:$0xff]  }
  0x85   : > { %1958 = vmatprep.mubr.bf16.mxu1 %v3711_v48  ;;  %2055 = vmatprep.mubr.bf16.mxu0 %v3715_v50 }
  0x8c   : > { %1959 = vmatmul.mubr.bf16.gmra.mxu1 %v3716_v52  ;;  %2056 = vmatmul.mubr.bf16.vlgmr.msra.gmra.mxu0 %v3713_v51 }
  0x8d   : > { %3511 = vmatpush3.bf16.msra.mxu0 %v3718_v28  ;;  %1966 = vmatprep.mubr.bf16.mxu1 %v3720_v53  ;;  %v3778_v28 = vld [vmem:[%s3940_s13 + $0x29c] ss:$36 sps:$4 sm:$0xff]  }
  0x8e   : > { %2063 = vmatprep.mubr.bf16.mxu0 %v3722_v54  ;;  %3512 = vmatprep.subr.bf16.mxu0 %v3733_v55  ;;  %v3808_v54 = vld [vmem:[%s3940_s13 + $0x3b8] ss:$36 sps:$4 sm:$0xff]  }
  0x91   : > { %3513 = vmatpush3.bf16.msra.mxu0 %v3733_v55  ;;  %v3809_v55 = vld [vmem:[%s3940_s13 + $0x180] ss:$36 sps:$4 sm:$0xff]  }
  0x92   : > { %3514 = vmatprep.subr.bf16.mxu0 %v3748_v56 }
  0x94   : > { %1967 = vmatmul.mubr.bf16.gmra.mxu1 %v3724_v57  ;;  %2064 = vmatmul.mubr.bf16.gmra.mxu0 %v3725_v58  ;;  %v3812_v57 = vld [vmem:[%s3940_s13 + $0x1cc] ss:$36 sps:$4 sm:$0xff]  }
  0x95   : > { %1974 = vmatprep.mubr.bf16.mxu1 %v3726_v59  ;;  %2071 = vmatprep.mubr.bf16.mxu0 %v3728_v60 }
  0x96   : > { %3515 = vmatpush3.bf16.msra.mxu0 %v3748_v56  ;;  %v3810_v56 = vld [vmem:[%s3940_s13 + $0x404] ss:$36 sps:$4 sm:$0xff]  }
  0x97   : > { %3516 = vmatprep.subr.bf16.mxu0 %v3763_v61 }
  0x9a   : > { %3517 = vmatpush3.bf16.msra.mxu0 %v3763_v61 }
  0x9b   : > { %3518 = vmatprep.subr.bf16.mxu0 %v3777_v63 }
  0x9c   : > { %1975 = vmatmul.mubr.bf16.gmra.mxu1 %v3730_v62  ;;  %2072 = vmatmul.mubr.bf16.gmra.mxu0 %v3731_v0 }
  0x9d   : > { %1982 = vmatprep.mubr.bf16.mxu1 %v3735_v1  ;;  %2079 = vmatprep.mubr.bf16.mxu0 %v3737_v2 }
  0x9e   : > { %3519 = vmatpush3.bf16.msra.mxu0 %v3777_v63 }
  0x9f   : > { %3520 = vmatprep.subr.bf16.mxu0 %v3790_v3 }
  0xa2   : > { %3521 = vmatpush3.bf16.msra.mxu0 %v3790_v3 }
  0xa3   : > { %3522 = vmatprep.subr.bf16.mxu0 %v3803_v5 }
  0xa4   : > { %1983 = vmatmul.mubr.bf16.gmra.mxu1 %v3739_v4  ;;  %2080 = vmatmul.mubr.bf16.gmra.mxu0 %v3740_v6  ;;  %v3814_v6 = vld [vmem:[%s3940_s13 + $0x400] ss:$36 sps:$4 sm:$0xff]  }
  0xa5   : > { %1990 = vmatprep.mubr.bf16.mxu1 %v3741_v7  ;;  %2087 = vmatprep.mubr.bf16.mxu0 %v3743_v8  ;;  %v3815_v7 = vld [vmem:[%s3940_s13 + $0x1c8] ss:$36 sps:$4 sm:$0xff]  }
  0xa6   : > { %3523 = vmatpush3.bf16.msra.mxu0 %v3803_v5  ;;  %v3817_v8 = vld [vmem:[%s3940_s13 + $0x44c] ss:$36 sps:$4 sm:$0xff]  }
  0xa7   : > { %3524 = vmatprep.subr.bf16.mxu0 %v3816_v9 }
  0xaa   : > { %3525 = vmatpush3.bf16.msra.mxu0 %v3816_v9  ;;  %v3819_v9 = vld [vmem:[%s3940_s13 + $0x214] ss:$36 sps:$4 sm:$0xff]  }
  0xac   : > { %1991 = vmatmul.mubr.bf16.gmra.mxu1 %v3745_v10  ;;  %2088 = vmatmul.mubr.bf16.gmra.mxu0 %v3746_v11 }
  0xad   : > { %1998 = vmatprep.mubr.bf16.mxu1 %v3750_v12  ;;  %2095 = vmatprep.mubr.bf16.mxu0 %v3752_v13 }
  0xb4   : > { %1999 = vmatmul.mubr.bf16.gmra.mxu1 %v3754_v14  ;;  %2096 = vmatmul.mubr.bf16.gmra.mxu0 %v3755_v15 }
  0xb5   : > { %2006 = vmatprep.mubr.bf16.mxu1 %v3756_v16  ;;  %2103 = vmatprep.mubr.bf16.mxu0 %v3758_v17 }
  0xbc   : > { %2007 = vmatmul.mubr.bf16.gmra.mxu1 %v3760_v18  ;;  %2104 = vmatmul.mubr.bf16.gmra.mxu0 %v3761_v19 }
  0xbd   : > { %2014 = vmatprep.mubr.bf16.mxu1 %v3765_v20  ;;  %2111 = vmatprep.mubr.bf16.mxu0 %v3767_v21 }
  0xc4   : > { %2015 = vmatmul.mubr.bf16.gmra.mxu1 %v3769_v22  ;;  %2112 = vmatmul.mubr.bf16.gmra.mxu0 %v3770_v23  ;;  %v3821_v22 = vld [vmem:[%s3940_s13 + $0x448] ss:$36 sps:$4 sm:$0xff]   ;;  %v3822_v23 = vld [vmem:[%s3940_s13 + $0x210] ss:$36 sps:$4 sm:$0xff]  }
  0xc5   : > { %2119 = vmatprep.mubr.bf16.mxu0 %v3771_v24  ;;  %2216 = vmatprep.mubr.bf16.mxu1 %v3775_v25  ;;  %v3825_v24 = vld [vmem:[%s3940_s13 + $0x25c] ss:$36 sps:$4 sm:$0xff]  }
  0xc6   : > { %v3826_v25 = vld [vmem:[%s3940_s13 + $0x20] ss:$36 sps:$4 sm:$0xff]  }
  0xcc   : > { %2120 = vmatmul.mubr.bf16.gmra.mxu0 %v3776_v27  ;;  %2217 = vmatmul.mubr.bf16.vlgmr.msra.gmra.mxu1 %v3773_v26 }
  0xcd   : > { %2127 = vmatprep.mubr.bf16.mxu0 %v3778_v28  ;;  %2224 = vmatprep.mubr.bf16.mxu1 %v3780_v29 }
  0xd4   : > { %2128 = vmatmul.mubr.bf16.gmra.mxu0 %v3782_v30  ;;  %2225 = vmatmul.mubr.bf16.gmra.mxu1 %v3783_v31 }
  0xd5   : > { %2135 = vmatprep.mubr.bf16.mxu0 %v3784_v32  ;;  %2232 = vmatprep.mubr.bf16.mxu1 %v3786_v33 }
  0xdc   : > { %2136 = vmatmul.mubr.bf16.gmra.mxu0 %v3788_v34  ;;  %2233 = vmatmul.mubr.bf16.gmra.mxu1 %v3789_v35 }
  0xdd   : > { %2143 = vmatprep.mubr.bf16.mxu0 %v3791_v36  ;;  %2240 = vmatprep.mubr.bf16.mxu1 %v3793_v37 }
  0xe4   : > { %2144 = vmatmul.mubr.bf16.gmra.mxu0 %v3795_v38  ;;  %2241 = vmatmul.mubr.bf16.gmra.mxu1 %v3796_v39  ;;  %v3823_v38 = vld [vmem:[%s3940_s13 + $0x258] ss:$36 sps:$4 sm:$0xff]   ;;  %v3827_v39 = vld [vmem:[%s3940_s13 + $0x68] ss:$36 sps:$4 sm:$0xff]  }
  0xe5   : > { %2151 = vmatprep.mubr.bf16.mxu0 %v3797_v40  ;;  %2248 = vmatprep.mubr.bf16.mxu1 %v3799_v41  ;;  %v3830_v40 = vld [vmem:[%s3940_s13 + $0x2a4] ss:$36 sps:$4 sm:$0xff]   ;;  %v3831_v41 = vld [vmem:[%s3940_s13 + $0xb0] ss:$36 sps:$4 sm:$0xff]  }
  0xec   : > { %v3054_v46 = vpop.f32.mrf.mxu0  ;;  %v3126_v47 = vpop.f32.mrf.mxu1  ;;  %2152 = vmatmul.mubr.bf16.gmra.mxu0 %v3801_v42  ;;  %2249 = vmatmul.mubr.bf16.gmra.mxu1 %v3802_v43 }
  0xed   : > { %2159 = vmatprep.mubr.bf16.mxu0 %v3804_v44  ;;  %2256 = vmatprep.mubr.bf16.mxu1 %v3806_v45 }
  0xee   : > { %v3055_v48 = vpop.f32.mrf.mxu0  ;;  %v3127_v49 = vpop.f32.mrf.mxu1 }
  0xef   : > { %v4233_v50 = vadd.f32 %v3055_v48, %v3054_v46  ;;  %v4235_v51 = vadd.f32 %v3127_v49, %v3126_v47  ;;  %v4284_v46 = vld [vmem:[%s4767_s2] ss:$0 sm:$0xff] }
  0xf0   : > { %v3057_v52 = vpop.f32.mrf.mxu0  ;;  %v3129_v53 = vpop.f32.mrf.mxu1 }
  0xf2   : > { %v3058_v58 = vpop.f32.mrf.mxu0  ;;  %v3130_v59 = vpop.f32.mrf.mxu1 }
  0xf3   : > { %v4241_v60 = vadd.f32 %v3058_v58, %v3057_v52  ;;  %v4243_v61 = vadd.f32 %v3130_v59, %v3129_v53  ;;  %v1736_v53 = vadd.f32 %v4233_v50, %v4284_v46  ;;  %v3828_v58 = vld [vmem:[%s3940_s13 + $0x2a0] ss:$36 sps:$4 sm:$0xff]   ;;  %v3832_v59 = vld [vmem:[%s3940_s13 + $0xf8] ss:$36 sps:$4 sm:$0xff]  }
  0xf4   : > { %v3060_v62 = vpop.f32.mrf.mxu0  ;;  %v3132_v63 = vpop.f32.mrf.mxu1  ;;  %2160 = vmatmul.mubr.bf16.gmra.mxu0 %v3808_v54  ;;  %2257 = vmatmul.mubr.bf16.gmra.mxu1 %v3809_v55 }
  0xf5   : > { %2167 = vmatprep.mubr.bf16.mxu0 %v3810_v56  ;;  %2264 = vmatprep.mubr.bf16.mxu1 %v3812_v57 }
  0xf6   : > { %v3061_v0 = vpop.f32.mrf.mxu0  ;;  %v3133_v1 = vpop.f32.mrf.mxu1 }
  0xf7   : > { %v4245_v2 = vadd.f32 %v3061_v0, %v3060_v62  ;;  %v4247_v3 = vadd.f32 %v3133_v1, %v3132_v63  ;;  %v3835_v63 = vld [vmem:[%s3940_s13 + $0x2ec] ss:$36 sps:$4 sm:$0xff]   ;;  %v3836_v0 = vld [vmem:[%s3940_s13 + $0x140] ss:$36 sps:$4 sm:$0xff]  }
  0xf8   : > { %v3063_v4 = vpop.f32.mrf.mxu0  ;;  %v3135_v5 = vpop.f32.mrf.mxu1 }
  0xfa   : > { %v3064_v10 = vpop.f32.mrf.mxu0  ;;  %v3136_v11 = vpop.f32.mrf.mxu1 }
  0xfb   : > { %v4253_v12 = vadd.f32 %v3064_v10, %v3063_v4  ;;  %v4255_v13 = vadd.f32 %v3136_v11, %v3135_v5  ;;  %v1739_v5 = vadd.f32 %v4241_v60, %v4284_v46  ;;  %v1744_v60 = vadd.f32 %v4245_v2, %v4284_v46 }
  0xfc   : > { %v3066_v14 = vpop.f32.mrf.mxu0  ;;  %v3138_v15 = vpop.f32.mrf.mxu1  ;;  %2168 = vmatmul.mubr.bf16.gmra.mxu0 %v3814_v6  ;;  %2265 = vmatmul.mubr.bf16.gmra.mxu1 %v3815_v7 }
  0xfd   : > { %2175 = vmatprep.mubr.bf16.mxu0 %v3817_v8  ;;  %2272 = vmatprep.mubr.bf16.mxu1 %v3819_v9 }
  0xfe   : > { %v3067_v16 = vpop.f32.mrf.mxu0  ;;  %v3139_v17 = vpop.f32.mrf.mxu1 }
  0xff   : > { %v4257_v18 = vadd.f32 %v3067_v16, %v3066_v14  ;;  %v4259_v19 = vadd.f32 %v3139_v17, %v3138_v15 }
 0x100   : > { %v3069_v20 = vpop.f32.mrf.mxu0  ;;  %v3141_v21 = vpop.f32.mrf.mxu1 }
 0x102   : > { %v3070_v26 = vpop.f32.mrf.mxu0  ;;  %v3142_v27 = vpop.f32.mrf.mxu1 }
 0x103   : > { %v4265_v28 = vadd.f32 %v3070_v26, %v3069_v20  ;;  %v4267_v29 = vadd.f32 %v3142_v27, %v3141_v21  ;;  %v3833_v20 = vld [vmem:[%s3940_s13 + $0x2e8] ss:$36 sps:$4 sm:$0xff]   ;;  %v1747_v27 = vadd.f32 %v4253_v12, %v4284_v46  ;;  %v1752_v12 = vadd.f32 %v4257_v18, %v4284_v46 }
 0x104   : > { %v3072_v30 = vpop.f32.mrf.mxu0  ;;  %v3144_v31 = vpop.f32.mrf.mxu1  ;;  %2176 = vmatmul.mubr.bf16.gmra.mxu0 %v3821_v22  ;;  %2273 = vmatmul.mubr.bf16.gmra.mxu1 %v3822_v23  ;;  %v3837_v21 = vld [vmem:[%s3940_s13 + $0x188] ss:$36 sps:$4 sm:$0xff]   ;;  %v3840_v23 = vld [vmem:[%s3940_s13 + $0x334] ss:$36 sps:$4 sm:$0xff]  }
 0x105   : > { %2280 = vmatprep.mubr.bf16.mxu1 %v3825_v24  ;;  %3526 = vmatprep.mubr.bf16.mxu0 %v3826_v25  ;;  %v3841_v24 = vld [vmem:[%s3940_s13 + $0x1d0] ss:$36 sps:$4 sm:$0xff]  }
 0x106   : > { %v3073_v32 = vpop.f32.mrf.mxu0  ;;  %v3145_v33 = vpop.f32.mrf.mxu1 }
 0x107   : > { %v4269_v34 = vadd.f32 %v3073_v32, %v3072_v30  ;;  %v4271_v35 = vadd.f32 %v3145_v33, %v3144_v31 }
 0x108   : > { %v3075_v36 = vpop.f32.mrf.mxu0  ;;  %v3147_v37 = vpop.f32.mrf.mxu1 }
 0x10a   : > { %v3076_v42 = vpop.f32.mrf.mxu0  ;;  %v3148_v43 = vpop.f32.mrf.mxu1 }
 0x10b   : > { %v4277_v44 = vadd.f32 %v3076_v42, %v3075_v36  ;;  %v4279_v45 = vadd.f32 %v3148_v43, %v3147_v37  ;;  %v3838_v42 = vld [vmem:[%s3940_s13 + $0x330] ss:$36 sps:$4 sm:$0xff]   ;;  %v3842_v43 = vld [vmem:[%s3940_s13 + $0x218] ss:$36 sps:$4 sm:$0xff]  }
 0x10c   : > { %v3078_v47 = vpop.f32.mrf.mxu0  ;;  %v3166_v48 = vpop.f32.mrf.mxu1  ;;  %2281 = vmatmul.mubr.bf16.gmra.mxu1 %v3823_v38  ;;  %3527 = vmatmul.mubr.bf16.vlgmr.msra.gmra.mxu0 %v3827_v39 }
 0x10d   : > { %2288 = vmatprep.mubr.bf16.mxu1 %v3830_v40  ;;  %3530 = vmatprep.mubr.bf16.mxu0 %v3831_v41 }
 0x10e   : > { %v3079_v49 = vpop.f32.mrf.mxu0  ;;  %v3167_v52 = vpop.f32.mrf.mxu1 }
 0x10f   : > { %v4288_v54 = vadd.f32 %v3079_v49, %v3078_v47  ;;  %v3168_v55 = vadd.f32 %v3167_v52, %v3166_v48  ;;  %v3845_v48 = vld [vmem:[%s3940_s13 + $0x37c] ss:$36 sps:$4 sm:$0xff]  }
 0x110   : > { %v3081_v56 = vpop.f32.mrf.mxu0  ;;  %v3169_v57 = vpop.f32.mrf.mxu1  ;;  %v3846_v49 = vld [vmem:[%s3940_s13 + $0x260] ss:$36 sps:$4 sm:$0xff]  }
 0x111   : > { %v4292_v62 = vadd.f32 %v3168_v55, %v1736_v53  ;;  %v1755_v55 = vadd.f32 %v4265_v28, %v4284_v46  ;;  %v1760_v28 = vadd.f32 %v4269_v34, %v4284_v46 }
 0x112   : > { %v3082_v1 = vpop.f32.mrf.mxu0  ;;  %v3170_v4 = vpop.f32.mrf.mxu1 }
 0x113   : > { %v4298_v6 = vadd.f32 %v3082_v1, %v3081_v56  ;;  %v3171_v50 = vadd.f32 %v3170_v4, %v3169_v57 }
 0x114   : > { %v3084_v7 = vpop.f32.mrf.mxu0  ;;  %v3172_v8 = vpop.f32.mrf.mxu1  ;;  %2289 = vmatmul.mubr.bf16.gmra.mxu1 %v3828_v58  ;;  %3531 = vmatmul.mubr.bf16.gmra.mxu0 %v3832_v59 }
 0x115   : > { %v4300_v9 = vadd.f32 %v3171_v50, %v1739_v5  ;;  %2296 = vmatprep.mubr.bf16.mxu1 %v3835_v63  ;;  %3534 = vmatprep.mubr.bf16.mxu0 %v3836_v0 }
 0x116   : > { %v3085_v10 = vpop.f32.mrf.mxu0  ;;  %v3173_v11 = vpop.f32.mrf.mxu1 }
 0x117   : > { %v4304_v14 = vadd.f32 %v3085_v10, %v3084_v7  ;;  %v3174_v15 = vadd.f32 %v3173_v11, %v3172_v8  ;;  %v3843_v7 = vld [vmem:[%s3940_s13 + $0x378] ss:$36 sps:$4 sm:$0xff]   ;;  %v3847_v8 = vld [vmem:[%s3940_s13 + $0x2a8] ss:$36 sps:$4 sm:$0xff]  }
 0x118   : > { %v3087_v16 = vpop.f32.mrf.mxu0  ;;  %v3175_v17 = vpop.f32.mrf.mxu1  ;;  %v3850_v11 = vld [vmem:[%s3940_s13 + $0x3c4] ss:$36 sps:$4 sm:$0xff]  }
 0x119   : > { %v4308_v22 = vadd.f32 %v3174_v15, %v1744_v60  ;;  %v3851_v60 = vld [vmem:[%s3940_s13 + $0x2f0] ss:$36 sps:$4 sm:$0xff]  }
 0x11a   : > { %v3088_v25 = vpop.f32.mrf.mxu0  ;;  %v3176_v26 = vpop.f32.mrf.mxu1 }
 0x11b   : > { %v4314_v30 = vadd.f32 %v3088_v25, %v3087_v16  ;;  %v3177_v2 = vadd.f32 %v3176_v26, %v3175_v17  ;;  %v1763_v17 = vadd.f32 %v4277_v44, %v4284_v46  ;;  %v1768_v44 = vadd.f32 %v4288_v54, %v4284_v46 }
 0x11c   : > { %v3090_v31 = vpop.f32.mrf.mxu0  ;;  %v3178_v32 = vpop.f32.mrf.mxu1  ;;  %2297 = vmatmul.mubr.bf16.gmra.mxu1 %v3833_v20  ;;  %3535 = vmatmul.mubr.bf16.gmra.mxu0 %v3837_v21 }
 0x11d   : > { %v4316_v33 = vadd.f32 %v3177_v2, %v1747_v27  ;;  %2304 = vmatprep.mubr.bf16.mxu1 %v3840_v23  ;;  %3538 = vmatprep.mubr.bf16.mxu0 %v3841_v24 }
 0x11e   : > { %v3091_v36 = vpop.f32.mrf.mxu0  ;;  %v3179_v37 = vpop.f32.mrf.mxu1 }
 0x11f   : > { %v4320_v38 = vadd.f32 %v3091_v36, %v3090_v31  ;;  %v3180_v39 = vadd.f32 %v3179_v37, %v3178_v32  ;;  %v3848_v36 = vld [vmem:[%s3940_s13 + $0x3c0] ss:$36 sps:$4 sm:$0xff]   ;;  %v3852_v37 = vld [vmem:[%s3940_s13 + $0x338] ss:$36 sps:$4 sm:$0xff]  }
 0x120   : > { %v3093_v40 = vpop.f32.mrf.mxu0  ;;  %v3181_v41 = vpop.f32.mrf.mxu1 }
 0x121   : > { %v4324_v47 = vadd.f32 %v3180_v39, %v1752_v12  ;;  %v3855_v39 = vld [vmem:[%s3940_s13 + $0x40c] ss:$36 sps:$4 sm:$0xff]  }
 0x122   : > { %v3094_v52 = vpop.f32.mrf.mxu0  ;;  %v3182_v53 = vpop.f32.mrf.mxu1 }
 0x123   : > { %v4330_v56 = vadd.f32 %v3094_v52, %v3093_v40  ;;  %v3183_v18 = vadd.f32 %v3182_v53, %v3181_v41  ;;  %v3856_v40 = vld [vmem:[%s3940_s13 + $0x380] ss:$36 sps:$4 sm:$0xff]  }
 0x124   : > { %v3096_v57 = vpop.f32.mrf.mxu0  ;;  %v3184_v58 = vpop.f32.mrf.mxu1  ;;  %2305 = vmatmul.mubr.bf16.gmra.mxu1 %v3838_v42  ;;  %3539 = vmatmul.mubr.bf16.gmra.mxu0 %v3842_v43  ;;  %v1771_v43 = vadd.f32 %v4298_v6, %v4284_v46  ;;  %v1776_v6 = vadd.f32 %v4304_v14, %v4284_v46 }
 0x125   : > { %v4332_v59 = vadd.f32 %v3183_v18, %v1755_v55  ;;  %2312 = vmatprep.mubr.bf16.mxu1 %v3845_v48  ;;  %3542 = vmatprep.mubr.bf16.mxu0 %v3846_v49 }
 0x126   : > { %v3097_v63 = vpop.f32.mrf.mxu0  ;;  %v3185_v0 = vpop.f32.mrf.mxu1 }
 0x127   : > { %v4336_v1 = vadd.f32 %v3097_v63, %v3096_v57  ;;  %v3186_v4 = vadd.f32 %v3185_v0, %v3184_v58 }
 0x128   : > { %v3099_v5 = vpop.f32.mrf.mxu0  ;;  %v3187_v50 = vpop.f32.mrf.mxu1 }
 0x129   : > { %v4340_v10 = vadd.f32 %v3186_v4, %v1760_v28  ;;  %v3853_v28 = vld [vmem:[%s3940_s13 + $0x408] ss:$36 sps:$4 sm:$0xff]  }
 0x12a   : > { %v3100_v15 = vpop.f32.mrf.mxu0  ;;  %v3188_v16 = vpop.f32.mrf.mxu1  ;;  %v3857_v4 = vld [vmem:[%s3940_s13 + $0x3c8] ss:$36 sps:$4 sm:$0xff]  }
 0x12b   : > { %v4346_v20 = vadd.f32 %v3100_v15, %v3099_v5  ;;  %v3189_v34 = vadd.f32 %v3188_v16, %v3187_v50  ;;  %v3860_v50 = vld [vmem:[%s3940_s13 + $0x454] ss:$36 sps:$4 sm:$0xff]  }
 0x12c   : > { %v3102_v21 = vpop.f32.mrf.mxu0  ;;  %v3190_v23 = vpop.f32.mrf.mxu1  ;;  %2313 = vmatmul.mubr.bf16.gmra.mxu1 %v3843_v7  ;;  %3543 = vmatmul.mubr.bf16.gmra.mxu0 %v3847_v8  ;;  %v3861_v7 = vld [vmem:[%s3940_s13 + $0x410] ss:$36 sps:$4 sm:$0xff]  }
 0x12d   : > { %v4348_v24 = vadd.f32 %v3189_v34, %v1763_v17  ;;  %2320 = vmatprep.mubr.bf16.mxu1 %v3850_v11  ;;  %3546 = vmatprep.mubr.bf16.mxu0 %v3851_v60  ;;  %v1779_v60 = vadd.f32 %v4314_v30, %v4284_v46 }
 0x12e   : > { %v3103_v25 = vpop.f32.mrf.mxu0  ;;  %v3191_v26 = vpop.f32.mrf.mxu1 }
 0x12f   : > { %v4352_v27 = vadd.f32 %v3103_v25, %v3102_v21  ;;  %v3192_v2 = vadd.f32 %v3191_v26, %v3190_v23  ;;  %v1784_v25 = vadd.f32 %v4320_v38, %v4284_v46 }
 0x130   : > { %v3105_v31 = vpop.f32.mrf.mxu0  ;;  %v3193_v32 = vpop.f32.mrf.mxu1 }
 0x131   : > { %v4356_v12 = vadd.f32 %v3192_v2, %v1768_v44 }
 0x132   : > { %v3106_v41 = vpop.f32.mrf.mxu0  ;;  %v3194_v42 = vpop.f32.mrf.mxu1 }
 0x133   : > { %v4362_v48 = vadd.f32 %v3106_v41, %v3105_v31  ;;  %v3195_v54 = vadd.f32 %v3194_v42, %v3193_v32  ;;  %v3858_v31 = vld [vmem:[%s3940_s13 + $0x450] ss:$36 sps:$4 sm:$0xff]   ;;  %v3862_v32 = vld [vmem:[%s3940_s13 + $0x458] ss:$36 sps:$4 sm:$0xff]   ;;  %s2739_s13 = sshll.u32 %s4803_s19, 2 }
 0x134   : > { %v3108_v49 = vpop.f32.mrf.mxu0  ;;  %v3196_v52 = vpop.f32.mrf.mxu1  ;;  %2321 = vmatmul.mubr.bf16.gmra.mxu1 %v3848_v36  ;;  %3547 = vmatmul.mubr.bf16.gmra.mxu0 %v3852_v37  ;;  %s4632_s11 = scalar_lea.vmem %s4768_s3, %s2739_s13 }
 0x135   : > { %v4364_v53 = vadd.f32 %v3195_v54, %v1771_v43  ;;  %2328 = vmatprep.mubr.bf16.mxu1 %v3855_v39  ;;  %3550 = vmatprep.mubr.bf16.mxu0 %v3856_v40  ;;  %v1787_v40 = vadd.f32 %v4330_v56, %v4284_v46 }
 0x136   : > { %v3109_v55 = vpop.f32.mrf.mxu0  ;;  %v3197_v18 = vpop.f32.mrf.mxu1 }
 0x137   : > { %v4368_v57 = vadd.f32 %v3109_v55, %v3108_v49  ;;  %v3198_v58 = vadd.f32 %v3197_v18, %v3196_v52  ;;  %v1792_v55 = vadd.f32 %v4336_v1, %v4284_v46 }
 0x138   : > { %v3111_v63 = vpop.f32.mrf.mxu0  ;;  %v3199_v0 = vpop.f32.mrf.mxu1 }
 0x139   : > { %v4372_v5 = vadd.f32 %v3198_v58, %v1776_v6 }
 0x13a   : > { %v3112_v8 = vpop.f32.mrf.mxu0  ;;  %v3200_v11 = vpop.f32.mrf.mxu1 }
 0x13b   : > { %v4378_v15 = vadd.f32 %v3112_v8, %v3111_v63  ;;  %v3201_v14 = vadd.f32 %v3200_v11, %v3199_v0 }
 0x13c   : > { %v3114_v16 = vpop.f32.mrf.mxu0  ;;  %v3202_v17 = vpop.f32.mrf.mxu1  ;;  %2329 = vmatmul.mubr.bf16.gmra.mxu1 %v3853_v28  ;;  %3551 = vmatmul.mubr.bf16.gmra.mxu0 %v3857_v4  ;;  %v1795_v4 = vadd.f32 %v4346_v20, %v4284_v46 }
 0x13d   : > { %v4380_v34 = vadd.f32 %v3201_v14, %v1779_v60  ;;  %2336 = vmatprep.mubr.bf16.mxu1 %v3860_v50  ;;  %3554 = vmatprep.mubr.bf16.mxu0 %v3861_v7 }
 0x13e   : > { %v3115_v21 = vpop.f32.mrf.mxu0  ;;  %v3203_v23 = vpop.f32.mrf.mxu1 }
 0x13f   : > { %v4384_v26 = vadd.f32 %v3115_v21, %v3114_v16  ;;  %v3204_v30 = vadd.f32 %v3203_v23, %v3202_v17  ;;  %v1800_v16 = vadd.f32 %v4352_v27, %v4284_v46 }
 0x140   : > { %v3117_v44 = vpop.f32.mrf.mxu0  ;;  %v3205_v2 = vpop.f32.mrf.mxu1 }
 0x141   : > { %v4388_v36 = vadd.f32 %v3204_v30, %v1784_v25 }
 0x142   : > { %v3118_v37 = vpop.f32.mrf.mxu0  ;;  %v3206_v39 = vpop.f32.mrf.mxu1 }
 0x143   : > { %v4392_v41 = vadd.f32 %v3118_v37, %v3117_v44  ;;  %v3207_v42 = vadd.f32 %v3206_v39, %v3205_v2 }
 0x144   : > { %v3120_v43 = vpop.f32.mrf.mxu0  ;;  %v3208_v54 = vpop.f32.mrf.mxu1  ;;  %2337 = vmatmul.mubr.bf16.gmra.mxu1 %v3858_v31  ;;  %3555 = vmatmul.mubr.bf16.gmra.mxu0 %v3862_v32  ;;  %v1803_v31 = vadd.f32 %v4362_v48, %v4284_v46 }
 0x145   : > { %v4394_v38 = vadd.f32 %v3207_v42, %v1787_v40 }
 0x146   : > { %v3121_v49 = vpop.f32.mrf.mxu0  ;;  %v3209_v52 = vpop.f32.mrf.mxu1 }
 0x147   : > { %v4398_v18 = vadd.f32 %v3121_v49, %v3120_v43  ;;  %v3210_v6 = vadd.f32 %v3209_v52, %v3208_v54 }
 0x148   : > { %v3123_v58 = vpop.f32.mrf.mxu0  ;;  %v3211_v63 = vpop.f32.mrf.mxu1 }
 0x149   : > { %v4400_v56 = vadd.f32 %v3210_v6, %v1792_v55 }
 0x14a   : > { %v3124_v0 = vpop.f32.mrf.mxu0  ;;  %v3212_v28 = vpop.f32.mrf.mxu1 }
 0x14b   : > { %v4404_v50 = vadd.f32 %v3124_v0, %v3123_v58  ;;  %v3213_v7 = vadd.f32 %v3212_v28, %v3211_v63 }
 0x14c   : > { %v3214_v8 = vpop.f32.mrf.mxu1  ;;  %v3278_v11 = vpop.f32.mrf.mxu0 }
 0x14d   : > { %v4406_v60 = vadd.f32 %v3213_v7, %v1795_v4 }
 0x14e   : > { %v3215_v1 = vpop.f32.mrf.mxu1  ;;  %v3279_v14 = vpop.f32.mrf.mxu0 }
 0x14f   : > { %v3216_v17 = vadd.f32 %v3215_v1, %v3214_v8  ;;  %v3280_v21 = vadd.f32 %v3279_v14, %v3278_v11 }
 0x150   : > { %v3217_v23 = vpop.f32.mrf.mxu1  ;;  %v3281_v25 = vpop.f32.mrf.mxu0 }
 0x151   : > { %v4410_v30 = vadd.f32 %v3216_v17, %v1800_v16  ;;  %v4413_v20 = vadd.f32 %v3280_v21, %v4292_v62  ;;  %v1808_v62 = vadd.f32 %v4368_v57, %v4284_v46 }
 0x152   : > { %v3218_v44 = vpop.f32.mrf.mxu1  ;;  %v3282_v2 = vpop.f32.mrf.mxu0 }
 0x153   : > { %v3219_v32 = vadd.f32 %v3218_v44, %v3217_v23  ;;  %v3283_v37 = vadd.f32 %v3282_v2, %v3281_v25 }
 0x154   : > { %v3220_v39 = vpop.f32.mrf.mxu1  ;;  %v3284_v40 = vpop.f32.mrf.mxu0 }
 0x155   : > { %v4417_v42 = vadd.f32 %v3219_v32, %v1803_v31  ;;  %v4420_v27 = vadd.f32 %v3283_v37, %v4300_v9  ;;  %v1811_v9 = vadd.f32 %v4378_v15, %v4284_v46 }
 0x156   : > { %v3221_v43 = vpop.f32.mrf.mxu1  ;;  %v3285_v54 = vpop.f32.mrf.mxu0 }
 0x157   : > { %v3222_v49 = vadd.f32 %v3221_v43, %v3220_v39  ;;  %v3286_v52 = vadd.f32 %v3285_v54, %v3284_v40 }
 0x158   : > { %v3223_v55 = vpop.f32.mrf.mxu1  ;;  %v3287_v6 = vpop.f32.mrf.mxu0 }
 0x159   : > { %v4424_v58 = vadd.f32 %v3222_v49, %v1808_v62  ;;  %v4427_v48 = vadd.f32 %v3286_v52, %v4308_v22  ;;  %v1816_v22 = vadd.f32 %v4384_v26, %v4284_v46 }
 0x15a   : > { %v3224_v63 = vpop.f32.mrf.mxu1  ;;  %v3288_v0 = vpop.f32.mrf.mxu0 }
 0x15b   : > { %v3225_v28 = vadd.f32 %v3224_v63, %v3223_v55  ;;  %v3289_v4 = vadd.f32 %v3288_v0, %v3287_v6 }
 0x15c   : > { %v3226_v7 = vpop.f32.mrf.mxu1  ;;  %v3290_v8 = vpop.f32.mrf.mxu0 }
 0x15d   : > { %v4431_v11 = vadd.f32 %v3225_v28, %v1811_v9  ;;  %v4434_v57 = vadd.f32 %v3289_v4, %v4316_v33  ;;  %v1819_v33 = vadd.f32 %v4392_v41, %v4284_v46 }
 0x15e   : > { %v3227_v1 = vpop.f32.mrf.mxu1  ;;  %v3291_v14 = vpop.f32.mrf.mxu0 }
 0x15f   : > { %v3228_v16 = vadd.f32 %v3227_v1, %v3226_v7  ;;  %v3292_v17 = vadd.f32 %v3291_v14, %v3290_v8 }
 0x160   : > { %v3229_v21 = vpop.f32.mrf.mxu1  ;;  %v3293_v23 = vpop.f32.mrf.mxu0 }
 0x161   : > { %v4438_v25 = vadd.f32 %v3228_v16, %v1816_v22  ;;  %v4441_v15 = vadd.f32 %v3292_v17, %v4324_v47  ;;  %v1824_v47 = vadd.f32 %v4398_v18, %v4284_v46 }
 0x162   : > { %v3230_v44 = vpop.f32.mrf.mxu1  ;;  %v3294_v2 = vpop.f32.mrf.mxu0 }
 0x163   : > { %v3231_v31 = vadd.f32 %v3230_v44, %v3229_v21  ;;  %v3295_v32 = vadd.f32 %v3294_v2, %v3293_v23 }
 0x164   : > { %v3232_v37 = vpop.f32.mrf.mxu1  ;;  %v3296_v39 = vpop.f32.mrf.mxu0 }
 0x165   : > { %v4445_v40 = vadd.f32 %v3231_v31, %v1819_v33  ;;  %v4448_v26 = vadd.f32 %v3295_v32, %v4332_v59  ;;  %v1827_v59 = vadd.f32 %v4404_v50, %v4284_v46 }
 0x166   : > { %v3233_v43 = vpop.f32.mrf.mxu1  ;;  %v3297_v54 = vpop.f32.mrf.mxu0 }
 0x167   : > { %v3234_v62 = vadd.f32 %v3233_v43, %v3232_v37  ;;  %v3298_v49 = vadd.f32 %v3297_v54, %v3296_v39 }
 0x168   : > { %v3235_v52 = vpop.f32.mrf.mxu1  ;;  %v3299_v55 = vpop.f32.mrf.mxu0 }
 0x169   : > { %v4452_v6 = vadd.f32 %v3234_v62, %v1824_v47  ;;  %v4455_v41 = vadd.f32 %v3298_v49, %v4340_v10  ;;  %v1832_v10 = vadd.f32 %v4235_v51, %v4284_v46 }
 0x16a   : > { %v3236_v63 = vpop.f32.mrf.mxu1  ;;  %v3300_v0 = vpop.f32.mrf.mxu0 }
 0x16b   : > { %v3237_v9 = vadd.f32 %v3236_v63, %v3235_v52  ;;  %v3301_v28 = vadd.f32 %v3300_v0, %v3299_v55 }
 0x16c   : > { %v3238_v4 = vpop.f32.mrf.mxu1  ;;  %v3302_v7 = vpop.f32.mrf.mxu0 }
 0x16d   : > { %v4459_v8 = vadd.f32 %v3237_v9, %v1827_v59  ;;  %v4462_v18 = vadd.f32 %v3301_v28, %v4348_v24  ;;  %v1835_v24 = vadd.f32 %v4243_v61, %v4284_v46 }
 0x16e   : > { %v3239_v1 = vpop.f32.mrf.mxu1  ;;  %v3303_v14 = vpop.f32.mrf.mxu0 }
 0x16f   : > { %v3240_v22 = vadd.f32 %v3239_v1, %v3238_v4  ;;  %v3304_v16 = vadd.f32 %v3303_v14, %v3302_v7 }
 0x170   : > { %v3241_v17 = vpop.f32.mrf.mxu1  ;;  %v3305_v21 = vpop.f32.mrf.mxu0 }
 0x171   : > { %v4466_v23 = vadd.f32 %v3240_v22, %v1832_v10  ;;  %v4469_v50 = vadd.f32 %v3304_v16, %v4356_v12  ;;  %v1840_v12 = vadd.f32 %v4247_v3, %v4284_v46 }
 0x172   : > { %v3242_v44 = vpop.f32.mrf.mxu1  ;;  %v3306_v2 = vpop.f32.mrf.mxu0 }
 0x173   : > { %v3243_v33 = vadd.f32 %v3242_v44, %v3241_v17  ;;  %v3307_v31 = vadd.f32 %v3306_v2, %v3305_v21 }
 0x174   : > { %v3244_v32 = vpop.f32.mrf.mxu1  ;;  %v3308_v37 = vpop.f32.mrf.mxu0 }
 0x175   : > { %v4473_v39 = vadd.f32 %v3243_v33, %v1835_v24  ;;  %v4476_v51 = vadd.f32 %v3307_v31, %v4364_v53  ;;  %v1843_v53 = vadd.f32 %v4255_v13, %v4284_v46 }
 0x176   : > { %v3245_v43 = vpop.f32.mrf.mxu1  ;;  %v3309_v54 = vpop.f32.mrf.mxu0 }
 0x177   : > { %v3246_v47 = vadd.f32 %v3245_v43, %v3244_v32  ;;  %v3310_v62 = vadd.f32 %v3309_v54, %v3308_v37 }
 0x178   : > { %v3247_v49 = vpop.f32.mrf.mxu1  ;;  %v3311_v52 = vpop.f32.mrf.mxu0 }
 0x179   : > { %v4480_v55 = vadd.f32 %v3246_v47, %v1840_v12  ;;  %v4483_v61 = vadd.f32 %v3310_v62, %v4372_v5  ;;  %v1848_v5 = vadd.f32 %v4259_v19, %v4284_v46 }
 0x17a   : > { %v3248_v63 = vpop.f32.mrf.mxu1  ;;  %v3312_v0 = vpop.f32.mrf.mxu0 }
 0x17b   : > { %v3249_v59 = vadd.f32 %v3248_v63, %v3247_v49  ;;  %v3313_v9 = vadd.f32 %v3312_v0, %v3311_v52 }
 0x17c   : > { %v3250_v28 = vpop.f32.mrf.mxu1  ;;  %v3314_v4 = vpop.f32.mrf.mxu0 }
 0x17d   : > { %v4487_v7 = vadd.f32 %v3249_v59, %v1843_v53  ;;  %v4490_v3 = vadd.f32 %v3313_v9, %v4380_v34  ;;  %v1851_v34 = vadd.f32 %v4267_v29, %v4284_v46 }
 0x17e   : > { %v3251_v1 = vpop.f32.mrf.mxu1  ;;  %v3315_v14 = vpop.f32.mrf.mxu0 }
 0x17f   : > { %v3252_v10 = vadd.f32 %v3251_v1, %v3250_v28  ;;  %v3316_v22 = vadd.f32 %v3315_v14, %v3314_v4 }
 0x180   : > { %v3253_v16 = vpop.f32.mrf.mxu1  ;;  %v3317_v17 = vpop.f32.mrf.mxu0 }
 0x181   : > { %v4494_v21 = vadd.f32 %v3252_v10, %v1848_v5  ;;  %v4497_v13 = vadd.f32 %v3316_v22, %v4388_v36  ;;  %v1856_v36 = vadd.f32 %v4271_v35, %v4284_v46 }
 0x182   : > { %v3254_v44 = vpop.f32.mrf.mxu1  ;;  %v3318_v2 = vpop.f32.mrf.mxu0 }
 0x183   : > { %v3255_v24 = vadd.f32 %v3254_v44, %v3253_v16  ;;  %v3319_v33 = vadd.f32 %v3318_v2, %v3317_v17 }
 0x184   : > { %v3256_v31 = vpop.f32.mrf.mxu1  ;;  %v3320_v32 = vpop.f32.mrf.mxu0 }
 0x185   : > { %v4501_v37 = vadd.f32 %v3255_v24, %v1851_v34  ;;  %v4504_v19 = vadd.f32 %v3319_v33, %v4394_v38  ;;  %v1859_v38 = vadd.f32 %v4279_v45, %v4284_v46 }
 0x186   : > { %v3257_v43 = vpop.f32.mrf.mxu1  ;;  %v3321_v54 = vpop.f32.mrf.mxu0 }
 0x187   : > { %v3258_v12 = vadd.f32 %v3257_v43, %v3256_v31  ;;  %v3322_v47 = vadd.f32 %v3321_v54, %v3320_v32 }
 0x188   : > { %v3259_v62 = vpop.f32.mrf.mxu1  ;;  %v3323_v49 = vpop.f32.mrf.mxu0 }
 0x189   : > { %v4508_v52 = vadd.f32 %v3258_v12, %v1856_v36  ;;  %v4511_v29 = vadd.f32 %v3322_v47, %v4400_v56 }
 0x18a   : > { %v3260_v63 = vpop.f32.mrf.mxu1  ;;  %v3324_v0 = vpop.f32.mrf.mxu0 }
 0x18b   : > { %v3261_v53 = vadd.f32 %v3260_v63, %v3259_v62  ;;  %v3325_v59 = vadd.f32 %v3324_v0, %v3323_v49 }
 0x18c   : > { %v3326_v9 = vpop.f32.mrf.mxu0  ;;  %v3390_v28 = vpop.f32.mrf.mxu1 }
 0x18d   : > { %v4515_v4 = vadd.f32 %v3261_v53, %v1859_v38  ;;  %v4518_v35 = vadd.f32 %v3325_v59, %v4406_v60 }
 0x18e   : > { %v3327_v1 = vpop.f32.mrf.mxu0  ;;  %v3391_v14 = vpop.f32.mrf.mxu1 }
 0x18f   : > { %v3328_v5 = vadd.f32 %v3327_v1, %v3326_v9  ;;  %v3392_v10 = vadd.f32 %v3391_v14, %v3390_v28 }
 0x190   : > { %v3329_v56 = vpop.f32.mrf.mxu0  ;;  %v4520_v22 = vpop.f32.mrf.mxu1 }
 0x191   : > { %v4523_v16 = vadd.f32 %v3328_v5, %v4410_v30  ;;  %v4526_v45 = vadd.f32 %v3392_v10, %v4413_v20 }
 0x192   : > { %v3330_v46 = vpop.f32.mrf.mxu0  ;;  %v4528_v17 = vpop.f32.mrf.mxu1 }
 0x193   : > { %4770 = vst [vmem:[#allocation2_spill] sm:$0xff] %v4523_v16  ;;  %v3331_v44 = vadd.f32 %v3330_v46, %v3329_v56 }
 0x194   : > { %v3332_v2 = vpop.f32.mrf.mxu0  ;;  %v4530_v60 = vpop.f32.mrf.mxu1 }
 0x195   : > { %v4533_v34 = vadd.f32 %v3331_v44, %v4417_v42 }
 0x196   : > { %v3333_v24 = vpop.f32.mrf.mxu0  ;;  %v4535_v33 = vpop.f32.mrf.mxu1 }
 0x197   : > { %4771 = vst [vmem:[#allocation3_spill] sm:$0xff] %v4533_v34  ;;  %v3334_v31 = vadd.f32 %v3333_v24, %v3332_v2 }
 0x198   : > { %v3335_v32 = vpop.f32.mrf.mxu0  ;;  %v4537_v30 = vpop.f32.mrf.mxu1 }
 0x199   : > { %v4540_v20 = vadd.f32 %v3334_v31, %v4424_v58 }
 0x19a   : > { %v3336_v43 = vpop.f32.mrf.mxu0  ;;  %v4542_v54 = vpop.f32.mrf.mxu1 }
 0x19b   : > { %4772 = vst [vmem:[#allocation4_spill] sm:$0xff] %v4540_v20  ;;  %v3337_v36 = vadd.f32 %v3336_v43, %v3335_v32 }
 0x19c   : > { %v3338_v12 = vpop.f32.mrf.mxu0  ;;  %v4544_v47 = vpop.f32.mrf.mxu1 }
 0x19d   : > { %v4547_v42 = vadd.f32 %v3337_v36, %v4431_v11 }
 0x19e   : > { %v3339_v62 = vpop.f32.mrf.mxu0  ;;  %v4549_v49 = vpop.f32.mrf.mxu1 }
 0x19f   : > { %4773 = vst [vmem:[#allocation5_spill] sm:$0xff] %v4547_v42  ;;  %v3340_v63 = vadd.f32 %v3339_v62, %v3338_v12 }
 0x1a0   : > { %v3341_v0 = vpop.f32.mrf.mxu0  ;;  %v4551_v38 = vpop.f32.mrf.mxu1 }
 0x1a1   : > { %v4554_v58 = vadd.f32 %v3340_v63, %v4438_v25 }
 0x1a2   : > { %v3342_v53 = vpop.f32.mrf.mxu0  ;;  %v4556_v59 = vpop.f32.mrf.mxu1 }
 0x1a3   : > { %4774 = vst [vmem:[#allocation6_spill] sm:$0xff] %v4554_v58  ;;  %v3343_v9 = vadd.f32 %v3342_v53, %v3341_v0 }
 0x1a4   : > { %v3344_v28 = vpop.f32.mrf.mxu0  ;;  %v4558_v1 = vpop.f32.mrf.mxu1 }
 0x1a5   : > { %v4561_v11 = vadd.f32 %v3343_v9, %v4445_v40 }
 0x1a6   : > { %v3345_v14 = vpop.f32.mrf.mxu0  ;;  %v4563_v5 = vpop.f32.mrf.mxu1 }
 0x1a7   : > { %4775 = vst [vmem:[#allocation7_spill] sm:$0xff] %v4561_v11  ;;  %v3346_v10 = vadd.f32 %v3345_v14, %v3344_v28 }
 0x1a8   : > { %v3347_v56 = vpop.f32.mrf.mxu0  ;;  %v4565_v46 = vpop.f32.mrf.mxu1 }
 0x1a9   : > { %v4568_v25 = vadd.f32 %v3346_v10, %v4452_v6 }
 0x1aa   : > { %v3348_v44 = vpop.f32.mrf.mxu0  ;;  %v4570_v2 = vpop.f32.mrf.mxu1 }
 0x1ab   : > { %4776 = vst [vmem:[#allocation8_spill] sm:$0xff] %v4568_v25  ;;  %v3349_v24 = vadd.f32 %v3348_v44, %v3347_v56 }
 0x1ac   : > { %v3350_v31 = vpop.f32.mrf.mxu0  ;;  %v4572_v32 = vpop.f32.mrf.mxu1 }
 0x1ad   : > { %v4575_v40 = vadd.f32 %v3349_v24, %v4459_v8 }
 0x1ae   : > { %v3351_v43 = vpop.f32.mrf.mxu0  ;;  %v4577_v36 = vpop.f32.mrf.mxu1 }
 0x1af   : > { %4777 = vst [vmem:[#allocation9_spill] sm:$0xff] %v4575_v40  ;;  %v3352_v12 = vadd.f32 %v3351_v43, %v3350_v31 }
 0x1b0   : > { %v3353_v62 = vpop.f32.mrf.mxu0  ;;  %v4579_v63 = vpop.f32.mrf.mxu1 }
 0x1b1   : > { %v4582_v6 = vadd.f32 %v3352_v12, %v4466_v23 }
 0x1b2   : > { %v3354_v0 = vpop.f32.mrf.mxu0  ;;  %v4584_v53 = vpop.f32.mrf.mxu1 }
 0x1b3   : > { %4778 = vst [vmem:[#allocation10_spill] sm:$0xff] %v4582_v6  ;;  %v3355_v9 = vadd.f32 %v3354_v0, %v3353_v62 }
 0x1b4   : > { %v3356_v28 = vpop.f32.mrf.mxu0  ;;  %v4586_v14 = vpop.f32.mrf.mxu1 }
 0x1b5   : > { %v4589_v8 = vadd.f32 %v3355_v9, %v4473_v39 }
 0x1b6   : > { %v3357_v10 = vpop.f32.mrf.mxu0  ;;  %v4591_v56 = vpop.f32.mrf.mxu1 }
 0x1b7   : > { %4779 = vst [vmem:[#allocation11_spill] sm:$0xff] %v4589_v8  ;;  %v3358_v44 = vadd.f32 %v3357_v10, %v3356_v28 }
 0x1b8   : > { %v3359_v24 = vpop.f32.mrf.mxu0  ;;  %v4593_v31 = vpop.f32.mrf.mxu1 }
 0x1b9   : > { %v4596_v23 = vadd.f32 %v3358_v44, %v4480_v55 }
 0x1ba   : > { %v3360_v43 = vpop.f32.mrf.mxu0  ;;  %v4598_v12 = vpop.f32.mrf.mxu1 }
 0x1bb   : > { %4780 = vst [vmem:[#allocation12_spill] sm:$0xff] %v4596_v23  ;;  %v3361_v62 = vadd.f32 %v3360_v43, %v3359_v24 }
 0x1bc   : > { %v3362_v0 = vpop.f32.mrf.mxu0  ;;  %v4600_v6 = vpop.f32.mrf.mxu1 }
 0x1bd   : > { %v4603_v39 = vadd.f32 %v3361_v62, %v4487_v7 }
 0x1be   : > { %v3363_v9 = vpop.f32.mrf.mxu0  ;;  %v4605_v8 = vpop.f32.mrf.mxu1 }
 0x1bf   : > { %4781 = vst [vmem:[#allocation13_spill] sm:$0xff] %v4603_v39  ;;  %v3364_v28 = vadd.f32 %v3363_v9, %v3362_v0 }
 0x1c0   : > { %v3365_v10 = vpop.f32.mrf.mxu0  ;;  %v4607_v40 = vpop.f32.mrf.mxu1 }
 0x1c1   : > { %v4610_v55 = vadd.f32 %v3364_v28, %v4494_v21 }
 0x1c2   : > { %v3366_v44 = vpop.f32.mrf.mxu0  ;;  %v4612_v23 = vpop.f32.mrf.mxu1 }
 0x1c3   : > { %4782 = vst [vmem:[#allocation14_spill] sm:$0xff] %v4610_v55  ;;  %v3367_v24 = vadd.f32 %v3366_v44, %v3365_v10 }
 0x1c4   : > { %v3368_v43 = vpop.f32.mrf.mxu0  ;;  %v4614_v11 = vpop.f32.mrf.mxu1 }
 0x1c5   : > { %v4617_v7 = vadd.f32 %v3367_v24, %v4501_v37  ;;  %v3398_v37 = vadd.f32 %v4535_v33, %v4530_v60 }
 0x1c6   : > { %v3369_v62 = vpop.f32.mrf.mxu0  ;;  %v4619_v39 = vpop.f32.mrf.mxu1 }
 0x1c7   : > { %4783 = vst [vmem:[#allocation15_spill] sm:$0xff] %v4617_v7  ;;  %v3370_v0 = vadd.f32 %v3369_v62, %v3368_v43  ;;  %v2960_v43 = vld [vmem:[%s4632_s11] sm:$0xff]   ;;  %v3401_v62 = vadd.f32 %v4542_v54, %v4537_v30  ;;  %v3023_v7 = vld [vmem:[%s4632_s11 + $0x8] sm:$0xff]   ;;  %v2227_v60 = vadd.f32 %v3398_v37, %v4427_v48  ;;  %v3404_v30 = vadd.f32 %v4549_v49, %v4544_v47  ;;  %v3024_v37 = vld [vmem:[%s4632_s11 + $0x10] sm:$0xff]  }
 0x1c8   : > { %v3371_v9 = vpop.f32.mrf.mxu0  ;;  %v4622_v25 = vpop.f32.mrf.mxu1  ;;  %v2966_v42 = vunpack.c.h.bf16 %v3023_v7 }
 0x1c9   : > { %v4625_v21 = vadd.f32 %v3370_v0, %v4508_v52  ;;  %v3395_v52 = vadd.f32 %v4528_v17, %v4520_v22  ;;  %v2962_v17 = vunpack.c.h.bf16 %v2960_v43  ;;  %v2230_v54 = vadd.f32 %v3401_v62, %v4434_v57 }
 0x1ca   : > { %v3372_v28 = vpop.f32.mrf.mxu0  ;;  %v4627_v55 = vpop.f32.mrf.mxu1  ;;  %v2235_v57 = vadd.f32 %v3404_v30, %v4441_v15  ;;  %v3413_v62 = vadd.f32 %v4570_v2, %v4565_v46 }
 0x1cb   : > { %4784 = vst [vmem:[#allocation16_spill] sm:$0xff] %v4625_v21  ;;  %v3373_v10 = vadd.f32 %v3372_v28, %v3371_v9  ;;  %v2961_v9 = vunpack.c.l.bf16 %v2960_v43  ;;  %v2965_v28 = vunpack.c.l.bf16 %v3023_v7  ;;  %v3410_v43 = vadd.f32 %v4563_v5, %v4558_v1 }
 0x1cc   : > { %v4636_v44 = vpop.f32.mrf.mxu1  ;;  %v3528_v24 = vpop.f32.mrf.mxu0 }
 0x1cd   : > { %v4644_v0 = vadd.f32 %v3373_v10, %v4515_v4  ;;  %v2388_v4 = vadd.f32 %v3528_v24, %v2227_v60  ;;  %v2222_v10 = vadd.f32 %v3395_v52, %v4420_v27  ;;  %v2969_v27 = vunpack.c.l.bf16 %v3024_v37  ;;  %v3025_v60 = vld [vmem:[%s4632_s11 + $0x18] sm:$0xff]  }
 0x1ce   : > { %v4647_v21 = vpop.f32.mrf.mxu1  ;;  %v2379_v58 = vpop.f32.mrf.mxu0  ;;  %v3407_v52 = vadd.f32 %v4556_v59, %v4551_v38  ;;  %v2243_v15 = vadd.f32 %v3410_v43, %v4455_v41  ;;  %v2973_v46 = vunpack.c.l.bf16 %v3025_v60 }
 0x1cf   : > { %4785 = vst [vmem:[#allocation17_spill] sm:$0xff] %v4644_v0  ;;  %v2380_v33 = vadd.f32 %v2379_v58, %v4526_v45  ;;  %v2572_v49 = vadd.f32 %v2965_v28, %v2388_v4  ;;  %v2246_v4 = vadd.f32 %v3413_v62, %v4462_v18 }
 0x1d0   : > { %v4651_v34 = vpop.f32.mrf.mxu1  ;;  %v3529_v22 = vpop.f32.mrf.mxu0 }
 0x1d1   : > { %v2570_v45 = vadd.f32 %v2961_v9, %v2380_v33  ;;  %v2391_v58 = vadd.f32 %v3529_v22, %v2230_v54  ;;  %v2604_v59 = vmax.f32 %v2572_v49, 0.0 }
 0x1d2   : > { %v4657_v0 = vpop.f32.mrf.mxu1  ;;  %v2382_v48 = vpop.f32.mrf.mxu0 }
 0x1d3   : > { %v2383_v20 = vadd.f32 %v2382_v48, %v2222_v10  ;;  %v2602_v9 = vmax.f32 %v2570_v45, 0.0  ;;  %v2573_v1 = vadd.f32 %v2966_v42, %v2391_v58  ;;  %v2238_v42 = vadd.f32 %v3407_v52, %v4448_v26  ;;  %v3026_v45 = vld [vmem:[%s4632_s11 + $0x20] sm:$0xff]   ;;  %v3027_v52 = vld [vmem:[%s4632_s11 + $0x28] sm:$0xff]  }
 0x1d4   : > { %v4662_v16 = vpop.f32.mrf.mxu1  ;;  %v3532_v47 = vpop.f32.mrf.mxu0  ;;  %v2974_v48 = vunpack.c.h.bf16 %v3025_v60  ;;  %v3422_v58 = vadd.f32 %v4591_v56, %v4586_v14  ;;  %v3419_v26 = vadd.f32 %v4584_v53, %v4579_v63  ;;  %v2977_v56 = vunpack.c.l.bf16 %v3026_v45 }
 0x1d5   : > { %v2571_v24 = vadd.f32 %v2962_v17, %v2383_v20  ;;  %v3416_v20 = vadd.f32 %v4577_v36, %v4572_v32  ;;  %v2404_v30 = vadd.f32 %v3532_v47, %v2243_v15  ;;  %v2970_v32 = vunpack.c.h.bf16 %v3024_v37 }
 0x1d6   : > { %v4670_v7 = vpop.f32.mrf.mxu1  ;;  %v2395_v33 = vpop.f32.mrf.mxu0  ;;  %v2605_v36 = vmax.f32 %v2573_v1, 0.0  ;;  %v3425_v37 = vadd.f32 %v4598_v12, %v4593_v31  ;;  %v2981_v63 = vunpack.c.l.bf16 %v3027_v52  ;;  %v3428_v12 = vadd.f32 %v4605_v8, %v4600_v6 }
 0x1d7   : > { %v2603_v5 = vmax.f32 %v2571_v24, 0.0  ;;  %v2396_v22 = vadd.f32 %v2395_v33, %v2235_v57  ;;  %v2251_v18 = vadd.f32 %v3416_v20, %v4469_v50  ;;  %v2576_v62 = vadd.f32 %v2973_v46, %v2404_v30 }
 0x1d8   : > { %v4675_v28 = vpop.f32.mrf.mxu1  ;;  %v3533_v38 = vpop.f32.mrf.mxu0  ;;  %v2259_v50 = vadd.f32 %v3422_v58, %v4483_v61  ;;  %v2262_v20 = vadd.f32 %v3425_v37, %v4490_v3  ;;  %v2254_v15 = vadd.f32 %v3419_v26, %v4476_v51  ;;  %v3029_v58 = vld [vmem:[%s4632_s11 + $0x38] sm:$0xff]  }
 0x1d9   : > { %v2634_v17 = vadd.f32 %v2603_v5, %v2602_v9  ;;  %v2574_v2 = vadd.f32 %v2969_v27, %v2396_v22  ;;  %v2407_v43 = vadd.f32 %v3533_v38, %v2246_v4  ;;  %v2978_v38 = vunpack.c.h.bf16 %v3026_v45 }
 0x1da   : > { %v4678_v54 = vpop.f32.mrf.mxu1  ;;  %v2398_v10 = vpop.f32.mrf.mxu0  ;;  %v2982_v4 = vunpack.c.h.bf16 %v3027_v52 }
 0x1db   : > { %v2635_v41 = vadd.f32 %v2634_v17, %v2604_v59  ;;  %v2399_v49 = vadd.f32 %v2398_v10, %v2238_v42  ;;  %v2606_v57 = vmax.f32 %v2574_v2, 0.0  ;;  %v2577_v5 = vadd.f32 %v2974_v48, %v2407_v43  ;;  %v3028_v10 = vld [vmem:[%s4632_s11 + $0x30] sm:$0xff]  }
 0x1dc   : > { %v4684_v24 = vpop.f32.mrf.mxu1  ;;  %v3536_v47 = vpop.f32.mrf.mxu0  ;;  %v2608_v59 = vmax.f32 %v2576_v62, 0.0  ;;  %v3437_v48 = vadd.f32 %v4627_v55, %v4622_v25  ;;  %v2267_v43 = vadd.f32 %v3428_v12, %v4497_v13  ;;  %v2985_v26 = vunpack.c.l.bf16 %v3028_v10 }
 0x1dd   : > { %v2636_v27 = vadd.f32 %v2635_v41, %v2605_v36  ;;  %v2575_v60 = vadd.f32 %v2970_v32, %v2399_v49  ;;  %v2420_v46 = vadd.f32 %v3536_v47, %v2259_v50  ;;  %v3434_v32 = vadd.f32 %v4619_v39, %v4614_v11 }
 0x1de   : > { %v4692_v33 = vpop.f32.mrf.mxu1  ;;  %v2411_v14 = vpop.f32.mrf.mxu0  ;;  %v2609_v6 = vmax.f32 %v2577_v5, 0.0  ;;  %v3431_v41 = vadd.f32 %v4612_v23, %v4607_v40  ;;  %v2989_v40 = vunpack.c.l.bf16 %v3029_v58  ;;  %v3440_v13 = vadd.f32 %v4647_v21, %v4636_v44 }
 0x1df   : > { %v2637_v9 = vadd.f32 %v2636_v27, %v2606_v57  ;;  %v2412_v1 = vadd.f32 %v2411_v14, %v2251_v18  ;;  %v2607_v22 = vmax.f32 %v2575_v60, 0.0  ;;  %v2580_v49 = vadd.f32 %v2981_v63, %v2420_v46  ;;  %v4786_v46 = vld [vmem:[#allocation2_spill] sm:$0xff] }
 0x1e0   : > { %v4695_v53 = vpop.f32.mrf.mxu1  ;;  %v3537_v31 = vpop.f32.mrf.mxu0  ;;  %v2275_v62 = vadd.f32 %v3434_v32, %v4511_v29  ;;  %v2278_v55 = vadd.f32 %v3437_v48, %v4518_v35  ;;  %v2270_v60 = vadd.f32 %v3431_v41, %v4504_v19  ;;  %v2986_v14 = vunpack.c.h.bf16 %v3028_v10  ;;  %v4788_v48 = vld [vmem:[#allocation5_spill] sm:$0xff] }
 0x1e1   : > { %v2638_v17 = vadd.f32 %v2637_v9, %v2607_v22  ;;  %v2578_v2 = vadd.f32 %v2977_v56, %v2412_v1  ;;  %v2423_v3 = vadd.f32 %v3537_v31, %v2262_v20  ;;  %v2612_v56 = vmax.f32 %v2580_v49, 0.0  ;;  %v3030_v31 = vld [vmem:[%s4632_s11 + $0x40] sm:$0xff]  }
 0x1e2   : > { %v4701_v30 = vpop.f32.mrf.mxu1  ;;  %v2414_v61 = vpop.f32.mrf.mxu0  ;;  %v2990_v50 = vunpack.c.h.bf16 %v3029_v58  ;;  %v3446_v12 = vadd.f32 %v4670_v7, %v4662_v16  ;;  %v3443_v19 = vadd.f32 %v4657_v0, %v4651_v34  ;;  %v2993_v7 = vunpack.c.l.bf16 %v3030_v31  ;;  %v4789_v58 = vld [vmem:[#allocation3_spill] sm:$0xff] }
 0x1e3   : > { %v2415_v42 = vadd.f32 %v2414_v61, %v2254_v15  ;;  %v2639_v8 = vadd.f32 %v2638_v17, %v2608_v59  ;;  %v2610_v47 = vmax.f32 %v2578_v2, 0.0  ;;  %v2581_v52 = vadd.f32 %v2982_v4, %v2423_v3  ;;  %v3031_v17 = vld [vmem:[%s4632_s11 + $0x48] sm:$0xff]  }
 0x1e4   : > { %v4706_v36 = vpop.f32.mrf.mxu1  ;;  %v3540_v51 = vpop.f32.mrf.mxu0  ;;  %v2283_v2 = vadd.f32 %v3440_v13, %v4786_v46  ;;  %v2997_v0 = vunpack.c.l.bf16 %v3031_v17  ;;  %v2994_v49 = vunpack.c.h.bf16 %v3030_v31  ;;  %v4792_v46 = vld [vmem:[#allocation7_spill] sm:$0xff] }
 0x1e5   : > { %v2579_v45 = vadd.f32 %v2978_v38, %v2415_v42  ;;  %v2640_v18 = vadd.f32 %v2639_v8, %v2609_v6  ;;  %v2436_v1 = vadd.f32 %v3540_v51, %v2275_v62  ;;  %v2613_v20 = vmax.f32 %v2581_v52, 0.0  ;;  %v4787_v51 = vld [vmem:[#allocation4_spill] sm:$0xff] }
 0x1e6   : > { %v3457_v11 = vpop.f32.mrf.mxu1  ;;  %v2427_v39 = vpop.f32.mrf.mxu0  ;;  %v3449_v38 = vadd.f32 %v4678_v54, %v4675_v28  ;;  %v2291_v34 = vadd.f32 %v3446_v12, %v4787_v51  ;;  %v3452_v54 = vadd.f32 %v4692_v33, %v4684_v24  ;;  %v2998_v24 = vunpack.c.h.bf16 %v3031_v17 }
 0x1e7   : > { %v2611_v37 = vmax.f32 %v2579_v45, 0.0  ;;  %v2428_v57 = vadd.f32 %v2427_v39, %v2267_v43  ;;  %v2641_v27 = vadd.f32 %v2640_v18, %v2610_v47  ;;  %v2584_v61 = vadd.f32 %v2989_v40, %v2436_v1 }
 0x1e8   : > { %v4715_v23 = vpop.f32.mrf.mxu1  ;;  %v3541_v25 = vpop.f32.mrf.mxu0  ;;  %v2294_v45 = vadd.f32 %v3449_v38, %v4788_v48  ;;  %v2286_v43 = vadd.f32 %v3443_v19, %v4789_v58  ;;  %v3458_v52 = vadd.f32 %v3457_v11, %v4706_v36  ;;  %v3035_v58 = vld [vmem:[%s4632_s11 + $0x68] sm:$0xff]  }
 0x1e9   : > { %v2642_v9 = vadd.f32 %v2641_v27, %v2611_v37  ;;  %v2582_v5 = vadd.f32 %v2985_v26, %v2428_v57  ;;  %v2439_v44 = vadd.f32 %v3541_v25, %v2278_v55  ;;  %v2616_v47 = vmax.f32 %v2584_v61, 0.0  ;;  %v3032_v27 = vld [vmem:[%s4632_s11 + $0x50] sm:$0xff]  }
 0x1ea   : > { %v3460_v22 = vpop.f32.mrf.mxu1  ;;  %v2430_v29 = vpop.f32.mrf.mxu0 }
 0x1eb   : > { %v2431_v63 = vadd.f32 %v2430_v29, %v2270_v60  ;;  %v2643_v21 = vadd.f32 %v2642_v9, %v2612_v56  ;;  %v2614_v4 = vmax.f32 %v2582_v5, 0.0  ;;  %v2585_v3 = vadd.f32 %v2990_v50, %v2439_v44  ;;  %v3033_v56 = vld [vmem:[%s4632_s11 + $0x58] sm:$0xff]   ;;  %v4790_v9 = vld [vmem:[#allocation6_spill] sm:$0xff] }
 0x1ec   : > { %v3462_v35 = vpop.f32.mrf.mxu1  ;;  %v3544_v15 = vpop.f32.mrf.mxu0  ;;  %v3455_v60 = vadd.f32 %v4701_v30, %v4695_v53  ;;  %v2299_v1 = vadd.f32 %v3452_v54, %v4790_v9  ;;  %v3001_v5 = vunpack.c.l.bf16 %v3032_v27  ;;  %v3461_v29 = vadd.f32 %v3460_v22, %v4715_v23 }
 0x1ed   : > { %v2583_v59 = vadd.f32 %v2986_v14, %v2431_v63  ;;  %v2644_v42 = vadd.f32 %v2643_v21, %v2613_v20  ;;  %v2452_v39 = vadd.f32 %v3544_v15, %v2291_v34  ;;  %v2617_v40 = vmax.f32 %v2585_v3, 0.0  ;;  %v4791_v20 = vld [vmem:[#allocation8_spill] sm:$0xff]  ;;  %v3034_v3 = vld [vmem:[%s4632_s11 + $0x60] sm:$0xff]  }
 0x1ee   : > { %v3463_v10 = vpop.f32.mrf.mxu1  ;;  %v2443_v16 = vpop.f32.mrf.mxu0  ;;  %v2307_v21 = vadd.f32 %v3458_v52, %v4791_v20  ;;  %v3005_v53 = vunpack.c.l.bf16 %v3033_v56  ;;  %v3002_v23 = vunpack.c.h.bf16 %v3032_v27  ;;  %v3009_v27 = vunpack.c.l.bf16 %v3034_v3 }
 0x1ef   : > { %v2615_v32 = vmax.f32 %v2583_v59, 0.0  ;;  %v2444_v6 = vadd.f32 %v2443_v16, %v2283_v2  ;;  %v2645_v8 = vadd.f32 %v2644_v42, %v2614_v4  ;;  %v2588_v50 = vadd.f32 %v2997_v0, %v2452_v39  ;;  %v4793_v42 = vld [vmem:[#allocation9_spill] sm:$0xff] }
 0x1f0   : > { %v3465_v41 = vpop.f32.mrf.mxu1  ;;  %v3545_v28 = vpop.f32.mrf.mxu0  ;;  %v3464_v59 = vadd.f32 %v3463_v10, %v3462_v35  ;;  %v2302_v2 = vadd.f32 %v3455_v60, %v4792_v46  ;;  %v2310_v16 = vadd.f32 %v3461_v29, %v4793_v42  ;;  %v3010_v9 = vunpack.c.h.bf16 %v3034_v3 }
 0x1f1   : > { %v2646_v18 = vadd.f32 %v2645_v8, %v2615_v32  ;;  %v2586_v26 = vadd.f32 %v2993_v7, %v2444_v6  ;;  %v2455_v13 = vadd.f32 %v3545_v28, %v2294_v45  ;;  %v2620_v22 = vmax.f32 %v2588_v50, 0.0  ;;  %v4797_v50 = vld [vmem:[#allocation13_spill] sm:$0xff] }
 0x1f2   : > { %v3466_v37 = vpop.f32.mrf.mxu1  ;;  %v2446_v57 = vpop.f32.mrf.mxu0  ;;  %v3006_v6 = vunpack.c.h.bf16 %v3033_v56 }
 0x1f3   : > { %v2447_v62 = vadd.f32 %v2446_v57, %v2286_v43  ;;  %v2647_v25 = vadd.f32 %v2646_v18, %v2616_v47  ;;  %v2618_v63 = vmax.f32 %v2586_v26, 0.0  ;;  %v2589_v19 = vadd.f32 %v2998_v24, %v2455_v13  ;;  %v4794_v43 = vld [vmem:[#allocation10_spill] sm:$0xff]  ;;  %v4795_v13 = vld [vmem:[#allocation12_spill] sm:$0xff] }
 0x1f4   : > { %v3468_v33 = vpop.f32.mrf.mxu1  ;;  %v3548_v55 = vpop.f32.mrf.mxu0  ;;  %v3467_v54 = vadd.f32 %v3466_v37, %v3465_v41 }
 0x1f5   : > { %v2587_v14 = vadd.f32 %v2994_v49, %v2447_v62  ;;  %v2648_v36 = vadd.f32 %v2647_v25, %v2617_v40  ;;  %v2468_v17 = vadd.f32 %v3548_v55, %v2307_v21  ;;  %v2621_v51 = vmax.f32 %v2589_v19, 0.0 }
 0x1f6   : > { %v3469_v11 = vpop.f32.mrf.mxu1  ;;  %v2459_v31 = vpop.f32.mrf.mxu0  ;;  %v2315_v49 = vadd.f32 %v3464_v59, %v4794_v43  ;;  %v4798_v59 = vld [vmem:[#allocation14_spill] sm:$0xff] }
 0x1f7   : > { %v2619_v12 = vmax.f32 %v2587_v14, 0.0  ;;  %v2460_v44 = vadd.f32 %v2459_v31, %v2299_v1  ;;  %v2649_v15 = vadd.f32 %v2648_v36, %v2618_v63  ;;  %v3470_v0 = vadd.f32 %v3469_v11, %v3468_v33  ;;  %v4796_v14 = vld [vmem:[#allocation11_spill] sm:$0xff] }
 0x1f8   : > { %v3471_v30 = vpop.f32.mrf.mxu1  ;;  %v3549_v38 = vpop.f32.mrf.mxu0  ;;  %v2592_v48 = vadd.f32 %v3005_v53, %v2468_v17  ;;  %v3013_v33 = vunpack.c.l.bf16 %v3035_v58  ;;  %v2318_v56 = vadd.f32 %v3467_v54, %v4796_v14 }
 0x1f9   : > { %v2650_v61 = vadd.f32 %v2649_v15, %v2619_v12  ;;  %v2590_v4 = vadd.f32 %v3001_v5, %v2460_v44  ;;  %v2471_v28 = vadd.f32 %v3549_v38, %v2310_v16  ;;  %v2323_v24 = vadd.f32 %v3470_v0, %v4795_v13  ;;  %v3036_v12 = vld [vmem:[%s4632_s11 + $0x70] sm:$0xff]  }
 0x1fa   : > { %v3472_v7 = vpop.f32.mrf.mxu1  ;;  %v2462_v32 = vpop.f32.mrf.mxu0  ;;  %v2624_v55 = vmax.f32 %v2592_v48, 0.0  ;;  %v3014_v15 = vunpack.c.h.bf16 %v3035_v58 }
 0x1fb   : > { %v2463_v8 = vadd.f32 %v2462_v32, %v2302_v2  ;;  %v2651_v34 = vadd.f32 %v2650_v61, %v2620_v22  ;;  %v2622_v47 = vmax.f32 %v2590_v4, 0.0  ;;  %v3473_v39 = vadd.f32 %v3472_v7, %v3471_v30  ;;  %v3037_v7 = vld [vmem:[%s4632_s11 + $0x78] sm:$0xff]  }
 0x1fc   : > { %v3474_v35 = vpop.f32.mrf.mxu1  ;;  %v3552_v10 = vpop.f32.mrf.mxu0  ;;  %v2593_v25 = vadd.f32 %v3006_v6, %v2471_v28  ;;  %v3017_v4 = vunpack.c.l.bf16 %v3036_v12  ;;  %v4800_v28 = vld [vmem:[#allocation15_spill] sm:$0xff] }
 0x1fd   : > { %v2591_v45 = vadd.f32 %v3002_v23, %v2463_v8  ;;  %v2652_v18 = vadd.f32 %v2651_v34, %v2621_v51  ;;  %v2484_v5 = vadd.f32 %v3552_v10, %v2323_v24  ;;  %v2326_v63 = vadd.f32 %v3473_v39, %v4797_v50  ;;  %v4799_v34 = vld [vmem:[#allocation16_spill] sm:$0xff] }
 0x1fe   : > { %v3475_v26 = vpop.f32.mrf.mxu1  ;;  %v2475_v57 = vpop.f32.mrf.mxu0  ;;  %v2625_v20 = vmax.f32 %v2593_v25, 0.0  ;;  %v3018_v10 = vunpack.c.h.bf16 %v3036_v12 }
 0x1ff   : > { %v2623_v52 = vmax.f32 %v2591_v45, 0.0  ;;  %v2476_v62 = vadd.f32 %v2475_v57, %v2315_v49  ;;  %v2653_v40 = vadd.f32 %v2652_v18, %v2622_v47  ;;  %v3476_v60 = vadd.f32 %v3475_v26, %v3474_v35 }
 0x200   : > { %v3477_v41 = vpop.f32.mrf.mxu1  ;;  %v3553_v37 = vpop.f32.mrf.mxu0  ;;  %v2596_v46 = vadd.f32 %v3013_v33, %v2484_v5  ;;  %v3021_v45 = vunpack.c.l.bf16 %v3037_v7 }
 0x201   : > { %v2654_v1 = vadd.f32 %v2653_v40, %v2623_v52  ;;  %v2594_v29 = vadd.f32 %v3009_v27, %v2476_v62  ;;  %v2487_v44 = vadd.f32 %v3553_v37, %v2326_v63  ;;  %v2331_v17 = vadd.f32 %v3476_v60, %v4798_v59  ;;  %v4801_v27 = vld [vmem:[#allocation17_spill] sm:$0xff] }
 0x202   : > { %v3478_v36 = vpop.f32.mrf.mxu1  ;;  %v2478_v11 = vpop.f32.mrf.mxu0  ;;  %v2628_v54 = vmax.f32 %v2596_v46, 0.0  ;;  %v3022_v62 = vunpack.c.h.bf16 %v3037_v7 }
 0x203   : > { %v2479_v31 = vadd.f32 %v2478_v11, %v2318_v56  ;;  %v2655_v21 = vadd.f32 %v2654_v1, %v2624_v55  ;;  %v3479_v30 = vadd.f32 %v3478_v36, %v3477_v41  ;;  %v2626_v2 = vmax.f32 %v2594_v29, 0.0 }
 0x204   : > { %v3480_v19 = vpop.f32.mrf.mxu1  ;;  %v3556_v53 = vpop.f32.mrf.mxu0  ;;  %v2597_v8 = vadd.f32 %v3014_v15, %v2487_v44 }
 0x205   : > { %v2595_v38 = vadd.f32 %v3010_v9, %v2479_v31  ;;  %v2656_v23 = vadd.f32 %v2655_v21, %v2625_v20  ;;  %v2334_v35 = vadd.f32 %v3479_v30, %v4800_v28 }
 0x206   : > { %v3481_v22 = vpop.f32.mrf.mxu1  ;;  %v2491_v61 = vpop.f32.mrf.mxu0  ;;  %v2629_v26 = vmax.f32 %v2597_v8, 0.0 }
 0x207   : > { %v2627_v42 = vmax.f32 %v2595_v38, 0.0  ;;  %v3482_v16 = vadd.f32 %v3481_v22, %v3480_v19  ;;  %v2492_v32 = vadd.f32 %v2491_v61, %v2331_v17  ;;  %v2657_v6 = vadd.f32 %v2656_v23, %v2626_v2 }
 0x208   : > { %v3483_v3 = vpop.f32.mrf.mxu1  ;;  %v3557_v51 = vpop.f32.mrf.mxu0 }
 0x209   : > { %v2339_v0 = vadd.f32 %v3482_v16, %v4799_v34  ;;  %v2658_v48 = vadd.f32 %v2657_v6, %v2627_v42  ;;  %v2598_v58 = vadd.f32 %v3017_v4, %v2492_v32 }
 0x20a   : > { %v3484_v43 = vpop.f32.mrf.mxu1  ;;  %v2494_v49 = vpop.f32.mrf.mxu0 }
 0x20b   : > { %v2500_v47 = vadd.f32 %v3556_v53, %v2339_v0  ;;  %v3485_v18 = vadd.f32 %v3484_v43, %v3483_v3  ;;  %v2495_v39 = vadd.f32 %v2494_v49, %v2334_v35  ;;  %v2659_v57 = vadd.f32 %v2658_v48, %v2628_v54 }
 0x20c   : > { %v2630_v13 = vmax.f32 %v2598_v58, 0.0 }
 0x20d   : > { %v2342_v52 = vadd.f32 %v3485_v18, %v4801_v27  ;;  %v2599_v40 = vadd.f32 %v3018_v10, %v2495_v39  ;;  %v2600_v25 = vadd.f32 %v3021_v45, %v2500_v47  ;;  %v2660_v24 = vadd.f32 %v2659_v57, %v2629_v26 }
 0x20f   : > { %v2503_v33 = vadd.f32 %v3557_v51, %v2342_v52  ;;  %v2631_v41 = vmax.f32 %v2599_v40, 0.0  ;;  %v2661_v37 = vadd.f32 %v2660_v24, %v2630_v13  ;;  %v2632_v60 = vmax.f32 %v2600_v25, 0.0 }
 0x211   : > { %v2601_v55 = vadd.f32 %v3022_v62, %v2503_v33  ;;  %v2662_v14 = vadd.f32 %v2661_v37, %v2631_v41 }
 0x213   : > { %v2633_v56 = vmax.f32 %v2601_v55, 0.0  ;;  %v2663_v9 = vadd.f32 %v2662_v14, %v2632_v60 }
 0x215   : > { %v2664_v1 = vadd.f32 %v2663_v9, %v2633_v56 }
 0x217   : > { %v2665_v5 = vrot.slane %v2664_v1, 4 }
 0x219   : > { %v2666_v29 = vadd.f32 %v2665_v5, %v2664_v1 }
 0x21b   : > { %v2667_v50 = vrot.slane %v2666_v29, 2 }
 0x21d   : > { %v2668_v63 = vadd.f32 %v2667_v50, %v2666_v29 }
 0x21f   : > { %v2669_v36 = vrot.slane %v2668_v63, 1 }
 0x221   : > { %v2670_v11 = vadd.f32 %v2669_v36, %v2668_v63 }
 0x223   : > { %2671 = vst [vmem:[%s220_s14] sm:$0x1] %v2670_v11 }
 0x224 PF: > { %s14_s15 = sadd.s32 1, %s3869_s15  }
 0x225   : > { %p11_p5 = scmp.ge.s32.totalorder %s14_s15, 4  }
 0x227   :  { %13 = sbr.rel (!%p11_p5) target bundleno = 1 (0x1), region = 69 }

// kernel: network_forward.11
= control target key start
LH: loop header
LB: loop body
LE: loop exit
PB: predicated region body
PF: predicated region fallthrough
CT: control target
= control target key end

     0   :  { %v1436_v3 = vmov 0   ;;  %vm238_vm0 = vcmask 1041409   ;;  %s1918_s1 = inlined_call_operand.vmem [shape: bf16[128,2048], index: 1, kind: input, shape index: {}]   ;;  %s1919_s0 = inlined_call_operand.vmem [shape: f32[2,1,128], index: 0, kind: input, shape index: {}]   ;;  %s1920_s2 = inlined_call_operand.vmem [shape: f32[1,2048], index: 2, kind: input, shape index: {}]   ;;  %s1921_s3 = inlined_call_operand.vmem [shape: f32[2,2048], index: 3, kind: output, shape index: {}]  }
   0x1   :  { %v133_v0 = vld [vmem:[%s1918_s1 + $0x380] sm:$0xff]  ;;  %v134_v2 = vld [vmem:[%s1918_s1 + $0x388] sm:$0xff]  ;;  %914 = vmatprep.mubr.bf16.mxu0 %v1436_v3  ;;  %955 = vmatprep.mubr.bf16.mxu1 %v1436_v3 }
   0x2   :  { %v141_v1 = vld [vmem:[%s1918_s1 + $0x3c0] sm:$0xff]  ;;  %v142_v5 = vld [vmem:[%s1918_s1 + $0x3c8] sm:$0xff] }
   0x3   :  { %v1419_v4 = vcombine.high %v133_v0, %v141_v1  ;;  %v1418_v6 = vcombine.low %v133_v0, %v141_v1  ;;  %v117_v7 = vld [vmem:[%s1918_s1 + $0x300] sm:$0xff]  ;;  %v1421_v9 = vcombine.high %v134_v2, %v142_v5  ;;  %v1420_v10 = vcombine.low %v134_v2, %v142_v5  ;;  %v118_v12 = vld [vmem:[%s1918_s1 + $0x308] sm:$0xff] }
   0x4   :  { %v125_v8 = vld [vmem:[%s1918_s1 + $0x340] sm:$0xff]  ;;  %v126_v13 = vld [vmem:[%s1918_s1 + $0x348] sm:$0xff] }
   0x5   :  { %v1403_v11 = vcombine.high %v117_v7, %v125_v8  ;;  %v101_v14 = vld [vmem:[%s1918_s1 + $0x280] sm:$0xff]  ;;  %882 = vmatprep.subr.bf16.mxu0 %v1419_v4  ;;  %v1405_v15 = vcombine.high %v118_v12, %v126_v13  ;;  %v102_v17 = vld [vmem:[%s1918_s1 + $0x288] sm:$0xff]  ;;  %923 = vmatprep.subr.bf16.mxu1 %v1421_v9  ;;  %v1402_v19 = vcombine.low %v117_v7, %v125_v8  ;;  %v135_v7 = vld [vmem:[%s1918_s1 + $0x390] sm:$0xff] }
   0x6   :  { %v109_v16 = vld [vmem:[%s1918_s1 + $0x2c0] sm:$0xff]  ;;  %v110_v18 = vld [vmem:[%s1918_s1 + $0x2c8] sm:$0xff]  ;;  %883 = vmatpush1.bf16.msra.mxu0 %v1418_v6  ;;  %924 = vmatpush1.bf16.msra.mxu1 %v1420_v10  ;;  %v1404_v20 = vcombine.low %v118_v12, %v126_v13  ;;  %v143_v8 = vld [vmem:[%s1918_s1 + $0x3d0] sm:$0xff] }
   0x7   :  { %884 = vmatprep.subr.bf16.mxu0 %v1403_v11  ;;  %v1387_v21 = vcombine.high %v101_v14, %v109_v16  ;;  %925 = vmatprep.subr.bf16.mxu1 %v1405_v15  ;;  %v1389_v22 = vcombine.high %v102_v17, %v110_v18  ;;  %v85_v23 = vld [vmem:[%s1918_s1 + $0x200] sm:$0xff]  ;;  %v86_v25 = vld [vmem:[%s1918_s1 + $0x208] sm:$0xff]  ;;  %v1386_v27 = vcombine.low %v101_v14, %v109_v16  ;;  %v136_v9 = vld [vmem:[%s1918_s1 + $0x398] sm:$0xff] }
   0x8   :  { %v93_v24 = vld [vmem:[%s1918_s1 + $0x240] sm:$0xff]  ;;  %v94_v26 = vld [vmem:[%s1918_s1 + $0x248] sm:$0xff]  ;;  %v1388_v28 = vcombine.low %v102_v17, %v110_v18  ;;  %v144_v10 = vld [vmem:[%s1918_s1 + $0x3d8] sm:$0xff]  ;;  %v1423_v14 = vcombine.high %v135_v7, %v143_v8 }
   0x9   :  { %v1371_v29 = vcombine.high %v85_v23, %v93_v24  ;;  %v1373_v30 = vcombine.high %v86_v25, %v94_v26  ;;  %v69_v31 = vld [vmem:[%s1918_s1 + $0x180] sm:$0xff]  ;;  %v70_v33 = vld [vmem:[%s1918_s1 + $0x188] sm:$0xff]  ;;  %v1370_v35 = vcombine.low %v85_v23, %v93_v24  ;;  %v1372_v36 = vcombine.low %v86_v25, %v94_v26  ;;  %v119_v16 = vld [vmem:[%s1918_s1 + $0x310] sm:$0xff] }
   0xa   :  { %885 = vmatpush1.bf16.msra.mxu0 %v1402_v19  ;;  %926 = vmatpush1.bf16.msra.mxu1 %v1404_v20  ;;  %v77_v32 = vld [vmem:[%s1918_s1 + $0x1c0] sm:$0xff]  ;;  %v78_v34 = vld [vmem:[%s1918_s1 + $0x1c8] sm:$0xff]  ;;  %v1425_v15 = vcombine.high %v136_v9, %v144_v10  ;;  %v127_v17 = vld [vmem:[%s1918_s1 + $0x350] sm:$0xff] }
   0xb   :  { %886 = vmatprep.subr.bf16.mxu0 %v1387_v21  ;;  %927 = vmatprep.subr.bf16.mxu1 %v1389_v22  ;;  %v1355_v37 = vcombine.high %v69_v31, %v77_v32  ;;  %v16_v38 = vld [vmem:[%s1919_s0 + $0x1] sm:$0x1]  ;;  %v1357_v39 = vcombine.high %v70_v33, %v78_v34  ;;  %v54_v42 = vld [vmem:[%s1918_s1 + $0x108] sm:$0xff]  ;;  %v1354_v44 = vcombine.low %v69_v31, %v77_v32  ;;  %v15_v48 = vld [vmem:[%s1919_s0] sm:$0x1] }
   0xc   :  { %v53_v40 = vld [vmem:[%s1918_s1 + $0x100] sm:$0xff]  ;;  %v62_v43 = vld [vmem:[%s1918_s1 + $0x148] sm:$0xff]  ;;  %v20_v45 = vpack.c.bf16 %v16_v38, %v16_v38  ;;  %v1356_v46 = vcombine.low %v70_v33, %v78_v34  ;;  %v19_v55 = vpack.c.bf16 %v15_v48, %v15_v48  ;;  %v120_v19 = vld [vmem:[%s1918_s1 + $0x318] sm:$0xff]  ;;  %v1422_v21 = vcombine.low %v135_v7, %v143_v8 }
   0xd   :  { %v61_v41 = vld [vmem:[%s1918_s1 + $0x140] sm:$0xff]  ;;  %v1341_v49 = vcombine.high %v54_v42, %v62_v43  ;;  %v38_v52 = vld [vmem:[%s1918_s1 + $0x88] sm:$0xff]  ;;  %v1340_v57 = vcombine.low %v54_v42, %v62_v43  ;;  %v128_v20 = vld [vmem:[%s1918_s1 + $0x358] sm:$0xff]  ;;  %v1424_v22 = vcombine.low %v136_v9, %v144_v10  ;;  %v1407_v23 = vcombine.high %v119_v16, %v127_v17 }
   0xe   :  { %887 = vmatpush1.bf16.msra.mxu0 %v1386_v27  ;;  %928 = vmatpush1.bf16.msra.mxu1 %v1388_v28  ;;  %v1339_v47 = vcombine.high %v53_v40, %v61_v41  ;;  %v37_v50 = vld [vmem:[%s1918_s1 + $0x80] sm:$0xff]  ;;  %v46_v53 = vld [vmem:[%s1918_s1 + $0xc8] sm:$0xff]  ;;  %v1338_v54 = vcombine.low %v53_v40, %v61_v41  ;;  %v236_v56 = vunpack.c.l.b16 %v20_v45  ;;  %v235_v1 = vunpack.c.l.b16 %v19_v55  ;;  %v103_v25 = vld [vmem:[%s1918_s1 + $0x290] sm:$0xff] }
   0xf   :  { %888 = vmatprep.subr.bf16.mxu0 %v1371_v29  ;;  %929 = vmatprep.subr.bf16.mxu1 %v1373_v30  ;;  %v45_v51 = vld [vmem:[%s1918_s1 + $0xc0] sm:$0xff]  ;;  %v1325_v59 = vcombine.high %v38_v52, %v46_v53  ;;  %v22_v62 = vld [vmem:[%s1918_s1 + $0x8] sm:$0xff]  ;;  %v1324_v4 = vcombine.low %v38_v52, %v46_v53  ;;  %v1409_v24 = vcombine.high %v120_v19, %v128_v20  ;;  %v111_v26 = vld [vmem:[%s1918_s1 + $0x2d0] sm:$0xff] }
  0x10   :  { %v1323_v58 = vcombine.high %v37_v50, %v45_v51  ;;  %v21_v60 = vld [vmem:[%s1918_s1] sm:$0xff]  ;;  %v30_v63 = vld [vmem:[%s1918_s1 + $0x48] sm:$0xff]  ;;  %v1322_v0 = vcombine.low %v37_v50, %v45_v51  ;;  %v237_v2 = vrot.slane %v236_v56, 7  ;;  %v104_v27 = vld [vmem:[%s1918_s1 + $0x298] sm:$0xff]  ;;  %v1406_v29 = vcombine.low %v119_v16, %v127_v17 }
  0x11   :  { %v29_v61 = vld [vmem:[%s1918_s1 + $0x40] sm:$0xff]  ;;  %v1309_v6 = vcombine.high %v22_v62, %v30_v63  ;;  %v1308_v13 = vcombine.low %v22_v62, %v30_v63  ;;  %v112_v28 = vld [vmem:[%s1918_s1 + $0x2d8] sm:$0xff]  ;;  %v1408_v30 = vcombine.low %v120_v19, %v128_v20  ;;  %v1391_v31 = vcombine.high %v103_v25, %v111_v26  ;;  %v87_v33 = vld [vmem:[%s1918_s1 + $0x210] sm:$0xff] }
  0x12   :  { %889 = vmatpush1.bf16.msra.mxu0 %v1370_v35  ;;  %930 = vmatpush1.bf16.msra.mxu1 %v1372_v36  ;;  %v1307_v5 = vcombine.high %v21_v60, %v29_v61  ;;  %v1306_v11 = vcombine.low %v21_v60, %v29_v61  ;;  %v239_v12 = vsel %vm238_vm0, %v237_v2, %v235_v1  ;;  %v95_v34 = vld [vmem:[%s1918_s1 + $0x250] sm:$0xff]  ;;  %v88_v35 = vld [vmem:[%s1918_s1 + $0x218] sm:$0xff]  ;;  %v137_v10 = vld [vmem:[%s1918_s1 + $0x3a0] sm:$0xff] }
  0x13   :  { %890 = vmatprep.subr.bf16.mxu0 %v1355_v37  ;;  %931 = vmatprep.subr.bf16.mxu1 %v1357_v39  ;;  %v1580_v18 = vpack.c.b16 %v239_v12, %v239_v12  ;;  %v1393_v32 = vcombine.high %v104_v27, %v112_v28  ;;  %v96_v36 = vld [vmem:[%s1918_s1 + $0x258] sm:$0xff]  ;;  %v1390_v37 = vcombine.low %v103_v25, %v111_v26  ;;  %v71_v41 = vld [vmem:[%s1918_s1 + $0x190] sm:$0xff]  ;;  %v138_v12 = vld [vmem:[%s1918_s1 + $0x3a8] sm:$0xff] }
  0x14   :  { %v1392_v38 = vcombine.low %v104_v27, %v112_v28  ;;  %v1375_v39 = vcombine.high %v87_v33, %v95_v34  ;;  %v1377_v40 = vcombine.high %v88_v35, %v96_v36  ;;  %v79_v42 = vld [vmem:[%s1918_s1 + $0x1d0] sm:$0xff]  ;;  %v72_v43 = vld [vmem:[%s1918_s1 + $0x198] sm:$0xff]  ;;  %v1374_v45 = vcombine.low %v87_v33, %v95_v34  ;;  %v121_v19 = vld [vmem:[%s1918_s1 + $0x320] sm:$0xff] }
  0x15   :  { %v63_v50 = vld [vmem:[%s1918_s1 + $0x150] sm:$0xff]  ;;  %v56_v51 = vld [vmem:[%s1918_s1 + $0x118] sm:$0xff]  ;;  %v1358_v53 = vcombine.low %v71_v41, %v79_v42  ;;  %v129_v20 = vld [vmem:[%s1918_s1 + $0x360] sm:$0xff] }
  0x16   :  { %891 = vmatpush1.bf16.msra.mxu0 %v1354_v44  ;;  %932 = vmatpush1.bf16.msra.mxu1 %v1356_v46  ;;  %v80_v44 = vld [vmem:[%s1918_s1 + $0x1d8] sm:$0xff]  ;;  %v1376_v46 = vcombine.low %v88_v35, %v96_v36  ;;  %v23_v1 = vld [vmem:[%s1918_s1 + $0x10] sm:$0xff]  ;;  %v1411_v25 = vcombine.high %v121_v19, %v129_v20  ;;  %v105_v27 = vld [vmem:[%s1918_s1 + $0x2a0] sm:$0xff] }
  0x17   :  { %892 = vmatprep.subr.bf16.mxu0 %v1339_v47  ;;  %933 = vmatprep.subr.bf16.mxu1 %v1341_v49  ;;  %v1359_v47 = vcombine.high %v71_v41, %v79_v42  ;;  %v1361_v48 = vcombine.high %v72_v43, %v80_v44  ;;  %v55_v49 = vld [vmem:[%s1918_s1 + $0x110] sm:$0xff]  ;;  %v64_v52 = vld [vmem:[%s1918_s1 + $0x158] sm:$0xff]  ;;  %v113_v28 = vld [vmem:[%s1918_s1 + $0x2e0] sm:$0xff] }
  0x18   :  { %v1343_v55 = vcombine.high %v55_v49, %v63_v50  ;;  %v1345_v56 = vcombine.high %v56_v51, %v64_v52  ;;  %v48_v60 = vld [vmem:[%s1918_s1 + $0xd8] sm:$0xff]  ;;  %v1342_v61 = vcombine.low %v55_v49, %v63_v50  ;;  %v1344_v62 = vcombine.low %v56_v51, %v64_v52  ;;  %v31_v2 = vld [vmem:[%s1918_s1 + $0x50] sm:$0xff]  ;;  %v89_v35 = vld [vmem:[%s1918_s1 + $0x220] sm:$0xff] }
  0x19   :  { %v1311_v8 = vcombine.high %v23_v1, %v31_v2  ;;  %v1395_v33 = vcombine.high %v105_v27, %v113_v28  ;;  %v97_v36 = vld [vmem:[%s1918_s1 + $0x260] sm:$0xff] }
  0x1a   :  { %893 = vmatpush1.bf16.msra.mxu0 %v1338_v54  ;;  %934 = vmatpush1.bf16.msra.mxu1 %v1340_v57  ;;  %v1360_v54 = vcombine.low %v72_v43, %v80_v44  ;;  %v39_v57 = vld [vmem:[%s1918_s1 + $0x90] sm:$0xff]  ;;  %v1379_v41 = vcombine.high %v89_v35, %v97_v36  ;;  %v73_v43 = vld [vmem:[%s1918_s1 + $0x1a0] sm:$0xff] }
  0x1b   :  { %894 = vmatprep.subr.bf16.mxu0 %v1323_v58  ;;  %935 = vmatprep.subr.bf16.mxu1 %v1325_v59  ;;  %v47_v58 = vld [vmem:[%s1918_s1 + $0xd0] sm:$0xff]  ;;  %v40_v59 = vld [vmem:[%s1918_s1 + $0x98] sm:$0xff]  ;;  %v81_v44 = vld [vmem:[%s1918_s1 + $0x1e0] sm:$0xff] }
  0x1c   :  { %v1327_v63 = vcombine.high %v39_v57, %v47_v58  ;;  %v1328_v7 = vcombine.low %v40_v59, %v48_v60  ;;  %v1363_v49 = vcombine.high %v73_v43, %v81_v44  ;;  %v57_v51 = vld [vmem:[%s1918_s1 + $0x120] sm:$0xff] }
  0x1d   :  { %v65_v52 = vld [vmem:[%s1918_s1 + $0x160] sm:$0xff] }
  0x1e   :  { %895 = vmatpush1.bf16.msra.mxu0 %v1322_v0  ;;  %936 = vmatpush1.bf16.msra.mxu1 %v1324_v4  ;;  %v1329_v0 = vcombine.high %v40_v59, %v48_v60  ;;  %v24_v4 = vld [vmem:[%s1918_s1 + $0x18] sm:$0xff]  ;;  %v41_v59 = vld [vmem:[%s1918_s1 + $0xa0] sm:$0xff] }
  0x1f   :  { %896 = vmatprep.subr.bf16.mxu0 %v1307_v5  ;;  %937 = vmatprep.subr.bf16.mxu1 %v1309_v6  ;;  %v32_v5 = vld [vmem:[%s1918_s1 + $0x58] sm:$0xff]  ;;  %v1326_v6 = vcombine.low %v39_v57, %v47_v58  ;;  %v1347_v57 = vcombine.high %v57_v51, %v65_v52  ;;  %v49_v60 = vld [vmem:[%s1918_s1 + $0xe0] sm:$0xff] }
  0x20   :  { %v1313_v9 = vcombine.high %v24_v4, %v32_v5 }
  0x22   :  { %897 = vmatpush1.bf16.msra.mxu0 %v1306_v11  ;;  %938 = vmatpush1.bf16.msra.mxu1 %v1308_v13  ;;  %v145_v11 = vld [vmem:[%s1918_s1 + $0x3e0] sm:$0xff]  ;;  %v146_v13 = vld [vmem:[%s1918_s1 + $0x3e8] sm:$0xff] }
  0x23   :  { %964 = vmatprep.subr.bf16.mxu0 %v1423_v14  ;;  %1005 = vmatprep.subr.bf16.mxu1 %v1425_v15  ;;  %v1310_v14 = vcombine.low %v23_v1, %v31_v2  ;;  %v1312_v15 = vcombine.low %v24_v4, %v32_v5  ;;  %v1427_v16 = vcombine.high %v137_v10, %v145_v11  ;;  %v25_v4 = vld [vmem:[%s1918_s1 + $0x20] sm:$0xff] }
  0x24   :  { %v1429_v17 = vcombine.high %v138_v12, %v146_v13  ;;  %v1331_v1 = vcombine.high %v41_v59, %v49_v60  ;;  %v33_v5 = vld [vmem:[%s1918_s1 + $0x60] sm:$0xff] }
  0x25   :  { %915 = vmatmul.mubr.bf16.vlgmr.msra.gmra.mxu0 %v1580_v18  ;;  %956 = vmatmul.mubr.bf16.vlgmr.msra.gmra.mxu1 %v1580_v18 }
  0x26   :  { %965 = vmatpush1.bf16.msra.mxu0 %v1422_v21  ;;  %1006 = vmatpush1.bf16.msra.mxu1 %v1424_v22  ;;  %v122_v21 = vld [vmem:[%s1918_s1 + $0x328] sm:$0xff] }
  0x27   :  { %966 = vmatprep.subr.bf16.mxu0 %v1407_v23  ;;  %1007 = vmatprep.subr.bf16.mxu1 %v1409_v24  ;;  %v130_v22 = vld [vmem:[%s1918_s1 + $0x368] sm:$0xff]  ;;  %v1426_v23 = vcombine.low %v137_v10, %v145_v11  ;;  %v1428_v24 = vcombine.low %v138_v12, %v146_v13  ;;  %v1315_v10 = vcombine.high %v25_v4, %v33_v5  ;;  %v139_v12 = vld [vmem:[%s1918_s1 + $0x3b0] sm:$0xff] }
  0x28   :  { %996 = vmatprep.mubr.bf16.mxu0 %v1436_v3  ;;  %1037 = vmatprep.mubr.bf16.mxu1 %v1436_v3  ;;  %v1413_v26 = vcombine.high %v122_v21, %v130_v22  ;;  %v147_v13 = vld [vmem:[%s1918_s1 + $0x3f0] sm:$0xff] }
  0x2a   :  { %967 = vmatpush1.bf16.msra.mxu0 %v1406_v29  ;;  %1008 = vmatpush1.bf16.msra.mxu1 %v1408_v30  ;;  %v106_v29 = vld [vmem:[%s1918_s1 + $0x2a8] sm:$0xff] }
  0x2b   :  { %968 = vmatprep.subr.bf16.mxu0 %v1391_v31  ;;  %1009 = vmatprep.subr.bf16.mxu1 %v1393_v32  ;;  %v114_v30 = vld [vmem:[%s1918_s1 + $0x2e8] sm:$0xff]  ;;  %v1410_v31 = vcombine.low %v121_v19, %v129_v20  ;;  %v1412_v32 = vcombine.low %v122_v21, %v130_v22  ;;  %v1431_v19 = vcombine.high %v139_v12, %v147_v13  ;;  %v123_v21 = vld [vmem:[%s1918_s1 + $0x330] sm:$0xff] }
  0x2c   :  { %v1397_v34 = vcombine.high %v106_v29, %v114_v30  ;;  %v131_v22 = vld [vmem:[%s1918_s1 + $0x370] sm:$0xff] }
  0x2e   :  { %969 = vmatpush1.bf16.msra.mxu0 %v1390_v37  ;;  %1010 = vmatpush1.bf16.msra.mxu1 %v1392_v38  ;;  %v90_v37 = vld [vmem:[%s1918_s1 + $0x228] sm:$0xff] }
  0x2f   :  { %970 = vmatprep.subr.bf16.mxu0 %v1375_v39  ;;  %1011 = vmatprep.subr.bf16.mxu1 %v1377_v40  ;;  %v98_v38 = vld [vmem:[%s1918_s1 + $0x268] sm:$0xff]  ;;  %v1394_v39 = vcombine.low %v105_v27, %v113_v28  ;;  %v1396_v40 = vcombine.low %v106_v29, %v114_v30  ;;  %v1415_v27 = vcombine.high %v123_v21, %v131_v22  ;;  %v107_v29 = vld [vmem:[%s1918_s1 + $0x2b0] sm:$0xff] }
  0x30   :  { %v1381_v42 = vcombine.high %v90_v37, %v98_v38  ;;  %v115_v30 = vld [vmem:[%s1918_s1 + $0x2f0] sm:$0xff] }
  0x32   :  { %971 = vmatpush1.bf16.msra.mxu0 %v1374_v45  ;;  %1012 = vmatpush1.bf16.msra.mxu1 %v1376_v46  ;;  %v74_v45 = vld [vmem:[%s1918_s1 + $0x1a8] sm:$0xff] }
  0x33   :  { %972 = vmatprep.subr.bf16.mxu0 %v1359_v47  ;;  %1013 = vmatprep.subr.bf16.mxu1 %v1361_v48  ;;  %v82_v46 = vld [vmem:[%s1918_s1 + $0x1e8] sm:$0xff]  ;;  %v1378_v47 = vcombine.low %v89_v35, %v97_v36  ;;  %v1380_v48 = vcombine.low %v90_v37, %v98_v38  ;;  %v1399_v35 = vcombine.high %v107_v29, %v115_v30  ;;  %v91_v37 = vld [vmem:[%s1918_s1 + $0x230] sm:$0xff] }
  0x34   :  { %v1365_v50 = vcombine.high %v74_v45, %v82_v46  ;;  %v99_v38 = vld [vmem:[%s1918_s1 + $0x270] sm:$0xff] }
  0x36   :  { %973 = vmatpush1.bf16.msra.mxu0 %v1358_v53  ;;  %1014 = vmatpush1.bf16.msra.mxu1 %v1360_v54  ;;  %v58_v53 = vld [vmem:[%s1918_s1 + $0x128] sm:$0xff] }
  0x37   :  { %974 = vmatprep.subr.bf16.mxu0 %v1343_v55  ;;  %1015 = vmatprep.subr.bf16.mxu1 %v1345_v56  ;;  %v66_v54 = vld [vmem:[%s1918_s1 + $0x168] sm:$0xff]  ;;  %v1362_v55 = vcombine.low %v73_v43, %v81_v44  ;;  %v1364_v56 = vcombine.low %v74_v45, %v82_v46  ;;  %v1383_v43 = vcombine.high %v91_v37, %v99_v38  ;;  %v75_v45 = vld [vmem:[%s1918_s1 + $0x1b0] sm:$0xff] }
  0x38   :  { %v1349_v58 = vcombine.high %v58_v53, %v66_v54  ;;  %v83_v46 = vld [vmem:[%s1918_s1 + $0x1f0] sm:$0xff] }
  0x3a   :  { %975 = vmatpush1.bf16.msra.mxu0 %v1342_v61  ;;  %1016 = vmatpush1.bf16.msra.mxu1 %v1344_v62  ;;  %v42_v61 = vld [vmem:[%s1918_s1 + $0xa8] sm:$0xff] }
  0x3b   :  { %976 = vmatprep.subr.bf16.mxu0 %v1327_v63  ;;  %1017 = vmatprep.subr.bf16.mxu1 %v1329_v0  ;;  %v50_v62 = vld [vmem:[%s1918_s1 + $0xe8] sm:$0xff]  ;;  %v1346_v63 = vcombine.low %v57_v51, %v65_v52  ;;  %v1348_v0 = vcombine.low %v58_v53, %v66_v54  ;;  %v59_v52 = vld [vmem:[%s1918_s1 + $0x130] sm:$0xff]  ;;  %v60_v54 = vld [vmem:[%s1918_s1 + $0x138] sm:$0xff] }
  0x3c   :  { %v1333_v2 = vcombine.high %v42_v61, %v50_v62  ;;  %v67_v53 = vld [vmem:[%s1918_s1 + $0x170] sm:$0xff] }
  0x3e   :  { %977 = vmatpush1.bf16.msra.mxu0 %v1326_v6  ;;  %1018 = vmatpush1.bf16.msra.mxu1 %v1328_v7  ;;  %v26_v6 = vld [vmem:[%s1918_s1 + $0x28] sm:$0xff] }
  0x3f   :  { %978 = vmatprep.subr.bf16.mxu0 %v1311_v8  ;;  %1019 = vmatprep.subr.bf16.mxu1 %v1313_v9  ;;  %v34_v7 = vld [vmem:[%s1918_s1 + $0x68] sm:$0xff]  ;;  %v1330_v8 = vcombine.low %v41_v59, %v49_v60  ;;  %v1332_v9 = vcombine.low %v42_v61, %v50_v62  ;;  %v43_v60 = vld [vmem:[%s1918_s1 + $0xb0] sm:$0xff]  ;;  %v44_v62 = vld [vmem:[%s1918_s1 + $0xb8] sm:$0xff] }
  0x40   :  { %v1317_v11 = vcombine.high %v26_v6, %v34_v7  ;;  %v51_v61 = vld [vmem:[%s1918_s1 + $0xf0] sm:$0xff] }
  0x42   :  { %979 = vmatpush1.bf16.msra.mxu0 %v1310_v14  ;;  %1020 = vmatpush1.bf16.msra.mxu1 %v1312_v15  ;;  %v140_v14 = vld [vmem:[%s1918_s1 + $0x3b8] sm:$0xff] }
  0x43   :  { %1046 = vmatprep.subr.bf16.mxu0 %v1427_v16  ;;  %1087 = vmatprep.subr.bf16.mxu1 %v1429_v17  ;;  %v148_v15 = vld [vmem:[%s1918_s1 + $0x3f8] sm:$0xff]  ;;  %v1314_v16 = vcombine.low %v25_v4, %v33_v5  ;;  %v1316_v17 = vcombine.low %v26_v6, %v34_v7  ;;  %v27_v5 = vld [vmem:[%s1918_s1 + $0x30] sm:$0xff] }
  0x44   :  { %v1433_v20 = vcombine.high %v140_v14, %v148_v15  ;;  %v35_v6 = vld [vmem:[%s1918_s1 + $0x70] sm:$0xff]  ;;  %v28_v7 = vld [vmem:[%s1918_s1 + $0x38] sm:$0xff] }
  0x45   :  { %997 = vmatmul.mubr.bf16.vlgmr.msra.gmra.mxu0 %v1580_v18  ;;  %1038 = vmatmul.mubr.bf16.vlgmr.msra.gmra.mxu1 %v1580_v18 }
  0x46   :  { %1047 = vmatpush1.bf16.msra.mxu0 %v1426_v23  ;;  %1088 = vmatpush1.bf16.msra.mxu1 %v1428_v24  ;;  %v124_v23 = vld [vmem:[%s1918_s1 + $0x338] sm:$0xff] }
  0x47   :  { %1048 = vmatprep.subr.bf16.mxu0 %v1411_v25  ;;  %1089 = vmatprep.subr.bf16.mxu1 %v1413_v26  ;;  %v132_v24 = vld [vmem:[%s1918_s1 + $0x378] sm:$0xff]  ;;  %v1430_v25 = vcombine.low %v139_v12, %v147_v13  ;;  %v1432_v26 = vcombine.low %v140_v14, %v148_v15  ;;  %v1318_v13 = vcombine.low %v27_v5, %v35_v6  ;;  %v153_v15 = vlaneseq }
  0x48   :  { %1078 = vmatprep.mubr.bf16.mxu0 %v1436_v3  ;;  %1119 = vmatprep.mubr.bf16.mxu1 %v1436_v3  ;;  %v1417_v28 = vcombine.high %v124_v23, %v132_v24 }
  0x4a   :  { %1049 = vmatpush1.bf16.msra.mxu0 %v1410_v31  ;;  %1090 = vmatpush1.bf16.msra.mxu1 %v1412_v32  ;;  %v108_v31 = vld [vmem:[%s1918_s1 + $0x2b8] sm:$0xff] }
  0x4b   :  { %1050 = vmatprep.subr.bf16.mxu0 %v1395_v33  ;;  %1091 = vmatprep.subr.bf16.mxu1 %v1397_v34  ;;  %v116_v32 = vld [vmem:[%s1918_s1 + $0x2f8] sm:$0xff]  ;;  %v1414_v33 = vcombine.low %v123_v21, %v131_v22  ;;  %v1416_v34 = vcombine.low %v124_v23, %v132_v24 }
  0x4c   :  { %v1401_v36 = vcombine.high %v108_v31, %v116_v32 }
  0x4e   :  { %1051 = vmatpush1.bf16.msra.mxu0 %v1394_v39  ;;  %1092 = vmatpush1.bf16.msra.mxu1 %v1396_v40  ;;  %v92_v39 = vld [vmem:[%s1918_s1 + $0x238] sm:$0xff] }
  0x4f   :  { %1052 = vmatprep.subr.bf16.mxu0 %v1379_v41  ;;  %1093 = vmatprep.subr.bf16.mxu1 %v1381_v42  ;;  %v100_v40 = vld [vmem:[%s1918_s1 + $0x278] sm:$0xff]  ;;  %v1398_v41 = vcombine.low %v107_v29, %v115_v30  ;;  %v1400_v42 = vcombine.low %v108_v31, %v116_v32 }
  0x50   :  { %v1385_v44 = vcombine.high %v92_v39, %v100_v40 }
  0x52   :  { %1053 = vmatpush1.bf16.msra.mxu0 %v1378_v47  ;;  %1094 = vmatpush1.bf16.msra.mxu1 %v1380_v48  ;;  %v84_v47 = vld [vmem:[%s1918_s1 + $0x1f8] sm:$0xff]  ;;  %v1382_v48 = vcombine.low %v91_v37, %v99_v38 }
  0x53   :  { %1054 = vmatprep.subr.bf16.mxu0 %v1363_v49  ;;  %1095 = vmatprep.subr.bf16.mxu1 %v1365_v50  ;;  %v1384_v49 = vcombine.low %v92_v39, %v100_v40  ;;  %v1367_v50 = vcombine.high %v75_v45, %v83_v46 }
  0x56   :  { %1055 = vmatpush1.bf16.msra.mxu0 %v1362_v55  ;;  %1096 = vmatpush1.bf16.msra.mxu1 %v1364_v56  ;;  %v68_v55 = vld [vmem:[%s1918_s1 + $0x178] sm:$0xff]  ;;  %v1366_v56 = vcombine.low %v75_v45, %v83_v46 }
  0x57   :  { %1056 = vmatprep.subr.bf16.mxu0 %v1347_v57  ;;  %1097 = vmatprep.subr.bf16.mxu1 %v1349_v58  ;;  %v1351_v58 = vcombine.high %v59_v52, %v67_v53  ;;  %v1353_v59 = vcombine.high %v60_v54, %v68_v55 }
  0x5a   :  { %1057 = vmatpush1.bf16.msra.mxu0 %v1346_v63  ;;  %1098 = vmatpush1.bf16.msra.mxu1 %v1348_v0  ;;  %v52_v63 = vld [vmem:[%s1918_s1 + $0xf8] sm:$0xff]  ;;  %v1350_v0 = vcombine.low %v59_v52, %v67_v53 }
  0x5b   :  { %1058 = vmatprep.subr.bf16.mxu0 %v1331_v1  ;;  %1099 = vmatprep.subr.bf16.mxu1 %v1333_v2  ;;  %v1352_v1 = vcombine.low %v60_v54, %v68_v55  ;;  %v1335_v2 = vcombine.high %v43_v60, %v51_v61  ;;  %v1337_v4 = vcombine.high %v44_v62, %v52_v63 }
  0x5e   :  { %1059 = vmatpush1.bf16.msra.mxu0 %v1330_v8  ;;  %1100 = vmatpush1.bf16.msra.mxu1 %v1332_v9  ;;  %v36_v8 = vld [vmem:[%s1918_s1 + $0x78] sm:$0xff]  ;;  %v1334_v9 = vcombine.low %v43_v60, %v51_v61 }
  0x5f   :  { %1060 = vmatprep.subr.bf16.mxu0 %v1315_v10  ;;  %1101 = vmatprep.subr.bf16.mxu1 %v1317_v11  ;;  %v1336_v10 = vcombine.low %v44_v62, %v52_v63  ;;  %v1319_v11 = vcombine.high %v27_v5, %v35_v6  ;;  %v1321_v12 = vcombine.high %v28_v7, %v36_v8 }
  0x60   :  { %v1320_v14 = vcombine.low %v28_v7, %v36_v8 }
  0x62   :  { %1061 = vmatpush1.bf16.msra.mxu0 %v1314_v16  ;;  %1102 = vmatpush1.bf16.msra.mxu1 %v1316_v17  ;;  %v154_v16 = vshrl.u32 %v153_v15, 7 }
  0x63   :  { %1128 = vmatprep.subr.bf16.mxu0 %v1431_v19  ;;  %1169 = vmatprep.subr.bf16.mxu1 %v1433_v20  ;;  %v150_v19 = vld [vmem:[%s1920_s2 + $0x8] sm:$0xff] }
  0x64   :  { %v155_v17 = vsub.s32 0, %v154_v16  ;;  %v163_v21 = vsub.s32 2, %v154_v16  ;;  %v159_v22 = vsub.s32 1, %v154_v16  ;;  %v167_v23 = vsub.s32 3, %v154_v16 }
  0x65   :  { %1079 = vmatmul.mubr.bf16.vlgmr.msra.gmra.mxu0 %v1580_v18  ;;  %1120 = vmatmul.mubr.bf16.vlgmr.msra.gmra.mxu1 %v1580_v18  ;;  %v175_v29 = vsub.s32 5, %v154_v16  ;;  %v183_v30 = vsub.s32 7, %v154_v16 }
  0x66   :  { %1129 = vmatpush1.bf16.msra.mxu0 %v1430_v25  ;;  %1170 = vmatpush1.bf16.msra.mxu1 %v1432_v26  ;;  %v1869_v20 = vrot.slane %v150_v19, %v155_v17  ;;  %v1871_v24 = vrot.slane %v150_v19, %v163_v21  ;;  %v1873_v25 = vrot.slane %v150_v19, %v159_v22 }
  0x67   :  { %1130 = vmatprep.subr.bf16.mxu0 %v1415_v27  ;;  %1171 = vmatprep.subr.bf16.mxu1 %v1417_v28  ;;  %v1875_v26 = vrot.slane %v150_v19, %v167_v23  ;;  %v171_v27 = vsub.s32 4, %v154_v16  ;;  %v179_v28 = vsub.s32 6, %v154_v16  ;;  %v1881_v32 = vrot.slane %v150_v19, %v175_v29 }
  0x68   :  { %1160 = vmatprep.mubr.bf16.mxu0 %v1436_v3  ;;  %1201 = vmatprep.mubr.bf16.mxu1 %v1436_v3  ;;  %v76_v3 = vld [vmem:[%s1918_s1 + $0x1b8] sm:$0xff] }
  0x69   :  { %v1369_v51 = vcombine.high %v76_v3, %v84_v47  ;;  %v1368_v57 = vcombine.low %v76_v3, %v84_v47  ;;  %v1879_v31 = vrot.slane %v150_v19, %v179_v28 }
  0x6a   :  { %1131 = vmatpush1.bf16.msra.mxu0 %v1414_v33  ;;  %1172 = vmatpush1.bf16.msra.mxu1 %v1416_v34  ;;  %v1883_v33 = vrot.slane %v150_v19, %v183_v30  ;;  %v149_v34 = vld [vmem:[%s1920_s2] sm:$0xff] }
  0x6b   :  { %1132 = vmatprep.subr.bf16.mxu0 %v1399_v35  ;;  %1173 = vmatprep.subr.bf16.mxu1 %v1401_v36  ;;  %v1437_v35 = vmov 1983009808   ;;  %v156_v37 = vrot.slane %v149_v34, %v155_v17  ;;  %v164_v38 = vrot.slane %v149_v34, %v163_v21  ;;  %v160_v39 = vrot.slane %v149_v34, %v159_v22 }
  0x6c   :  { %v1229_v36 = vunpack.c.l.s4 %v1437_v35  ;;  %v180_v60 = vrot.slane %v149_v34, %v179_v28  ;;  %v176_v61 = vrot.slane %v149_v34, %v175_v29  ;;  %v184_v63 = vrot.slane %v149_v34, %v183_v30 }
  0x6e   :  { %1133 = vmatpush1.bf16.msra.mxu0 %v1398_v41  ;;  %1174 = vmatpush1.bf16.msra.mxu1 %v1400_v42  ;;  %v1230_v40 = vunpack.c.0.s8 %v1229_v36  ;;  %v168_v42 = vrot.slane %v149_v34, %v167_v23 }
  0x6f   :  { %1134 = vmatprep.subr.bf16.mxu0 %v1383_v43  ;;  %1175 = vmatprep.subr.bf16.mxu1 %v1385_v44 }
  0x70   :  { %v1888_v47 = vsub.s32 %v1230_v40, %v154_v16 }
  0x72   :  { %1135 = vmatpush1.bf16.msra.mxu0 %v1382_v48  ;;  %1176 = vmatpush1.bf16.msra.mxu1 %v1384_v49 }
  0x73   :  { %1136 = vmatprep.subr.bf16.mxu0 %v1367_v50  ;;  %1177 = vmatprep.subr.bf16.mxu1 %v1369_v51 }
  0x76   :  { %1137 = vmatpush1.bf16.msra.mxu0 %v1366_v56  ;;  %1178 = vmatpush1.bf16.msra.mxu1 %v1368_v57 }
  0x77   :  { %1138 = vmatprep.subr.bf16.mxu0 %v1351_v58  ;;  %1179 = vmatprep.subr.bf16.mxu1 %v1353_v59  ;;  %v172_v59 = vrot.slane %v149_v34, %v171_v27 }
  0x7a   :  { %1139 = vmatpush1.bf16.msra.mxu0 %v1350_v0  ;;  %1180 = vmatpush1.bf16.msra.mxu1 %v1352_v1 }
  0x7b   :  { %1140 = vmatprep.subr.bf16.mxu0 %v1335_v2  ;;  %1181 = vmatprep.subr.bf16.mxu1 %v1337_v4 }
  0x7e   :  { %1141 = vmatpush1.bf16.msra.mxu0 %v1334_v9  ;;  %1182 = vmatpush1.bf16.msra.mxu1 %v1336_v10 }
  0x7f   :  { %1142 = vmatprep.subr.bf16.mxu0 %v1319_v11  ;;  %1183 = vmatprep.subr.bf16.mxu1 %v1321_v12 }
  0x82   :  { %1143 = vmatpush1.bf16.msra.mxu0 %v1318_v13  ;;  %1184 = vmatpush1.bf16.msra.mxu1 %v1320_v14 }
  0x85   :  { %1161 = vmatmul.mubr.bf16.vlgmr.msra.gmra.mxu0 %v1580_v18  ;;  %1202 = vmatmul.mubr.bf16.vlgmr.msra.gmra.mxu1 %v1580_v18  ;;  %v1877_v18 = vrot.slane %v150_v19, %v171_v27 }
  0xe5   :  { %v916_v41 = vpop.f32.mrf.mxu0  ;;  %v957_v44 = vpop.f32.mrf.mxu1 }
  0xe6   :  { %v917_v43 = vadd.f32 %v916_v41, %v156_v37  ;;  %v958_v45 = vadd.f32 %v957_v44, %v164_v38 }
  0xe7   :  { %v918_v46 = vpop.f32.mrf.mxu0  ;;  %v959_v48 = vpop.f32.mrf.mxu1 }
  0xe8   :  { %v919_v3 = vadd.f32 %v918_v46, %v160_v39  ;;  %v960_v49 = vadd.f32 %v959_v48, %v168_v42 }
  0xe9   :  { %v920_v50 = vpop.f32.mrf.mxu0  ;;  %v961_v52 = vpop.f32.mrf.mxu1 }
  0xea   :  { %v1226_v51 = vcombine.low %v917_v43, %v919_v3  ;;  %v1227_v53 = vcombine.low %v958_v45, %v960_v49 }
  0xeb   :  { %v921_v54 = vpop.f32.mrf.mxu0  ;;  %v962_v56 = vpop.f32.mrf.mxu1 }
  0xec   :  { %v1234_v55 = vrot.slane %v1226_v51, %v1888_v47  ;;  %v1241_v57 = vrot.slane %v1227_v53, %v1888_v47 }
  0xee   :  { %v1242_v58 = vcombine.low %v1234_v55, %v1241_v57 }
  0xf0   :  { %1298 = vst [vmem:[%s1921_s3] sm:$0xff] %v1242_v58 }
 0x105   :  { %v998_v62 = vpop.f32.mrf.mxu0  ;;  %v1039_v1 = vpop.f32.mrf.mxu1 }
 0x106   :  { %v999_v0 = vadd.f32 %v998_v62, %v172_v59  ;;  %v1040_v2 = vadd.f32 %v1039_v1, %v180_v60 }
 0x107   :  { %v1000_v4 = vpop.f32.mrf.mxu0  ;;  %v1041_v6 = vpop.f32.mrf.mxu1 }
 0x108   :  { %v1001_v5 = vadd.f32 %v1000_v4, %v176_v61  ;;  %v1042_v7 = vadd.f32 %v1041_v6, %v184_v63 }
 0x109   :  { %v1002_v8 = vpop.f32.mrf.mxu0  ;;  %v1043_v10 = vpop.f32.mrf.mxu1 }
 0x10a   :  { %v1243_v9 = vcombine.low %v999_v0, %v1001_v5  ;;  %v1244_v11 = vcombine.low %v1040_v2, %v1042_v7 }
 0x10b   :  { %v1003_v12 = vpop.f32.mrf.mxu0  ;;  %v1044_v14 = vpop.f32.mrf.mxu1 }
 0x10c   :  { %v1251_v13 = vrot.slane %v1243_v9, %v1888_v47  ;;  %v1258_v15 = vrot.slane %v1244_v11, %v1888_v47 }
 0x10e   :  { %v1259_v16 = vcombine.low %v1251_v13, %v1258_v15 }
 0x110   :  { %1299 = vst [vmem:[%s1921_s3 + $0x8] sm:$0xff] %v1259_v16 }
 0x125   :  { %v1080_v17 = vpop.f32.mrf.mxu0  ;;  %v1121_v21 = vpop.f32.mrf.mxu1 }
 0x126   :  { %v1081_v19 = vadd.f32 %v1080_v17, %v1869_v20  ;;  %v1122_v22 = vadd.f32 %v1121_v21, %v1871_v24 }
 0x127   :  { %v1082_v23 = vpop.f32.mrf.mxu0  ;;  %v1123_v28 = vpop.f32.mrf.mxu1 }
 0x128   :  { %v1083_v27 = vadd.f32 %v1082_v23, %v1873_v25  ;;  %v1124_v29 = vadd.f32 %v1123_v28, %v1875_v26 }
 0x129   :  { %v1084_v30 = vpop.f32.mrf.mxu0  ;;  %v1125_v35 = vpop.f32.mrf.mxu1 }
 0x12a   :  { %v1260_v34 = vcombine.low %v1081_v19, %v1083_v27  ;;  %v1261_v36 = vcombine.low %v1122_v22, %v1124_v29 }
 0x12b   :  { %v1085_v37 = vpop.f32.mrf.mxu0  ;;  %v1126_v39 = vpop.f32.mrf.mxu1 }
 0x12c   :  { %v1268_v38 = vrot.slane %v1260_v34, %v1888_v47  ;;  %v1275_v40 = vrot.slane %v1261_v36, %v1888_v47 }
 0x12e   :  { %v1276_v20 = vcombine.low %v1268_v38, %v1275_v40 }
 0x130   :  { %1300 = vst [vmem:[%s1921_s3 + $0x10] sm:$0xff] %v1276_v20 }
 0x145   :  { %v1162_v24 = vpop.f32.mrf.mxu0  ;;  %v1203_v25 = vpop.f32.mrf.mxu1 }
 0x146   :  { %v1163_v26 = vadd.f32 %v1162_v24, %v1877_v18  ;;  %v1204_v44 = vadd.f32 %v1203_v25, %v1879_v31 }
 0x147   :  { %v1164_v41 = vpop.f32.mrf.mxu0  ;;  %v1205_v43 = vpop.f32.mrf.mxu1 }
 0x148   :  { %v1165_v42 = vadd.f32 %v1164_v41, %v1881_v32  ;;  %v1206_v45 = vadd.f32 %v1205_v43, %v1883_v33 }
 0x149   :  { %v1166_v46 = vpop.f32.mrf.mxu0  ;;  %v1207_v48 = vpop.f32.mrf.mxu1 }
 0x14a   :  { %v1277_v3 = vcombine.low %v1163_v26, %v1165_v42  ;;  %v1278_v49 = vcombine.low %v1204_v44, %v1206_v45 }
 0x14b   :  { %v1167_v50 = vpop.f32.mrf.mxu0  ;;  %v1208_v52 = vpop.f32.mrf.mxu1 }
 0x14c   :  { %v1285_v51 = vrot.slane %v1277_v3, %v1888_v47  ;;  %v1292_v53 = vrot.slane %v1278_v49, %v1888_v47 }
 0x14e   :  { %v1293_v54 = vcombine.low %v1285_v51, %v1292_v53 }
 0x150   :  { %1301 = vst [vmem:[%s1921_s3 + $0x18] sm:$0xff] %v1293_v54 }

</bundles_post_ra>
